<compile_context>
chip_gen: v5e
topology: v5e:2x2
jax: 0.10.0
libtpu: 0.0.40
codegen_flags: <defaults>
</compile_context>

<pallas_src>
import functools

import numpy as np
import jax
import jax.numpy as jnp
from jax import lax
from jax.experimental import pallas as pl
from jax.experimental.pallas import tpu as pltpu


def _round_up(x, m):
    return ((x + m - 1) // m) * m


# ----------------------------------------------------------------------------
# Pallas kernel: one block of TB GRU-D steps per grid iteration.
# Grid = (batch_tiles, time_blocks); time is serial ("arbitrary"), state
# (h, p, last_x, elementwise MAE accumulator) stays resident in VMEM.
# ----------------------------------------------------------------------------
def _grud_kernel(
    gamma_ref,    # SMEM (4,) f32: [w_gx, b_gx, w_gh, b_gh]
    nreal_ref,    # SMEM (1,) i32: number of real (non-padded) time steps
    packed_ref,   # VMEM (TB, BB, Wc) f32: [X(D) | M(D) | interval | 0...]
    p0_ref,       # VMEM (1, Dp) f32: p_model(h=0), precomputed on host
    wg_ref,       # VMEM (Hp+Kx, 3*Hp) bf16: K-fused [r|z|h~] gate weight
    whh_ref,      # VMEM (Hp, Hp) bf16: h-weight of the h~ gate (applied to r*h_hat)
    b3_ref,       # VMEM (1, 3*Hp) f32
    w1_ref, b1_ref, w2_ref, b2_ref,   # p_model weights (bf16) + biases (f32)
    loss_ref,     # out (BB, D) f32: accumulated |X - p| * M (elementwise)
    h_ref,        # out (BB, Hp) f32: hidden state
    p_ref,        # out (BB, Dp) f32: prediction
    lastx_s,      # scratch (BB, D) f32: last observed value
    *, D,
):
    t_blk = pl.program_id(1)
    TB, BB, _ = packed_ref.shape
    Hp = h_ref.shape[1]
    Dp = p_ref.shape[1]
    Kx = wg_ref.shape[0] - Hp          # lane width of the [X_hat | M] K-slot (128)

    @pl.when(t_blk == 0)
    def _init():
        h_ref[...] = jnp.zeros_like(h_ref)
        lastx_s[...] = jnp.zeros_like(lastx_s)
        loss_ref[...] = jnp.zeros_like(loss_ref)
        # p_model(zeros) precomputed on host -> no cold-path matmuls.
        p_ref[...] = jnp.broadcast_to(p0_ref[...], p_ref.shape)

    # ---- hoisted out of the unrolled time loop (no per-step re-broadcast) ----
    w_gx = gamma_ref[0]
    b_gx = gamma_ref[1]
    w_gh = gamma_ref[2]
    b_gh = gamma_ref[3]
    n_real = nreal_ref[0]
    b3b = jnp.broadcast_to(b3_ref[...], (BB, 3 * Hp))
    b1b = jnp.broadcast_to(b1_ref[...], (BB, Hp))
    b2b = jnp.broadcast_to(b2_ref[...], (BB, Dp))
    xm_pad = jnp.zeros((BB, Kx - 2 * D), jnp.float32)

    bf16 = jnp.bfloat16

    def step(s, carry):
        h, p, last_x, loss = carry
        row = packed_ref[s]                      # (BB, Wc) f32, one tile per step
        Xs = row[:, :D]
        Ms = row[:, D:2 * D]
        iv = row[:, 2 * D:2 * D + 1]             # (BB, 1) interval

        # MAE uses p from the *previous* step; padded steps/features have M == 0,
        # so loss and last_x need no time-padding mask.
        loss = loss + jnp.abs(Xs - p[:, :D]) * Ms
        last_x = last_x * (1.0 - Ms) + Xs

        # lin_gamma_x / lin_gamma_h: 1->1 Linear then exp(-relu), computed once
        # per row on the (BB,1) interval column and lane-broadcast on use.
        g_x = jnp.exp(-jnp.maximum(0.0, iv * w_gx + b_gx))
        g_h = jnp.exp(-jnp.maximum(0.0, iv * w_gh + b_gh))

        X_hat = Ms * last_x + (1.0 - Ms) * (g_x * last_x)   # (BB, D)
        h_hat = g_h * h                                     # (BB, Hp)

        # K-fused gate matmul: LHS = [h_hat | X_hat | M | 0], K = Hp + Kx.
        # Weight columns: [r | z | h~]; h_hat rows of the h~ columns are zero
        # (the reset path goes through the separate whh matmul below).
        lhs = jnp.concatenate([h_hat, X_hat, Ms, xm_pad], axis=-1)
        pre = jnp.dot(lhs.astype(bf16), wg_ref[...],
                      preferred_element_type=jnp.float32) + b3b

        r = jax.nn.sigmoid(pre[:, :Hp])
        z = jax.nn.sigmoid(pre[:, Hp:2 * Hp])
        h_tilde = jnp.tanh(
            pre[:, 2 * Hp:]
            + jnp.dot((r * h_hat).astype(bf16), whh_ref[...],
                      preferred_element_type=jnp.float32))
        h_new = (1.0 - z) * h_hat + z * h_tilde

        # p_model: Linear -> ReLU -> Dropout(identity, eval) -> Linear
        hid = jnp.maximum(
            jnp.dot(h_new.astype(bf16), w1_ref[...],
                    preferred_element_type=jnp.float32) + b1b, 0.0)
        p_new = jnp.dot(hid.astype(bf16), w2_ref[...],
                        preferred_element_type=jnp.float32) + b2b

        # Time-padding steps must not advance the recurrence (single select each).
        valid = (t_blk * TB + s) < n_real
        h = jnp.where(valid, h_new, h)
        p = jnp.where(valid, p_new, p)
        return (h, p, last_x, loss)

    # NOTE: at BB >= 128 move loss/last_x out of the carry into in-place ref
    # accumulation to avoid vreg pressure; at BB == 8-32 the carry is ~4 vregs.
    carry0 = (h_ref[...], p_ref[...], lastx_s[...], loss_ref[...])
    h, p, last_x, loss = lax.fori_loop(0, TB, step, carry0, unroll=True)
    h_ref[...] = h
    p_ref[...] = p
    lastx_s[...] = last_x
    loss_ref[...] = loss


# ----------------------------------------------------------------------------
# Parameter construction (xavier-uniform, bias = 0.01), fused + lane-padded.
# ----------------------------------------------------------------------------
def init_params(key, input_size, hidden_size):
    D, H = input_size, hidden_size
    Dp, Hp = _round_up(D, 128), _round_up(H, 128)
    Kx = 128                          # one lane tile holds [X_hat | M | pad]
    assert 2 * D + 1 <= Kx, "TODO(synk): tile the X/M K-slot for input_size > 63"
    in_dim = H + 2 * D
    ks = jax.random.split(key, 8)

    def xavier(k, out_f, in_f):
        a = float(np.sqrt(6.0 / (in_f + out_f)))
        return np.asarray(jax.random.uniform(k, (out_f, in_f), jnp.float32, -a, a))

    Wr = xavier(ks[0], H, in_dim)
    Wz = xavier(ks[1], H, in_dim)
    Wh = xavier(ks[2], H, in_dim)
    W1 = xavier(ks[3], H, H)          # p_model layer 1
    W2 = xavier(ks[4], D, H)          # p_model layer 2
    w_gx = xavier(ks[5], 1, 1)
    w_gh = xavier(ks[6], 1, 1)
    bias = 0.01

    # Fused gate weight.  K rows = [h_hat (Hp) | X_hat (D) | M (D) | pad],
    # N cols = [r | z | h~], each gate padded to Hp.  Padded rows/cols are zero,
    # which provably keeps padded state lanes at exactly 0.
    # Reference forward() cat order for lin_* input is [X_hat, h_hat, M].
    wg = np.zeros((Hp + Kx, 3 * Hp), np.float32)
    for g, W in enumerate((Wr, Wz, Wh)):
        Wx = W[:, :D]              # (H, D)
        Whh_ = W[:, D:D + H]       # (H, H)
        Wm = W[:, D + H:]          # (H, D)
        c0 = g * Hp
        if g < 2:                  # h~ gate gets h through the separate whh matmul
            wg[0:H, c0:c0 + H] = Whh_.T
        wg[Hp:Hp + D, c0:c0 + H] = Wx.T
        wg[Hp + D:Hp + 2 * D, c0:c0 + H] = Wm.T

    whh = np.zeros((Hp, Hp), np.float32)
    whh[:H, :H] = Wh[:, D:D + H].T

    b3 = np.zeros((1, 3 * Hp), np.float32)
    for g in range(3):
        b3[0, g * Hp:g * Hp + H] = bias

    w1 = np.zeros((Hp, Hp), np.float32); w1[:H, :H] = W1.T
    b1 = np.zeros((1, Hp), np.float32);  b1[0, :H] = bias
    w2 = np.zeros((Hp, Dp), np.float32); w2[:H, :D] = W2.T
    b2 = np.zeros((1, Dp), np.float32);  b2[0, :D] = bias

    # Host-precomputed p0 = p_model(h=0) = relu(b1) @ W2^T + b2 (f32).
    hid0 = np.maximum(np.full((1, H), bias, np.float32), 0.0)
    p0 = np.zeros((1, Dp), np.float32)
    p0[0, :D] = (hid0 @ W2.T + bias)[0]

    bf = jnp.bfloat16
    return dict(
        gamma=jnp.array([w_gx[0, 0], bias, w_gh[0, 0], bias], jnp.float32),
        wg=jnp.asarray(wg, bf), whh=jnp.asarray(whh, bf),
        b3=jnp.asarray(b3), w1=jnp.asarray(w1, bf), b1=jnp.asarray(b1),
        w2=jnp.asarray(w2, bf), b2=jnp.asarray(b2), p0=jnp.asarray(p0),
        Din=D, H=H, Dp=Dp, Hp=Hp, Kx=Kx)


# ----------------------------------------------------------------------------
# Wrapper: host-side densification of the event stream + pallas_call.
# ----------------------------------------------------------------------------
def grud_forward(params, obs_times, event_pt, batch_idx, X, M, B,
                 T=None, prop_to_end=True, dt=0.1, time_block=16, batch_tiles=1):
    D, H = params['Din'], params['H']
    Dp, Hp, Kx = params['Dp'], params['Hp'], params['Kx']
    Wc = Kx                          # packed slab lane width (one (8,128) tile)
    assert 2 * D + 1 <= Wc

    # ---- host glue: scatter irregular events into dense per-step slabs,
    #      compute decay intervals, unroll the prop_to_end while-loop.
    X_np = np.asarray(X, dtype=np.float32)
    M_np = np.asarray(M, dtype=np.float32)
    last_t = np.zeros(B, dtype=np.float64)
    steps = []
    current_time = 0.0
    for i, obs_time in enumerate(obs_times):
        current_time = float(obs_time)
        start, end = int(event_pt[i]), int(event_pt[i + 1])
        i_obs = np.asarray(batch_idx[start:end], dtype=np.int64)
        M_dense = np.zeros((B, D), dtype=np.float32)
        X_dense = np.zeros((B, D), dtype=np.float32)
        M_dense[i_obs, :] = M_np[start:end, :]
        X_dense[i_obs, :] = X_np[start:end, :]
        interval = (current_time - last_t).astype(np.float32)
        last_t[i_obs] = current_time
        steps.append((interval, M_dense, X_dense))
    if prop_to_end and T is not None:
        zeros = np.zeros((B, D), dtype=np.float32)
        while current_time < T - 0.0001 * dt:
            current_time = current_time + dt
            steps.append(((current_time - last_t).astype(np.float32), zeros, zeros))

    Tn = len(steps)
    TB = int(time_block)
    ntb = max(1, -(-Tn // TB))
    Tn_pad = ntb * TB

    packed = np.zeros((Tn_pad, B, Wc), dtype=np.float32)
    for t, (iv, Md, Xd) in enumerate(steps):
        packed[t, :, :D] = Xd
        packed[t, :, D:2 * D] = Md
        packed[t, :, 2 * D] = iv
    packed = jnp.asarray(packed)
    n_real = jnp.asarray([Tn], dtype=jnp.int32)

    nb = int(batch_tiles)            # >= 2 on v7x to feed both TensorCores
    assert B % nb == 0 and (B // nb) % 8 == 0, "batch tile must keep >= 8 sublanes"
    BB = B // nb

    def wspec(shape):
        nd = len(shape)
        return pl.BlockSpec(shape, lambda b, t, _n=nd: (0,) * _n)

    in_specs = [
        pl.BlockSpec(memory_space=pltpu.MemorySpace.SMEM),   # gamma scalars
        pl.BlockSpec(memory_space=pltpu.MemorySpace.SMEM),   # n_real
        pl.BlockSpec((TB, BB, Wc), lambda b, t: (t, b, 0)),  # packed [X|M|interval]
        wspec((1, Dp)),                                      # p0
        wspec((Hp + Kx, 3 * Hp)),                            # wg (K-fused gates)
        wspec((Hp, Hp)),                                     # whh
        wspec((1, 3 * Hp)),                                  # b3
        wspec((Hp, Hp)), wspec((1, Hp)),                     # w1, b1
        wspec((Hp, Dp)), wspec((1, Dp)),                     # w2, b2
    ]
    out_specs = [
        pl.BlockSpec((BB, D), lambda b, t: (b, 0)),    # loss accumulator (natural D)
        pl.BlockSpec((BB, Hp), lambda b, t: (b, 0)),   # h
        pl.BlockSpec((BB, Dp), lambda b, t: (b, 0)),   # p
    ]
    out_shape = [
        jax.ShapeDtypeStruct((B, D), jnp.float32),
        jax.ShapeDtypeStruct((B, Hp), jnp.float32),
        jax.ShapeDtypeStruct((B, Dp), jnp.float32),
    ]

    # VMEM budget derived from the actual footprint (weights are double-buffered
    # by the default pipeliner), clamped to this generation's physical VMEM.
    wt_bytes = 2 * (((Hp + Kx) * 3 * Hp + 2 * Hp * Hp + Hp * Dp) * 2
                    + (3 * Hp + Hp + 2 * Dp) * 4)
    slab_bytes = 2 * TB * BB * Wc * 4
    state_bytes = 2 * BB * (D + Hp + Dp) * 4 + BB * 128 * 4
    need = wt_bytes + slab_bytes + state_bytes + (4 << 20)
    try:
        cap = int(pltpu.get_tpu_info().vmem_capacity_bytes)
    except Exception:
        cap = 64 << 20                # conservative (v7x physical VMEM per TC)
    vmem_limit = int(max(min(need, cap - (8 << 20)), 32 << 20))

    kernel = functools.partial(_grud_kernel, D=D)
    loss_elems, h_pad, p_pad = pl.pallas_call(
        kernel,
        out_shape=out_shape,
        grid=(nb, ntb),
        in_specs=in_specs,
        out_specs=out_specs,
        scratch_shapes=[pltpu.VMEM((BB, D), jnp.float32)],
        compiler_params=pltpu.CompilerParams(
            dimension_semantics=("parallel", "arbitrary"),
            vmem_limit_bytes=vmem_limit),
    )(params['gamma'], n_real, packed, params['p0'],
      params['wg'], params['whh'], params['b3'],
      params['w1'], params['b1'], params['w2'], params['b2'])

    loss = jnp.sum(loss_elems)
    # Reproduces the reference-code ordering bug: total_M_obs sums M_obs
    # *before* it is filled, so it is always 0 (loss/total_M_obs == inf).
    total_M_obs = jnp.asarray(0.0, dtype=jnp.float32)
    return loss, loss / total_M_obs, h_pad[:, :H], p_pad[:, :D]


# TODO(synk): classify / class_per_time / return_path branches (CrossEntropy,
# per-step path collection) are not implemented; only the default forward path.
# TODO(synk): weight-stationary MXU driving (matmul_push_rhs) for tiny batches.

if __name__ == "__main__":
    key = jax.random.PRNGKey(0)
    B, Din, H = 8, 4, 32
    T_end, dt = 3.0, 0.1

    k_par, k_evt = jax.random.split(key)
    params = init_params(k_par, Din, H)

    # Deterministic synthetic irregular event stream.
    obs_times = np.array([0.3, 0.7, 1.1, 1.6, 2.0, 2.4], dtype=np.float64)
    counts = [3 + (i % 3) for i in range(len(obs_times))]
    event_pt = np.concatenate([[0], np.cumsum(counts)]).astype(np.int64)
    n_events = int(event_pt[-1])

    batch_idx_list = []
    ks = jax.random.split(k_evt, len(obs_times) + 2)
    for i, c in enumerate(counts):
        perm = np.asarray(jax.random.permutation(ks[i], B))[:c]
        batch_idx_list.append(np.sort(perm))
    batch_idx = np.concatenate(batch_idx_list).astype(np.int64)

    X = np.asarray(jax.random.normal(ks[-2], (n_events, Din), jnp.float32))
    M = np.asarray(
        jax.random.bernoulli(ks[-1], 0.6, (n_events, Din)).astype(jnp.float32))

    loss, loss_norm, h_final, p_final = grud_forward(
        params, obs_times, event_pt, batch_idx, X, M, B,
        T=T_end, prop_to_end=True, dt=dt, time_block=16, batch_tiles=1)

    jax.block_until_ready((loss, loss_norm, h_final, p_final))
    assert bool(jnp.isfinite(loss))
    assert bool(jnp.all(jnp.isfinite(h_final))) and bool(jnp.all(jnp.isfinite(p_final)))
    print("KERNEL_OK")
</pallas_src>

<mosaic_0001>
module attributes {stable_mosaic.version = 11 : i64} {
  func.func @_grud_kernel(%arg0: i32, %arg1: i32, %arg2: memref<4xf32, #tpu.memory_space<smem>>, %arg3: memref<1xi32, #tpu.memory_space<smem>>, %arg4: memref<16x8x128xf32, #tpu.memory_space<vmem>>, %arg5: memref<1x128xf32, #tpu.memory_space<vmem>>, %arg6: memref<256x384xbf16, #tpu.memory_space<vmem>>, %arg7: memref<128x128xbf16, #tpu.memory_space<vmem>>, %arg8: memref<1x384xf32, #tpu.memory_space<vmem>>, %arg9: memref<128x128xbf16, #tpu.memory_space<vmem>>, %arg10: memref<1x128xf32, #tpu.memory_space<vmem>>, %arg11: memref<128x128xbf16, #tpu.memory_space<vmem>>, %arg12: memref<1x128xf32, #tpu.memory_space<vmem>>, %arg13: memref<8x4xf32, #tpu.memory_space<vmem>>, %arg14: memref<8x128xf32, #tpu.memory_space<vmem>>, %arg15: memref<8x128xf32, #tpu.memory_space<vmem>>, %arg16: memref<8x4xf32, #tpu.memory_space<vmem>>) attributes {dimension_semantics = [#tpu.dimension_semantics<parallel>, #tpu.dimension_semantics<arbitrary>], iteration_bounds = array<i64: 1, 1>, scalar_prefetch = 0 : i64, scratch_operands = 1 : i64, tpu.core_type = #tpu.core_type<tc>, window_params = [{transform_indices = @transform_0, window_bounds = array<i64: 4>}, {transform_indices = @transform_1, window_bounds = array<i64: 1>}, {transform_indices = @transform_2, window_bounds = array<i64: 16, 8, 128>}, {pipeline_mode = #tpu.pipeline_mode<synchronous>, transform_indices = @transform_3, window_bounds = array<i64: 1, 128>}, {pipeline_mode = #tpu.pipeline_mode<synchronous>, transform_indices = @transform_4, window_bounds = array<i64: 256, 384>}, {pipeline_mode = #tpu.pipeline_mode<synchronous>, transform_indices = @transform_5, window_bounds = array<i64: 128, 128>}, {pipeline_mode = #tpu.pipeline_mode<synchronous>, transform_indices = @transform_6, window_bounds = array<i64: 1, 384>}, {pipeline_mode = #tpu.pipeline_mode<synchronous>, transform_indices = @transform_7, window_bounds = array<i64: 128, 128>}, {pipeline_mode = #tpu.pipeline_mode<synchronous>, transform_indices = @transform_8, window_bounds = array<i64: 1, 128>}, {pipeline_mode = #tpu.pipeline_mode<synchronous>, transform_indices = @transform_9, window_bounds = array<i64: 128, 128>}, {pipeline_mode = #tpu.pipeline_mode<synchronous>, transform_indices = @transform_10, window_bounds = array<i64: 1, 128>}, {transform_indices = @transform_11, window_bounds = array<i64: 8, 4>}, {transform_indices = @transform_12, window_bounds = array<i64: 8, 128>}, {transform_indices = @transform_13, window_bounds = array<i64: 8, 128>}]} {
    %c0_i32 = arith.constant 0 : i32
    %0 = arith.cmpi eq, %arg1, %c0_i32 : i32
    %1 = arith.extui %0 : i1 to i32
    %c0_i32_0 = arith.constant 0 : i32
    %2 = arith.cmpi ne, %1, %c0_i32_0 : i32
    scf.if %2 {
      %cst_425 = arith.constant 0.000000e+00 : f32
      %1402 = vector.broadcast %cst_425 : f32 to vector<8x128xf32>
      %c0_426 = arith.constant 0 : index
      %c0_427 = arith.constant 0 : index
      %1403 = vector.load %arg14[%c0_426, %c0_427] : memref<8x128xf32, #tpu.memory_space<vmem>>, vector<8x128xf32>
      tpu.vector_store %arg14[%c0_426, %c0_427], %1402 {strides = array<i32>} : memref<8x128xf32, #tpu.memory_space<vmem>>, vector<8x128xf32>,
      %cst_428 = arith.constant 0.000000e+00 : f32
      %1404 = vector.broadcast %cst_428 : f32 to vector<8x4xf32>
      %c0_429 = arith.constant 0 : index
      %c0_430 = arith.constant 0 : index
      %1405 = vector.load %arg16[%c0_429, %c0_430] : memref<8x4xf32, #tpu.memory_space<vmem>>, vector<8x4xf32>
      tpu.vector_store %arg16[%c0_429, %c0_430], %1404 {strides = array<i32>} : memref<8x4xf32, #tpu.memory_space<vmem>>, vector<8x4xf32>,
      %cst_431 = arith.constant 0.000000e+00 : f32
      %1406 = vector.broadcast %cst_431 : f32 to vector<8x4xf32>
      %c0_432 = arith.constant 0 : index
      %c0_433 = arith.constant 0 : index
      %1407 = vector.load %arg13[%c0_432, %c0_433] : memref<8x4xf32, #tpu.memory_space<vmem>>, vector<8x4xf32>
      tpu.vector_store %arg13[%c0_432, %c0_433], %1406 {strides = array<i32>} : memref<8x4xf32, #tpu.memory_space<vmem>>, vector<8x4xf32>,
      %c0_434 = arith.constant 0 : index
      %c0_435 = arith.constant 0 : index
      %1408 = vector.load %arg5[%c0_434, %c0_435] : memref<1x128xf32, #tpu.memory_space<vmem>>, vector<1x128xf32>
      %1409 = vector.shape_cast %1408 : vector<1x128xf32> to vector<1x128xf32>
      %1410 = vector.broadcast %1409 : vector<1x128xf32> to vector<8x128xf32>
      %c0_436 = arith.constant 0 : index
      %c0_437 = arith.constant 0 : index
      %1411 = vector.load %arg15[%c0_436, %c0_437] : memref<8x128xf32, #tpu.memory_space<vmem>>, vector<8x128xf32>
      tpu.vector_store %arg15[%c0_436, %c0_437], %1410 {strides = array<i32>} : memref<8x128xf32, #tpu.memory_space<vmem>>, vector<8x128xf32>,
    } else {
    }
    %c0 = arith.constant 0 : index
    %3 = memref.load %arg2[%c0] : memref<4xf32, #tpu.memory_space<smem>>
    %c1 = arith.constant 1 : index
    %4 = memref.load %arg2[%c1] : memref<4xf32, #tpu.memory_space<smem>>
    %c2 = arith.constant 2 : index
    %5 = memref.load %arg2[%c2] : memref<4xf32, #tpu.memory_space<smem>>
    %c3 = arith.constant 3 : index
    %6 = memref.load %arg2[%c3] : memref<4xf32, #tpu.memory_space<smem>>
    %c0_1 = arith.constant 0 : index
    %7 = memref.load %arg3[%c0_1] : memref<1xi32, #tpu.memory_space<smem>>
    %c0_2 = arith.constant 0 : index
    %c0_3 = arith.constant 0 : index
    %8 = vector.load %arg8[%c0_2, %c0_3] : memref<1x384xf32, #tpu.memory_space<vmem>>, vector<1x384xf32>
    %9 = vector.shape_cast %8 : vector<1x384xf32> to vector<1x384xf32>
    %10 = vector.broadcast %9 : vector<1x384xf32> to vector<8x384xf32>
    %c0_4 = arith.constant 0 : index
    %c0_5 = arith.constant 0 : index
    %11 = vector.load %arg10[%c0_4, %c0_5] : memref<1x128xf32, #tpu.memory_space<vmem>>, vector<1x128xf32>
    %12 = vector.shape_cast %11 : vector<1x128xf32> to vector<1x128xf32>
    %13 = vector.broadcast %12 : vector<1x128xf32> to vector<8x128xf32>
    %c0_6 = arith.constant 0 : index
    %c0_7 = arith.constant 0 : index
    %14 = vector.load %arg12[%c0_6, %c0_7] : memref<1x128xf32, #tpu.memory_space<vmem>>, vector<1x128xf32>
    %15 = vector.shape_cast %14 : vector<1x128xf32> to vector<1x128xf32>
    %16 = vector.broadcast %15 : vector<1x128xf32> to vector<8x128xf32>
    %cst = arith.constant 0.000000e+00 : f32
    %17 = vector.broadcast %cst : f32 to vector<8x120xf32>
    %c0_8 = arith.constant 0 : index
    %c0_9 = arith.constant 0 : index
    %18 = vector.load %arg14[%c0_8, %c0_9] : memref<8x128xf32, #tpu.memory_space<vmem>>, vector<8x128xf32>
    %c0_10 = arith.constant 0 : index
    %c0_11 = arith.constant 0 : index
    %19 = vector.load %arg15[%c0_10, %c0_11] : memref<8x128xf32, #tpu.memory_space<vmem>>, vector<8x128xf32>
    %c0_12 = arith.constant 0 : index
    %c0_13 = arith.constant 0 : index
    %20 = vector.load %arg16[%c0_12, %c0_13] : memref<8x4xf32, #tpu.memory_space<vmem>>, vector<8x4xf32>
    %c0_14 = arith.constant 0 : index
    %c0_15 = arith.constant 0 : index
    %21 = vector.load %arg13[%c0_14, %c0_15] : memref<8x4xf32, #tpu.memory_space<vmem>>, vector<8x4xf32>
    %c0_i32_16 = arith.constant 0 : i32
    %22 = arith.index_cast %c0_i32_16 : i32 to index
    %c0_17 = arith.constant 0 : index
    %c0_18 = arith.constant 0 : index
    %23 = vector.load %arg4[%22, %c0_17, %c0_18] : memref<16x8x128xf32, #tpu.memory_space<vmem>>, vector<1x8x128xf32>
    %24 = vector.shape_cast %23 : vector<1x8x128xf32> to vector<8x128xf32>
    %25 = vector.extract_strided_slice %24 {offsets = [0, 0], sizes = [8, 4], strides = [1, 1]} : vector<8x128xf32> to vector<8x4xf32>
    %26 = vector.extract_strided_slice %24 {offsets = [0, 4], sizes = [8, 4], strides = [1, 1]} : vector<8x128xf32> to vector<8x4xf32>
    %27 = vector.extract_strided_slice %24 {offsets = [0, 8], sizes = [8, 1], strides = [1, 1]} : vector<8x128xf32> to vector<8x1xf32>
    %28 = vector.extract_strided_slice %19 {offsets = [0, 0], sizes = [8, 4], strides = [1, 1]} : vector<8x128xf32> to vector<8x4xf32>
    %29 = arith.subf %25, %28 : vector<8x4xf32>
    %30 = math.absf %29 : vector<8x4xf32>
    %31 = arith.mulf %30, %26 : vector<8x4xf32>
    %32 = arith.addf %21, %31 : vector<8x4xf32>
    %cst_19 = arith.constant 1.000000e+00 : f32
    %33 = vector.broadcast %cst_19 : f32 to vector<8x4xf32>
    %34 = arith.subf %33, %26 : vector<8x4xf32>
    %35 = arith.mulf %20, %34 : vector<8x4xf32>
    %36 = arith.addf %35, %25 : vector<8x4xf32>
    %37 = vector.broadcast %3 : f32 to vector<8x1xf32>
    %38 = arith.mulf %27, %37 : vector<8x1xf32>
    %39 = vector.broadcast %4 : f32 to vector<8x1xf32>
    %40 = arith.addf %38, %39 : vector<8x1xf32>
    %cst_20 = arith.constant 0.000000e+00 : f32
    %41 = vector.broadcast %cst_20 : f32 to vector<8x1xf32>
    %42 = arith.maximumf %41, %40 : vector<8x1xf32>
    %cst_21 = arith.constant 0.000000e+00 : f32
    %43 = vector.broadcast %cst_21 : f32 to vector<8x1xf32>
    %44 = arith.subf %43, %42 : vector<8x1xf32>
    %45 = math.exp %44 : vector<8x1xf32>
    %46 = vector.broadcast %5 : f32 to vector<8x1xf32>
    %47 = arith.mulf %27, %46 : vector<8x1xf32>
    %48 = vector.broadcast %6 : f32 to vector<8x1xf32>
    %49 = arith.addf %47, %48 : vector<8x1xf32>
    %cst_22 = arith.constant 0.000000e+00 : f32
    %50 = vector.broadcast %cst_22 : f32 to vector<8x1xf32>
    %51 = arith.maximumf %50, %49 : vector<8x1xf32>
    %cst_23 = arith.constant 0.000000e+00 : f32
    %52 = vector.broadcast %cst_23 : f32 to vector<8x1xf32>
    %53 = arith.subf %52, %51 : vector<8x1xf32>
    %54 = math.exp %53 : vector<8x1xf32>
    %55 = arith.mulf %26, %36 : vector<8x4xf32>
    %cst_24 = arith.constant 1.000000e+00 : f32
    %56 = vector.broadcast %cst_24 : f32 to vector<8x4xf32>
    %57 = arith.subf %56, %26 : vector<8x4xf32>
    %58 = vector.broadcast %45 : vector<8x1xf32> to vector<8x4xf32>
    %59 = arith.mulf %58, %36 : vector<8x4xf32>
    %60 = arith.mulf %57, %59 : vector<8x4xf32>
    %61 = arith.addf %55, %60 : vector<8x4xf32>
    %62 = vector.broadcast %54 : vector<8x1xf32> to vector<8x128xf32>
    %63 = arith.mulf %62, %18 : vector<8x128xf32>
    %64 = tpu.concatenate %63, %61, %26, %17 in 1 : vector<8x128xf32>, vector<8x4xf32>, vector<8x4xf32>, vector<8x120xf32> -> vector<8x256xf32>
    %65 = arith.truncf %64 : vector<8x256xf32> to vector<8x256xbf16>
    %c0_25 = arith.constant 0 : index
    %c0_26 = arith.constant 0 : index
    %66 = vector.load %arg6[%c0_25, %c0_26] : memref<256x384xbf16, #tpu.memory_space<vmem>>, vector<256x384xbf16>
    %cst_27 = arith.constant dense<0.000000e+00> : vector<8x384xf32>
    %67 = tpu.matmul %65, %66, %cst_27 {dimension_numbers = #tpu.dot_dimension_numbers<[1], [0], [0], [1], [0, 0, 1, 1], [], []>} : vector<8x256xbf16>, vector<256x384xbf16>, vector<8x384xf32> -> vector<8x384xf32>
    %68 = arith.addf %67, %10 : vector<8x384xf32>
    %69 = vector.extract_strided_slice %68 {offsets = [0, 0], sizes = [8, 128], strides = [1, 1]} : vector<8x384xf32> to vector<8x128xf32>
    %70 = arith.negf %69 : vector<8x128xf32>
    %71 = math.exp %70 : vector<8x128xf32>
    %cst_28 = arith.constant 1.000000e+00 : f32
    %72 = vector.broadcast %cst_28 : f32 to vector<8x128xf32>
    %73 = arith.addf %72, %71 : vector<8x128xf32>
    %74 = arith.divf %72, %73 : vector<8x128xf32>
    %75 = vector.extract_strided_slice %68 {offsets = [0, 128], sizes = [8, 128], strides = [1, 1]} : vector<8x384xf32> to vector<8x128xf32>
    %76 = arith.negf %75 : vector<8x128xf32>
    %77 = math.exp %76 : vector<8x128xf32>
    %cst_29 = arith.constant 1.000000e+00 : f32
    %78 = vector.broadcast %cst_29 : f32 to vector<8x128xf32>
    %79 = arith.addf %78, %77 : vector<8x128xf32>
    %80 = arith.divf %78, %79 : vector<8x128xf32>
    %81 = vector.extract_strided_slice %68 {offsets = [0, 256], sizes = [8, 128], strides = [1, 1]} : vector<8x384xf32> to vector<8x128xf32>
    %82 = arith.mulf %74, %63 : vector<8x128xf32>
    %83 = arith.truncf %82 : vector<8x128xf32> to vector<8x128xbf16>
    %c0_30 = arith.constant 0 : index
    %c0_31 = arith.constant 0 : index
    %84 = vector.load %arg7[%c0_30, %c0_31] : memref<128x128xbf16, #tpu.memory_space<vmem>>, vector<128x128xbf16>
    %cst_32 = arith.constant dense<0.000000e+00> : vector<8x128xf32>
    %85 = tpu.matmul %83, %84, %cst_32 {dimension_numbers = #tpu.dot_dimension_numbers<[1], [0], [0], [1], [0, 0, 1, 1], [], []>} : vector<8x128xbf16>, vector<128x128xbf16>, vector<8x128xf32> -> vector<8x128xf32>
    %86 = arith.addf %81, %85 : vector<8x128xf32>
    %87 = math.tanh %86 : vector<8x128xf32>
    %cst_33 = arith.constant 1.000000e+00 : f32
    %88 = vector.broadcast %cst_33 : f32 to vector<8x128xf32>
    %89 = arith.subf %88, %80 : vector<8x128xf32>
    %90 = arith.mulf %89, %63 : vector<8x128xf32>
    %91 = arith.mulf %80, %87 : vector<8x128xf32>
    %92 = arith.addf %90, %91 : vector<8x128xf32>
    %93 = arith.truncf %92 : vector<8x128xf32> to vector<8x128xbf16>
    %c0_34 = arith.constant 0 : index
    %c0_35 = arith.constant 0 : index
    %94 = vector.load %arg9[%c0_34, %c0_35] : memref<128x128xbf16, #tpu.memory_space<vmem>>, vector<128x128xbf16>
    %cst_36 = arith.constant dense<0.000000e+00> : vector<8x128xf32>
    %95 = tpu.matmul %93, %94, %cst_36 {dimension_numbers = #tpu.dot_dimension_numbers<[1], [0], [0], [1], [0, 0, 1, 1], [], []>} : vector<8x128xbf16>, vector<128x128xbf16>, vector<8x128xf32> -> vector<8x128xf32>
    %96 = arith.addf %95, %13 : vector<8x128xf32>
    %cst_37 = arith.constant 0.000000e+00 : f32
    %97 = vector.broadcast %cst_37 : f32 to vector<8x128xf32>
    %98 = arith.maximumf %96, %97 : vector<8x128xf32>
    %99 = arith.truncf %98 : vector<8x128xf32> to vector<8x128xbf16>
    %c0_38 = arith.constant 0 : index
    %c0_39 = arith.constant 0 : index
    %100 = vector.load %arg11[%c0_38, %c0_39] : memref<128x128xbf16, #tpu.memory_space<vmem>>, vector<128x128xbf16>
    %cst_40 = arith.constant dense<0.000000e+00> : vector<8x128xf32>
    %101 = tpu.matmul %99, %100, %cst_40 {dimension_numbers = #tpu.dot_dimension_numbers<[1], [0], [0], [1], [0, 0, 1, 1], [], []>} : vector<8x128xbf16>, vector<128x128xbf16>, vector<8x128xf32> -> vector<8x128xf32>
    %102 = arith.addf %101, %16 : vector<8x128xf32>
    %c16_i32 = arith.constant 16 : i32
    %103 = arith.muli %arg1, %c16_i32 : i32
    %104 = arith.addi %103, %c0_i32_16 : i32
    %105 = arith.cmpi slt, %104, %7 : i32
    %106 = arith.select %105, %92, %18 : vector<8x128xf32>
    %107 = arith.select %105, %102, %19 : vector<8x128xf32>
    %c1_i32 = arith.constant 1 : i32
    %108 = arith.index_cast %c1_i32 : i32 to index
    %c0_41 = arith.constant 0 : index
    %c0_42 = arith.constant 0 : index
    %109 = vector.load %arg4[%108, %c0_41, %c0_42] : memref<16x8x128xf32, #tpu.memory_space<vmem>>, vector<1x8x128xf32>
    %110 = vector.shape_cast %109 : vector<1x8x128xf32> to vector<8x128xf32>
    %111 = vector.extract_strided_slice %110 {offsets = [0, 0], sizes = [8, 4], strides = [1, 1]} : vector<8x128xf32> to vector<8x4xf32>
    %112 = vector.extract_strided_slice %110 {offsets = [0, 4], sizes = [8, 4], strides = [1, 1]} : vector<8x128xf32> to vector<8x4xf32>
    %113 = vector.extract_strided_slice %110 {offsets = [0, 8], sizes = [8, 1], strides = [1, 1]} : vector<8x128xf32> to vector<8x1xf32>
    %114 = vector.extract_strided_slice %107 {offsets = [0, 0], sizes = [8, 4], strides = [1, 1]} : vector<8x128xf32> to vector<8x4xf32>
    %115 = arith.subf %111, %114 : vector<8x4xf32>
    %116 = math.absf %115 : vector<8x4xf32>
    %117 = arith.mulf %116, %112 : vector<8x4xf32>
    %118 = arith.addf %32, %117 : vector<8x4xf32>
    %cst_43 = arith.constant 1.000000e+00 : f32
    %119 = vector.broadcast %cst_43 : f32 to vector<8x4xf32>
    %120 = arith.subf %119, %112 : vector<8x4xf32>
    %121 = arith.mulf %36, %120 : vector<8x4xf32>
    %122 = arith.addf %121, %111 : vector<8x4xf32>
    %123 = vector.broadcast %3 : f32 to vector<8x1xf32>
    %124 = arith.mulf %113, %123 : vector<8x1xf32>
    %125 = vector.broadcast %4 : f32 to vector<8x1xf32>
    %126 = arith.addf %124, %125 : vector<8x1xf32>
    %cst_44 = arith.constant 0.000000e+00 : f32
    %127 = vector.broadcast %cst_44 : f32 to vector<8x1xf32>
    %128 = arith.maximumf %127, %126 : vector<8x1xf32>
    %cst_45 = arith.constant 0.000000e+00 : f32
    %129 = vector.broadcast %cst_45 : f32 to vector<8x1xf32>
    %130 = arith.subf %129, %128 : vector<8x1xf32>
    %131 = math.exp %130 : vector<8x1xf32>
    %132 = vector.broadcast %5 : f32 to vector<8x1xf32>
    %133 = arith.mulf %113, %132 : vector<8x1xf32>
    %134 = vector.broadcast %6 : f32 to vector<8x1xf32>
    %135 = arith.addf %133, %134 : vector<8x1xf32>
    %cst_46 = arith.constant 0.000000e+00 : f32
    %136 = vector.broadcast %cst_46 : f32 to vector<8x1xf32>
    %137 = arith.maximumf %136, %135 : vector<8x1xf32>
    %cst_47 = arith.constant 0.000000e+00 : f32
    %138 = vector.broadcast %cst_47 : f32 to vector<8x1xf32>
    %139 = arith.subf %138, %137 : vector<8x1xf32>
    %140 = math.exp %139 : vector<8x1xf32>
    %141 = arith.mulf %112, %122 : vector<8x4xf32>
    %cst_48 = arith.constant 1.000000e+00 : f32
    %142 = vector.broadcast %cst_48 : f32 to vector<8x4xf32>
    %143 = arith.subf %142, %112 : vector<8x4xf32>
    %144 = vector.broadcast %131 : vector<8x1xf32> to vector<8x4xf32>
    %145 = arith.mulf %144, %122 : vector<8x4xf32>
    %146 = arith.mulf %143, %145 : vector<8x4xf32>
    %147 = arith.addf %141, %146 : vector<8x4xf32>
    %148 = vector.broadcast %140 : vector<8x1xf32> to vector<8x128xf32>
    %149 = arith.mulf %148, %106 : vector<8x128xf32>
    %150 = tpu.concatenate %149, %147, %112, %17 in 1 : vector<8x128xf32>, vector<8x4xf32>, vector<8x4xf32>, vector<8x120xf32> -> vector<8x256xf32>
    %151 = arith.truncf %150 : vector<8x256xf32> to vector<8x256xbf16>
    %c0_49 = arith.constant 0 : index
    %c0_50 = arith.constant 0 : index
    %152 = vector.load %arg6[%c0_49, %c0_50] : memref<256x384xbf16, #tpu.memory_space<vmem>>, vector<256x384xbf16>
    %cst_51 = arith.constant dense<0.000000e+00> : vector<8x384xf32>
    %153 = tpu.matmul %151, %152, %cst_51 {dimension_numbers = #tpu.dot_dimension_numbers<[1], [0], [0], [1], [0, 0, 1, 1], [], []>} : vector<8x256xbf16>, vector<256x384xbf16>, vector<8x384xf32> -> vector<8x384xf32>
    %154 = arith.addf %153, %10 : vector<8x384xf32>
    %155 = vector.extract_strided_slice %154 {offsets = [0, 0], sizes = [8, 128], strides = [1, 1]} : vector<8x384xf32> to vector<8x128xf32>
    %156 = arith.negf %155 : vector<8x128xf32>
    %157 = math.exp %156 : vector<8x128xf32>
    %cst_52 = arith.constant 1.000000e+00 : f32
    %158 = vector.broadcast %cst_52 : f32 to vector<8x128xf32>
    %159 = arith.addf %158, %157 : vector<8x128xf32>
    %160 = arith.divf %158, %159 : vector<8x128xf32>
    %161 = vector.extract_strided_slice %154 {offsets = [0, 128], sizes = [8, 128], strides = [1, 1]} : vector<8x384xf32> to vector<8x128xf32>
    %162 = arith.negf %161 : vector<8x128xf32>
    %163 = math.exp %162 : vector<8x128xf32>
    %cst_53 = arith.constant 1.000000e+00 : f32
    %164 = vector.broadcast %cst_53 : f32 to vector<8x128xf32>
    %165 = arith.addf %164, %163 : vector<8x128xf32>
    %166 = arith.divf %164, %165 : vector<8x128xf32>
    %167 = vector.extract_strided_slice %154 {offsets = [0, 256], sizes = [8, 128], strides = [1, 1]} : vector<8x384xf32> to vector<8x128xf32>
    %168 = arith.mulf %160, %149 : vector<8x128xf32>
    %169 = arith.truncf %168 : vector<8x128xf32> to vector<8x128xbf16>
    %c0_54 = arith.constant 0 : index
    %c0_55 = arith.constant 0 : index
    %170 = vector.load %arg7[%c0_54, %c0_55] : memref<128x128xbf16, #tpu.memory_space<vmem>>, vector<128x128xbf16>
    %cst_56 = arith.constant dense<0.000000e+00> : vector<8x128xf32>
    %171 = tpu.matmul %169, %170, %cst_56 {dimension_numbers = #tpu.dot_dimension_numbers<[1], [0], [0], [1], [0, 0, 1, 1], [], []>} : vector<8x128xbf16>, vector<128x128xbf16>, vector<8x128xf32> -> vector<8x128xf32>
    %172 = arith.addf %167, %171 : vector<8x128xf32>
    %173 = math.tanh %172 : vector<8x128xf32>
    %cst_57 = arith.constant 1.000000e+00 : f32
    %174 = vector.broadcast %cst_57 : f32 to vector<8x128xf32>
    %175 = arith.subf %174, %166 : vector<8x128xf32>
    %176 = arith.mulf %175, %149 : vector<8x128xf32>
    %177 = arith.mulf %166, %173 : vector<8x128xf32>
    %178 = arith.addf %176, %177 : vector<8x128xf32>
    %179 = arith.truncf %178 : vector<8x128xf32> to vector<8x128xbf16>
    %c0_58 = arith.constant 0 : index
    %c0_59 = arith.constant 0 : index
    %180 = vector.load %arg9[%c0_58, %c0_59] : memref<128x128xbf16, #tpu.memory_space<vmem>>, vector<128x128xbf16>
    %cst_60 = arith.constant dense<0.000000e+00> : vector<8x128xf32>
    %181 = tpu.matmul %179, %180, %cst_60 {dimension_numbers = #tpu.dot_dimension_numbers<[1], [0], [0], [1], [0, 0, 1, 1], [], []>} : vector<8x128xbf16>, vector<128x128xbf16>, vector<8x128xf32> -> vector<8x128xf32>
    %182 = arith.addf %181, %13 : vector<8x128xf32>
    %cst_61 = arith.constant 0.000000e+00 : f32
    %183 = vector.broadcast %cst_61 : f32 to vector<8x128xf32>
    %184 = arith.maximumf %182, %183 : vector<8x128xf32>
    %185 = arith.truncf %184 : vector<8x128xf32> to vector<8x128xbf16>
    %c0_62 = arith.constant 0 : index
    %c0_63 = arith.constant 0 : index
    %186 = vector.load %arg11[%c0_62, %c0_63] : memref<128x128xbf16, #tpu.memory_space<vmem>>, vector<128x128xbf16>
    %cst_64 = arith.constant dense<0.000000e+00> : vector<8x128xf32>
    %187 = tpu.matmul %185, %186, %cst_64 {dimension_numbers = #tpu.dot_dimension_numbers<[1], [0], [0], [1], [0, 0, 1, 1], [], []>} : vector<8x128xbf16>, vector<128x128xbf16>, vector<8x128xf32> -> vector<8x128xf32>
    %188 = arith.addf %187, %16 : vector<8x128xf32>
    %c16_i32_65 = arith.constant 16 : i32
    %189 = arith.muli %arg1, %c16_i32_65 : i32
    %190 = arith.addi %189, %c1_i32 : i32
    %191 = arith.cmpi slt, %190, %7 : i32
    %192 = arith.select %191, %178, %106 : vector<8x128xf32>
    %193 = arith.select %191, %188, %107 : vector<8x128xf32>
    %c2_i32 = arith.constant 2 : i32
    %194 = arith.index_cast %c2_i32 : i32 to index
    %c0_66 = arith.constant 0 : index
    %c0_67 = arith.constant 0 : index
    %195 = vector.load %arg4[%194, %c0_66, %c0_67] : memref<16x8x128xf32, #tpu.memory_space<vmem>>, vector<1x8x128xf32>
    %196 = vector.shape_cast %195 : vector<1x8x128xf32> to vector<8x128xf32>
    %197 = vector.extract_strided_slice %196 {offsets = [0, 0], sizes = [8, 4], strides = [1, 1]} : vector<8x128xf32> to vector<8x4xf32>
    %198 = vector.extract_strided_slice %196 {offsets = [0, 4], sizes = [8, 4], strides = [1, 1]} : vector<8x128xf32> to vector<8x4xf32>
    %199 = vector.extract_strided_slice %196 {offsets = [0, 8], sizes = [8, 1], strides = [1, 1]} : vector<8x128xf32> to vector<8x1xf32>
    %200 = vector.extract_strided_slice %193 {offsets = [0, 0], sizes = [8, 4], strides = [1, 1]} : vector<8x128xf32> to vector<8x4xf32>
    %201 = arith.subf %197, %200 : vector<8x4xf32>
    %202 = math.absf %201 : vector<8x4xf32>
    %203 = arith.mulf %202, %198 : vector<8x4xf32>
    %204 = arith.addf %118, %203 : vector<8x4xf32>
    %cst_68 = arith.constant 1.000000e+00 : f32
    %205 = vector.broadcast %cst_68 : f32 to vector<8x4xf32>
    %206 = arith.subf %205, %198 : vector<8x4xf32>
    %207 = arith.mulf %122, %206 : vector<8x4xf32>
    %208 = arith.addf %207, %197 : vector<8x4xf32>
    %209 = vector.broadcast %3 : f32 to vector<8x1xf32>
    %210 = arith.mulf %199, %209 : vector<8x1xf32>
    %211 = vector.broadcast %4 : f32 to vector<8x1xf32>
    %212 = arith.addf %210, %211 : vector<8x1xf32>
    %cst_69 = arith.constant 0.000000e+00 : f32
    %213 = vector.broadcast %cst_69 : f32 to vector<8x1xf32>
    %214 = arith.maximumf %213, %212 : vector<8x1xf32>
    %cst_70 = arith.constant 0.000000e+00 : f32
    %215 = vector.broadcast %cst_70 : f32 to vector<8x1xf32>
    %216 = arith.subf %215, %214 : vector<8x1xf32>
    %217 = math.exp %216 : vector<8x1xf32>
    %218 = vector.broadcast %5 : f32 to vector<8x1xf32>
    %219 = arith.mulf %199, %218 : vector<8x1xf32>
    %220 = vector.broadcast %6 : f32 to vector<8x1xf32>
    %221 = arith.addf %219, %220 : vector<8x1xf32>
    %cst_71 = arith.constant 0.000000e+00 : f32
    %222 = vector.broadcast %cst_71 : f32 to vector<8x1xf32>
    %223 = arith.maximumf %222, %221 : vector<8x1xf32>
    %cst_72 = arith.constant 0.000000e+00 : f32
    %224 = vector.broadcast %cst_72 : f32 to vector<8x1xf32>
    %225 = arith.subf %224, %223 : vector<8x1xf32>
    %226 = math.exp %225 : vector<8x1xf32>
    %227 = arith.mulf %198, %208 : vector<8x4xf32>
    %cst_73 = arith.constant 1.000000e+00 : f32
    %228 = vector.broadcast %cst_73 : f32 to vector<8x4xf32>
    %229 = arith.subf %228, %198 : vector<8x4xf32>
    %230 = vector.broadcast %217 : vector<8x1xf32> to vector<8x4xf32>
    %231 = arith.mulf %230, %208 : vector<8x4xf32>
    %232 = arith.mulf %229, %231 : vector<8x4xf32>
    %233 = arith.addf %227, %232 : vector<8x4xf32>
    %234 = vector.broadcast %226 : vector<8x1xf32> to vector<8x128xf32>
    %235 = arith.mulf %234, %192 : vector<8x128xf32>
    %236 = tpu.concatenate %235, %233, %198, %17 in 1 : vector<8x128xf32>, vector<8x4xf32>, vector<8x4xf32>, vector<8x120xf32> -> vector<8x256xf32>
    %237 = arith.truncf %236 : vector<8x256xf32> to vector<8x256xbf16>
    %c0_74 = arith.constant 0 : index
    %c0_75 = arith.constant 0 : index
    %238 = vector.load %arg6[%c0_74, %c0_75] : memref<256x384xbf16, #tpu.memory_space<vmem>>, vector<256x384xbf16>
    %cst_76 = arith.constant dense<0.000000e+00> : vector<8x384xf32>
    %239 = tpu.matmul %237, %238, %cst_76 {dimension_numbers = #tpu.dot_dimension_numbers<[1], [0], [0], [1], [0, 0, 1, 1], [], []>} : vector<8x256xbf16>, vector<256x384xbf16>, vector<8x384xf32> -> vector<8x384xf32>
    %240 = arith.addf %239, %10 : vector<8x384xf32>
    %241 = vector.extract_strided_slice %240 {offsets = [0, 0], sizes = [8, 128], strides = [1, 1]} : vector<8x384xf32> to vector<8x128xf32>
    %242 = arith.negf %241 : vector<8x128xf32>
    %243 = math.exp %242 : vector<8x128xf32>
    %cst_77 = arith.constant 1.000000e+00 : f32
    %244 = vector.broadcast %cst_77 : f32 to vector<8x128xf32>
    %245 = arith.addf %244, %243 : vector<8x128xf32>
    %246 = arith.divf %244, %245 : vector<8x128xf32>
    %247 = vector.extract_strided_slice %240 {offsets = [0, 128], sizes = [8, 128], strides = [1, 1]} : vector<8x384xf32> to vector<8x128xf32>
    %248 = arith.negf %247 : vector<8x128xf32>
    %249 = math.exp %248 : vector<8x128xf32>
    %cst_78 = arith.constant 1.000000e+00 : f32
    %250 = vector.broadcast %cst_78 : f32 to vector<8x128xf32>
    %251 = arith.addf %250, %249 : vector<8x128xf32>
    %252 = arith.divf %250, %251 : vector<8x128xf32>
    %253 = vector.extract_strided_slice %240 {offsets = [0, 256], sizes = [8, 128], strides = [1, 1]} : vector<8x384xf32> to vector<8x128xf32>
    %254 = arith.mulf %246, %235 : vector<8x128xf32>
    %255 = arith.truncf %254 : vector<8x128xf32> to vector<8x128xbf16>
    %c0_79 = arith.constant 0 : index
    %c0_80 = arith.constant 0 : index
    %256 = vector.load %arg7[%c0_79, %c0_80] : memref<128x128xbf16, #tpu.memory_space<vmem>>, vector<128x128xbf16>
    %cst_81 = arith.constant dense<0.000000e+00> : vector<8x128xf32>
    %257 = tpu.matmul %255, %256, %cst_81 {dimension_numbers = #tpu.dot_dimension_numbers<[1], [0], [0], [1], [0, 0, 1, 1], [], []>} : vector<8x128xbf16>, vector<128x128xbf16>, vector<8x128xf32> -> vector<8x128xf32>
    %258 = arith.addf %253, %257 : vector<8x128xf32>
    %259 = math.tanh %258 : vector<8x128xf32>
    %cst_82 = arith.constant 1.000000e+00 : f32
    %260 = vector.broadcast %cst_82 : f32 to vector<8x128xf32>
    %261 = arith.subf %260, %252 : vector<8x128xf32>
    %262 = arith.mulf %261, %235 : vector<8x128xf32>
    %263 = arith.mulf %252, %259 : vector<8x128xf32>
    %264 = arith.addf %262, %263 : vector<8x128xf32>
    %265 = arith.truncf %264 : vector<8x128xf32> to vector<8x128xbf16>
    %c0_83 = arith.constant 0 : index
    %c0_84 = arith.constant 0 : index
    %266 = vector.load %arg9[%c0_83, %c0_84] : memref<128x128xbf16, #tpu.memory_space<vmem>>, vector<128x128xbf16>
    %cst_85 = arith.constant dense<0.000000e+00> : vector<8x128xf32>
    %267 = tpu.matmul %265, %266, %cst_85 {dimension_numbers = #tpu.dot_dimension_numbers<[1], [0], [0], [1], [0, 0, 1, 1], [], []>} : vector<8x128xbf16>, vector<128x128xbf16>, vector<8x128xf32> -> vector<8x128xf32>
    %268 = arith.addf %267, %13 : vector<8x128xf32>
    %cst_86 = arith.constant 0.000000e+00 : f32
    %269 = vector.broadcast %cst_86 : f32 to vector<8x128xf32>
    %270 = arith.maximumf %268, %269 : vector<8x128xf32>
    %271 = arith.truncf %270 : vector<8x128xf32> to vector<8x128xbf16>
    %c0_87 = arith.constant 0 : index
    %c0_88 = arith.constant 0 : index
    %272 = vector.load %arg11[%c0_87, %c0_88] : memref<128x128xbf16, #tpu.memory_space<vmem>>, vector<128x128xbf16>
    %cst_89 = arith.constant dense<0.000000e+00> : vector<8x128xf32>
    %273 = tpu.matmul %271, %272, %cst_89 {dimension_numbers = #tpu.dot_dimension_numbers<[1], [0], [0], [1], [0, 0, 1, 1], [], []>} : vector<8x128xbf16>, vector<128x128xbf16>, vector<8x128xf32> -> vector<8x128xf32>
    %274 = arith.addf %273, %16 : vector<8x128xf32>
    %c16_i32_90 = arith.constant 16 : i32
    %275 = arith.muli %arg1, %c16_i32_90 : i32
    %276 = arith.addi %275, %c2_i32 : i32
    %277 = arith.cmpi slt, %276, %7 : i32
    %278 = arith.select %277, %264, %192 : vector<8x128xf32>
    %279 = arith.select %277, %274, %193 : vector<8x128xf32>
    %c3_i32 = arith.constant 3 : i32
    %280 = arith.index_cast %c3_i32 : i32 to index
    %c0_91 = arith.constant 0 : index
    %c0_92 = arith.constant 0 : index
    %281 = vector.load %arg4[%280, %c0_91, %c0_92] : memref<16x8x128xf32, #tpu.memory_space<vmem>>, vector<1x8x128xf32>
    %282 = vector.shape_cast %281 : vector<1x8x128xf32> to vector<8x128xf32>
    %283 = vector.extract_strided_slice %282 {offsets = [0, 0], sizes = [8, 4], strides = [1, 1]} : vector<8x128xf32> to vector<8x4xf32>
    %284 = vector.extract_strided_slice %282 {offsets = [0, 4], sizes = [8, 4], strides = [1, 1]} : vector<8x128xf32> to vector<8x4xf32>
    %285 = vector.extract_strided_slice %282 {offsets = [0, 8], sizes = [8, 1], strides = [1, 1]} : vector<8x128xf32> to vector<8x1xf32>
    %286 = vector.extract_strided_slice %279 {offsets = [0, 0], sizes = [8, 4], strides = [1, 1]} : vector<8x128xf32> to vector<8x4xf32>
    %287 = arith.subf %283, %286 : vector<8x4xf32>
    %288 = math.absf %287 : vector<8x4xf32>
    %289 = arith.mulf %288, %284 : vector<8x4xf32>
    %290 = arith.addf %204, %289 : vector<8x4xf32>
    %cst_93 = arith.constant 1.000000e+00 : f32
    %291 = vector.broadcast %cst_93 : f32 to vector<8x4xf32>
    %292 = arith.subf %291, %284 : vector<8x4xf32>
    %293 = arith.mulf %208, %292 : vector<8x4xf32>
    %294 = arith.addf %293, %283 : vector<8x4xf32>
    %295 = vector.broadcast %3 : f32 to vector<8x1xf32>
    %296 = arith.mulf %285, %295 : vector<8x1xf32>
    %297 = vector.broadcast %4 : f32 to vector<8x1xf32>
    %298 = arith.addf %296, %297 : vector<8x1xf32>
    %cst_94 = arith.constant 0.000000e+00 : f32
    %299 = vector.broadcast %cst_94 : f32 to vector<8x1xf32>
    %300 = arith.maximumf %299, %298 : vector<8x1xf32>
    %cst_95 = arith.constant 0.000000e+00 : f32
    %301 = vector.broadcast %cst_95 : f32 to vector<8x1xf32>
    %302 = arith.subf %301, %300 : vector<8x1xf32>
    %303 = math.exp %302 : vector<8x1xf32>
    %304 = vector.broadcast %5 : f32 to vector<8x1xf32>
    %305 = arith.mulf %285, %304 : vector<8x1xf32>
    %306 = vector.broadcast %6 : f32 to vector<8x1xf32>
    %307 = arith.addf %305, %306 : vector<8x1xf32>
    %cst_96 = arith.constant 0.000000e+00 : f32
    %308 = vector.broadcast %cst_96 : f32 to vector<8x1xf32>
    %309 = arith.maximumf %308, %307 : vector<8x1xf32>
    %cst_97 = arith.constant 0.000000e+00 : f32
    %310 = vector.broadcast %cst_97 : f32 to vector<8x1xf32>
    %311 = arith.subf %310, %309 : vector<8x1xf32>
    %312 = math.exp %311 : vector<8x1xf32>
    %313 = arith.mulf %284, %294 : vector<8x4xf32>
    %cst_98 = arith.constant 1.000000e+00 : f32
    %314 = vector.broadcast %cst_98 : f32 to vector<8x4xf32>
    %315 = arith.subf %314, %284 : vector<8x4xf32>
    %316 = vector.broadcast %303 : vector<8x1xf32> to vector<8x4xf32>
    %317 = arith.mulf %316, %294 : vector<8x4xf32>
    %318 = arith.mulf %315, %317 : vector<8x4xf32>
    %319 = arith.addf %313, %318 : vector<8x4xf32>
    %320 = vector.broadcast %312 : vector<8x1xf32> to vector<8x128xf32>
    %321 = arith.mulf %320, %278 : vector<8x128xf32>
    %322 = tpu.concatenate %321, %319, %284, %17 in 1 : vector<8x128xf32>, vector<8x4xf32>, vector<8x4xf32>, vector<8x120xf32> -> vector<8x256xf32>
    %323 = arith.truncf %322 : vector<8x256xf32> to vector<8x256xbf16>
    %c0_99 = arith.constant 0 : index
    %c0_100 = arith.constant 0 : index
    %324 = vector.load %arg6[%c0_99, %c0_100] : memref<256x384xbf16, #tpu.memory_space<vmem>>, vector<256x384xbf16>
    %cst_101 = arith.constant dense<0.000000e+00> : vector<8x384xf32>
    %325 = tpu.matmul %323, %324, %cst_101 {dimension_numbers = #tpu.dot_dimension_numbers<[1], [0], [0], [1], [0, 0, 1, 1], [], []>} : vector<8x256xbf16>, vector<256x384xbf16>, vector<8x384xf32> -> vector<8x384xf32>
    %326 = arith.addf %325, %10 : vector<8x384xf32>
    %327 = vector.extract_strided_slice %326 {offsets = [0, 0], sizes = [8, 128], strides = [1, 1]} : vector<8x384xf32> to vector<8x128xf32>
    %328 = arith.negf %327 : vector<8x128xf32>
    %329 = math.exp %328 : vector<8x128xf32>
    %cst_102 = arith.constant 1.000000e+00 : f32
    %330 = vector.broadcast %cst_102 : f32 to vector<8x128xf32>
    %331 = arith.addf %330, %329 : vector<8x128xf32>
    %332 = arith.divf %330, %331 : vector<8x128xf32>
    %333 = vector.extract_strided_slice %326 {offsets = [0, 128], sizes = [8, 128], strides = [1, 1]} : vector<8x384xf32> to vector<8x128xf32>
    %334 = arith.negf %333 : vector<8x128xf32>
    %335 = math.exp %334 : vector<8x128xf32>
    %cst_103 = arith.constant 1.000000e+00 : f32
    %336 = vector.broadcast %cst_103 : f32 to vector<8x128xf32>
    %337 = arith.addf %336, %335 : vector<8x128xf32>
    %338 = arith.divf %336, %337 : vector<8x128xf32>
    %339 = vector.extract_strided_slice %326 {offsets = [0, 256], sizes = [8, 128], strides = [1, 1]} : vector<8x384xf32> to vector<8x128xf32>
    %340 = arith.mulf %332, %321 : vector<8x128xf32>
    %341 = arith.truncf %340 : vector<8x128xf32> to vector<8x128xbf16>
    %c0_104 = arith.constant 0 : index
    %c0_105 = arith.constant 0 : index
    %342 = vector.load %arg7[%c0_104, %c0_105] : memref<128x128xbf16, #tpu.memory_space<vmem>>, vector<128x128xbf16>
    %cst_106 = arith.constant dense<0.000000e+00> : vector<8x128xf32>
    %343 = tpu.matmul %341, %342, %cst_106 {dimension_numbers = #tpu.dot_dimension_numbers<[1], [0], [0], [1], [0, 0, 1, 1], [], []>} : vector<8x128xbf16>, vector<128x128xbf16>, vector<8x128xf32> -> vector<8x128xf32>
    %344 = arith.addf %339, %343 : vector<8x128xf32>
    %345 = math.tanh %344 : vector<8x128xf32>
    %cst_107 = arith.constant 1.000000e+00 : f32
    %346 = vector.broadcast %cst_107 : f32 to vector<8x128xf32>
    %347 = arith.subf %346, %338 : vector<8x128xf32>
    %348 = arith.mulf %347, %321 : vector<8x128xf32>
    %349 = arith.mulf %338, %345 : vector<8x128xf32>
    %350 = arith.addf %348, %349 : vector<8x128xf32>
    %351 = arith.truncf %350 : vector<8x128xf32> to vector<8x128xbf16>
    %c0_108 = arith.constant 0 : index
    %c0_109 = arith.constant 0 : index
    %352 = vector.load %arg9[%c0_108, %c0_109] : memref<128x128xbf16, #tpu.memory_space<vmem>>, vector<128x128xbf16>
    %cst_110 = arith.constant dense<0.000000e+00> : vector<8x128xf32>
    %353 = tpu.matmul %351, %352, %cst_110 {dimension_numbers = #tpu.dot_dimension_numbers<[1], [0], [0], [1], [0, 0, 1, 1], [], []>} : vector<8x128xbf16>, vector<128x128xbf16>, vector<8x128xf32> -> vector<8x128xf32>
    %354 = arith.addf %353, %13 : vector<8x128xf32>
    %cst_111 = arith.constant 0.000000e+00 : f32
    %355 = vector.broadcast %cst_111 : f32 to vector<8x128xf32>
    %356 = arith.maximumf %354, %355 : vector<8x128xf32>
    %357 = arith.truncf %356 : vector<8x128xf32> to vector<8x128xbf16>
    %c0_112 = arith.constant 0 : index
    %c0_113 = arith.constant 0 : index
    %358 = vector.load %arg11[%c0_112, %c0_113] : memref<128x128xbf16, #tpu.memory_space<vmem>>, vector<128x128xbf16>
    %cst_114 = arith.constant dense<0.000000e+00> : vector<8x128xf32>
    %359 = tpu.matmul %357, %358, %cst_114 {dimension_numbers = #tpu.dot_dimension_numbers<[1], [0], [0], [1], [0, 0, 1, 1], [], []>} : vector<8x128xbf16>, vector<128x128xbf16>, vector<8x128xf32> -> vector<8x128xf32>
    %360 = arith.addf %359, %16 : vector<8x128xf32>
    %c16_i32_115 = arith.constant 16 : i32
    %361 = arith.muli %arg1, %c16_i32_115 : i32
    %362 = arith.addi %361, %c3_i32 : i32
    %363 = arith.cmpi slt, %362, %7 : i32
    %364 = arith.select %363, %350, %278 : vector<8x128xf32>
    %365 = arith.select %363, %360, %279 : vector<8x128xf32>
    %c4_i32 = arith.constant 4 : i32
    %366 = arith.index_cast %c4_i32 : i32 to index
    %c0_116 = arith.constant 0 : index
    %c0_117 = arith.constant 0 : index
    %367 = vector.load %arg4[%366, %c0_116, %c0_117] : memref<16x8x128xf32, #tpu.memory_space<vmem>>, vector<1x8x128xf32>
    %368 = vector.shape_cast %367 : vector<1x8x128xf32> to vector<8x128xf32>
    %369 = vector.extract_strided_slice %368 {offsets = [0, 0], sizes = [8, 4], strides = [1, 1]} : vector<8x128xf32> to vector<8x4xf32>
    %370 = vector.extract_strided_slice %368 {offsets = [0, 4], sizes = [8, 4], strides = [1, 1]} : vector<8x128xf32> to vector<8x4xf32>
    %371 = vector.extract_strided_slice %368 {offsets = [0, 8], sizes = [8, 1], strides = [1, 1]} : vector<8x128xf32> to vector<8x1xf32>
    %372 = vector.extract_strided_slice %365 {offsets = [0, 0], sizes = [8, 4], strides = [1, 1]} : vector<8x128xf32> to vector<8x4xf32>
    %373 = arith.subf %369, %372 : vector<8x4xf32>
    %374 = math.absf %373 : vector<8x4xf32>
    %375 = arith.mulf %374, %370 : vector<8x4xf32>
    %376 = arith.addf %290, %375 : vector<8x4xf32>
    %cst_118 = arith.constant 1.000000e+00 : f32
    %377 = vector.broadcast %cst_118 : f32 to vector<8x4xf32>
    %378 = arith.subf %377, %370 : vector<8x4xf32>
    %379 = arith.mulf %294, %378 : vector<8x4xf32>
    %380 = arith.addf %379, %369 : vector<8x4xf32>
    %381 = vector.broadcast %3 : f32 to vector<8x1xf32>
    %382 = arith.mulf %371, %381 : vector<8x1xf32>
    %383 = vector.broadcast %4 : f32 to vector<8x1xf32>
    %384 = arith.addf %382, %383 : vector<8x1xf32>
    %cst_119 = arith.constant 0.000000e+00 : f32
    %385 = vector.broadcast %cst_119 : f32 to vector<8x1xf32>
    %386 = arith.maximumf %385, %384 : vector<8x1xf32>
    %cst_120 = arith.constant 0.000000e+00 : f32
    %387 = vector.broadcast %cst_120 : f32 to vector<8x1xf32>
    %388 = arith.subf %387, %386 : vector<8x1xf32>
    %389 = math.exp %388 : vector<8x1xf32>
    %390 = vector.broadcast %5 : f32 to vector<8x1xf32>
    %391 = arith.mulf %371, %390 : vector<8x1xf32>
    %392 = vector.broadcast %6 : f32 to vector<8x1xf32>
    %393 = arith.addf %391, %392 : vector<8x1xf32>
    %cst_121 = arith.constant 0.000000e+00 : f32
    %394 = vector.broadcast %cst_121 : f32 to vector<8x1xf32>
    %395 = arith.maximumf %394, %393 : vector<8x1xf32>
    %cst_122 = arith.constant 0.000000e+00 : f32
    %396 = vector.broadcast %cst_122 : f32 to vector<8x1xf32>
    %397 = arith.subf %396, %395 : vector<8x1xf32>
    %398 = math.exp %397 : vector<8x1xf32>
    %399 = arith.mulf %370, %380 : vector<8x4xf32>
    %cst_123 = arith.constant 1.000000e+00 : f32
    %400 = vector.broadcast %cst_123 : f32 to vector<8x4xf32>
    %401 = arith.subf %400, %370 : vector<8x4xf32>
    %402 = vector.broadcast %389 : vector<8x1xf32> to vector<8x4xf32>
    %403 = arith.mulf %402, %380 : vector<8x4xf32>
    %404 = arith.mulf %401, %403 : vector<8x4xf32>
    %405 = arith.addf %399, %404 : vector<8x4xf32>
    %406 = vector.broadcast %398 : vector<8x1xf32> to vector<8x128xf32>
    %407 = arith.mulf %406, %364 : vector<8x128xf32>
    %408 = tpu.concatenate %407, %405, %370, %17 in 1 : vector<8x128xf32>, vector<8x4xf32>, vector<8x4xf32>, vector<8x120xf32> -> vector<8x256xf32>
    %409 = arith.truncf %408 : vector<8x256xf32> to vector<8x256xbf16>
    %c0_124 = arith.constant 0 : index
    %c0_125 = arith.constant 0 : index
    %410 = vector.load %arg6[%c0_124, %c0_125] : memref<256x384xbf16, #tpu.memory_space<vmem>>, vector<256x384xbf16>
    %cst_126 = arith.constant dense<0.000000e+00> : vector<8x384xf32>
    %411 = tpu.matmul %409, %410, %cst_126 {dimension_numbers = #tpu.dot_dimension_numbers<[1], [0], [0], [1], [0, 0, 1, 1], [], []>} : vector<8x256xbf16>, vector<256x384xbf16>, vector<8x384xf32> -> vector<8x384xf32>
    %412 = arith.addf %411, %10 : vector<8x384xf32>
    %413 = vector.extract_strided_slice %412 {offsets = [0, 0], sizes = [8, 128], strides = [1, 1]} : vector<8x384xf32> to vector<8x128xf32>
    %414 = arith.negf %413 : vector<8x128xf32>
    %415 = math.exp %414 : vector<8x128xf32>
    %cst_127 = arith.constant 1.000000e+00 : f32
    %416 = vector.broadcast %cst_127 : f32 to vector<8x128xf32>
    %417 = arith.addf %416, %415 : vector<8x128xf32>
    %418 = arith.divf %416, %417 : vector<8x128xf32>
    %419 = vector.extract_strided_slice %412 {offsets = [0, 128], sizes = [8, 128], strides = [1, 1]} : vector<8x384xf32> to vector<8x128xf32>
    %420 = arith.negf %419 : vector<8x128xf32>
    %421 = math.exp %420 : vector<8x128xf32>
    %cst_128 = arith.constant 1.000000e+00 : f32
    %422 = vector.broadcast %cst_128 : f32 to vector<8x128xf32>
    %423 = arith.addf %422, %421 : vector<8x128xf32>
    %424 = arith.divf %422, %423 : vector<8x128xf32>
    %425 = vector.extract_strided_slice %412 {offsets = [0, 256], sizes = [8, 128], strides = [1, 1]} : vector<8x384xf32> to vector<8x128xf32>
    %426 = arith.mulf %418, %407 : vector<8x128xf32>
    %427 = arith.truncf %426 : vector<8x128xf32> to vector<8x128xbf16>
    %c0_129 = arith.constant 0 : index
    %c0_130 = arith.constant 0 : index
    %428 = vector.load %arg7[%c0_129, %c0_130] : memref<128x128xbf16, #tpu.memory_space<vmem>>, vector<128x128xbf16>
    %cst_131 = arith.constant dense<0.000000e+00> : vector<8x128xf32>
    %429 = tpu.matmul %427, %428, %cst_131 {dimension_numbers = #tpu.dot_dimension_numbers<[1], [0], [0], [1], [0, 0, 1, 1], [], []>} : vector<8x128xbf16>, vector<128x128xbf16>, vector<8x128xf32> -> vector<8x128xf32>
    %430 = arith.addf %425, %429 : vector<8x128xf32>
    %431 = math.tanh %430 : vector<8x128xf32>
    %cst_132 = arith.constant 1.000000e+00 : f32
    %432 = vector.broadcast %cst_132 : f32 to vector<8x128xf32>
    %433 = arith.subf %432, %424 : vector<8x128xf32>
    %434 = arith.mulf %433, %407 : vector<8x128xf32>
    %435 = arith.mulf %424, %431 : vector<8x128xf32>
    %436 = arith.addf %434, %435 : vector<8x128xf32>
    %437 = arith.truncf %436 : vector<8x128xf32> to vector<8x128xbf16>
    %c0_133 = arith.constant 0 : index
    %c0_134 = arith.constant 0 : index
    %438 = vector.load %arg9[%c0_133, %c0_134] : memref<128x128xbf16, #tpu.memory_space<vmem>>, vector<128x128xbf16>
    %cst_135 = arith.constant dense<0.000000e+00> : vector<8x128xf32>
    %439 = tpu.matmul %437, %438, %cst_135 {dimension_numbers = #tpu.dot_dimension_numbers<[1], [0], [0], [1], [0, 0, 1, 1], [], []>} : vector<8x128xbf16>, vector<128x128xbf16>, vector<8x128xf32> -> vector<8x128xf32>
    %440 = arith.addf %439, %13 : vector<8x128xf32>
    %cst_136 = arith.constant 0.000000e+00 : f32
    %441 = vector.broadcast %cst_136 : f32 to vector<8x128xf32>
    %442 = arith.maximumf %440, %441 : vector<8x128xf32>
    %443 = arith.truncf %442 : vector<8x128xf32> to vector<8x128xbf16>
    %c0_137 = arith.constant 0 : index
    %c0_138 = arith.constant 0 : index
    %444 = vector.load %arg11[%c0_137, %c0_138] : memref<128x128xbf16, #tpu.memory_space<vmem>>, vector<128x128xbf16>
    %cst_139 = arith.constant dense<0.000000e+00> : vector<8x128xf32>
    %445 = tpu.matmul %443, %444, %cst_139 {dimension_numbers = #tpu.dot_dimension_numbers<[1], [0], [0], [1], [0, 0, 1, 1], [], []>} : vector<8x128xbf16>, vector<128x128xbf16>, vector<8x128xf32> -> vector<8x128xf32>
    %446 = arith.addf %445, %16 : vector<8x128xf32>
    %c16_i32_140 = arith.constant 16 : i32
    %447 = arith.muli %arg1, %c16_i32_140 : i32
    %448 = arith.addi %447, %c4_i32 : i32
    %449 = arith.cmpi slt, %448, %7 : i32
    %450 = arith.select %449, %436, %364 : vector<8x128xf32>
    %451 = arith.select %449, %446, %365 : vector<8x128xf32>
    %c5_i32 = arith.constant 5 : i32
    %452 = arith.index_cast %c5_i32 : i32 to index
    %c0_141 = arith.constant 0 : index
    %c0_142 = arith.constant 0 : index
    %453 = vector.load %arg4[%452, %c0_141, %c0_142] : memref<16x8x128xf32, #tpu.memory_space<vmem>>, vector<1x8x128xf32>
    %454 = vector.shape_cast %453 : vector<1x8x128xf32> to vector<8x128xf32>
    %455 = vector.extract_strided_slice %454 {offsets = [0, 0], sizes = [8, 4], strides = [1, 1]} : vector<8x128xf32> to vector<8x4xf32>
    %456 = vector.extract_strided_slice %454 {offsets = [0, 4], sizes = [8, 4], strides = [1, 1]} : vector<8x128xf32> to vector<8x4xf32>
    %457 = vector.extract_strided_slice %454 {offsets = [0, 8], sizes = [8, 1], strides = [1, 1]} : vector<8x128xf32> to vector<8x1xf32>
    %458 = vector.extract_strided_slice %451 {offsets = [0, 0], sizes = [8, 4], strides = [1, 1]} : vector<8x128xf32> to vector<8x4xf32>
    %459 = arith.subf %455, %458 : vector<8x4xf32>
    %460 = math.absf %459 : vector<8x4xf32>
    %461 = arith.mulf %460, %456 : vector<8x4xf32>
    %462 = arith.addf %376, %461 : vector<8x4xf32>
    %cst_143 = arith.constant 1.000000e+00 : f32
    %463 = vector.broadcast %cst_143 : f32 to vector<8x4xf32>
    %464 = arith.subf %463, %456 : vector<8x4xf32>
    %465 = arith.mulf %380, %464 : vector<8x4xf32>
    %466 = arith.addf %465, %455 : vector<8x4xf32>
    %467 = vector.broadcast %3 : f32 to vector<8x1xf32>
    %468 = arith.mulf %457, %467 : vector<8x1xf32>
    %469 = vector.broadcast %4 : f32 to vector<8x1xf32>
    %470 = arith.addf %468, %469 : vector<8x1xf32>
    %cst_144 = arith.constant 0.000000e+00 : f32
    %471 = vector.broadcast %cst_144 : f32 to vector<8x1xf32>
    %472 = arith.maximumf %471, %470 : vector<8x1xf32>
    %cst_145 = arith.constant 0.000000e+00 : f32
    %473 = vector.broadcast %cst_145 : f32 to vector<8x1xf32>
    %474 = arith.subf %473, %472 : vector<8x1xf32>
    %475 = math.exp %474 : vector<8x1xf32>
    %476 = vector.broadcast %5 : f32 to vector<8x1xf32>
    %477 = arith.mulf %457, %476 : vector<8x1xf32>
    %478 = vector.broadcast %6 : f32 to vector<8x1xf32>
    %479 = arith.addf %477, %478 : vector<8x1xf32>
    %cst_146 = arith.constant 0.000000e+00 : f32
    %480 = vector.broadcast %cst_146 : f32 to vector<8x1xf32>
    %481 = arith.maximumf %480, %479 : vector<8x1xf32>
    %cst_147 = arith.constant 0.000000e+00 : f32
    %482 = vector.broadcast %cst_147 : f32 to vector<8x1xf32>
    %483 = arith.subf %482, %481 : vector<8x1xf32>
    %484 = math.exp %483 : vector<8x1xf32>
    %485 = arith.mulf %456, %466 : vector<8x4xf32>
    %cst_148 = arith.constant 1.000000e+00 : f32
    %486 = vector.broadcast %cst_148 : f32 to vector<8x4xf32>
    %487 = arith.subf %486, %456 : vector<8x4xf32>
    %488 = vector.broadcast %475 : vector<8x1xf32> to vector<8x4xf32>
    %489 = arith.mulf %488, %466 : vector<8x4xf32>
    %490 = arith.mulf %487, %489 : vector<8x4xf32>
    %491 = arith.addf %485, %490 : vector<8x4xf32>
    %492 = vector.broadcast %484 : vector<8x1xf32> to vector<8x128xf32>
    %493 = arith.mulf %492, %450 : vector<8x128xf32>
    %494 = tpu.concatenate %493, %491, %456, %17 in 1 : vector<8x128xf32>, vector<8x4xf32>, vector<8x4xf32>, vector<8x120xf32> -> vector<8x256xf32>
    %495 = arith.truncf %494 : vector<8x256xf32> to vector<8x256xbf16>
    %c0_149 = arith.constant 0 : index
    %c0_150 = arith.constant 0 : index
    %496 = vector.load %arg6[%c0_149, %c0_150] : memref<256x384xbf16, #tpu.memory_space<vmem>>, vector<256x384xbf16>
    %cst_151 = arith.constant dense<0.000000e+00> : vector<8x384xf32>
    %497 = tpu.matmul %495, %496, %cst_151 {dimension_numbers = #tpu.dot_dimension_numbers<[1], [0], [0], [1], [0, 0, 1, 1], [], []>} : vector<8x256xbf16>, vector<256x384xbf16>, vector<8x384xf32> -> vector<8x384xf32>
    %498 = arith.addf %497, %10 : vector<8x384xf32>
    %499 = vector.extract_strided_slice %498 {offsets = [0, 0], sizes = [8, 128], strides = [1, 1]} : vector<8x384xf32> to vector<8x128xf32>
    %500 = arith.negf %499 : vector<8x128xf32>
    %501 = math.exp %500 : vector<8x128xf32>
    %cst_152 = arith.constant 1.000000e+00 : f32
    %502 = vector.broadcast %cst_152 : f32 to vector<8x128xf32>
    %503 = arith.addf %502, %501 : vector<8x128xf32>
    %504 = arith.divf %502, %503 : vector<8x128xf32>
    %505 = vector.extract_strided_slice %498 {offsets = [0, 128], sizes = [8, 128], strides = [1, 1]} : vector<8x384xf32> to vector<8x128xf32>
    %506 = arith.negf %505 : vector<8x128xf32>
    %507 = math.exp %506 : vector<8x128xf32>
    %cst_153 = arith.constant 1.000000e+00 : f32
    %508 = vector.broadcast %cst_153 : f32 to vector<8x128xf32>
    %509 = arith.addf %508, %507 : vector<8x128xf32>
    %510 = arith.divf %508, %509 : vector<8x128xf32>
    %511 = vector.extract_strided_slice %498 {offsets = [0, 256], sizes = [8, 128], strides = [1, 1]} : vector<8x384xf32> to vector<8x128xf32>
    %512 = arith.mulf %504, %493 : vector<8x128xf32>
    %513 = arith.truncf %512 : vector<8x128xf32> to vector<8x128xbf16>
    %c0_154 = arith.constant 0 : index
    %c0_155 = arith.constant 0 : index
    %514 = vector.load %arg7[%c0_154, %c0_155] : memref<128x128xbf16, #tpu.memory_space<vmem>>, vector<128x128xbf16>
    %cst_156 = arith.constant dense<0.000000e+00> : vector<8x128xf32>
    %515 = tpu.matmul %513, %514, %cst_156 {dimension_numbers = #tpu.dot_dimension_numbers<[1], [0], [0], [1], [0, 0, 1, 1], [], []>} : vector<8x128xbf16>, vector<128x128xbf16>, vector<8x128xf32> -> vector<8x128xf32>
    %516 = arith.addf %511, %515 : vector<8x128xf32>
    %517 = math.tanh %516 : vector<8x128xf32>
    %cst_157 = arith.constant 1.000000e+00 : f32
    %518 = vector.broadcast %cst_157 : f32 to vector<8x128xf32>
    %519 = arith.subf %518, %510 : vector<8x128xf32>
    %520 = arith.mulf %519, %493 : vector<8x128xf32>
    %521 = arith.mulf %510, %517 : vector<8x128xf32>
    %522 = arith.addf %520, %521 : vector<8x128xf32>
    %523 = arith.truncf %522 : vector<8x128xf32> to vector<8x128xbf16>
    %c0_158 = arith.constant 0 : index
    %c0_159 = arith.constant 0 : index
    %524 = vector.load %arg9[%c0_158, %c0_159] : memref<128x128xbf16, #tpu.memory_space<vmem>>, vector<128x128xbf16>
    %cst_160 = arith.constant dense<0.000000e+00> : vector<8x128xf32>
    %525 = tpu.matmul %523, %524, %cst_160 {dimension_numbers = #tpu.dot_dimension_numbers<[1], [0], [0], [1], [0, 0, 1, 1], [], []>} : vector<8x128xbf16>, vector<128x128xbf16>, vector<8x128xf32> -> vector<8x128xf32>
    %526 = arith.addf %525, %13 : vector<8x128xf32>
    %cst_161 = arith.constant 0.000000e+00 : f32
    %527 = vector.broadcast %cst_161 : f32 to vector<8x128xf32>
    %528 = arith.maximumf %526, %527 : vector<8x128xf32>
    %529 = arith.truncf %528 : vector<8x128xf32> to vector<8x128xbf16>
    %c0_162 = arith.constant 0 : index
    %c0_163 = arith.constant 0 : index
    %530 = vector.load %arg11[%c0_162, %c0_163] : memref<128x128xbf16, #tpu.memory_space<vmem>>, vector<128x128xbf16>
    %cst_164 = arith.constant dense<0.000000e+00> : vector<8x128xf32>
    %531 = tpu.matmul %529, %530, %cst_164 {dimension_numbers = #tpu.dot_dimension_numbers<[1], [0], [0], [1], [0, 0, 1, 1], [], []>} : vector<8x128xbf16>, vector<128x128xbf16>, vector<8x128xf32> -> vector<8x128xf32>
    %532 = arith.addf %531, %16 : vector<8x128xf32>
    %c16_i32_165 = arith.constant 16 : i32
    %533 = arith.muli %arg1, %c16_i32_165 : i32
    %534 = arith.addi %533, %c5_i32 : i32
    %535 = arith.cmpi slt, %534, %7 : i32
    %536 = arith.select %535, %522, %450 : vector<8x128xf32>
    %537 = arith.select %535, %532, %451 : vector<8x128xf32>
    %c6_i32 = arith.constant 6 : i32
    %538 = arith.index_cast %c6_i32 : i32 to index
    %c0_166 = arith.constant 0 : index
    %c0_167 = arith.constant 0 : index
    %539 = vector.load %arg4[%538, %c0_166, %c0_167] : memref<16x8x128xf32, #tpu.memory_space<vmem>>, vector<1x8x128xf32>
    %540 = vector.shape_cast %539 : vector<1x8x128xf32> to vector<8x128xf32>
    %541 = vector.extract_strided_slice %540 {offsets = [0, 0], sizes = [8, 4], strides = [1, 1]} : vector<8x128xf32> to vector<8x4xf32>
    %542 = vector.extract_strided_slice %540 {offsets = [0, 4], sizes = [8, 4], strides = [1, 1]} : vector<8x128xf32> to vector<8x4xf32>
    %543 = vector.extract_strided_slice %540 {offsets = [0, 8], sizes = [8, 1], strides = [1, 1]} : vector<8x128xf32> to vector<8x1xf32>
    %544 = vector.extract_strided_slice %537 {offsets = [0, 0], sizes = [8, 4], strides = [1, 1]} : vector<8x128xf32> to vector<8x4xf32>
    %545 = arith.subf %541, %544 : vector<8x4xf32>
    %546 = math.absf %545 : vector<8x4xf32>
    %547 = arith.mulf %546, %542 : vector<8x4xf32>
    %548 = arith.addf %462, %547 : vector<8x4xf32>
    %cst_168 = arith.constant 1.000000e+00 : f32
    %549 = vector.broadcast %cst_168 : f32 to vector<8x4xf32>
    %550 = arith.subf %549, %542 : vector<8x4xf32>
    %551 = arith.mulf %466, %550 : vector<8x4xf32>
    %552 = arith.addf %551, %541 : vector<8x4xf32>
    %553 = vector.broadcast %3 : f32 to vector<8x1xf32>
    %554 = arith.mulf %543, %553 : vector<8x1xf32>
    %555 = vector.broadcast %4 : f32 to vector<8x1xf32>
    %556 = arith.addf %554, %555 : vector<8x1xf32>
    %cst_169 = arith.constant 0.000000e+00 : f32
    %557 = vector.broadcast %cst_169 : f32 to vector<8x1xf32>
    %558 = arith.maximumf %557, %556 : vector<8x1xf32>
    %cst_170 = arith.constant 0.000000e+00 : f32
    %559 = vector.broadcast %cst_170 : f32 to vector<8x1xf32>
    %560 = arith.subf %559, %558 : vector<8x1xf32>
    %561 = math.exp %560 : vector<8x1xf32>
    %562 = vector.broadcast %5 : f32 to vector<8x1xf32>
    %563 = arith.mulf %543, %562 : vector<8x1xf32>
    %564 = vector.broadcast %6 : f32 to vector<8x1xf32>
    %565 = arith.addf %563, %564 : vector<8x1xf32>
    %cst_171 = arith.constant 0.000000e+00 : f32
    %566 = vector.broadcast %cst_171 : f32 to vector<8x1xf32>
    %567 = arith.maximumf %566, %565 : vector<8x1xf32>
    %cst_172 = arith.constant 0.000000e+00 : f32
    %568 = vector.broadcast %cst_172 : f32 to vector<8x1xf32>
    %569 = arith.subf %568, %567 : vector<8x1xf32>
    %570 = math.exp %569 : vector<8x1xf32>
    %571 = arith.mulf %542, %552 : vector<8x4xf32>
    %cst_173 = arith.constant 1.000000e+00 : f32
    %572 = vector.broadcast %cst_173 : f32 to vector<8x4xf32>
    %573 = arith.subf %572, %542 : vector<8x4xf32>
    %574 = vector.broadcast %561 : vector<8x1xf32> to vector<8x4xf32>
    %575 = arith.mulf %574, %552 : vector<8x4xf32>
    %576 = arith.mulf %573, %575 : vector<8x4xf32>
    %577 = arith.addf %571, %576 : vector<8x4xf32>
    %578 = vector.broadcast %570 : vector<8x1xf32> to vector<8x128xf32>
    %579 = arith.mulf %578, %536 : vector<8x128xf32>
    %580 = tpu.concatenate %579, %577, %542, %17 in 1 : vector<8x128xf32>, vector<8x4xf32>, vector<8x4xf32>, vector<8x120xf32> -> vector<8x256xf32>
    %581 = arith.truncf %580 : vector<8x256xf32> to vector<8x256xbf16>
    %c0_174 = arith.constant 0 : index
    %c0_175 = arith.constant 0 : index
    %582 = vector.load %arg6[%c0_174, %c0_175] : memref<256x384xbf16, #tpu.memory_space<vmem>>, vector<256x384xbf16>
    %cst_176 = arith.constant dense<0.000000e+00> : vector<8x384xf32>
    %583 = tpu.matmul %581, %582, %cst_176 {dimension_numbers = #tpu.dot_dimension_numbers<[1], [0], [0], [1], [0, 0, 1, 1], [], []>} : vector<8x256xbf16>, vector<256x384xbf16>, vector<8x384xf32> -> vector<8x384xf32>
    %584 = arith.addf %583, %10 : vector<8x384xf32>
    %585 = vector.extract_strided_slice %584 {offsets = [0, 0], sizes = [8, 128], strides = [1, 1]} : vector<8x384xf32> to vector<8x128xf32>
    %586 = arith.negf %585 : vector<8x128xf32>
    %587 = math.exp %586 : vector<8x128xf32>
    %cst_177 = arith.constant 1.000000e+00 : f32
    %588 = vector.broadcast %cst_177 : f32 to vector<8x128xf32>
    %589 = arith.addf %588, %587 : vector<8x128xf32>
    %590 = arith.divf %588, %589 : vector<8x128xf32>
    %591 = vector.extract_strided_slice %584 {offsets = [0, 128], sizes = [8, 128], strides = [1, 1]} : vector<8x384xf32> to vector<8x128xf32>
    %592 = arith.negf %591 : vector<8x128xf32>
    %593 = math.exp %592 : vector<8x128xf32>
    %cst_178 = arith.constant 1.000000e+00 : f32
    %594 = vector.broadcast %cst_178 : f32 to vector<8x128xf32>
    %595 = arith.addf %594, %593 : vector<8x128xf32>
    %596 = arith.divf %594, %595 : vector<8x128xf32>
    %597 = vector.extract_strided_slice %584 {offsets = [0, 256], sizes = [8, 128], strides = [1, 1]} : vector<8x384xf32> to vector<8x128xf32>
    %598 = arith.mulf %590, %579 : vector<8x128xf32>
    %599 = arith.truncf %598 : vector<8x128xf32> to vector<8x128xbf16>
    %c0_179 = arith.constant 0 : index
    %c0_180 = arith.constant 0 : index
    %600 = vector.load %arg7[%c0_179, %c0_180] : memref<128x128xbf16, #tpu.memory_space<vmem>>, vector<128x128xbf16>
    %cst_181 = arith.constant dense<0.000000e+00> : vector<8x128xf32>
    %601 = tpu.matmul %599, %600, %cst_181 {dimension_numbers = #tpu.dot_dimension_numbers<[1], [0], [0], [1], [0, 0, 1, 1], [], []>} : vector<8x128xbf16>, vector<128x128xbf16>, vector<8x128xf32> -> vector<8x128xf32>
    %602 = arith.addf %597, %601 : vector<8x128xf32>
    %603 = math.tanh %602 : vector<8x128xf32>
    %cst_182 = arith.constant 1.000000e+00 : f32
    %604 = vector.broadcast %cst_182 : f32 to vector<8x128xf32>
    %605 = arith.subf %604, %596 : vector<8x128xf32>
    %606 = arith.mulf %605, %579 : vector<8x128xf32>
    %607 = arith.mulf %596, %603 : vector<8x128xf32>
    %608 = arith.addf %606, %607 : vector<8x128xf32>
    %609 = arith.truncf %608 : vector<8x128xf32> to vector<8x128xbf16>
    %c0_183 = arith.constant 0 : index
    %c0_184 = arith.constant 0 : index
    %610 = vector.load %arg9[%c0_183, %c0_184] : memref<128x128xbf16, #tpu.memory_space<vmem>>, vector<128x128xbf16>
    %cst_185 = arith.constant dense<0.000000e+00> : vector<8x128xf32>
    %611 = tpu.matmul %609, %610, %cst_185 {dimension_numbers = #tpu.dot_dimension_numbers<[1], [0], [0], [1], [0, 0, 1, 1], [], []>} : vector<8x128xbf16>, vector<128x128xbf16>, vector<8x128xf32> -> vector<8x128xf32>
    %612 = arith.addf %611, %13 : vector<8x128xf32>
    %cst_186 = arith.constant 0.000000e+00 : f32
    %613 = vector.broadcast %cst_186 : f32 to vector<8x128xf32>
    %614 = arith.maximumf %612, %613 : vector<8x128xf32>
    %615 = arith.truncf %614 : vector<8x128xf32> to vector<8x128xbf16>
    %c0_187 = arith.constant 0 : index
    %c0_188 = arith.constant 0 : index
    %616 = vector.load %arg11[%c0_187, %c0_188] : memref<128x128xbf16, #tpu.memory_space<vmem>>, vector<128x128xbf16>
    %cst_189 = arith.constant dense<0.000000e+00> : vector<8x128xf32>
    %617 = tpu.matmul %615, %616, %cst_189 {dimension_numbers = #tpu.dot_dimension_numbers<[1], [0], [0], [1], [0, 0, 1, 1], [], []>} : vector<8x128xbf16>, vector<128x128xbf16>, vector<8x128xf32> -> vector<8x128xf32>
    %618 = arith.addf %617, %16 : vector<8x128xf32>
    %c16_i32_190 = arith.constant 16 : i32
    %619 = arith.muli %arg1, %c16_i32_190 : i32
    %620 = arith.addi %619, %c6_i32 : i32
    %621 = arith.cmpi slt, %620, %7 : i32
    %622 = arith.select %621, %608, %536 : vector<8x128xf32>
    %623 = arith.select %621, %618, %537 : vector<8x128xf32>
    %c7_i32 = arith.constant 7 : i32
    %624 = arith.index_cast %c7_i32 : i32 to index
    %c0_191 = arith.constant 0 : index
    %c0_192 = arith.constant 0 : index
    %625 = vector.load %arg4[%624, %c0_191, %c0_192] : memref<16x8x128xf32, #tpu.memory_space<vmem>>, vector<1x8x128xf32>
    %626 = vector.shape_cast %625 : vector<1x8x128xf32> to vector<8x128xf32>
    %627 = vector.extract_strided_slice %626 {offsets = [0, 0], sizes = [8, 4], strides = [1, 1]} : vector<8x128xf32> to vector<8x4xf32>
    %628 = vector.extract_strided_slice %626 {offsets = [0, 4], sizes = [8, 4], strides = [1, 1]} : vector<8x128xf32> to vector<8x4xf32>
    %629 = vector.extract_strided_slice %626 {offsets = [0, 8], sizes = [8, 1], strides = [1, 1]} : vector<8x128xf32> to vector<8x1xf32>
    %630 = vector.extract_strided_slice %623 {offsets = [0, 0], sizes = [8, 4], strides = [1, 1]} : vector<8x128xf32> to vector<8x4xf32>
    %631 = arith.subf %627, %630 : vector<8x4xf32>
    %632 = math.absf %631 : vector<8x4xf32>
    %633 = arith.mulf %632, %628 : vector<8x4xf32>
    %634 = arith.addf %548, %633 : vector<8x4xf32>
    %cst_193 = arith.constant 1.000000e+00 : f32
    %635 = vector.broadcast %cst_193 : f32 to vector<8x4xf32>
    %636 = arith.subf %635, %628 : vector<8x4xf32>
    %637 = arith.mulf %552, %636 : vector<8x4xf32>
    %638 = arith.addf %637, %627 : vector<8x4xf32>
    %639 = vector.broadcast %3 : f32 to vector<8x1xf32>
    %640 = arith.mulf %629, %639 : vector<8x1xf32>
    %641 = vector.broadcast %4 : f32 to vector<8x1xf32>
    %642 = arith.addf %640, %641 : vector<8x1xf32>
    %cst_194 = arith.constant 0.000000e+00 : f32
    %643 = vector.broadcast %cst_194 : f32 to vector<8x1xf32>
    %644 = arith.maximumf %643, %642 : vector<8x1xf32>
    %cst_195 = arith.constant 0.000000e+00 : f32
    %645 = vector.broadcast %cst_195 : f32 to vector<8x1xf32>
    %646 = arith.subf %645, %644 : vector<8x1xf32>
    %647 = math.exp %646 : vector<8x1xf32>
    %648 = vector.broadcast %5 : f32 to vector<8x1xf32>
    %649 = arith.mulf %629, %648 : vector<8x1xf32>
    %650 = vector.broadcast %6 : f32 to vector<8x1xf32>
    %651 = arith.addf %649, %650 : vector<8x1xf32>
    %cst_196 = arith.constant 0.000000e+00 : f32
    %652 = vector.broadcast %cst_196 : f32 to vector<8x1xf32>
    %653 = arith.maximumf %652, %651 : vector<8x1xf32>
    %cst_197 = arith.constant 0.000000e+00 : f32
    %654 = vector.broadcast %cst_197 : f32 to vector<8x1xf32>
    %655 = arith.subf %654, %653 : vector<8x1xf32>
    %656 = math.exp %655 : vector<8x1xf32>
    %657 = arith.mulf %628, %638 : vector<8x4xf32>
    %cst_198 = arith.constant 1.000000e+00 : f32
    %658 = vector.broadcast %cst_198 : f32 to vector<8x4xf32>
    %659 = arith.subf %658, %628 : vector<8x4xf32>
    %660 = vector.broadcast %647 : vector<8x1xf32> to vector<8x4xf32>
    %661 = arith.mulf %660, %638 : vector<8x4xf32>
    %662 = arith.mulf %659, %661 : vector<8x4xf32>
    %663 = arith.addf %657, %662 : vector<8x4xf32>
    %664 = vector.broadcast %656 : vector<8x1xf32> to vector<8x128xf32>
    %665 = arith.mulf %664, %622 : vector<8x128xf32>
    %666 = tpu.concatenate %665, %663, %628, %17 in 1 : vector<8x128xf32>, vector<8x4xf32>, vector<8x4xf32>, vector<8x120xf32> -> vector<8x256xf32>
    %667 = arith.truncf %666 : vector<8x256xf32> to vector<8x256xbf16>
    %c0_199 = arith.constant 0 : index
    %c0_200 = arith.constant 0 : index
    %668 = vector.load %arg6[%c0_199, %c0_200] : memref<256x384xbf16, #tpu.memory_space<vmem>>, vector<256x384xbf16>
    %cst_201 = arith.constant dense<0.000000e+00> : vector<8x384xf32>
    %669 = tpu.matmul %667, %668, %cst_201 {dimension_numbers = #tpu.dot_dimension_numbers<[1], [0], [0], [1], [0, 0, 1, 1], [], []>} : vector<8x256xbf16>, vector<256x384xbf16>, vector<8x384xf32> -> vector<8x384xf32>
    %670 = arith.addf %669, %10 : vector<8x384xf32>
    %671 = vector.extract_strided_slice %670 {offsets = [0, 0], sizes = [8, 128], strides = [1, 1]} : vector<8x384xf32> to vector<8x128xf32>
    %672 = arith.negf %671 : vector<8x128xf32>
    %673 = math.exp %672 : vector<8x128xf32>
    %cst_202 = arith.constant 1.000000e+00 : f32
    %674 = vector.broadcast %cst_202 : f32 to vector<8x128xf32>
    %675 = arith.addf %674, %673 : vector<8x128xf32>
    %676 = arith.divf %674, %675 : vector<8x128xf32>
    %677 = vector.extract_strided_slice %670 {offsets = [0, 128], sizes = [8, 128], strides = [1, 1]} : vector<8x384xf32> to vector<8x128xf32>
    %678 = arith.negf %677 : vector<8x128xf32>
    %679 = math.exp %678 : vector<8x128xf32>
    %cst_203 = arith.constant 1.000000e+00 : f32
    %680 = vector.broadcast %cst_203 : f32 to vector<8x128xf32>
    %681 = arith.addf %680, %679 : vector<8x128xf32>
    %682 = arith.divf %680, %681 : vector<8x128xf32>
    %683 = vector.extract_strided_slice %670 {offsets = [0, 256], sizes = [8, 128], strides = [1, 1]} : vector<8x384xf32> to vector<8x128xf32>
    %684 = arith.mulf %676, %665 : vector<8x128xf32>
    %685 = arith.truncf %684 : vector<8x128xf32> to vector<8x128xbf16>
    %c0_204 = arith.constant 0 : index
    %c0_205 = arith.constant 0 : index
    %686 = vector.load %arg7[%c0_204, %c0_205] : memref<128x128xbf16, #tpu.memory_space<vmem>>, vector<128x128xbf16>
    %cst_206 = arith.constant dense<0.000000e+00> : vector<8x128xf32>
    %687 = tpu.matmul %685, %686, %cst_206 {dimension_numbers = #tpu.dot_dimension_numbers<[1], [0], [0], [1], [0, 0, 1, 1], [], []>} : vector<8x128xbf16>, vector<128x128xbf16>, vector<8x128xf32> -> vector<8x128xf32>
    %688 = arith.addf %683, %687 : vector<8x128xf32>
    %689 = math.tanh %688 : vector<8x128xf32>
    %cst_207 = arith.constant 1.000000e+00 : f32
    %690 = vector.broadcast %cst_207 : f32 to vector<8x128xf32>
    %691 = arith.subf %690, %682 : vector<8x128xf32>
    %692 = arith.mulf %691, %665 : vector<8x128xf32>
    %693 = arith.mulf %682, %689 : vector<8x128xf32>
    %694 = arith.addf %692, %693 : vector<8x128xf32>
    %695 = arith.truncf %694 : vector<8x128xf32> to vector<8x128xbf16>
    %c0_208 = arith.constant 0 : index
    %c0_209 = arith.constant 0 : index
    %696 = vector.load %arg9[%c0_208, %c0_209] : memref<128x128xbf16, #tpu.memory_space<vmem>>, vector<128x128xbf16>
    %cst_210 = arith.constant dense<0.000000e+00> : vector<8x128xf32>
    %697 = tpu.matmul %695, %696, %cst_210 {dimension_numbers = #tpu.dot_dimension_numbers<[1], [0], [0], [1], [0, 0, 1, 1], [], []>} : vector<8x128xbf16>, vector<128x128xbf16>, vector<8x128xf32> -> vector<8x128xf32>
    %698 = arith.addf %697, %13 : vector<8x128xf32>
    %cst_211 = arith.constant 0.000000e+00 : f32
    %699 = vector.broadcast %cst_211 : f32 to vector<8x128xf32>
    %700 = arith.maximumf %698, %699 : vector<8x128xf32>
    %701 = arith.truncf %700 : vector<8x128xf32> to vector<8x128xbf16>
    %c0_212 = arith.constant 0 : index
    %c0_213 = arith.constant 0 : index
    %702 = vector.load %arg11[%c0_212, %c0_213] : memref<128x128xbf16, #tpu.memory_space<vmem>>, vector<128x128xbf16>
    %cst_214 = arith.constant dense<0.000000e+00> : vector<8x128xf32>
    %703 = tpu.matmul %701, %702, %cst_214 {dimension_numbers = #tpu.dot_dimension_numbers<[1], [0], [0], [1], [0, 0, 1, 1], [], []>} : vector<8x128xbf16>, vector<128x128xbf16>, vector<8x128xf32> -> vector<8x128xf32>
    %704 = arith.addf %703, %16 : vector<8x128xf32>
    %c16_i32_215 = arith.constant 16 : i32
    %705 = arith.muli %arg1, %c16_i32_215 : i32
    %706 = arith.addi %705, %c7_i32 : i32
    %707 = arith.cmpi slt, %706, %7 : i32
    %708 = arith.select %707, %694, %622 : vector<8x128xf32>
    %709 = arith.select %707, %704, %623 : vector<8x128xf32>
    %c8_i32 = arith.constant 8 : i32
    %710 = arith.index_cast %c8_i32 : i32 to index
    %c0_216 = arith.constant 0 : index
    %c0_217 = arith.constant 0 : index
    %711 = vector.load %arg4[%710, %c0_216, %c0_217] : memref<16x8x128xf32, #tpu.memory_space<vmem>>, vector<1x8x128xf32>
    %712 = vector.shape_cast %711 : vector<1x8x128xf32> to vector<8x128xf32>
    %713 = vector.extract_strided_slice %712 {offsets = [0, 0], sizes = [8, 4], strides = [1, 1]} : vector<8x128xf32> to vector<8x4xf32>
    %714 = vector.extract_strided_slice %712 {offsets = [0, 4], sizes = [8, 4], strides = [1, 1]} : vector<8x128xf32> to vector<8x4xf32>
    %715 = vector.extract_strided_slice %712 {offsets = [0, 8], sizes = [8, 1], strides = [1, 1]} : vector<8x128xf32> to vector<8x1xf32>
    %716 = vector.extract_strided_slice %709 {offsets = [0, 0], sizes = [8, 4], strides = [1, 1]} : vector<8x128xf32> to vector<8x4xf32>
    %717 = arith.subf %713, %716 : vector<8x4xf32>
    %718 = math.absf %717 : vector<8x4xf32>
    %719 = arith.mulf %718, %714 : vector<8x4xf32>
    %720 = arith.addf %634, %719 : vector<8x4xf32>
    %cst_218 = arith.constant 1.000000e+00 : f32
    %721 = vector.broadcast %cst_218 : f32 to vector<8x4xf32>
    %722 = arith.subf %721, %714 : vector<8x4xf32>
    %723 = arith.mulf %638, %722 : vector<8x4xf32>
    %724 = arith.addf %723, %713 : vector<8x4xf32>
    %725 = vector.broadcast %3 : f32 to vector<8x1xf32>
    %726 = arith.mulf %715, %725 : vector<8x1xf32>
    %727 = vector.broadcast %4 : f32 to vector<8x1xf32>
    %728 = arith.addf %726, %727 : vector<8x1xf32>
    %cst_219 = arith.constant 0.000000e+00 : f32
    %729 = vector.broadcast %cst_219 : f32 to vector<8x1xf32>
    %730 = arith.maximumf %729, %728 : vector<8x1xf32>
    %cst_220 = arith.constant 0.000000e+00 : f32
    %731 = vector.broadcast %cst_220 : f32 to vector<8x1xf32>
    %732 = arith.subf %731, %730 : vector<8x1xf32>
    %733 = math.exp %732 : vector<8x1xf32>
    %734 = vector.broadcast %5 : f32 to vector<8x1xf32>
    %735 = arith.mulf %715, %734 : vector<8x1xf32>
    %736 = vector.broadcast %6 : f32 to vector<8x1xf32>
    %737 = arith.addf %735, %736 : vector<8x1xf32>
    %cst_221 = arith.constant 0.000000e+00 : f32
    %738 = vector.broadcast %cst_221 : f32 to vector<8x1xf32>
    %739 = arith.maximumf %738, %737 : vector<8x1xf32>
    %cst_222 = arith.constant 0.000000e+00 : f32
    %740 = vector.broadcast %cst_222 : f32 to vector<8x1xf32>
    %741 = arith.subf %740, %739 : vector<8x1xf32>
    %742 = math.exp %741 : vector<8x1xf32>
    %743 = arith.mulf %714, %724 : vector<8x4xf32>
    %cst_223 = arith.constant 1.000000e+00 : f32
    %744 = vector.broadcast %cst_223 : f32 to vector<8x4xf32>
    %745 = arith.subf %744, %714 : vector<8x4xf32>
    %746 = vector.broadcast %733 : vector<8x1xf32> to vector<8x4xf32>
    %747 = arith.mulf %746, %724 : vector<8x4xf32>
    %748 = arith.mulf %745, %747 : vector<8x4xf32>
    %749 = arith.addf %743, %748 : vector<8x4xf32>
    %750 = vector.broadcast %742 : vector<8x1xf32> to vector<8x128xf32>
    %751 = arith.mulf %750, %708 : vector<8x128xf32>
    %752 = tpu.concatenate %751, %749, %714, %17 in 1 : vector<8x128xf32>, vector<8x4xf32>, vector<8x4xf32>, vector<8x120xf32> -> vector<8x256xf32>
    %753 = arith.truncf %752 : vector<8x256xf32> to vector<8x256xbf16>
    %c0_224 = arith.constant 0 : index
    %c0_225 = arith.constant 0 : index
    %754 = vector.load %arg6[%c0_224, %c0_225] : memref<256x384xbf16, #tpu.memory_space<vmem>>, vector<256x384xbf16>
    %cst_226 = arith.constant dense<0.000000e+00> : vector<8x384xf32>
    %755 = tpu.matmul %753, %754, %cst_226 {dimension_numbers = #tpu.dot_dimension_numbers<[1], [0], [0], [1], [0, 0, 1, 1], [], []>} : vector<8x256xbf16>, vector<256x384xbf16>, vector<8x384xf32> -> vector<8x384xf32>
    %756 = arith.addf %755, %10 : vector<8x384xf32>
    %757 = vector.extract_strided_slice %756 {offsets = [0, 0], sizes = [8, 128], strides = [1, 1]} : vector<8x384xf32> to vector<8x128xf32>
    %758 = arith.negf %757 : vector<8x128xf32>
    %759 = math.exp %758 : vector<8x128xf32>
    %cst_227 = arith.constant 1.000000e+00 : f32
    %760 = vector.broadcast %cst_227 : f32 to vector<8x128xf32>
    %761 = arith.addf %760, %759 : vector<8x128xf32>
    %762 = arith.divf %760, %761 : vector<8x128xf32>
    %763 = vector.extract_strided_slice %756 {offsets = [0, 128], sizes = [8, 128], strides = [1, 1]} : vector<8x384xf32> to vector<8x128xf32>
    %764 = arith.negf %763 : vector<8x128xf32>
    %765 = math.exp %764 : vector<8x128xf32>
    %cst_228 = arith.constant 1.000000e+00 : f32
    %766 = vector.broadcast %cst_228 : f32 to vector<8x128xf32>
    %767 = arith.addf %766, %765 : vector<8x128xf32>
    %768 = arith.divf %766, %767 : vector<8x128xf32>
    %769 = vector.extract_strided_slice %756 {offsets = [0, 256], sizes = [8, 128], strides = [1, 1]} : vector<8x384xf32> to vector<8x128xf32>
    %770 = arith.mulf %762, %751 : vector<8x128xf32>
    %771 = arith.truncf %770 : vector<8x128xf32> to vector<8x128xbf16>
    %c0_229 = arith.constant 0 : index
    %c0_230 = arith.constant 0 : index
    %772 = vector.load %arg7[%c0_229, %c0_230] : memref<128x128xbf16, #tpu.memory_space<vmem>>, vector<128x128xbf16>
    %cst_231 = arith.constant dense<0.000000e+00> : vector<8x128xf32>
    %773 = tpu.matmul %771, %772, %cst_231 {dimension_numbers = #tpu.dot_dimension_numbers<[1], [0], [0], [1], [0, 0, 1, 1], [], []>} : vector<8x128xbf16>, vector<128x128xbf16>, vector<8x128xf32> -> vector<8x128xf32>
    %774 = arith.addf %769, %773 : vector<8x128xf32>
    %775 = math.tanh %774 : vector<8x128xf32>
    %cst_232 = arith.constant 1.000000e+00 : f32
    %776 = vector.broadcast %cst_232 : f32 to vector<8x128xf32>
    %777 = arith.subf %776, %768 : vector<8x128xf32>
    %778 = arith.mulf %777, %751 : vector<8x128xf32>
    %779 = arith.mulf %768, %775 : vector<8x128xf32>
    %780 = arith.addf %778, %779 : vector<8x128xf32>
    %781 = arith.truncf %780 : vector<8x128xf32> to vector<8x128xbf16>
    %c0_233 = arith.constant 0 : index
    %c0_234 = arith.constant 0 : index
    %782 = vector.load %arg9[%c0_233, %c0_234] : memref<128x128xbf16, #tpu.memory_space<vmem>>, vector<128x128xbf16>
    %cst_235 = arith.constant dense<0.000000e+00> : vector<8x128xf32>
    %783 = tpu.matmul %781, %782, %cst_235 {dimension_numbers = #tpu.dot_dimension_numbers<[1], [0], [0], [1], [0, 0, 1, 1], [], []>} : vector<8x128xbf16>, vector<128x128xbf16>, vector<8x128xf32> -> vector<8x128xf32>
    %784 = arith.addf %783, %13 : vector<8x128xf32>
    %cst_236 = arith.constant 0.000000e+00 : f32
    %785 = vector.broadcast %cst_236 : f32 to vector<8x128xf32>
    %786 = arith.maximumf %784, %785 : vector<8x128xf32>
    %787 = arith.truncf %786 : vector<8x128xf32> to vector<8x128xbf16>
    %c0_237 = arith.constant 0 : index
    %c0_238 = arith.constant 0 : index
    %788 = vector.load %arg11[%c0_237, %c0_238] : memref<128x128xbf16, #tpu.memory_space<vmem>>, vector<128x128xbf16>
    %cst_239 = arith.constant dense<0.000000e+00> : vector<8x128xf32>
    %789 = tpu.matmul %787, %788, %cst_239 {dimension_numbers = #tpu.dot_dimension_numbers<[1], [0], [0], [1], [0, 0, 1, 1], [], []>} : vector<8x128xbf16>, vector<128x128xbf16>, vector<8x128xf32> -> vector<8x128xf32>
    %790 = arith.addf %789, %16 : vector<8x128xf32>
    %c16_i32_240 = arith.constant 16 : i32
    %791 = arith.muli %arg1, %c16_i32_240 : i32
    %792 = arith.addi %791, %c8_i32 : i32
    %793 = arith.cmpi slt, %792, %7 : i32
    %794 = arith.select %793, %780, %708 : vector<8x128xf32>
    %795 = arith.select %793, %790, %709 : vector<8x128xf32>
    %c9_i32 = arith.constant 9 : i32
    %796 = arith.index_cast %c9_i32 : i32 to index
    %c0_241 = arith.constant 0 : index
    %c0_242 = arith.constant 0 : index
    %797 = vector.load %arg4[%796, %c0_241, %c0_242] : memref<16x8x128xf32, #tpu.memory_space<vmem>>, vector<1x8x128xf32>
    %798 = vector.shape_cast %797 : vector<1x8x128xf32> to vector<8x128xf32>
    %799 = vector.extract_strided_slice %798 {offsets = [0, 0], sizes = [8, 4], strides = [1, 1]} : vector<8x128xf32> to vector<8x4xf32>
    %800 = vector.extract_strided_slice %798 {offsets = [0, 4], sizes = [8, 4], strides = [1, 1]} : vector<8x128xf32> to vector<8x4xf32>
    %801 = vector.extract_strided_slice %798 {offsets = [0, 8], sizes = [8, 1], strides = [1, 1]} : vector<8x128xf32> to vector<8x1xf32>
    %802 = vector.extract_strided_slice %795 {offsets = [0, 0], sizes = [8, 4], strides = [1, 1]} : vector<8x128xf32> to vector<8x4xf32>
    %803 = arith.subf %799, %802 : vector<8x4xf32>
    %804 = math.absf %803 : vector<8x4xf32>
    %805 = arith.mulf %804, %800 : vector<8x4xf32>
    %806 = arith.addf %720, %805 : vector<8x4xf32>
    %cst_243 = arith.constant 1.000000e+00 : f32
    %807 = vector.broadcast %cst_243 : f32 to vector<8x4xf32>
    %808 = arith.subf %807, %800 : vector<8x4xf32>
    %809 = arith.mulf %724, %808 : vector<8x4xf32>
    %810 = arith.addf %809, %799 : vector<8x4xf32>
    %811 = vector.broadcast %3 : f32 to vector<8x1xf32>
    %812 = arith.mulf %801, %811 : vector<8x1xf32>
    %813 = vector.broadcast %4 : f32 to vector<8x1xf32>
    %814 = arith.addf %812, %813 : vector<8x1xf32>
    %cst_244 = arith.constant 0.000000e+00 : f32
    %815 = vector.broadcast %cst_244 : f32 to vector<8x1xf32>
    %816 = arith.maximumf %815, %814 : vector<8x1xf32>
    %cst_245 = arith.constant 0.000000e+00 : f32
    %817 = vector.broadcast %cst_245 : f32 to vector<8x1xf32>
    %818 = arith.subf %817, %816 : vector<8x1xf32>
    %819 = math.exp %818 : vector<8x1xf32>
    %820 = vector.broadcast %5 : f32 to vector<8x1xf32>
    %821 = arith.mulf %801, %820 : vector<8x1xf32>
    %822 = vector.broadcast %6 : f32 to vector<8x1xf32>
    %823 = arith.addf %821, %822 : vector<8x1xf32>
    %cst_246 = arith.constant 0.000000e+00 : f32
    %824 = vector.broadcast %cst_246 : f32 to vector<8x1xf32>
    %825 = arith.maximumf %824, %823 : vector<8x1xf32>
    %cst_247 = arith.constant 0.000000e+00 : f32
    %826 = vector.broadcast %cst_247 : f32 to vector<8x1xf32>
    %827 = arith.subf %826, %825 : vector<8x1xf32>
    %828 = math.exp %827 : vector<8x1xf32>
    %829 = arith.mulf %800, %810 : vector<8x4xf32>
    %cst_248 = arith.constant 1.000000e+00 : f32
    %830 = vector.broadcast %cst_248 : f32 to vector<8x4xf32>
    %831 = arith.subf %830, %800 : vector<8x4xf32>
    %832 = vector.broadcast %819 : vector<8x1xf32> to vector<8x4xf32>
    %833 = arith.mulf %832, %810 : vector<8x4xf32>
    %834 = arith.mulf %831, %833 : vector<8x4xf32>
    %835 = arith.addf %829, %834 : vector<8x4xf32>
    %836 = vector.broadcast %828 : vector<8x1xf32> to vector<8x128xf32>
    %837 = arith.mulf %836, %794 : vector<8x128xf32>
    %838 = tpu.concatenate %837, %835, %800, %17 in 1 : vector<8x128xf32>, vector<8x4xf32>, vector<8x4xf32>, vector<8x120xf32> -> vector<8x256xf32>
    %839 = arith.truncf %838 : vector<8x256xf32> to vector<8x256xbf16>
    %c0_249 = arith.constant 0 : index
    %c0_250 = arith.constant 0 : index
    %840 = vector.load %arg6[%c0_249, %c0_250] : memref<256x384xbf16, #tpu.memory_space<vmem>>, vector<256x384xbf16>
    %cst_251 = arith.constant dense<0.000000e+00> : vector<8x384xf32>
    %841 = tpu.matmul %839, %840, %cst_251 {dimension_numbers = #tpu.dot_dimension_numbers<[1], [0], [0], [1], [0, 0, 1, 1], [], []>} : vector<8x256xbf16>, vector<256x384xbf16>, vector<8x384xf32> -> vector<8x384xf32>
    %842 = arith.addf %841, %10 : vector<8x384xf32>
    %843 = vector.extract_strided_slice %842 {offsets = [0, 0], sizes = [8, 128], strides = [1, 1]} : vector<8x384xf32> to vector<8x128xf32>
    %844 = arith.negf %843 : vector<8x128xf32>
    %845 = math.exp %844 : vector<8x128xf32>
    %cst_252 = arith.constant 1.000000e+00 : f32
    %846 = vector.broadcast %cst_252 : f32 to vector<8x128xf32>
    %847 = arith.addf %846, %845 : vector<8x128xf32>
    %848 = arith.divf %846, %847 : vector<8x128xf32>
    %849 = vector.extract_strided_slice %842 {offsets = [0, 128], sizes = [8, 128], strides = [1, 1]} : vector<8x384xf32> to vector<8x128xf32>
    %850 = arith.negf %849 : vector<8x128xf32>
    %851 = math.exp %850 : vector<8x128xf32>
    %cst_253 = arith.constant 1.000000e+00 : f32
    %852 = vector.broadcast %cst_253 : f32 to vector<8x128xf32>
    %853 = arith.addf %852, %851 : vector<8x128xf32>
    %854 = arith.divf %852, %853 : vector<8x128xf32>
    %855 = vector.extract_strided_slice %842 {offsets = [0, 256], sizes = [8, 128], strides = [1, 1]} : vector<8x384xf32> to vector<8x128xf32>
    %856 = arith.mulf %848, %837 : vector<8x128xf32>
    %857 = arith.truncf %856 : vector<8x128xf32> to vector<8x128xbf16>
    %c0_254 = arith.constant 0 : index
    %c0_255 = arith.constant 0 : index
    %858 = vector.load %arg7[%c0_254, %c0_255] : memref<128x128xbf16, #tpu.memory_space<vmem>>, vector<128x128xbf16>
    %cst_256 = arith.constant dense<0.000000e+00> : vector<8x128xf32>
    %859 = tpu.matmul %857, %858, %cst_256 {dimension_numbers = #tpu.dot_dimension_numbers<[1], [0], [0], [1], [0, 0, 1, 1], [], []>} : vector<8x128xbf16>, vector<128x128xbf16>, vector<8x128xf32> -> vector<8x128xf32>
    %860 = arith.addf %855, %859 : vector<8x128xf32>
    %861 = math.tanh %860 : vector<8x128xf32>
    %cst_257 = arith.constant 1.000000e+00 : f32
    %862 = vector.broadcast %cst_257 : f32 to vector<8x128xf32>
    %863 = arith.subf %862, %854 : vector<8x128xf32>
    %864 = arith.mulf %863, %837 : vector<8x128xf32>
    %865 = arith.mulf %854, %861 : vector<8x128xf32>
    %866 = arith.addf %864, %865 : vector<8x128xf32>
    %867 = arith.truncf %866 : vector<8x128xf32> to vector<8x128xbf16>
    %c0_258 = arith.constant 0 : index
    %c0_259 = arith.constant 0 : index
    %868 = vector.load %arg9[%c0_258, %c0_259] : memref<128x128xbf16, #tpu.memory_space<vmem>>, vector<128x128xbf16>
    %cst_260 = arith.constant dense<0.000000e+00> : vector<8x128xf32>
    %869 = tpu.matmul %867, %868, %cst_260 {dimension_numbers = #tpu.dot_dimension_numbers<[1], [0], [0], [1], [0, 0, 1, 1], [], []>} : vector<8x128xbf16>, vector<128x128xbf16>, vector<8x128xf32> -> vector<8x128xf32>
    %870 = arith.addf %869, %13 : vector<8x128xf32>
    %cst_261 = arith.constant 0.000000e+00 : f32
    %871 = vector.broadcast %cst_261 : f32 to vector<8x128xf32>
    %872 = arith.maximumf %870, %871 : vector<8x128xf32>
    %873 = arith.truncf %872 : vector<8x128xf32> to vector<8x128xbf16>
    %c0_262 = arith.constant 0 : index
    %c0_263 = arith.constant 0 : index
    %874 = vector.load %arg11[%c0_262, %c0_263] : memref<128x128xbf16, #tpu.memory_space<vmem>>, vector<128x128xbf16>
    %cst_264 = arith.constant dense<0.000000e+00> : vector<8x128xf32>
    %875 = tpu.matmul %873, %874, %cst_264 {dimension_numbers = #tpu.dot_dimension_numbers<[1], [0], [0], [1], [0, 0, 1, 1], [], []>} : vector<8x128xbf16>, vector<128x128xbf16>, vector<8x128xf32> -> vector<8x128xf32>
    %876 = arith.addf %875, %16 : vector<8x128xf32>
    %c16_i32_265 = arith.constant 16 : i32
    %877 = arith.muli %arg1, %c16_i32_265 : i32
    %878 = arith.addi %877, %c9_i32 : i32
    %879 = arith.cmpi slt, %878, %7 : i32
    %880 = arith.select %879, %866, %794 : vector<8x128xf32>
    %881 = arith.select %879, %876, %795 : vector<8x128xf32>
    %c10_i32 = arith.constant 10 : i32
    %882 = arith.index_cast %c10_i32 : i32 to index
    %c0_266 = arith.constant 0 : index
    %c0_267 = arith.constant 0 : index
    %883 = vector.load %arg4[%882, %c0_266, %c0_267] : memref<16x8x128xf32, #tpu.memory_space<vmem>>, vector<1x8x128xf32>
    %884 = vector.shape_cast %883 : vector<1x8x128xf32> to vector<8x128xf32>
    %885 = vector.extract_strided_slice %884 {offsets = [0, 0], sizes = [8, 4], strides = [1, 1]} : vector<8x128xf32> to vector<8x4xf32>
    %886 = vector.extract_strided_slice %884 {offsets = [0, 4], sizes = [8, 4], strides = [1, 1]} : vector<8x128xf32> to vector<8x4xf32>
    %887 = vector.extract_strided_slice %884 {offsets = [0, 8], sizes = [8, 1], strides = [1, 1]} : vector<8x128xf32> to vector<8x1xf32>
    %888 = vector.extract_strided_slice %881 {offsets = [0, 0], sizes = [8, 4], strides = [1, 1]} : vector<8x128xf32> to vector<8x4xf32>
    %889 = arith.subf %885, %888 : vector<8x4xf32>
    %890 = math.absf %889 : vector<8x4xf32>
    %891 = arith.mulf %890, %886 : vector<8x4xf32>
    %892 = arith.addf %806, %891 : vector<8x4xf32>
    %cst_268 = arith.constant 1.000000e+00 : f32
    %893 = vector.broadcast %cst_268 : f32 to vector<8x4xf32>
    %894 = arith.subf %893, %886 : vector<8x4xf32>
    %895 = arith.mulf %810, %894 : vector<8x4xf32>
    %896 = arith.addf %895, %885 : vector<8x4xf32>
    %897 = vector.broadcast %3 : f32 to vector<8x1xf32>
    %898 = arith.mulf %887, %897 : vector<8x1xf32>
    %899 = vector.broadcast %4 : f32 to vector<8x1xf32>
    %900 = arith.addf %898, %899 : vector<8x1xf32>
    %cst_269 = arith.constant 0.000000e+00 : f32
    %901 = vector.broadcast %cst_269 : f32 to vector<8x1xf32>
    %902 = arith.maximumf %901, %900 : vector<8x1xf32>
    %cst_270 = arith.constant 0.000000e+00 : f32
    %903 = vector.broadcast %cst_270 : f32 to vector<8x1xf32>
    %904 = arith.subf %903, %902 : vector<8x1xf32>
    %905 = math.exp %904 : vector<8x1xf32>
    %906 = vector.broadcast %5 : f32 to vector<8x1xf32>
    %907 = arith.mulf %887, %906 : vector<8x1xf32>
    %908 = vector.broadcast %6 : f32 to vector<8x1xf32>
    %909 = arith.addf %907, %908 : vector<8x1xf32>
    %cst_271 = arith.constant 0.000000e+00 : f32
    %910 = vector.broadcast %cst_271 : f32 to vector<8x1xf32>
    %911 = arith.maximumf %910, %909 : vector<8x1xf32>
    %cst_272 = arith.constant 0.000000e+00 : f32
    %912 = vector.broadcast %cst_272 : f32 to vector<8x1xf32>
    %913 = arith.subf %912, %911 : vector<8x1xf32>
    %914 = math.exp %913 : vector<8x1xf32>
    %915 = arith.mulf %886, %896 : vector<8x4xf32>
    %cst_273 = arith.constant 1.000000e+00 : f32
    %916 = vector.broadcast %cst_273 : f32 to vector<8x4xf32>
    %917 = arith.subf %916, %886 : vector<8x4xf32>
    %918 = vector.broadcast %905 : vector<8x1xf32> to vector<8x4xf32>
    %919 = arith.mulf %918, %896 : vector<8x4xf32>
    %920 = arith.mulf %917, %919 : vector<8x4xf32>
    %921 = arith.addf %915, %920 : vector<8x4xf32>
    %922 = vector.broadcast %914 : vector<8x1xf32> to vector<8x128xf32>
    %923 = arith.mulf %922, %880 : vector<8x128xf32>
    %924 = tpu.concatenate %923, %921, %886, %17 in 1 : vector<8x128xf32>, vector<8x4xf32>, vector<8x4xf32>, vector<8x120xf32> -> vector<8x256xf32>
    %925 = arith.truncf %924 : vector<8x256xf32> to vector<8x256xbf16>
    %c0_274 = arith.constant 0 : index
    %c0_275 = arith.constant 0 : index
    %926 = vector.load %arg6[%c0_274, %c0_275] : memref<256x384xbf16, #tpu.memory_space<vmem>>, vector<256x384xbf16>
    %cst_276 = arith.constant dense<0.000000e+00> : vector<8x384xf32>
    %927 = tpu.matmul %925, %926, %cst_276 {dimension_numbers = #tpu.dot_dimension_numbers<[1], [0], [0], [1], [0, 0, 1, 1], [], []>} : vector<8x256xbf16>, vector<256x384xbf16>, vector<8x384xf32> -> vector<8x384xf32>
    %928 = arith.addf %927, %10 : vector<8x384xf32>
    %929 = vector.extract_strided_slice %928 {offsets = [0, 0], sizes = [8, 128], strides = [1, 1]} : vector<8x384xf32> to vector<8x128xf32>
    %930 = arith.negf %929 : vector<8x128xf32>
    %931 = math.exp %930 : vector<8x128xf32>
    %cst_277 = arith.constant 1.000000e+00 : f32
    %932 = vector.broadcast %cst_277 : f32 to vector<8x128xf32>
    %933 = arith.addf %932, %931 : vector<8x128xf32>
    %934 = arith.divf %932, %933 : vector<8x128xf32>
    %935 = vector.extract_strided_slice %928 {offsets = [0, 128], sizes = [8, 128], strides = [1, 1]} : vector<8x384xf32> to vector<8x128xf32>
    %936 = arith.negf %935 : vector<8x128xf32>
    %937 = math.exp %936 : vector<8x128xf32>
    %cst_278 = arith.constant 1.000000e+00 : f32
    %938 = vector.broadcast %cst_278 : f32 to vector<8x128xf32>
    %939 = arith.addf %938, %937 : vector<8x128xf32>
    %940 = arith.divf %938, %939 : vector<8x128xf32>
    %941 = vector.extract_strided_slice %928 {offsets = [0, 256], sizes = [8, 128], strides = [1, 1]} : vector<8x384xf32> to vector<8x128xf32>
    %942 = arith.mulf %934, %923 : vector<8x128xf32>
    %943 = arith.truncf %942 : vector<8x128xf32> to vector<8x128xbf16>
    %c0_279 = arith.constant 0 : index
    %c0_280 = arith.constant 0 : index
    %944 = vector.load %arg7[%c0_279, %c0_280] : memref<128x128xbf16, #tpu.memory_space<vmem>>, vector<128x128xbf16>
    %cst_281 = arith.constant dense<0.000000e+00> : vector<8x128xf32>
    %945 = tpu.matmul %943, %944, %cst_281 {dimension_numbers = #tpu.dot_dimension_numbers<[1], [0], [0], [1], [0, 0, 1, 1], [], []>} : vector<8x128xbf16>, vector<128x128xbf16>, vector<8x128xf32> -> vector<8x128xf32>
    %946 = arith.addf %941, %945 : vector<8x128xf32>
    %947 = math.tanh %946 : vector<8x128xf32>
    %cst_282 = arith.constant 1.000000e+00 : f32
    %948 = vector.broadcast %cst_282 : f32 to vector<8x128xf32>
    %949 = arith.subf %948, %940 : vector<8x128xf32>
    %950 = arith.mulf %949, %923 : vector<8x128xf32>
    %951 = arith.mulf %940, %947 : vector<8x128xf32>
    %952 = arith.addf %950, %951 : vector<8x128xf32>
    %953 = arith.truncf %952 : vector<8x128xf32> to vector<8x128xbf16>
    %c0_283 = arith.constant 0 : index
    %c0_284 = arith.constant 0 : index
    %954 = vector.load %arg9[%c0_283, %c0_284] : memref<128x128xbf16, #tpu.memory_space<vmem>>, vector<128x128xbf16>
    %cst_285 = arith.constant dense<0.000000e+00> : vector<8x128xf32>
    %955 = tpu.matmul %953, %954, %cst_285 {dimension_numbers = #tpu.dot_dimension_numbers<[1], [0], [0], [1], [0, 0, 1, 1], [], []>} : vector<8x128xbf16>, vector<128x128xbf16>, vector<8x128xf32> -> vector<8x128xf32>
    %956 = arith.addf %955, %13 : vector<8x128xf32>
    %cst_286 = arith.constant 0.000000e+00 : f32
    %957 = vector.broadcast %cst_286 : f32 to vector<8x128xf32>
    %958 = arith.maximumf %956, %957 : vector<8x128xf32>
    %959 = arith.truncf %958 : vector<8x128xf32> to vector<8x128xbf16>
    %c0_287 = arith.constant 0 : index
    %c0_288 = arith.constant 0 : index
    %960 = vector.load %arg11[%c0_287, %c0_288] : memref<128x128xbf16, #tpu.memory_space<vmem>>, vector<128x128xbf16>
    %cst_289 = arith.constant dense<0.000000e+00> : vector<8x128xf32>
    %961 = tpu.matmul %959, %960, %cst_289 {dimension_numbers = #tpu.dot_dimension_numbers<[1], [0], [0], [1], [0, 0, 1, 1], [], []>} : vector<8x128xbf16>, vector<128x128xbf16>, vector<8x128xf32> -> vector<8x128xf32>
    %962 = arith.addf %961, %16 : vector<8x128xf32>
    %c16_i32_290 = arith.constant 16 : i32
    %963 = arith.muli %arg1, %c16_i32_290 : i32
    %964 = arith.addi %963, %c10_i32 : i32
    %965 = arith.cmpi slt, %964, %7 : i32
    %966 = arith.select %965, %952, %880 : vector<8x128xf32>
    %967 = arith.select %965, %962, %881 : vector<8x128xf32>
    %c11_i32 = arith.constant 11 : i32
    %968 = arith.index_cast %c11_i32 : i32 to index
    %c0_291 = arith.constant 0 : index
    %c0_292 = arith.constant 0 : index
    %969 = vector.load %arg4[%968, %c0_291, %c0_292] : memref<16x8x128xf32, #tpu.memory_space<vmem>>, vector<1x8x128xf32>
    %970 = vector.shape_cast %969 : vector<1x8x128xf32> to vector<8x128xf32>
    %971 = vector.extract_strided_slice %970 {offsets = [0, 0], sizes = [8, 4], strides = [1, 1]} : vector<8x128xf32> to vector<8x4xf32>
    %972 = vector.extract_strided_slice %970 {offsets = [0, 4], sizes = [8, 4], strides = [1, 1]} : vector<8x128xf32> to vector<8x4xf32>
    %973 = vector.extract_strided_slice %970 {offsets = [0, 8], sizes = [8, 1], strides = [1, 1]} : vector<8x128xf32> to vector<8x1xf32>
    %974 = vector.extract_strided_slice %967 {offsets = [0, 0], sizes = [8, 4], strides = [1, 1]} : vector<8x128xf32> to vector<8x4xf32>
    %975 = arith.subf %971, %974 : vector<8x4xf32>
    %976 = math.absf %975 : vector<8x4xf32>
    %977 = arith.mulf %976, %972 : vector<8x4xf32>
    %978 = arith.addf %892, %977 : vector<8x4xf32>
    %cst_293 = arith.constant 1.000000e+00 : f32
    %979 = vector.broadcast %cst_293 : f32 to vector<8x4xf32>
    %980 = arith.subf %979, %972 : vector<8x4xf32>
    %981 = arith.mulf %896, %980 : vector<8x4xf32>
    %982 = arith.addf %981, %971 : vector<8x4xf32>
    %983 = vector.broadcast %3 : f32 to vector<8x1xf32>
    %984 = arith.mulf %973, %983 : vector<8x1xf32>
    %985 = vector.broadcast %4 : f32 to vector<8x1xf32>
    %986 = arith.addf %984, %985 : vector<8x1xf32>
    %cst_294 = arith.constant 0.000000e+00 : f32
    %987 = vector.broadcast %cst_294 : f32 to vector<8x1xf32>
    %988 = arith.maximumf %987, %986 : vector<8x1xf32>
    %cst_295 = arith.constant 0.000000e+00 : f32
    %989 = vector.broadcast %cst_295 : f32 to vector<8x1xf32>
    %990 = arith.subf %989, %988 : vector<8x1xf32>
    %991 = math.exp %990 : vector<8x1xf32>
    %992 = vector.broadcast %5 : f32 to vector<8x1xf32>
    %993 = arith.mulf %973, %992 : vector<8x1xf32>
    %994 = vector.broadcast %6 : f32 to vector<8x1xf32>
    %995 = arith.addf %993, %994 : vector<8x1xf32>
    %cst_296 = arith.constant 0.000000e+00 : f32
    %996 = vector.broadcast %cst_296 : f32 to vector<8x1xf32>
    %997 = arith.maximumf %996, %995 : vector<8x1xf32>
    %cst_297 = arith.constant 0.000000e+00 : f32
    %998 = vector.broadcast %cst_297 : f32 to vector<8x1xf32>
    %999 = arith.subf %998, %997 : vector<8x1xf32>
    %1000 = math.exp %999 : vector<8x1xf32>
    %1001 = arith.mulf %972, %982 : vector<8x4xf32>
    %cst_298 = arith.constant 1.000000e+00 : f32
    %1002 = vector.broadcast %cst_298 : f32 to vector<8x4xf32>
    %1003 = arith.subf %1002, %972 : vector<8x4xf32>
    %1004 = vector.broadcast %991 : vector<8x1xf32> to vector<8x4xf32>
    %1005 = arith.mulf %1004, %982 : vector<8x4xf32>
    %1006 = arith.mulf %1003, %1005 : vector<8x4xf32>
    %1007 = arith.addf %1001, %1006 : vector<8x4xf32>
    %1008 = vector.broadcast %1000 : vector<8x1xf32> to vector<8x128xf32>
    %1009 = arith.mulf %1008, %966 : vector<8x128xf32>
    %1010 = tpu.concatenate %1009, %1007, %972, %17 in 1 : vector<8x128xf32>, vector<8x4xf32>, vector<8x4xf32>, vector<8x120xf32> -> vector<8x256xf32>
    %1011 = arith.truncf %1010 : vector<8x256xf32> to vector<8x256xbf16>
    %c0_299 = arith.constant 0 : index
    %c0_300 = arith.constant 0 : index
    %1012 = vector.load %arg6[%c0_299, %c0_300] : memref<256x384xbf16, #tpu.memory_space<vmem>>, vector<256x384xbf16>
    %cst_301 = arith.constant dense<0.000000e+00> : vector<8x384xf32>
    %1013 = tpu.matmul %1011, %1012, %cst_301 {dimension_numbers = #tpu.dot_dimension_numbers<[1], [0], [0], [1], [0, 0, 1, 1], [], []>} : vector<8x256xbf16>, vector<256x384xbf16>, vector<8x384xf32> -> vector<8x384xf32>
    %1014 = arith.addf %1013, %10 : vector<8x384xf32>
    %1015 = vector.extract_strided_slice %1014 {offsets = [0, 0], sizes = [8, 128], strides = [1, 1]} : vector<8x384xf32> to vector<8x128xf32>
    %1016 = arith.negf %1015 : vector<8x128xf32>
    %1017 = math.exp %1016 : vector<8x128xf32>
    %cst_302 = arith.constant 1.000000e+00 : f32
    %1018 = vector.broadcast %cst_302 : f32 to vector<8x128xf32>
    %1019 = arith.addf %1018, %1017 : vector<8x128xf32>
    %1020 = arith.divf %1018, %1019 : vector<8x128xf32>
    %1021 = vector.extract_strided_slice %1014 {offsets = [0, 128], sizes = [8, 128], strides = [1, 1]} : vector<8x384xf32> to vector<8x128xf32>
    %1022 = arith.negf %1021 : vector<8x128xf32>
    %1023 = math.exp %1022 : vector<8x128xf32>
    %cst_303 = arith.constant 1.000000e+00 : f32
    %1024 = vector.broadcast %cst_303 : f32 to vector<8x128xf32>
    %1025 = arith.addf %1024, %1023 : vector<8x128xf32>
    %1026 = arith.divf %1024, %1025 : vector<8x128xf32>
    %1027 = vector.extract_strided_slice %1014 {offsets = [0, 256], sizes = [8, 128], strides = [1, 1]} : vector<8x384xf32> to vector<8x128xf32>
    %1028 = arith.mulf %1020, %1009 : vector<8x128xf32>
    %1029 = arith.truncf %1028 : vector<8x128xf32> to vector<8x128xbf16>
    %c0_304 = arith.constant 0 : index
    %c0_305 = arith.constant 0 : index
    %1030 = vector.load %arg7[%c0_304, %c0_305] : memref<128x128xbf16, #tpu.memory_space<vmem>>, vector<128x128xbf16>
    %cst_306 = arith.constant dense<0.000000e+00> : vector<8x128xf32>
    %1031 = tpu.matmul %1029, %1030, %cst_306 {dimension_numbers = #tpu.dot_dimension_numbers<[1], [0], [0], [1], [0, 0, 1, 1], [], []>} : vector<8x128xbf16>, vector<128x128xbf16>, vector<8x128xf32> -> vector<8x128xf32>
    %1032 = arith.addf %1027, %1031 : vector<8x128xf32>
    %1033 = math.tanh %1032 : vector<8x128xf32>
    %cst_307 = arith.constant 1.000000e+00 : f32
    %1034 = vector.broadcast %cst_307 : f32 to vector<8x128xf32>
    %1035 = arith.subf %1034, %1026 : vector<8x128xf32>
    %1036 = arith.mulf %1035, %1009 : vector<8x128xf32>
    %1037 = arith.mulf %1026, %1033 : vector<8x128xf32>
    %1038 = arith.addf %1036, %1037 : vector<8x128xf32>
    %1039 = arith.truncf %1038 : vector<8x128xf32> to vector<8x128xbf16>
    %c0_308 = arith.constant 0 : index
    %c0_309 = arith.constant 0 : index
    %1040 = vector.load %arg9[%c0_308, %c0_309] : memref<128x128xbf16, #tpu.memory_space<vmem>>, vector<128x128xbf16>
    %cst_310 = arith.constant dense<0.000000e+00> : vector<8x128xf32>
    %1041 = tpu.matmul %1039, %1040, %cst_310 {dimension_numbers = #tpu.dot_dimension_numbers<[1], [0], [0], [1], [0, 0, 1, 1], [], []>} : vector<8x128xbf16>, vector<128x128xbf16>, vector<8x128xf32> -> vector<8x128xf32>
    %1042 = arith.addf %1041, %13 : vector<8x128xf32>
    %cst_311 = arith.constant 0.000000e+00 : f32
    %1043 = vector.broadcast %cst_311 : f32 to vector<8x128xf32>
    %1044 = arith.maximumf %1042, %1043 : vector<8x128xf32>
    %1045 = arith.truncf %1044 : vector<8x128xf32> to vector<8x128xbf16>
    %c0_312 = arith.constant 0 : index
    %c0_313 = arith.constant 0 : index
    %1046 = vector.load %arg11[%c0_312, %c0_313] : memref<128x128xbf16, #tpu.memory_space<vmem>>, vector<128x128xbf16>
    %cst_314 = arith.constant dense<0.000000e+00> : vector<8x128xf32>
    %1047 = tpu.matmul %1045, %1046, %cst_314 {dimension_numbers = #tpu.dot_dimension_numbers<[1], [0], [0], [1], [0, 0, 1, 1], [], []>} : vector<8x128xbf16>, vector<128x128xbf16>, vector<8x128xf32> -> vector<8x128xf32>
    %1048 = arith.addf %1047, %16 : vector<8x128xf32>
    %c16_i32_315 = arith.constant 16 : i32
    %1049 = arith.muli %arg1, %c16_i32_315 : i32
    %1050 = arith.addi %1049, %c11_i32 : i32
    %1051 = arith.cmpi slt, %1050, %7 : i32
    %1052 = arith.select %1051, %1038, %966 : vector<8x128xf32>
    %1053 = arith.select %1051, %1048, %967 : vector<8x128xf32>
    %c12_i32 = arith.constant 12 : i32
    %1054 = arith.index_cast %c12_i32 : i32 to index
    %c0_316 = arith.constant 0 : index
    %c0_317 = arith.constant 0 : index
    %1055 = vector.load %arg4[%1054, %c0_316, %c0_317] : memref<16x8x128xf32, #tpu.memory_space<vmem>>, vector<1x8x128xf32>
    %1056 = vector.shape_cast %1055 : vector<1x8x128xf32> to vector<8x128xf32>
    %1057 = vector.extract_strided_slice %1056 {offsets = [0, 0], sizes = [8, 4], strides = [1, 1]} : vector<8x128xf32> to vector<8x4xf32>
    %1058 = vector.extract_strided_slice %1056 {offsets = [0, 4], sizes = [8, 4], strides = [1, 1]} : vector<8x128xf32> to vector<8x4xf32>
    %1059 = vector.extract_strided_slice %1056 {offsets = [0, 8], sizes = [8, 1], strides = [1, 1]} : vector<8x128xf32> to vector<8x1xf32>
    %1060 = vector.extract_strided_slice %1053 {offsets = [0, 0], sizes = [8, 4], strides = [1, 1]} : vector<8x128xf32> to vector<8x4xf32>
    %1061 = arith.subf %1057, %1060 : vector<8x4xf32>
    %1062 = math.absf %1061 : vector<8x4xf32>
    %1063 = arith.mulf %1062, %1058 : vector<8x4xf32>
    %1064 = arith.addf %978, %1063 : vector<8x4xf32>
    %cst_318 = arith.constant 1.000000e+00 : f32
    %1065 = vector.broadcast %cst_318 : f32 to vector<8x4xf32>
    %1066 = arith.subf %1065, %1058 : vector<8x4xf32>
    %1067 = arith.mulf %982, %1066 : vector<8x4xf32>
    %1068 = arith.addf %1067, %1057 : vector<8x4xf32>
    %1069 = vector.broadcast %3 : f32 to vector<8x1xf32>
    %1070 = arith.mulf %1059, %1069 : vector<8x1xf32>
    %1071 = vector.broadcast %4 : f32 to vector<8x1xf32>
    %1072 = arith.addf %1070, %1071 : vector<8x1xf32>
    %cst_319 = arith.constant 0.000000e+00 : f32
    %1073 = vector.broadcast %cst_319 : f32 to vector<8x1xf32>
    %1074 = arith.maximumf %1073, %1072 : vector<8x1xf32>
    %cst_320 = arith.constant 0.000000e+00 : f32
    %1075 = vector.broadcast %cst_320 : f32 to vector<8x1xf32>
    %1076 = arith.subf %1075, %1074 : vector<8x1xf32>
    %1077 = math.exp %1076 : vector<8x1xf32>
    %1078 = vector.broadcast %5 : f32 to vector<8x1xf32>
    %1079 = arith.mulf %1059, %1078 : vector<8x1xf32>
    %1080 = vector.broadcast %6 : f32 to vector<8x1xf32>
    %1081 = arith.addf %1079, %1080 : vector<8x1xf32>
    %cst_321 = arith.constant 0.000000e+00 : f32
    %1082 = vector.broadcast %cst_321 : f32 to vector<8x1xf32>
    %1083 = arith.maximumf %1082, %1081 : vector<8x1xf32>
    %cst_322 = arith.constant 0.000000e+00 : f32
    %1084 = vector.broadcast %cst_322 : f32 to vector<8x1xf32>
    %1085 = arith.subf %1084, %1083 : vector<8x1xf32>
    %1086 = math.exp %1085 : vector<8x1xf32>
    %1087 = arith.mulf %1058, %1068 : vector<8x4xf32>
    %cst_323 = arith.constant 1.000000e+00 : f32
    %1088 = vector.broadcast %cst_323 : f32 to vector<8x4xf32>
    %1089 = arith.subf %1088, %1058 : vector<8x4xf32>
    %1090 = vector.broadcast %1077 : vector<8x1xf32> to vector<8x4xf32>
    %1091 = arith.mulf %1090, %1068 : vector<8x4xf32>
    %1092 = arith.mulf %1089, %1091 : vector<8x4xf32>
    %1093 = arith.addf %1087, %1092 : vector<8x4xf32>
    %1094 = vector.broadcast %1086 : vector<8x1xf32> to vector<8x128xf32>
    %1095 = arith.mulf %1094, %1052 : vector<8x128xf32>
    %1096 = tpu.concatenate %1095, %1093, %1058, %17 in 1 : vector<8x128xf32>, vector<8x4xf32>, vector<8x4xf32>, vector<8x120xf32> -> vector<8x256xf32>
    %1097 = arith.truncf %1096 : vector<8x256xf32> to vector<8x256xbf16>
    %c0_324 = arith.constant 0 : index
    %c0_325 = arith.constant 0 : index
    %1098 = vector.load %arg6[%c0_324, %c0_325] : memref<256x384xbf16, #tpu.memory_space<vmem>>, vector<256x384xbf16>
    %cst_326 = arith.constant dense<0.000000e+00> : vector<8x384xf32>
    %1099 = tpu.matmul %1097, %1098, %cst_326 {dimension_numbers = #tpu.dot_dimension_numbers<[1], [0], [0], [1], [0, 0, 1, 1], [], []>} : vector<8x256xbf16>, vector<256x384xbf16>, vector<8x384xf32> -> vector<8x384xf32>
    %1100 = arith.addf %1099, %10 : vector<8x384xf32>
    %1101 = vector.extract_strided_slice %1100 {offsets = [0, 0], sizes = [8, 128], strides = [1, 1]} : vector<8x384xf32> to vector<8x128xf32>
    %1102 = arith.negf %1101 : vector<8x128xf32>
    %1103 = math.exp %1102 : vector<8x128xf32>
    %cst_327 = arith.constant 1.000000e+00 : f32
    %1104 = vector.broadcast %cst_327 : f32 to vector<8x128xf32>
    %1105 = arith.addf %1104, %1103 : vector<8x128xf32>
    %1106 = arith.divf %1104, %1105 : vector<8x128xf32>
    %1107 = vector.extract_strided_slice %1100 {offsets = [0, 128], sizes = [8, 128], strides = [1, 1]} : vector<8x384xf32> to vector<8x128xf32>
    %1108 = arith.negf %1107 : vector<8x128xf32>
    %1109 = math.exp %1108 : vector<8x128xf32>
    %cst_328 = arith.constant 1.000000e+00 : f32
    %1110 = vector.broadcast %cst_328 : f32 to vector<8x128xf32>
    %1111 = arith.addf %1110, %1109 : vector<8x128xf32>
    %1112 = arith.divf %1110, %1111 : vector<8x128xf32>
    %1113 = vector.extract_strided_slice %1100 {offsets = [0, 256], sizes = [8, 128], strides = [1, 1]} : vector<8x384xf32> to vector<8x128xf32>
    %1114 = arith.mulf %1106, %1095 : vector<8x128xf32>
    %1115 = arith.truncf %1114 : vector<8x128xf32> to vector<8x128xbf16>
    %c0_329 = arith.constant 0 : index
    %c0_330 = arith.constant 0 : index
    %1116 = vector.load %arg7[%c0_329, %c0_330] : memref<128x128xbf16, #tpu.memory_space<vmem>>, vector<128x128xbf16>
    %cst_331 = arith.constant dense<0.000000e+00> : vector<8x128xf32>
    %1117 = tpu.matmul %1115, %1116, %cst_331 {dimension_numbers = #tpu.dot_dimension_numbers<[1], [0], [0], [1], [0, 0, 1, 1], [], []>} : vector<8x128xbf16>, vector<128x128xbf16>, vector<8x128xf32> -> vector<8x128xf32>
    %1118 = arith.addf %1113, %1117 : vector<8x128xf32>
    %1119 = math.tanh %1118 : vector<8x128xf32>
    %cst_332 = arith.constant 1.000000e+00 : f32
    %1120 = vector.broadcast %cst_332 : f32 to vector<8x128xf32>
    %1121 = arith.subf %1120, %1112 : vector<8x128xf32>
    %1122 = arith.mulf %1121, %1095 : vector<8x128xf32>
    %1123 = arith.mulf %1112, %1119 : vector<8x128xf32>
    %1124 = arith.addf %1122, %1123 : vector<8x128xf32>
    %1125 = arith.truncf %1124 : vector<8x128xf32> to vector<8x128xbf16>
    %c0_333 = arith.constant 0 : index
    %c0_334 = arith.constant 0 : index
    %1126 = vector.load %arg9[%c0_333, %c0_334] : memref<128x128xbf16, #tpu.memory_space<vmem>>, vector<128x128xbf16>
    %cst_335 = arith.constant dense<0.000000e+00> : vector<8x128xf32>
    %1127 = tpu.matmul %1125, %1126, %cst_335 {dimension_numbers = #tpu.dot_dimension_numbers<[1], [0], [0], [1], [0, 0, 1, 1], [], []>} : vector<8x128xbf16>, vector<128x128xbf16>, vector<8x128xf32> -> vector<8x128xf32>
    %1128 = arith.addf %1127, %13 : vector<8x128xf32>
    %cst_336 = arith.constant 0.000000e+00 : f32
    %1129 = vector.broadcast %cst_336 : f32 to vector<8x128xf32>
    %1130 = arith.maximumf %1128, %1129 : vector<8x128xf32>
    %1131 = arith.truncf %1130 : vector<8x128xf32> to vector<8x128xbf16>
    %c0_337 = arith.constant 0 : index
    %c0_338 = arith.constant 0 : index
    %1132 = vector.load %arg11[%c0_337, %c0_338] : memref<128x128xbf16, #tpu.memory_space<vmem>>, vector<128x128xbf16>
    %cst_339 = arith.constant dense<0.000000e+00> : vector<8x128xf32>
    %1133 = tpu.matmul %1131, %1132, %cst_339 {dimension_numbers = #tpu.dot_dimension_numbers<[1], [0], [0], [1], [0, 0, 1, 1], [], []>} : vector<8x128xbf16>, vector<128x128xbf16>, vector<8x128xf32> -> vector<8x128xf32>
    %1134 = arith.addf %1133, %16 : vector<8x128xf32>
    %c16_i32_340 = arith.constant 16 : i32
    %1135 = arith.muli %arg1, %c16_i32_340 : i32
    %1136 = arith.addi %1135, %c12_i32 : i32
    %1137 = arith.cmpi slt, %1136, %7 : i32
    %1138 = arith.select %1137, %1124, %1052 : vector<8x128xf32>
    %1139 = arith.select %1137, %1134, %1053 : vector<8x128xf32>
    %c13_i32 = arith.constant 13 : i32
    %1140 = arith.index_cast %c13_i32 : i32 to index
    %c0_341 = arith.constant 0 : index
    %c0_342 = arith.constant 0 : index
    %1141 = vector.load %arg4[%1140, %c0_341, %c0_342] : memref<16x8x128xf32, #tpu.memory_space<vmem>>, vector<1x8x128xf32>
    %1142 = vector.shape_cast %1141 : vector<1x8x128xf32> to vector<8x128xf32>
    %1143 = vector.extract_strided_slice %1142 {offsets = [0, 0], sizes = [8, 4], strides = [1, 1]} : vector<8x128xf32> to vector<8x4xf32>
    %1144 = vector.extract_strided_slice %1142 {offsets = [0, 4], sizes = [8, 4], strides = [1, 1]} : vector<8x128xf32> to vector<8x4xf32>
    %1145 = vector.extract_strided_slice %1142 {offsets = [0, 8], sizes = [8, 1], strides = [1, 1]} : vector<8x128xf32> to vector<8x1xf32>
    %1146 = vector.extract_strided_slice %1139 {offsets = [0, 0], sizes = [8, 4], strides = [1, 1]} : vector<8x128xf32> to vector<8x4xf32>
    %1147 = arith.subf %1143, %1146 : vector<8x4xf32>
    %1148 = math.absf %1147 : vector<8x4xf32>
    %1149 = arith.mulf %1148, %1144 : vector<8x4xf32>
    %1150 = arith.addf %1064, %1149 : vector<8x4xf32>
    %cst_343 = arith.constant 1.000000e+00 : f32
    %1151 = vector.broadcast %cst_343 : f32 to vector<8x4xf32>
    %1152 = arith.subf %1151, %1144 : vector<8x4xf32>
    %1153 = arith.mulf %1068, %1152 : vector<8x4xf32>
    %1154 = arith.addf %1153, %1143 : vector<8x4xf32>
    %1155 = vector.broadcast %3 : f32 to vector<8x1xf32>
    %1156 = arith.mulf %1145, %1155 : vector<8x1xf32>
    %1157 = vector.broadcast %4 : f32 to vector<8x1xf32>
    %1158 = arith.addf %1156, %1157 : vector<8x1xf32>
    %cst_344 = arith.constant 0.000000e+00 : f32
    %1159 = vector.broadcast %cst_344 : f32 to vector<8x1xf32>
    %1160 = arith.maximumf %1159, %1158 : vector<8x1xf32>
    %cst_345 = arith.constant 0.000000e+00 : f32
    %1161 = vector.broadcast %cst_345 : f32 to vector<8x1xf32>
    %1162 = arith.subf %1161, %1160 : vector<8x1xf32>
    %1163 = math.exp %1162 : vector<8x1xf32>
    %1164 = vector.broadcast %5 : f32 to vector<8x1xf32>
    %1165 = arith.mulf %1145, %1164 : vector<8x1xf32>
    %1166 = vector.broadcast %6 : f32 to vector<8x1xf32>
    %1167 = arith.addf %1165, %1166 : vector<8x1xf32>
    %cst_346 = arith.constant 0.000000e+00 : f32
    %1168 = vector.broadcast %cst_346 : f32 to vector<8x1xf32>
    %1169 = arith.maximumf %1168, %1167 : vector<8x1xf32>
    %cst_347 = arith.constant 0.000000e+00 : f32
    %1170 = vector.broadcast %cst_347 : f32 to vector<8x1xf32>
    %1171 = arith.subf %1170, %1169 : vector<8x1xf32>
    %1172 = math.exp %1171 : vector<8x1xf32>
    %1173 = arith.mulf %1144, %1154 : vector<8x4xf32>
    %cst_348 = arith.constant 1.000000e+00 : f32
    %1174 = vector.broadcast %cst_348 : f32 to vector<8x4xf32>
    %1175 = arith.subf %1174, %1144 : vector<8x4xf32>
    %1176 = vector.broadcast %1163 : vector<8x1xf32> to vector<8x4xf32>
    %1177 = arith.mulf %1176, %1154 : vector<8x4xf32>
    %1178 = arith.mulf %1175, %1177 : vector<8x4xf32>
    %1179 = arith.addf %1173, %1178 : vector<8x4xf32>
    %1180 = vector.broadcast %1172 : vector<8x1xf32> to vector<8x128xf32>
    %1181 = arith.mulf %1180, %1138 : vector<8x128xf32>
    %1182 = tpu.concatenate %1181, %1179, %1144, %17 in 1 : vector<8x128xf32>, vector<8x4xf32>, vector<8x4xf32>, vector<8x120xf32> -> vector<8x256xf32>
    %1183 = arith.truncf %1182 : vector<8x256xf32> to vector<8x256xbf16>
    %c0_349 = arith.constant 0 : index
    %c0_350 = arith.constant 0 : index
    %1184 = vector.load %arg6[%c0_349, %c0_350] : memref<256x384xbf16, #tpu.memory_space<vmem>>, vector<256x384xbf16>
    %cst_351 = arith.constant dense<0.000000e+00> : vector<8x384xf32>
    %1185 = tpu.matmul %1183, %1184, %cst_351 {dimension_numbers = #tpu.dot_dimension_numbers<[1], [0], [0], [1], [0, 0, 1, 1], [], []>} : vector<8x256xbf16>, vector<256x384xbf16>, vector<8x384xf32> -> vector<8x384xf32>
    %1186 = arith.addf %1185, %10 : vector<8x384xf32>
    %1187 = vector.extract_strided_slice %1186 {offsets = [0, 0], sizes = [8, 128], strides = [1, 1]} : vector<8x384xf32> to vector<8x128xf32>
    %1188 = arith.negf %1187 : vector<8x128xf32>
    %1189 = math.exp %1188 : vector<8x128xf32>
    %cst_352 = arith.constant 1.000000e+00 : f32
    %1190 = vector.broadcast %cst_352 : f32 to vector<8x128xf32>
    %1191 = arith.addf %1190, %1189 : vector<8x128xf32>
    %1192 = arith.divf %1190, %1191 : vector<8x128xf32>
    %1193 = vector.extract_strided_slice %1186 {offsets = [0, 128], sizes = [8, 128], strides = [1, 1]} : vector<8x384xf32> to vector<8x128xf32>
    %1194 = arith.negf %1193 : vector<8x128xf32>
    %1195 = math.exp %1194 : vector<8x128xf32>
    %cst_353 = arith.constant 1.000000e+00 : f32
    %1196 = vector.broadcast %cst_353 : f32 to vector<8x128xf32>
    %1197 = arith.addf %1196, %1195 : vector<8x128xf32>
    %1198 = arith.divf %1196, %1197 : vector<8x128xf32>
    %1199 = vector.extract_strided_slice %1186 {offsets = [0, 256], sizes = [8, 128], strides = [1, 1]} : vector<8x384xf32> to vector<8x128xf32>
    %1200 = arith.mulf %1192, %1181 : vector<8x128xf32>
    %1201 = arith.truncf %1200 : vector<8x128xf32> to vector<8x128xbf16>
    %c0_354 = arith.constant 0 : index
    %c0_355 = arith.constant 0 : index
    %1202 = vector.load %arg7[%c0_354, %c0_355] : memref<128x128xbf16, #tpu.memory_space<vmem>>, vector<128x128xbf16>
    %cst_356 = arith.constant dense<0.000000e+00> : vector<8x128xf32>
    %1203 = tpu.matmul %1201, %1202, %cst_356 {dimension_numbers = #tpu.dot_dimension_numbers<[1], [0], [0], [1], [0, 0, 1, 1], [], []>} : vector<8x128xbf16>, vector<128x128xbf16>, vector<8x128xf32> -> vector<8x128xf32>
    %1204 = arith.addf %1199, %1203 : vector<8x128xf32>
    %1205 = math.tanh %1204 : vector<8x128xf32>
    %cst_357 = arith.constant 1.000000e+00 : f32
    %1206 = vector.broadcast %cst_357 : f32 to vector<8x128xf32>
    %1207 = arith.subf %1206, %1198 : vector<8x128xf32>
    %1208 = arith.mulf %1207, %1181 : vector<8x128xf32>
    %1209 = arith.mulf %1198, %1205 : vector<8x128xf32>
    %1210 = arith.addf %1208, %1209 : vector<8x128xf32>
    %1211 = arith.truncf %1210 : vector<8x128xf32> to vector<8x128xbf16>
    %c0_358 = arith.constant 0 : index
    %c0_359 = arith.constant 0 : index
    %1212 = vector.load %arg9[%c0_358, %c0_359] : memref<128x128xbf16, #tpu.memory_space<vmem>>, vector<128x128xbf16>
    %cst_360 = arith.constant dense<0.000000e+00> : vector<8x128xf32>
    %1213 = tpu.matmul %1211, %1212, %cst_360 {dimension_numbers = #tpu.dot_dimension_numbers<[1], [0], [0], [1], [0, 0, 1, 1], [], []>} : vector<8x128xbf16>, vector<128x128xbf16>, vector<8x128xf32> -> vector<8x128xf32>
    %1214 = arith.addf %1213, %13 : vector<8x128xf32>
    %cst_361 = arith.constant 0.000000e+00 : f32
    %1215 = vector.broadcast %cst_361 : f32 to vector<8x128xf32>
    %1216 = arith.maximumf %1214, %1215 : vector<8x128xf32>
    %1217 = arith.truncf %1216 : vector<8x128xf32> to vector<8x128xbf16>
    %c0_362 = arith.constant 0 : index
    %c0_363 = arith.constant 0 : index
    %1218 = vector.load %arg11[%c0_362, %c0_363] : memref<128x128xbf16, #tpu.memory_space<vmem>>, vector<128x128xbf16>
    %cst_364 = arith.constant dense<0.000000e+00> : vector<8x128xf32>
    %1219 = tpu.matmul %1217, %1218, %cst_364 {dimension_numbers = #tpu.dot_dimension_numbers<[1], [0], [0], [1], [0, 0, 1, 1], [], []>} : vector<8x128xbf16>, vector<128x128xbf16>, vector<8x128xf32> -> vector<8x128xf32>
    %1220 = arith.addf %1219, %16 : vector<8x128xf32>
    %c16_i32_365 = arith.constant 16 : i32
    %1221 = arith.muli %arg1, %c16_i32_365 : i32
    %1222 = arith.addi %1221, %c13_i32 : i32
    %1223 = arith.cmpi slt, %1222, %7 : i32
    %1224 = arith.select %1223, %1210, %1138 : vector<8x128xf32>
    %1225 = arith.select %1223, %1220, %1139 : vector<8x128xf32>
    %c14_i32 = arith.constant 14 : i32
    %1226 = arith.index_cast %c14_i32 : i32 to index
    %c0_366 = arith.constant 0 : index
    %c0_367 = arith.constant 0 : index
    %1227 = vector.load %arg4[%1226, %c0_366, %c0_367] : memref<16x8x128xf32, #tpu.memory_space<vmem>>, vector<1x8x128xf32>
    %1228 = vector.shape_cast %1227 : vector<1x8x128xf32> to vector<8x128xf32>
    %1229 = vector.extract_strided_slice %1228 {offsets = [0, 0], sizes = [8, 4], strides = [1, 1]} : vector<8x128xf32> to vector<8x4xf32>
    %1230 = vector.extract_strided_slice %1228 {offsets = [0, 4], sizes = [8, 4], strides = [1, 1]} : vector<8x128xf32> to vector<8x4xf32>
    %1231 = vector.extract_strided_slice %1228 {offsets = [0, 8], sizes = [8, 1], strides = [1, 1]} : vector<8x128xf32> to vector<8x1xf32>
    %1232 = vector.extract_strided_slice %1225 {offsets = [0, 0], sizes = [8, 4], strides = [1, 1]} : vector<8x128xf32> to vector<8x4xf32>
    %1233 = arith.subf %1229, %1232 : vector<8x4xf32>
    %1234 = math.absf %1233 : vector<8x4xf32>
    %1235 = arith.mulf %1234, %1230 : vector<8x4xf32>
    %1236 = arith.addf %1150, %1235 : vector<8x4xf32>
    %cst_368 = arith.constant 1.000000e+00 : f32
    %1237 = vector.broadcast %cst_368 : f32 to vector<8x4xf32>
    %1238 = arith.subf %1237, %1230 : vector<8x4xf32>
    %1239 = arith.mulf %1154, %1238 : vector<8x4xf32>
    %1240 = arith.addf %1239, %1229 : vector<8x4xf32>
    %1241 = vector.broadcast %3 : f32 to vector<8x1xf32>
    %1242 = arith.mulf %1231, %1241 : vector<8x1xf32>
    %1243 = vector.broadcast %4 : f32 to vector<8x1xf32>
    %1244 = arith.addf %1242, %1243 : vector<8x1xf32>
    %cst_369 = arith.constant 0.000000e+00 : f32
    %1245 = vector.broadcast %cst_369 : f32 to vector<8x1xf32>
    %1246 = arith.maximumf %1245, %1244 : vector<8x1xf32>
    %cst_370 = arith.constant 0.000000e+00 : f32
    %1247 = vector.broadcast %cst_370 : f32 to vector<8x1xf32>
    %1248 = arith.subf %1247, %1246 : vector<8x1xf32>
    %1249 = math.exp %1248 : vector<8x1xf32>
    %1250 = vector.broadcast %5 : f32 to vector<8x1xf32>
    %1251 = arith.mulf %1231, %1250 : vector<8x1xf32>
    %1252 = vector.broadcast %6 : f32 to vector<8x1xf32>
    %1253 = arith.addf %1251, %1252 : vector<8x1xf32>
    %cst_371 = arith.constant 0.000000e+00 : f32
    %1254 = vector.broadcast %cst_371 : f32 to vector<8x1xf32>
    %1255 = arith.maximumf %1254, %1253 : vector<8x1xf32>
    %cst_372 = arith.constant 0.000000e+00 : f32
    %1256 = vector.broadcast %cst_372 : f32 to vector<8x1xf32>
    %1257 = arith.subf %1256, %1255 : vector<8x1xf32>
    %1258 = math.exp %1257 : vector<8x1xf32>
    %1259 = arith.mulf %1230, %1240 : vector<8x4xf32>
    %cst_373 = arith.constant 1.000000e+00 : f32
    %1260 = vector.broadcast %cst_373 : f32 to vector<8x4xf32>
    %1261 = arith.subf %1260, %1230 : vector<8x4xf32>
    %1262 = vector.broadcast %1249 : vector<8x1xf32> to vector<8x4xf32>
    %1263 = arith.mulf %1262, %1240 : vector<8x4xf32>
    %1264 = arith.mulf %1261, %1263 : vector<8x4xf32>
    %1265 = arith.addf %1259, %1264 : vector<8x4xf32>
    %1266 = vector.broadcast %1258 : vector<8x1xf32> to vector<8x128xf32>
    %1267 = arith.mulf %1266, %1224 : vector<8x128xf32>
    %1268 = tpu.concatenate %1267, %1265, %1230, %17 in 1 : vector<8x128xf32>, vector<8x4xf32>, vector<8x4xf32>, vector<8x120xf32> -> vector<8x256xf32>
    %1269 = arith.truncf %1268 : vector<8x256xf32> to vector<8x256xbf16>
    %c0_374 = arith.constant 0 : index
    %c0_375 = arith.constant 0 : index
    %1270 = vector.load %arg6[%c0_374, %c0_375] : memref<256x384xbf16, #tpu.memory_space<vmem>>, vector<256x384xbf16>
    %cst_376 = arith.constant dense<0.000000e+00> : vector<8x384xf32>
    %1271 = tpu.matmul %1269, %1270, %cst_376 {dimension_numbers = #tpu.dot_dimension_numbers<[1], [0], [0], [1], [0, 0, 1, 1], [], []>} : vector<8x256xbf16>, vector<256x384xbf16>, vector<8x384xf32> -> vector<8x384xf32>
    %1272 = arith.addf %1271, %10 : vector<8x384xf32>
    %1273 = vector.extract_strided_slice %1272 {offsets = [0, 0], sizes = [8, 128], strides = [1, 1]} : vector<8x384xf32> to vector<8x128xf32>
    %1274 = arith.negf %1273 : vector<8x128xf32>
    %1275 = math.exp %1274 : vector<8x128xf32>
    %cst_377 = arith.constant 1.000000e+00 : f32
    %1276 = vector.broadcast %cst_377 : f32 to vector<8x128xf32>
    %1277 = arith.addf %1276, %1275 : vector<8x128xf32>
    %1278 = arith.divf %1276, %1277 : vector<8x128xf32>
    %1279 = vector.extract_strided_slice %1272 {offsets = [0, 128], sizes = [8, 128], strides = [1, 1]} : vector<8x384xf32> to vector<8x128xf32>
    %1280 = arith.negf %1279 : vector<8x128xf32>
    %1281 = math.exp %1280 : vector<8x128xf32>
    %cst_378 = arith.constant 1.000000e+00 : f32
    %1282 = vector.broadcast %cst_378 : f32 to vector<8x128xf32>
    %1283 = arith.addf %1282, %1281 : vector<8x128xf32>
    %1284 = arith.divf %1282, %1283 : vector<8x128xf32>
    %1285 = vector.extract_strided_slice %1272 {offsets = [0, 256], sizes = [8, 128], strides = [1, 1]} : vector<8x384xf32> to vector<8x128xf32>
    %1286 = arith.mulf %1278, %1267 : vector<8x128xf32>
    %1287 = arith.truncf %1286 : vector<8x128xf32> to vector<8x128xbf16>
    %c0_379 = arith.constant 0 : index
    %c0_380 = arith.constant 0 : index
    %1288 = vector.load %arg7[%c0_379, %c0_380] : memref<128x128xbf16, #tpu.memory_space<vmem>>, vector<128x128xbf16>
    %cst_381 = arith.constant dense<0.000000e+00> : vector<8x128xf32>
    %1289 = tpu.matmul %1287, %1288, %cst_381 {dimension_numbers = #tpu.dot_dimension_numbers<[1], [0], [0], [1], [0, 0, 1, 1], [], []>} : vector<8x128xbf16>, vector<128x128xbf16>, vector<8x128xf32> -> vector<8x128xf32>
    %1290 = arith.addf %1285, %1289 : vector<8x128xf32>
    %1291 = math.tanh %1290 : vector<8x128xf32>
    %cst_382 = arith.constant 1.000000e+00 : f32
    %1292 = vector.broadcast %cst_382 : f32 to vector<8x128xf32>
    %1293 = arith.subf %1292, %1284 : vector<8x128xf32>
    %1294 = arith.mulf %1293, %1267 : vector<8x128xf32>
    %1295 = arith.mulf %1284, %1291 : vector<8x128xf32>
    %1296 = arith.addf %1294, %1295 : vector<8x128xf32>
    %1297 = arith.truncf %1296 : vector<8x128xf32> to vector<8x128xbf16>
    %c0_383 = arith.constant 0 : index
    %c0_384 = arith.constant 0 : index
    %1298 = vector.load %arg9[%c0_383, %c0_384] : memref<128x128xbf16, #tpu.memory_space<vmem>>, vector<128x128xbf16>
    %cst_385 = arith.constant dense<0.000000e+00> : vector<8x128xf32>
    %1299 = tpu.matmul %1297, %1298, %cst_385 {dimension_numbers = #tpu.dot_dimension_numbers<[1], [0], [0], [1], [0, 0, 1, 1], [], []>} : vector<8x128xbf16>, vector<128x128xbf16>, vector<8x128xf32> -> vector<8x128xf32>
    %1300 = arith.addf %1299, %13 : vector<8x128xf32>
    %cst_386 = arith.constant 0.000000e+00 : f32
    %1301 = vector.broadcast %cst_386 : f32 to vector<8x128xf32>
    %1302 = arith.maximumf %1300, %1301 : vector<8x128xf32>
    %1303 = arith.truncf %1302 : vector<8x128xf32> to vector<8x128xbf16>
    %c0_387 = arith.constant 0 : index
    %c0_388 = arith.constant 0 : index
    %1304 = vector.load %arg11[%c0_387, %c0_388] : memref<128x128xbf16, #tpu.memory_space<vmem>>, vector<128x128xbf16>
    %cst_389 = arith.constant dense<0.000000e+00> : vector<8x128xf32>
    %1305 = tpu.matmul %1303, %1304, %cst_389 {dimension_numbers = #tpu.dot_dimension_numbers<[1], [0], [0], [1], [0, 0, 1, 1], [], []>} : vector<8x128xbf16>, vector<128x128xbf16>, vector<8x128xf32> -> vector<8x128xf32>
    %1306 = arith.addf %1305, %16 : vector<8x128xf32>
    %c16_i32_390 = arith.constant 16 : i32
    %1307 = arith.muli %arg1, %c16_i32_390 : i32
    %1308 = arith.addi %1307, %c14_i32 : i32
    %1309 = arith.cmpi slt, %1308, %7 : i32
    %1310 = arith.select %1309, %1296, %1224 : vector<8x128xf32>
    %1311 = arith.select %1309, %1306, %1225 : vector<8x128xf32>
    %c15_i32 = arith.constant 15 : i32
    %1312 = arith.index_cast %c15_i32 : i32 to index
    %c0_391 = arith.constant 0 : index
    %c0_392 = arith.constant 0 : index
    %1313 = vector.load %arg4[%1312, %c0_391, %c0_392] : memref<16x8x128xf32, #tpu.memory_space<vmem>>, vector<1x8x128xf32>
    %1314 = vector.shape_cast %1313 : vector<1x8x128xf32> to vector<8x128xf32>
    %1315 = vector.extract_strided_slice %1314 {offsets = [0, 0], sizes = [8, 4], strides = [1, 1]} : vector<8x128xf32> to vector<8x4xf32>
    %1316 = vector.extract_strided_slice %1314 {offsets = [0, 4], sizes = [8, 4], strides = [1, 1]} : vector<8x128xf32> to vector<8x4xf32>
    %1317 = vector.extract_strided_slice %1314 {offsets = [0, 8], sizes = [8, 1], strides = [1, 1]} : vector<8x128xf32> to vector<8x1xf32>
    %1318 = vector.extract_strided_slice %1311 {offsets = [0, 0], sizes = [8, 4], strides = [1, 1]} : vector<8x128xf32> to vector<8x4xf32>
    %1319 = arith.subf %1315, %1318 : vector<8x4xf32>
    %1320 = math.absf %1319 : vector<8x4xf32>
    %1321 = arith.mulf %1320, %1316 : vector<8x4xf32>
    %1322 = arith.addf %1236, %1321 : vector<8x4xf32>
    %cst_393 = arith.constant 1.000000e+00 : f32
    %1323 = vector.broadcast %cst_393 : f32 to vector<8x4xf32>
    %1324 = arith.subf %1323, %1316 : vector<8x4xf32>
    %1325 = arith.mulf %1240, %1324 : vector<8x4xf32>
    %1326 = arith.addf %1325, %1315 : vector<8x4xf32>
    %1327 = vector.broadcast %3 : f32 to vector<8x1xf32>
    %1328 = arith.mulf %1317, %1327 : vector<8x1xf32>
    %1329 = vector.broadcast %4 : f32 to vector<8x1xf32>
    %1330 = arith.addf %1328, %1329 : vector<8x1xf32>
    %cst_394 = arith.constant 0.000000e+00 : f32
    %1331 = vector.broadcast %cst_394 : f32 to vector<8x1xf32>
    %1332 = arith.maximumf %1331, %1330 : vector<8x1xf32>
    %cst_395 = arith.constant 0.000000e+00 : f32
    %1333 = vector.broadcast %cst_395 : f32 to vector<8x1xf32>
    %1334 = arith.subf %1333, %1332 : vector<8x1xf32>
    %1335 = math.exp %1334 : vector<8x1xf32>
    %1336 = vector.broadcast %5 : f32 to vector<8x1xf32>
    %1337 = arith.mulf %1317, %1336 : vector<8x1xf32>
    %1338 = vector.broadcast %6 : f32 to vector<8x1xf32>
    %1339 = arith.addf %1337, %1338 : vector<8x1xf32>
    %cst_396 = arith.constant 0.000000e+00 : f32
    %1340 = vector.broadcast %cst_396 : f32 to vector<8x1xf32>
    %1341 = arith.maximumf %1340, %1339 : vector<8x1xf32>
    %cst_397 = arith.constant 0.000000e+00 : f32
    %1342 = vector.broadcast %cst_397 : f32 to vector<8x1xf32>
    %1343 = arith.subf %1342, %1341 : vector<8x1xf32>
    %1344 = math.exp %1343 : vector<8x1xf32>
    %1345 = arith.mulf %1316, %1326 : vector<8x4xf32>
    %cst_398 = arith.constant 1.000000e+00 : f32
    %1346 = vector.broadcast %cst_398 : f32 to vector<8x4xf32>
    %1347 = arith.subf %1346, %1316 : vector<8x4xf32>
    %1348 = vector.broadcast %1335 : vector<8x1xf32> to vector<8x4xf32>
    %1349 = arith.mulf %1348, %1326 : vector<8x4xf32>
    %1350 = arith.mulf %1347, %1349 : vector<8x4xf32>
    %1351 = arith.addf %1345, %1350 : vector<8x4xf32>
    %1352 = vector.broadcast %1344 : vector<8x1xf32> to vector<8x128xf32>
    %1353 = arith.mulf %1352, %1310 : vector<8x128xf32>
    %1354 = tpu.concatenate %1353, %1351, %1316, %17 in 1 : vector<8x128xf32>, vector<8x4xf32>, vector<8x4xf32>, vector<8x120xf32> -> vector<8x256xf32>
    %1355 = arith.truncf %1354 : vector<8x256xf32> to vector<8x256xbf16>
    %c0_399 = arith.constant 0 : index
    %c0_400 = arith.constant 0 : index
    %1356 = vector.load %arg6[%c0_399, %c0_400] : memref<256x384xbf16, #tpu.memory_space<vmem>>, vector<256x384xbf16>
    %cst_401 = arith.constant dense<0.000000e+00> : vector<8x384xf32>
    %1357 = tpu.matmul %1355, %1356, %cst_401 {dimension_numbers = #tpu.dot_dimension_numbers<[1], [0], [0], [1], [0, 0, 1, 1], [], []>} : vector<8x256xbf16>, vector<256x384xbf16>, vector<8x384xf32> -> vector<8x384xf32>
    %1358 = arith.addf %1357, %10 : vector<8x384xf32>
    %1359 = vector.extract_strided_slice %1358 {offsets = [0, 0], sizes = [8, 128], strides = [1, 1]} : vector<8x384xf32> to vector<8x128xf32>
    %1360 = arith.negf %1359 : vector<8x128xf32>
    %1361 = math.exp %1360 : vector<8x128xf32>
    %cst_402 = arith.constant 1.000000e+00 : f32
    %1362 = vector.broadcast %cst_402 : f32 to vector<8x128xf32>
    %1363 = arith.addf %1362, %1361 : vector<8x128xf32>
    %1364 = arith.divf %1362, %1363 : vector<8x128xf32>
    %1365 = vector.extract_strided_slice %1358 {offsets = [0, 128], sizes = [8, 128], strides = [1, 1]} : vector<8x384xf32> to vector<8x128xf32>
    %1366 = arith.negf %1365 : vector<8x128xf32>
    %1367 = math.exp %1366 : vector<8x128xf32>
    %cst_403 = arith.constant 1.000000e+00 : f32
    %1368 = vector.broadcast %cst_403 : f32 to vector<8x128xf32>
    %1369 = arith.addf %1368, %1367 : vector<8x128xf32>
    %1370 = arith.divf %1368, %1369 : vector<8x128xf32>
    %1371 = vector.extract_strided_slice %1358 {offsets = [0, 256], sizes = [8, 128], strides = [1, 1]} : vector<8x384xf32> to vector<8x128xf32>
    %1372 = arith.mulf %1364, %1353 : vector<8x128xf32>
    %1373 = arith.truncf %1372 : vector<8x128xf32> to vector<8x128xbf16>
    %c0_404 = arith.constant 0 : index
    %c0_405 = arith.constant 0 : index
    %1374 = vector.load %arg7[%c0_404, %c0_405] : memref<128x128xbf16, #tpu.memory_space<vmem>>, vector<128x128xbf16>
    %cst_406 = arith.constant dense<0.000000e+00> : vector<8x128xf32>
    %1375 = tpu.matmul %1373, %1374, %cst_406 {dimension_numbers = #tpu.dot_dimension_numbers<[1], [0], [0], [1], [0, 0, 1, 1], [], []>} : vector<8x128xbf16>, vector<128x128xbf16>, vector<8x128xf32> -> vector<8x128xf32>
    %1376 = arith.addf %1371, %1375 : vector<8x128xf32>
    %1377 = math.tanh %1376 : vector<8x128xf32>
    %cst_407 = arith.constant 1.000000e+00 : f32
    %1378 = vector.broadcast %cst_407 : f32 to vector<8x128xf32>
    %1379 = arith.subf %1378, %1370 : vector<8x128xf32>
    %1380 = arith.mulf %1379, %1353 : vector<8x128xf32>
    %1381 = arith.mulf %1370, %1377 : vector<8x128xf32>
    %1382 = arith.addf %1380, %1381 : vector<8x128xf32>
    %1383 = arith.truncf %1382 : vector<8x128xf32> to vector<8x128xbf16>
    %c0_408 = arith.constant 0 : index
    %c0_409 = arith.constant 0 : index
    %1384 = vector.load %arg9[%c0_408, %c0_409] : memref<128x128xbf16, #tpu.memory_space<vmem>>, vector<128x128xbf16>
    %cst_410 = arith.constant dense<0.000000e+00> : vector<8x128xf32>
    %1385 = tpu.matmul %1383, %1384, %cst_410 {dimension_numbers = #tpu.dot_dimension_numbers<[1], [0], [0], [1], [0, 0, 1, 1], [], []>} : vector<8x128xbf16>, vector<128x128xbf16>, vector<8x128xf32> -> vector<8x128xf32>
    %1386 = arith.addf %1385, %13 : vector<8x128xf32>
    %cst_411 = arith.constant 0.000000e+00 : f32
    %1387 = vector.broadcast %cst_411 : f32 to vector<8x128xf32>
    %1388 = arith.maximumf %1386, %1387 : vector<8x128xf32>
    %1389 = arith.truncf %1388 : vector<8x128xf32> to vector<8x128xbf16>
    %c0_412 = arith.constant 0 : index
    %c0_413 = arith.constant 0 : index
    %1390 = vector.load %arg11[%c0_412, %c0_413] : memref<128x128xbf16, #tpu.memory_space<vmem>>, vector<128x128xbf16>
    %cst_414 = arith.constant dense<0.000000e+00> : vector<8x128xf32>
    %1391 = tpu.matmul %1389, %1390, %cst_414 {dimension_numbers = #tpu.dot_dimension_numbers<[1], [0], [0], [1], [0, 0, 1, 1], [], []>} : vector<8x128xbf16>, vector<128x128xbf16>, vector<8x128xf32> -> vector<8x128xf32>
    %1392 = arith.addf %1391, %16 : vector<8x128xf32>
    %c16_i32_415 = arith.constant 16 : i32
    %1393 = arith.muli %arg1, %c16_i32_415 : i32
    %1394 = arith.addi %1393, %c15_i32 : i32
    %1395 = arith.cmpi slt, %1394, %7 : i32
    %1396 = arith.select %1395, %1382, %1310 : vector<8x128xf32>
    %1397 = arith.select %1395, %1392, %1311 : vector<8x128xf32>
    %c16_i32_416 = arith.constant 16 : i32
    %c0_417 = arith.constant 0 : index
    %c0_418 = arith.constant 0 : index
    %1398 = vector.load %arg14[%c0_417, %c0_418] : memref<8x128xf32, #tpu.memory_space<vmem>>, vector<8x128xf32>
    tpu.vector_store %arg14[%c0_417, %c0_418], %1396 {strides = array<i32>} : memref<8x128xf32, #tpu.memory_space<vmem>>, vector<8x128xf32>,
    %c0_419 = arith.constant 0 : index
    %c0_420 = arith.constant 0 : index
    %1399 = vector.load %arg15[%c0_419, %c0_420] : memref<8x128xf32, #tpu.memory_space<vmem>>, vector<8x128xf32>
    tpu.vector_store %arg15[%c0_419, %c0_420], %1397 {strides = array<i32>} : memref<8x128xf32, #tpu.memory_space<vmem>>, vector<8x128xf32>,
    %c0_421 = arith.constant 0 : index
    %c0_422 = arith.constant 0 : index
    %1400 = vector.load %arg16[%c0_421, %c0_422] : memref<8x4xf32, #tpu.memory_space<vmem>>, vector<8x4xf32>
    tpu.vector_store %arg16[%c0_421, %c0_422], %1326 {strides = array<i32>} : memref<8x4xf32, #tpu.memory_space<vmem>>, vector<8x4xf32>,
    %c0_423 = arith.constant 0 : index
    %c0_424 = arith.constant 0 : index
    %1401 = vector.load %arg13[%c0_423, %c0_424] : memref<8x4xf32, #tpu.memory_space<vmem>>, vector<8x4xf32>
    tpu.vector_store %arg13[%c0_423, %c0_424], %1322 {strides = array<i32>} : memref<8x4xf32, #tpu.memory_space<vmem>>, vector<8x4xf32>,
    return
  }
  func.func @transform_0(%arg0: i32, %arg1: i32) -> i32 {
    %c0_i32 = arith.constant 0 : i32
    %c0_i32_0 = arith.constant 0 : i32
    return %c0_i32 : i32
  }
  func.func @transform_1(%arg0: i32, %arg1: i32) -> i32 {
    %c0_i32 = arith.constant 0 : i32
    %c0_i32_0 = arith.constant 0 : i32
    return %c0_i32 : i32
  }
  func.func @transform_2(%arg0: i32, %arg1: i32) -> (i32, i32, i32) {
    %c0_i32 = arith.constant 0 : i32
    %c0_i32_0 = arith.constant 0 : i32
    return %arg1, %arg0, %c0_i32 : i32, i32, i32
  }
  func.func @transform_3(%arg0: i32, %arg1: i32) -> (i32, i32) {
    %c0_i32 = arith.constant 0 : i32
    %c0_i32_0 = arith.constant 0 : i32
    %c0_i32_1 = arith.constant 0 : i32
    return %c0_i32, %c0_i32_0 : i32, i32
  }
  func.func @transform_4(%arg0: i32, %arg1: i32) -> (i32, i32) {
    %c0_i32 = arith.constant 0 : i32
    %c0_i32_0 = arith.constant 0 : i32
    %c0_i32_1 = arith.constant 0 : i32
    return %c0_i32, %c0_i32_0 : i32, i32
  }
  func.func @transform_5(%arg0: i32, %arg1: i32) -> (i32, i32) {
    %c0_i32 = arith.constant 0 : i32
    %c0_i32_0 = arith.constant 0 : i32
    %c0_i32_1 = arith.constant 0 : i32
    return %c0_i32, %c0_i32_0 : i32, i32
  }
  func.func @transform_6(%arg0: i32, %arg1: i32) -> (i32, i32) {
    %c0_i32 = arith.constant 0 : i32
    %c0_i32_0 = arith.constant 0 : i32
    %c0_i32_1 = arith.constant 0 : i32
    return %c0_i32, %c0_i32_0 : i32, i32
  }
  func.func @transform_7(%arg0: i32, %arg1: i32) -> (i32, i32) {
    %c0_i32 = arith.constant 0 : i32
    %c0_i32_0 = arith.constant 0 : i32
    %c0_i32_1 = arith.constant 0 : i32
    return %c0_i32, %c0_i32_0 : i32, i32
  }
  func.func @transform_8(%arg0: i32, %arg1: i32) -> (i32, i32) {
    %c0_i32 = arith.constant 0 : i32
    %c0_i32_0 = arith.constant 0 : i32
    %c0_i32_1 = arith.constant 0 : i32
    return %c0_i32, %c0_i32_0 : i32, i32
  }
  func.func @transform_9(%arg0: i32, %arg1: i32) -> (i32, i32) {
    %c0_i32 = arith.constant 0 : i32
    %c0_i32_0 = arith.constant 0 : i32
    %c0_i32_1 = arith.constant 0 : i32
    return %c0_i32, %c0_i32_0 : i32, i32
  }
  func.func @transform_10(%arg0: i32, %arg1: i32) -> (i32, i32) {
    %c0_i32 = arith.constant 0 : i32
    %c0_i32_0 = arith.constant 0 : i32
    %c0_i32_1 = arith.constant 0 : i32
    return %c0_i32, %c0_i32_0 : i32, i32
  }
  func.func @transform_11(%arg0: i32, %arg1: i32) -> (i32, i32) {
    %c0_i32 = arith.constant 0 : i32
    %c0_i32_0 = arith.constant 0 : i32
    return %arg0, %c0_i32 : i32, i32
  }
  func.func @transform_12(%arg0: i32, %arg1: i32) -> (i32, i32) {
    %c0_i32 = arith.constant 0 : i32
    %c0_i32_0 = arith.constant 0 : i32
    return %arg0, %c0_i32 : i32, i32
  }
  func.func @transform_13(%arg0: i32, %arg1: i32) -> (i32, i32) {
    %c0_i32 = arith.constant 0 : i32
    %c0_i32_0 = arith.constant 0 : i32
    return %arg0, %c0_i32 : i32, i32
  }
}

</mosaic_0001>

<bundles_post_ra>
// kernel: tpu_custom_call.1
= control target key start
LH: loop header
LB: loop body
LE: loop exit
PB: predicated region body
PF: predicated region fallthrough
CT: control target
= control target key end

     0   :  { %20 = vsyncpa [#allocation7], 0  ;;  %s8678_s0 = inlined_call_operand.vmem [shape: f32[4], index: 0, kind: input, shape index: {}]   ;;  %s8679_s1 = inlined_call_operand.<no memory space> [shape: s32[1], index: 1, kind: input, shape index: {}]   ;;  %s8680_s2 = inlined_call_operand.hbm [shape: f32[16,8,128], index: 2, kind: input, shape index: {}]   ;;  %s8681_s3 = inlined_call_operand.vmem [shape: f32[1,128], index: 3, kind: input, shape index: {}]   ;;  %s8682_s4 = inlined_call_operand.hbm [shape: bf16[256,384], index: 4, kind: input, shape index: {}]   ;;  %s8683_s5 = inlined_call_operand.hbm [shape: bf16[128,128], index: 5, kind: input, shape index: {}]   ;;  %s8684_s6 = inlined_call_operand.vmem [shape: f32[1,384], index: 6, kind: input, shape index: {}]   ;;  %s8685_s7 = inlined_call_operand.hbm [shape: bf16[128,128], index: 7, kind: input, shape index: {}]   ;;  %s8686_s8 = inlined_call_operand.vmem [shape: f32[1,128], index: 8, kind: input, shape index: {}]   ;;  %s8687_s9 = inlined_call_operand.hbm [shape: bf16[128,128], index: 9, kind: input, shape index: {}]   ;;  %s8688_s10 = inlined_call_operand.vmem [shape: f32[1,128], index: 10, kind: input, shape index: {}]   ;;  %s8689_s11 = inlined_call_operand.vmem [shape: f32[8,4], index: 11, kind: output, shape index: {0}]   ;;  %s8690_s12 = inlined_call_operand.hbm [shape: f32[8,128], index: 12, kind: output, shape index: {1}]   ;;  %s8691_s13 = inlined_call_operand.hbm [shape: f32[8,128], index: 13, kind: output, shape index: {2}]  }
   0x1   :  { %21 = vsyncpa [#allocation5], 0 }
   0x2   :  { %22 = vsyncpa [#allocation10], 0 }
   0x3   :  { %23 = vsyncpa [#allocation13], 0 }
   0x4   :  { %24 = vsyncpa [#allocation6], 0  ;;  %s56_s27 = sshll.u32 %s8682_s4, 4  ;;  %s57_s27 = int_to_ptr.hbm [resolvable:$true] %s56_s27 }
   0x5   :  { %25 = vsyncpa [#allocation17], 0  ;;  %s5583_s28 = smov [#allocation9]   ;;  %s5584_s30 = smov 192  }
   0x6   :  { %s58_s29 = sshll.u32 %s5583_s28, 4  ;;  %s5585_s14 = smov 12   ;;  %s59_s29 = int_to_ptr.vmem [resolvable:$true] %s58_s29 }
   0x7   :  { %64 = dma.hbm_to_vmem [thread:$0]  %s57_s27, 6144, %s59_s29, [#allocation10], %s5584_s30, %s5584_s30, %s5585_s14  }
   0x8   :  { %s84_s17 = sshll.u32 %s8685_s7, 4  ;;  %s5586_s18 = smov [#allocation12]   ;;  %s85_s17 = int_to_ptr.hbm [resolvable:$true] %s84_s17 }
   0x9   :  { %s86_s19 = sshll.u32 %s5586_s18, 4  ;;  %s31_s22 = sshll.u32 %s8678_s0, 4  ;;  %s87_s19 = int_to_ptr.vmem [resolvable:$true] %s86_s19  ;;  %s32_s22 = int_to_ptr.vmem [resolvable:$true] %s31_s22 }
   0xa   :  { %s5587_s4 = smov 64   ;;  %s5588_s23 = smov 4  }
   0xb   :  { %92 = dma.hbm_to_vmem [thread:$0]  %s85_s17, 1024, %s87_s19, [#allocation13], %s5587_s4, %s5587_s4, %s5588_s23  }
   0xc   :  { %s41_s26 = sshll.u32 %s8680_s2, 4  ;;  %s5589_s27 = smov [#allocation4]   ;;  %s42_s26 = int_to_ptr.hbm [resolvable:$true] %s41_s26 }
   0xd   :  { %34 = dma.vmem_to_smem %s32_s22, 16, %s5589_s27, [#allocation7]  }
   0xe   :  { %s5590_s7 = smov [#allocation8]   ;;  %s5591_s29 = smov 128  }
   0xf   :  { %s43_s28 = sshll.u32 %s5590_s7, 4  ;;  %s5592_s30 = smov 8   ;;  %s44_s28 = int_to_ptr.vmem [resolvable:$true] %s43_s28 }
  0x10   :  { %49 = dma.hbm_to_vmem [thread:$0]  %s42_s26, 2048, %s44_s28, [#allocation5], %s5591_s29, %s5591_s29, %s5592_s30  }
  0x11   :  { %s69_s15 = sshll.u32 %s8683_s5, 4  ;;  %s5593_s16 = smov [#allocation11]   ;;  %s70_s15 = int_to_ptr.hbm [resolvable:$true] %s69_s15 }
  0x12   :  { %s71_s17 = sshll.u32 %s5593_s16, 4  ;;  %s99_s2 = sshll.u32 %s8687_s9, 4  ;;  %s72_s17 = int_to_ptr.vmem [resolvable:$true] %s71_s17  ;;  %s100_s2 = int_to_ptr.hbm [resolvable:$true] %s99_s2 }
  0x13   :  { %77 = dma.hbm_to_vmem [thread:$0]  %s70_s15, 1024, %s72_s17, [#allocation10], %s5587_s4, %s5587_s4, %s5588_s23  }
  0x14   :  { %s5594_s20 = smov [#allocation14]  }
  0x15   :  { %s101_s21 = sshll.u32 %s5594_s20, 4  ;;  %s102_s21 = int_to_ptr.vmem [resolvable:$true] %s101_s21 }
  0x16   :  { %107 = dma.hbm_to_vmem [thread:$0]  %s100_s2, 1024, %s102_s21, [#allocation13], %s5587_s4, %s5587_s4, %s5588_s23  }
  0x17   :  { %5571 = dma.done.wait [#allocation7], 16  }
  0x18   :  { %5572 = vsyncadd [#allocation7], 4294967280 }
  0x19   :  { %5573 = dma.done.wait [#allocation5], 2048  }
  0x1a   :  { %5574 = vsyncadd [#allocation5], 4294965248 }
  0x1b   :  { %5575 = dma.done.wait [#allocation10], 7168  }
  0x1c   :  { %5576 = vsyncadd [#allocation10], 4294960128 }
  0x1d   :  { %5577 = dma.done.wait [#allocation13], 2048  }
  0x1e   :  { %5578 = vsyncadd [#allocation13], 4294965248 }
  0x1f   :  { %134 = sfence }
  0x20   :  { %v5691_v0 = vld [vmem:[#allocation8] sm:$0xff]  ;;  %s148_s5 = sld [smem:[#allocation4]]  ;;  %v5595_v2 = vmov 8   ;;  %s5596_s22 = smov 124   ;;  %vm140_vm0 = vcmask 31744   ;;  %v5597_v11 = vmov 0.0  }
  0x21   :  { %v182_v1 = vsub.f32 1.0, %v5691_v0  ;;  %5034 = vset.pattern.permute.xlu0 %v5595_v2  ;;  %s4462_s9 = sld [smem:[#allocation4 + $0x1]]  ;;  %5035 = vset.pattern.permute.xlu2 %v5595_v2  ;;  %141 = vst.msk [vmem:[#allocation2] sm:$0xff] %vm140_vm0, %v5597_v11  ;;  %v5723_v26 = vld [vmem:[#allocation8 + $0x8] sm:$0xff]  ;;  %v4967_v31 = vld [vmem:[#allocation9 + $0xb0] sm:$0xf0] }
  0x22   :  { %142 = vst.msk [vmem:[%s8689_s11] sm:$0xff] %vm140_vm0, %v5597_v11  ;;  %s4463_s25 = sld [smem:[#allocation4 + $0x2]]  ;;  %v8692_v27 = vsub.f32 1.0, %v5723_v26  ;;  %v4551_v30 = vld [vmem:[#allocation9 + $0xa8] sm:$0xf]  ;;  %vm234_vm1 = vcmask 64512  }
  0x23   :  { %184 = vrot.lane.b32.xlu0 %v182_v1, %s5596_s22  ;;  %s4464_s26 = sld [smem:[#allocation4 + $0x3]]  ;;  %v4539_v32 = vld [vmem:[#allocation9 + $0x90] sm:$0xf]  ;;  %v5732_v34 = vor.u32 %v4967_v31, %v4551_v30  ;;  %v4964_v35 = vld [vmem:[#allocation9 + $0x98] sm:$0xf0]  ;;  %vm5900_vm2 = vmpackc.low %vm234_vm1, %vm234_vm1  ;;  %p4764_p0 = scmp.gt.s32.totalorder %s8679_s1, 0 }
  0x24   :  { %v5737_v38 = vor.u32 %v4964_v35, %v4539_v32  ;;  %v4527_v39 = vld [vmem:[#allocation9 + $0x78] sm:$0xf]  ;;  %v4961_v40 = vld [vmem:[#allocation9 + $0x80] sm:$0xf0]  ;;  %v4966_v41 = vld [vmem:[#allocation9 + $0xac] sm:$0xf] }
  0x25   :  { %9007 = vst [vmem:[#allocation28_spill] sm:$0xff] %v5732_v34  ;;  %558 = vmatpush.bf16.msra.mxu0 %v5732_v34  ;;  %v4553_v42 = vld [vmem:[#allocation9 + $0xb4] sm:$0xf0]  ;;  %v4647_v45 = vld [vmem:[#allocation9 + $0x168] sm:$0xf]  ;;  %v5743_v47 = vor.u32 %v4961_v40, %v4527_v39  ;;  %p4776_p1 = scmp.gt.s32.totalorder %s8679_s1, 1 }
  0x26   :  { %v5697_v3 = vstv %s148_s5  ;;  %9008 = vst [vmem:[#allocation29_spill] sm:$0xff] %v5737_v38  ;;  %v5739_v44 = vor.u32 %v4966_v41, %v4553_v42  ;;  %v4991_v48 = vld [vmem:[#allocation9 + $0x170] sm:$0xf0]  ;;  %v4541_v50 = vld [vmem:[#allocation9 + $0x9c] sm:$0xf0]  ;;  %p4788_p2 = scmp.gt.s32.totalorder %s8679_s1, 2 }
  0x27   :  { %9003 = vst [vmem:[#allocation24_spill] sm:$0xff] %v5697_v3  ;;  %v190_v4 = vmul.f32 %v5697_v3, %v5691_v0  ;;  %v5701_v5 = vstv %s4462_s9  ;;  %v940_v28 = vmul.f32 %v5723_v26, %v5697_v3  ;;  %v4963_v49 = vld [vmem:[#allocation9 + $0x94] sm:$0xf]  ;;  %v4515_v51 = vld [vmem:[#allocation9 + $0x60] sm:$0xf]  ;;  %v5746_v53 = vor.u32 %v4991_v48, %v4647_v45  ;;  %p4800_p3 = scmp.gt.s32.totalorder %s8679_s1, 3 }
  0x28   :  { %9004 = vst [vmem:[#allocation25_spill] sm:$0xff] %v5701_v5  ;;  %v171_v12 = vld [vmem:[#allocation2] sm:$0xff]  ;;  %v5709_v14 = vstv %s4463_s25  ;;  %v4958_v52 = vld [vmem:[#allocation9 + $0x68] sm:$0xf0]  ;;  %584 = vmatpush.bf16.msra.mxu2 %v5739_v44  ;;  %v5748_v54 = vor.u32 %v4963_v49, %v4541_v50  ;;  %v4635_v55 = vld [vmem:[#allocation9 + $0x150] sm:$0xf] }
  0x29   :  { %v192_v6 = vadd.f32 %v5701_v5, %v190_v4  ;;  %9005 = vst [vmem:[#allocation26_spill] sm:$0xff] %v5709_v14  ;;  %v5711_v15 = vstv %s4464_s26  ;;  %v198_v17 = vmul.f32 %v5709_v14, %v5691_v0  ;;  %v941_v29 = vadd.f32 %v940_v28, %v5701_v5  ;;  %559 = vmatpush.bf16.msra.mxu0 %v5737_v38  ;;  %v4988_v56 = vld [vmem:[#allocation9 + $0x158] sm:$0xf0]  ;;  %v4529_v58 = vld [vmem:[#allocation9 + $0x84] sm:$0xf0]  ;;  %p4812_p4 = scmp.gt.s32.totalorder %s8679_s1, 4 }
  0x2a   :  { %9006 = vst [vmem:[#allocation27_spill] sm:$0xff] %v5711_v15  ;;  %v946_v37 = vmul.f32 %v5723_v26, %v5709_v14  ;;  %v4960_v57 = vld [vmem:[#allocation9 + $0x7c] sm:$0xf]  ;;  %571 = vmatpush.bf16.msra.mxu1 %v5746_v53  ;;  %v5751_v60 = vor.u32 %v4988_v56, %v4635_v55  ;;  %v5754_v63 = vor.u32 %v4958_v52, %v4515_v51  ;;  %v4623_v2 = vld [vmem:[#allocation9 + $0x138] sm:$0xf]  ;;  %p4824_p5 = scmp.gt.s32.totalorder %s8679_s1, 5 }
  0x2b   :  { %v193_v7 = vmax.f32 %v192_v6, 0.0  ;;  %v200_v19 = vadd.f32 %v5711_v15, %v198_v17  ;;  %v942_v36 = vmax.f32 %v941_v29, 0.0  ;;  %9009 = vst [vmem:[#allocation30_spill] sm:$0xff] %v5743_v47  ;;  %v4985_v4 = vld [vmem:[#allocation9 + $0x140] sm:$0xf0]  ;;  %p4836_p6 = scmp.gt.s32.totalorder %s8679_s1, 6 }
  0x2c   :  { %v947_v46 = vadd.f32 %v946_v37, %v5711_v15  ;;  %9010 = vst [vmem:[#allocation31_spill] sm:$0xff] %v5746_v53  ;;  %585 = vmatpush.bf16.msra.mxu2 %v5748_v54  ;;  %v4957_v11 = vld [vmem:[#allocation9 + $0x64] sm:$0xf]  ;;  %v4987_v29 = vld [vmem:[#allocation9 + $0x154] sm:$0xf]  ;;  %p4848_p7 = scmp.gt.s32.totalorder %s8679_s1, 7 }
  0x2d   :  { %v194_v8 = vsub.f32 0.0, %v193_v7  ;;  %v201_v20 = vmax.f32 %v200_v19, 0.0  ;;  %v943_v43 = vsub.f32 0.0, %v942_v36  ;;  %9011 = vst [vmem:[#allocation32_spill] sm:$0xff] %v5751_v60  ;;  %560 = vmatpush.bf16.msra.mxu0 %v5743_v47  ;;  %v5763_v19 = vor.u32 %v4985_v4, %v4623_v2  ;;  %v4637_v30 = vld [vmem:[#allocation9 + $0x15c] sm:$0xf0] }
  0x2e   :  { %v948_v62 = vmax.f32 %v947_v46, 0.0  ;;  %9012 = vst [vmem:[#allocation33_spill] sm:$0xff] %v5754_v63  ;;  %572 = vmatpush.bf16.msra.mxu1 %v5751_v60  ;;  %v4954_v32 = vld [vmem:[#allocation9 + $0x4c] sm:$0xf]  ;;  %v5778_v35 = vor.u32 %v4987_v29, %v4637_v30  ;;  %v4599_v40 = vld [vmem:[#allocation9 + $0x108] sm:$0xf] }
  0x2f   :  { %v195_v9 = vmul.f32 1.442695, %v194_v8  ;;  %v202_v21 = vsub.f32 0.0, %v201_v20  ;;  %v944_v59 = vmul.f32 1.442695, %v943_v43  ;;  %9013 = vst [vmem:[#allocation34_spill] sm:$0xff] %v5763_v19 }
  0x30   :  { %v4503_v8 = vld [vmem:[#allocation9 + $0x48] sm:$0xf]  ;;  %9018 = vst [vmem:[#allocation39_spill] sm:$0xff] %v5778_v35  ;;  %v4979_v41 = vld [vmem:[#allocation9 + $0x110] sm:$0xf0]  ;;  %p4860_p8 = scmp.gt.s32.totalorder %s8679_s1, 8 }
  0x31   :  { %5039 = vpow2.f32 %v195_v9  ;;  %v203_v22 = vmul.f32 1.442695, %v202_v21  ;;  %v4955_v9 = vld [vmem:[#allocation9 + $0x50] sm:$0xf0]  ;;  %v949_v21 = vsub.f32 0.0, %v948_v62  ;;  %561 = vmatpush.bf16.msra.mxu0 %v5754_v63  ;;  %v5792_v52 = vor.u32 %v4979_v41, %v4599_v40  ;;  %p4872_p9 = scmp.gt.s32.totalorder %s8679_s1, 9 }
  0x32   :  { %573 = vmatpush.bf16.msra.mxu1 %v5763_v19  ;;  %v4479_v43 = vld [vmem:[#allocation9 + $0x18] sm:$0xf]  ;;  %v4949_v45 = vld [vmem:[#allocation9 + $0x20] sm:$0xf0]  ;;  %v4984_v46 = vld [vmem:[#allocation9 + $0x13c] sm:$0xf] }
  0x33   :  { %5041 = vpow2.f32 %v203_v22  ;;  %v4611_v22 = vld [vmem:[#allocation9 + $0x120] sm:$0xf]  ;;  %v950_v37 = vmul.f32 1.442695, %v949_v21  ;;  %v4625_v50 = vld [vmem:[#allocation9 + $0x144] sm:$0xf0] }
  0x34   :  { %5043 = vpow2.f32 %v944_v59  ;;  %9021 = vst [vmem:[#allocation42_spill] sm:$0xff] %v5792_v52  ;;  %v4951_v55 = vld [vmem:[#allocation9 + $0x34] sm:$0xf]  ;;  %v5794_v56 = vor.u32 %v4984_v46, %v4625_v50  ;;  %v4587_v59 = vld [vmem:[#allocation9 + $0xf0] sm:$0xf]  ;;  %p4884_p10 = scmp.gt.s32.totalorder %s8679_s1, 10 }
  0x35   :  { %5045 = vpow2.f32 %v950_v37  ;;  %v4467_v62 = vld [vmem:[#allocation9] sm:$0xf]  ;;  %v4946_v2 = vld [vmem:[#allocation9 + $0x8] sm:$0xf0]  ;;  %v4981_v4 = vld [vmem:[#allocation9 + $0x124] sm:$0xf] }
  0x36   :  { %9022 = vst [vmem:[#allocation43_spill] sm:$0xff] %v5794_v56  ;;  %v5813_v21 = vor.u32 %v4946_v2, %v4467_v62  ;;  %v4547_v30 = vld [vmem:[#allocation9 + $0x98] sm:$0xf]  ;;  %v4945_v41 = vld [vmem:[#allocation9 + $0x4] sm:$0xf]  ;;  %p4896_p11 = scmp.gt.s32.totalorder %s8679_s1, 11 }
  0x37   :  { %v5040_v10 = vpop.eup %5039  ;;  %v4970_v46 = vld [vmem:[#allocation9 + $0xc8] sm:$0xf0]  ;;  %s918_s29 = scalar_select %p4764_p0, 1, 0 }
  0x38   :  { %212 = vperm.xlu0 %5034, %v5040_v10   ;;  %v5760_v10 = vor.u32 %v4960_v57, %v4529_v58  ;;  %v5797_v57 = vor.u32 %v4949_v45, %v4479_v43  ;;  %9027 = vst [vmem:[#allocation48_spill] sm:$0xff] %v5813_v21  ;;  %v4563_v45 = vld [vmem:[#allocation9 + $0xc0] sm:$0xf]  ;;  %s1151_s18 = scalar_select %p4776_p1, 1, 0 }
  0x39   :  { %v5042_v23 = vpop.eup %5041  ;;  %s1384_s4 = scalar_select %p4788_p2, 1, 0 }
  0x3a   :  { %224 = vperm.xlu2 %5035, %v5042_v23   ;;  %v4982_v23 = vld [vmem:[#allocation9 + $0x128] sm:$0xf0]  ;;  %586 = vmatpush.bf16.msra.mxu2 %v5760_v10  ;;  %v5044_v48 = vpop.eup %5043  ;;  %9023 = vst [vmem:[#allocation44_spill] sm:$0xff] %v5797_v57  ;;  %s1617_s26 = scalar_select %p4800_p3, 1, 0 }
  0x3b   :  { %v5776_v31 = vor.u32 %v4982_v23, %v4611_v22  ;;  %v4575_v22 = vld [vmem:[#allocation9 + $0xd8] sm:$0xf]  ;;  %v4973_v23 = vld [vmem:[#allocation9 + $0xe0] sm:$0xf0]  ;;  %v5046_v29 = vpop.eup %5045  ;;  %s2083_s16 = scalar_select %p4824_p5, 1, 0 }
  0x3c   :  { %v5826_v40 = vor.u32 %v4973_v23, %v4575_v22  ;;  %v4989_v22 = vld [vmem:[#allocation9 + $0x160] sm:$0xf0]  ;;  %v4523_v23 = vld [vmem:[#allocation9 + $0x68] sm:$0xf]  ;;  %s2782_s7 = scalar_select %p4860_p8, 1, 0 }
  0x3d   :  { %9017 = vst [vmem:[#allocation38_spill] sm:$0xff] %v5776_v31  ;;  %574 = vmatpush.bf16.msra.mxu1 %v5776_v31  ;;  %s3481_s2 = scalar_select %p4896_p11, 1, 0 }
  0x3e   :  { %9030 = vst [vmem:[#allocation51_spill] sm:$0xff] %v5826_v40  ;;  %p4908_p12 = scmp.gt.s32.totalorder %s8679_s1, 12  ;;  %p4920_p13 = scmp.gt.s32.totalorder %s8679_s1, 13 }
  0x3f   :  { %p4932_p0 = scmp.gt.s32.totalorder %s8679_s1, 14  ;;  %p4944_p1 = scmp.gt.s32.totalorder %s8679_s1, 15 }
  0x40   :  { %s3714_s21 = scalar_select %p4908_p12, 1, 0 }
  0x41   :  { %575 = vmatpush.bf16.msra.mxu1 %v5792_v52  ;;  %s5598_s1 = smov [#allocation15]   ;;  %s4431_s15 = sshll.u32 %s8690_s12, 4  ;;  %s4432_s15 = int_to_ptr.hbm [resolvable:$true] %s4431_s15 }
  0x42   :  { %s4429_s30 = sshll.u32 %s5598_s1, 4  ;;  %s4442_s19 = sshll.u32 %s8691_s13, 4  ;;  %s4430_s30 = int_to_ptr.vmem [resolvable:$true] %s4429_s30  ;;  %s4443_s19 = int_to_ptr.hbm [resolvable:$true] %s4442_s19 }
  0x94   :  { %v225_v58 = vpop.permute.xlu2 %224 }
  0x95   :  { %v185_v13 = vpop.permute.xlu0 %184 }
  0x96   :  { %v187_v16 = vmul.f32 %v185_v13, %v171_v12  ;;  %v4517_v12 = vld [vmem:[#allocation9 + $0x6c] sm:$0xf0]  ;;  %v4990_v13 = vld [vmem:[#allocation9 + $0x16c] sm:$0xf] }
  0x97   :  { %v5772_v28 = vor.u32 %v4957_v11, %v4517_v12  ;;  %v5805_v11 = vmul.f32 0.0, %v225_v58  ;;  %v4589_v58 = vld [vmem:[#allocation9 + $0xfc] sm:$0xf0] }
  0x98   :  { %v5716_v18 = vadd.f32 %v187_v16, %v5691_v0  ;;  %v4649_v16 = vld [vmem:[#allocation9 + $0x174] sm:$0xf0] }
  0x99   :  { %v5765_v20 = vor.u32 %v4990_v13, %v4649_v16  ;;  %9016 = vst [vmem:[#allocation37_spill] sm:$0xff] %v5772_v28  ;;  %587 = vmatpush.bf16.msra.mxu2 %v5772_v28  ;;  %v4948_v13 = vld [vmem:[#allocation9 + $0x1c] sm:$0xf]  ;;  %v4481_v16 = vld [vmem:[#allocation9 + $0x24] sm:$0xf0]  ;;  %v5823_v37 = vpack.c.bf16 %v5805_v11, %v5805_v11 }
  0x9a   :  { %206 = vrot.lane.b32.xlu1 %v5716_v18, %s5588_s23 }
  0x9b   :  { %9014 = vst [vmem:[#allocation35_spill] sm:$0xff] %v5765_v20  ;;  %597 = vmatpush.bf16.msra.mxu3 %v5765_v20 }
  0x9f   :  { %598 = vmatpush.bf16.msra.mxu3 %v5778_v35  ;;  %v153_v35 = vld [vmem:[%s8684_s6] sm:$0x7] }
  0xa3   :  { %599 = vmatpush.bf16.msra.mxu3 %v5794_v56  ;;  %v5956_v56 = vld [vmem:[#allocation11 + $0x10] sm:$0xff] }
  0xa4   :  { %9056 = vst [vmem:[#allocation75_spill] sm:$0xff] %v5956_v56 }
  0xaa   :  { %v213_v24 = vpop.permute.xlu0 %212 }
  0xab   :  { %v215_v25 = vmul.f32 %v213_v24, %v5716_v18  ;;  %v4491_v24 = vld [vmem:[#allocation9 + $0x30] sm:$0xf] }
  0xad   :  { %217 = vrot.lane.b32.xlu1 %v215_v25, %s5588_s23  ;;  %v4952_v25 = vld [vmem:[#allocation9 + $0x38] sm:$0xf0] }
  0xae   :  { %v5781_v39 = vor.u32 %v4952_v25, %v4491_v24  ;;  %v4978_v25 = vld [vmem:[#allocation9 + $0x10c] sm:$0xf] }
  0xb0   :  { %9019 = vst [vmem:[#allocation40_spill] sm:$0xff] %v5781_v39 }
  0xb5   :  { %935 = vrot.lane.b32.xlu1 %v8692_v27, %s5596_s22 }
 0x10c   :  { %v207_v33 = vpop.permute.xlu1 %206 }
 0x10d   :  { %v209_v6 = vmul.f32 %v207_v33, %v5691_v0  ;;  %v4505_v33 = vld [vmem:[#allocation9 + $0x54] sm:$0xf0] }
 0x10e   :  { %v5785_v49 = vor.u32 %v4954_v32, %v4505_v33  ;;  %v4965_v32 = vld [vmem:[#allocation9 + $0xa0] sm:$0xf0]  ;;  %v5818_v33 = vor.u32 %v4948_v13, %v4481_v16  ;;  %v4643_v16 = vld [vmem:[#allocation9 + $0x158] sm:$0xf] }
 0x10f   :  { %v5832_v50 = vor.u32 %v4965_v32, %v4547_v30  ;;  %v5855_v30 = vor.u32 %v4989_v22, %v4643_v16  ;;  %v4947_v16 = vld [vmem:[#allocation9 + $0x10] sm:$0xf0] }
 0x110   :  { %9020 = vst [vmem:[#allocation41_spill] sm:$0xff] %v5785_v49  ;;  %588 = vmatpush.bf16.msra.mxu2 %v5785_v49 }
 0x111   :  { %9029 = vst [vmem:[#allocation50_spill] sm:$0xff] %v5818_v33 }
 0x112   :  { %9032 = vst [vmem:[#allocation53_spill] sm:$0xff] %v5832_v50 }
 0x11f   :  { %v218_v61 = vpop.permute.xlu1 %217 }
 0x120   :  { %v220_v7 = vmul.f32 %v218_v61, %v182_v1  ;;  %v5768_v1 = vor.u32 %v4955_v9, %v4503_v8  ;;  %v4976_v61 = vld [vmem:[#allocation9 + $0xf8] sm:$0xf0]  ;;  %v4613_v9 = vld [vmem:[#allocation9 + $0x12c] sm:$0xf0] }
 0x121   :  { %v5808_v12 = vor.u32 %v4976_v61, %v4587_v59  ;;  %v4535_v59 = vld [vmem:[#allocation9 + $0x80] sm:$0xf]  ;;  %v4962_v61 = vld [vmem:[#allocation9 + $0x88] sm:$0xf0] }
 0x122   :  { %v221_v17 = vadd.f32 %v220_v7, %v209_v6  ;;  %9015 = vst [vmem:[#allocation36_spill] sm:$0xff] %v5768_v1  ;;  %562 = vmatpush.bf16.msra.mxu0 %v5768_v1  ;;  %v4559_v6 = vld [vmem:[#allocation9 + $0xb0] sm:$0xf]  ;;  %v4968_v7 = vld [vmem:[#allocation9 + $0xb8] sm:$0xf0]  ;;  %v5847_v13 = vor.u32 %v4962_v61, %v4535_v59 }
 0x123   :  { %9025 = vst [vmem:[#allocation46_spill] sm:$0xff] %v5808_v12  ;;  %v5815_v24 = vor.u32 %v4968_v7, %v4559_v6  ;;  %576 = vmatpush.bf16.msra.mxu1 %v5808_v12  ;;  %v4972_v6 = vld [vmem:[#allocation9 + $0xdc] sm:$0xf]  ;;  %v4577_v7 = vld [vmem:[#allocation9 + $0xe4] sm:$0xf0] }
 0x124   :  { %229 = vrot.lane.b32.xlu2 %v221_v17, %s5596_s22  ;;  %v5810_v17 = vor.u32 %v4981_v4, %v4613_v9  ;;  %v5842_v4 = vor.u32 %v4970_v46, %v4563_v45  ;;  %9036 = vst [vmem:[#allocation57_spill] sm:$0xff] %v5847_v13  ;;  %v4956_v45 = vld [vmem:[#allocation9 + $0x58] sm:$0xf0]  ;;  %v4487_v59 = vld [vmem:[#allocation9 + $0x20] sm:$0xf] }
 0x125   :  { %9028 = vst [vmem:[#allocation49_spill] sm:$0xff] %v5815_v24  ;;  %v4950_v61 = vld [vmem:[#allocation9 + $0x28] sm:$0xf0] }
 0x126   :  { %563 = vmatpush.bf16.msra.mxu0 %v5781_v39  ;;  %9026 = vst [vmem:[#allocation47_spill] sm:$0xff] %v5810_v17  ;;  %600 = vmatpush.bf16.msra.mxu3 %v5810_v17 }
 0x127   :  { %v936_v36 = vpop.permute.xlu1 %935  ;;  %577 = vmatpush.bf16.msra.mxu1 %v5826_v40  ;;  %9035 = vst [vmem:[#allocation56_spill] sm:$0xff] %v5842_v4 }
 0x128   :  { %v938_v42 = vmul.f32 %v936_v36, %v5716_v18  ;;  %v4493_v18 = vld [vmem:[#allocation9 + $0x3c] sm:$0xf0]  ;;  %v4601_v36 = vld [vmem:[#allocation9 + $0x114] sm:$0xf0] }
 0x129   :  { %v5802_v8 = vor.u32 %v4951_v55, %v4493_v18  ;;  %v5828_v43 = vor.u32 %v4978_v25, %v4601_v36  ;;  %v4655_v55 = vld [vmem:[#allocation9 + $0x170] sm:$0xf]  ;;  %v4992_v18 = vld [vmem:[#allocation9 + $0x178] sm:$0xf0]  ;;  %v4959_v25 = vld [vmem:[#allocation9 + $0x70] sm:$0xf0] }
 0x12a   :  { %v5789_v51 = vadd.f32 %v938_v42, %v5723_v26  ;;  %564 = vmatpush.bf16.msra.mxu0 %v5797_v57  ;;  %v4469_v42 = vld [vmem:[#allocation9 + $0xc] sm:$0xf0]  ;;  %v5844_v9 = vor.u32 %v4992_v18, %v4655_v55  ;;  %v5858_v32 = vor.u32 %v4959_v25, %v4523_v23  ;;  %v4631_v36 = vld [vmem:[#allocation9 + $0x140] sm:$0xf]  ;;  %v4499_v55 = vld [vmem:[#allocation9 + $0x38] sm:$0xf] }
 0x12b   :  { %9024 = vst [vmem:[#allocation45_spill] sm:$0xff] %v5802_v8  ;;  %589 = vmatpush.bf16.msra.mxu2 %v5802_v8  ;;  %v5835_v62 = vor.u32 %v4945_v41, %v4469_v42  ;;  %601 = vmatpush.bf16.msra.mxu3 %v5828_v43  ;;  %v4986_v41 = vld [vmem:[#allocation9 + $0x148] sm:$0xf0]  ;;  %v4511_v42 = vld [vmem:[#allocation9 + $0x50] sm:$0xf]  ;;  %v5975_v8 = vld [vmem:[#allocation11] sm:$0xff] }
 0x12c   :  { %959 = vperm.xlu2 %5035, %v5044_v48   ;;  %953 = vrot.lane.b32.xlu0 %v5789_v51, %s5588_s23  ;;  %9031 = vst [vmem:[#allocation52_spill] sm:$0xff] %v5828_v43  ;;  %v4975_v48 = vld [vmem:[#allocation9 + $0xf4] sm:$0xf]  ;;  %v5863_v46 = vor.u32 %v4986_v41, %v4631_v36  ;;  %v4953_v18 = vld [vmem:[#allocation9 + $0x40] sm:$0xf0] }
 0x12d   :  { %9033 = vst [vmem:[#allocation54_spill] sm:$0xff] %v5835_v62  ;;  %v5838_v2 = vor.u32 %v4975_v48, %v4589_v58  ;;  %578 = vmatpush.bf16.msra.mxu1 %v5842_v4  ;;  %v5866_v48 = vor.u32 %v4956_v45, %v4511_v42  ;;  %v5870_v58 = vor.u32 %v4953_v18, %v4499_v55  ;;  %v4969_v23 = vld [vmem:[#allocation9 + $0xc4] sm:$0xf]  ;;  %v4565_v25 = vld [vmem:[#allocation9 + $0xcc] sm:$0xf0] }
 0x12e   :  { %565 = vmatpush.bf16.msra.mxu0 %v5813_v21  ;;  %9038 = vst [vmem:[#allocation59_spill] sm:$0xff] %v5858_v32  ;;  %v4619_v36 = vld [vmem:[#allocation9 + $0x128] sm:$0xf]  ;;  %v5880_v41 = vor.u32 %v4969_v23, %v4565_v25  ;;  %v4983_v42 = vld [vmem:[#allocation9 + $0x130] sm:$0xf0] }
 0x12f   :  { %590 = vmatpush.bf16.msra.mxu2 %v5818_v33  ;;  %9034 = vst [vmem:[#allocation55_spill] sm:$0xff] %v5838_v2  ;;  %602 = vmatpush.bf16.msra.mxu3 %v5838_v2  ;;  %v5882_v45 = vor.u32 %v4983_v42, %v4619_v36  ;;  %v4607_v55 = vld [vmem:[#allocation9 + $0x110] sm:$0xf]  ;;  %v4980_v18 = vld [vmem:[#allocation9 + $0x118] sm:$0xf0]  ;;  %v5947_v2 = vld [vmem:[#allocation11 + $0x20] sm:$0xff] }
 0x130   :  { %9039 = vst [vmem:[#allocation60_spill] sm:$0xff] %v5866_v48  ;;  %v4974_v23 = vld [vmem:[#allocation9 + $0xe8] sm:$0xf0]  ;;  %v4571_v36 = vld [vmem:[#allocation9 + $0xc8] sm:$0xf] }
 0x131   :  { %566 = vmatmul.bf16.vlgmr.msra.gmra.mxu0 %v5823_v37  ;;  %623 = vmatpush.bf16.msrb.mxu1 %v5844_v9  ;;  %9040 = vst [vmem:[#allocation61_spill] sm:$0xff] %v5870_v58  ;;  %v4971_v42 = vld [vmem:[#allocation9 + $0xd0] sm:$0xf0] }
 0x132   :  { %610 = vmatpush.bf16.msrb.mxu0 %v5815_v24  ;;  %9043 = vst [vmem:[#allocation64_spill] sm:$0xff] %v5880_v41  ;;  %v5895_v27 = vor.u32 %v4971_v42, %v4571_v36 }
 0x133   :  { %591 = vmatpush.bf16.msra.mxu2 %v5835_v62  ;;  %9044 = vst [vmem:[#allocation65_spill] sm:$0xff] %v5882_v45 }
 0x134   :  { %971 = vperm.xlu0 %5034, %v5046_v29   ;;  %v5851_v29 = vor.u32 %v4972_v6, %v4577_v7  ;;  %v5873_v6 = vor.u32 %v4950_v61, %v4487_v59  ;;  %v4475_v7 = vld [vmem:[#allocation9 + $0x8] sm:$0xf]  ;;  %v5886_v59 = vor.u32 %v4980_v18, %v4607_v55  ;;  %v4595_v61 = vld [vmem:[#allocation9 + $0xf8] sm:$0xf]  ;;  %9048 = vst [vmem:[#allocation69_spill] sm:$0xff] %v5895_v27 }
 0x135   :  { %624 = vmatpush.bf16.msrb.mxu1 %v5855_v30  ;;  %v5876_v22 = vor.u32 %v4947_v16, %v4475_v7  ;;  %v4583_v16 = vld [vmem:[#allocation9 + $0xe0] sm:$0xf]  ;;  %9054 = vst [vmem:[#allocation73_spill] sm:$0xff] %v5947_v2 }
 0x136   :  { %611 = vmatpush.bf16.msrb.mxu0 %v5832_v50  ;;  %9037 = vst [vmem:[#allocation58_spill] sm:$0xff] %v5851_v29  ;;  %592 = vmatmul.bf16.vlgmr.msra.gmra.mxu2 %v5823_v37  ;;  %v5892_v25 = vor.u32 %v4974_v23, %v4583_v16 }
 0x137   :  { %603 = vmatpush.bf16.msra.mxu3 %v5851_v29  ;;  %9041 = vst [vmem:[#allocation62_spill] sm:$0xff] %v5873_v6  ;;  %v5942_v29 = vld [vmem:[#allocation11 + $0x28] sm:$0xff] }
 0x138   :  { %9042 = vst [vmem:[#allocation63_spill] sm:$0xff] %v5876_v22 }
 0x139   :  { %625 = vmatpush.bf16.msrb.mxu1 %v5863_v46  ;;  %9045 = vst [vmem:[#allocation66_spill] sm:$0xff] %v5886_v59 }
 0x13a   :  { %612 = vmatpush.bf16.msrb.mxu0 %v5847_v13  ;;  %9047 = vst [vmem:[#allocation68_spill] sm:$0xff] %v5892_v25 }
 0x13b   :  { %604 = vmatpush.bf16.msra.mxu3 %v5880_v41  ;;  %v5939_v41 = vld [vmem:[#allocation11 + $0x30] sm:$0xff]  ;;  %9053 = vst [vmem:[#allocation72_spill] sm:$0xff] %v5942_v29 }
 0x13c   :  { %9052 = vst [vmem:[#allocation71_spill] sm:$0xff] %v5939_v41 }
 0x13d   :  { %626 = vmatpush.bf16.msrb.mxu1 %v5882_v45  ;;  %9060 = vst [vmem:[#allocation78_spill] sm:$0xff] %v5975_v8 }
 0x13e   :  { %613 = vmatpush.bf16.msrb.mxu0 %v5858_v32 }
 0x141   :  { %627 = vmatpush.bf16.msrb.mxu1 %v5886_v59 }
 0x142   :  { %614 = vmatpush.bf16.msrb.mxu0 %v5866_v48 }
 0x146   :  { %615 = vmatpush.bf16.msrb.mxu0 %v5870_v58 }
 0x14a   :  { %616 = vmatpush.bf16.msrb.mxu0 %v5873_v6 }
 0x14e   :  { %617 = vmatpush.bf16.msrb.mxu0 %v5876_v22 }
 0x151   :  { %618 = vmatmul.bf16.vlgmr.msrb.gmra.mxu0 %v5823_v37  ;;  %v4977_v37 = vld [vmem:[#allocation9 + $0x100] sm:$0xf0] }
 0x152   :  { %v5889_v7 = vor.u32 %v4977_v37, %v4595_v61 }
 0x154   :  { %9046 = vst [vmem:[#allocation67_spill] sm:$0xff] %v5889_v7  ;;  %628 = vmatpush.bf16.msrb.mxu1 %v5889_v7 }
 0x158   :  { %629 = vmatpush.bf16.msrb.mxu1 %v5892_v25 }
 0x15c   :  { %630 = vmatpush.bf16.msrb.mxu1 %v5895_v27 }
 0x17e   :  { %v230_v55 = vpop.permute.xlu2 %229 }
 0x17f   :  { %v233_v18 = vsel %vm140_vm0, %v230_v55, %v5691_v0  ;;  %v5912_v0 = vld [vmem:[#allocation8 + $0x10] sm:$0xff] }
 0x180   :  { %v4658_v37 = vpack.c.bf16 %v233_v18, %v233_v18  ;;  %v8693_v36 = vsub.f32 1.0, %v5912_v0  ;;  %v1179_v17 = vmul.f32 %v5912_v0, %v5709_v14 }
 0x182   :  { %4659 = vmatmul.msk.bf16.vlgmr.msra.gmra.mxu1 %vm5900_vm2, %v4658_v37  ;;  %4662 = vmatmul.msk.bf16.vlgmr.msra.gmra.mxu3 %vm5900_vm2, %v4658_v37 }
 0x183   :  { %983 = vmatpush.bf16.msra.mxu1 %v5732_v34 }
 0x186   :  { %v960_v16 = vpop.permute.xlu2 %959 }
 0x187   :  { %v962_v23 = vmul.f32 %v960_v16, %v5789_v51  ;;  %984 = vmatpush.bf16.msra.mxu1 %v5737_v38 }
 0x189   :  { %964 = vrot.lane.b32.xlu1 %v962_v23, %s5588_s23 }
 0x18b   :  { %985 = vmatpush.bf16.msra.mxu1 %v5743_v47 }
 0x18f   :  { %986 = vmatpush.bf16.msra.mxu1 %v5754_v63 }
 0x191   :  { %1168 = vrot.lane.b32.xlu1 %v8693_v36, %s5596_s22  ;;  %v5936_v36 = vld [vmem:[#allocation11 + $0x38] sm:$0xff] }
 0x192   :  { %4665 = vmatmul.msk.bf16.vlgmr.msrb.gmra.mxu1 %vm5900_vm2, %v4658_v37  ;;  %9051 = vst [vmem:[#allocation70_spill] sm:$0xff] %v5936_v36  ;;  %740 = vmatpush.bf16.msrb.mxu2 %v5936_v36 }
 0x193   :  { %987 = vmatpush.bf16.msra.mxu1 %v5768_v1 }
 0x196   :  { %741 = vmatpush.bf16.msrb.mxu2 %v5939_v41  ;;  %v5967_v41 = vperm.slane %v153_v35, 0 }
 0x197   :  { %988 = vmatpush.bf16.msra.mxu1 %v5781_v39 }
 0x198   :  { %9058 = vst [vmem:[#allocation77_spill] sm:$0xff] %v5967_v41 }
 0x19a   :  { %742 = vmatpush.bf16.msrb.mxu2 %v5942_v29  ;;  %v1180_v29 = vadd.f32 %v1179_v17, %v5711_v15  ;;  %v9059_v17 = vsub.f32 1.0, %v5723_v26 }
 0x19b   :  { %989 = vmatpush.bf16.msra.mxu1 %v5797_v57 }
 0x19c   :  { %v1181_v62 = vmax.f32 %v1180_v29, 0.0  ;;  %v5980_v29 = vperm.slane %v153_v35, 1 }
 0x19e   :  { %743 = vmatpush.bf16.msrb.mxu2 %v5947_v2  ;;  %v954_v2 = vpop.permute.xlu0 %953  ;;  %v1182_v28 = vsub.f32 0.0, %v1181_v62  ;;  %9061 = vst [vmem:[#allocation79_spill] sm:$0xff] %v5980_v29 }
 0x19f   :  { %990 = vmatpush.bf16.msra.mxu1 %v5813_v21 }
 0x1a3   :  { %1035 = vmatpush.bf16.msrb.mxu1 %v5815_v24 }
 0x1a7   :  { %1036 = vmatpush.bf16.msrb.mxu1 %v5832_v50 }
 0x1ab   :  { %1037 = vmatpush.bf16.msrb.mxu1 %v5847_v13 }
 0x1ae   :  { %v567_v42 = vpop.f32.mrf.mxu0 }
 0x1af   :  { %1038 = vmatpush.bf16.msrb.mxu1 %v5858_v32 }
 0x1b3   :  { %1039 = vmatpush.bf16.msrb.mxu1 %v5866_v48 }
 0x1b6   :  { %v569_v55 = vpop.f32.mrf.mxu0 }
 0x1b7   :  { %1040 = vmatpush.bf16.msrb.mxu1 %v5870_v58  ;;  %v1173_v55 = vmul.f32 %v5912_v0, %v5697_v3 }
 0x1b9   :  { %v593_v18 = vpop.f32.mrf.mxu2 }
 0x1ba   :  { %v594_v62 = vadd.f32 %v593_v18, %v5980_v29  ;;  %v5997_v18 = vld [vmem:[#allocation8 + $0x20] sm:$0xff] }
 0x1bb   :  { %1041 = vmatpush.bf16.msrb.mxu1 %v5873_v6 }
 0x1bf   :  { %1042 = vmatpush.bf16.msrb.mxu1 %v5876_v22  ;;  %v568_v22 = vadd.f32 %v567_v42, %v5967_v41 }
 0x1c1   :  { %v595_v37 = vpop.f32.mrf.mxu2 }
 0x1c2   :  { %v1174_v37 = vadd.f32 %v1173_v55, %v5701_v5  ;;  %v5963_v55 = vld [vmem:[#allocation8 + $0x18] sm:$0xff] }
 0x1c3   :  { %v1406_v33 = vmul.f32 %v5963_v55, %v5697_v3 }
 0x1c4   :  { %v1175_v43 = vmax.f32 %v1174_v37, 0.0  ;;  %v5965_v37 = vld [vmem:[#allocation11 + $0x8] sm:$0xff] }
 0x1c5   :  { %9057 = vst [vmem:[#allocation76_spill] sm:$0xff] %v5965_v37 }
 0x1c6   :  { %v1176_v20 = vsub.f32 0.0, %v1175_v43  ;;  %v956_v43 = vmul.f32 %v954_v2, %v5723_v26 }
 0x1ce   :  { %v5934_v16 = vpop.f32.mrf.mxu0 }
 0x1d6   :  { %v621_v23 = vpop.f32.mrf.mxu0 }
 0x1d7   :  { %v5951_v23 = vld [vmem:[#allocation11 + $0x18] sm:$0xff] }
 0x1d8   :  { %9055 = vst [vmem:[#allocation74_spill] sm:$0xff] %v5951_v23  ;;  %744 = vmatpush.bf16.msrb.mxu2 %v5951_v23  ;;  %v1177_v23 = vmul.f32 1.442695, %v1176_v20  ;;  %v1407_v20 = vadd.f32 %v1406_v33, %v5701_v5 }
 0x1da   :  { %5047 = vpow2.f32 %v1177_v23  ;;  %v1408_v58 = vmax.f32 %v1407_v20, 0.0 }
 0x1dc   :  { %745 = vmatpush.bf16.msrb.mxu2 %v5956_v56 }
 0x1e0   :  { %746 = vmatpush.bf16.msrb.mxu2 %v5965_v37  ;;  %v5048_v42 = vpop.eup %5047 }
 0x1e4   :  { %747 = vmatpush.bf16.msrb.mxu2 %v5975_v8 }
 0x1e8   :  { %996 = vmatpush.bf16.msra.mxu2 %v5746_v53 }
 0x1ec   :  { %997 = vmatpush.bf16.msra.mxu2 %v5751_v60 }
 0x1f0   :  { %998 = vmatpush.bf16.msra.mxu2 %v5763_v19 }
 0x1f4   :  { %999 = vmatpush.bf16.msra.mxu2 %v5776_v31 }
 0x1f8   :  { %1000 = vmatpush.bf16.msra.mxu2 %v5792_v52 }
 0x1fb   :  { %v965_v36 = vpop.permute.xlu1 %964 }
 0x1fc   :  { %v967_v56 = vmul.f32 %v965_v36, %v9059_v17  ;;  %v1183_v17 = vmul.f32 1.442695, %v1182_v28  ;;  %v1409_v28 = vsub.f32 0.0, %v1408_v58  ;;  %1001 = vmatpush.bf16.msra.mxu2 %v5808_v12 }
 0x1fe   :  { %v968_v49 = vadd.f32 %v967_v56, %v956_v43  ;;  %v1412_v56 = vmul.f32 %v5963_v55, %v5709_v14  ;;  %v6000_v43 = vperm.slane %v153_v35, 2 }
 0x1ff   :  { %v580_v6 = vpop.f32.mrf.mxu1 }
 0x200   :  { %v581_v37 = vadd.f32 %v580_v6, %v568_v22  ;;  %976 = vrot.lane.b32.xlu2 %v968_v49, %s5596_s22  ;;  %9062 = vst [vmem:[#allocation80_spill] sm:$0xff] %v6000_v43  ;;  %1002 = vmatpush.bf16.msra.mxu2 %v5826_v40 }
 0x202   :  { %v4666_v2 = vmul.f32 -1.442695, %v581_v37  ;;  %v1413_v37 = vadd.f32 %v1412_v56, %v5711_v15 }
 0x203   :  { %v1169_v36 = vpop.permute.xlu1 %1168 }
 0x204   :  { %5049 = vpow2.f32 %v4666_v2  ;;  %v1171_v33 = vmul.f32 %v1169_v36, %v5789_v51  ;;  %v1410_v2 = vmul.f32 1.442695, %v1409_v28  ;;  %v1414_v36 = vmax.f32 %v1413_v37, 0.0  ;;  %1003 = vmatpush.bf16.msra.mxu2 %v5842_v4 }
 0x205   :  { %v606_v6 = vpop.f32.mrf.mxu3  ;;  %5051 = vpow2.f32 %v1183_v17  ;;  %v1639_v17 = vmul.f32 %v5997_v18, %v5697_v3 }
 0x206   :  { %v5990_v49 = vadd.f32 %v1171_v33, %v5912_v0  ;;  %v5992_v22 = vadd.f32 %v606_v6, %v594_v62  ;;  %v620_v62 = vadd.f32 %v5934_v16, %v6000_v43 }
 0x207   :  { %v582_v23 = vpop.f32.mrf.mxu1  ;;  %v1640_v35 = vadd.f32 %v1639_v17, %v5701_v5 }
 0x208   :  { %1192 = vperm.xlu2 %5035, %v5048_v42   ;;  %1186 = vrot.lane.b32.xlu0 %v5990_v49, %s5588_s23  ;;  %v1415_v42 = vsub.f32 0.0, %v1414_v36 }
 0x209   :  { %v1641_v37 = vmax.f32 %v1640_v35, 0.0 }
 0x20a   :  { %v5050_v51 = vpop.eup %5049  ;;  %v1416_v28 = vmul.f32 1.442695, %v1415_v42  ;;  %v6015_v42 = vld [vmem:[#allocation8 + $0x28] sm:$0xff] }
 0x20b   :  { %v639_v20 = vadd.f32 1.0, %v5050_v51  ;;  %v5052_v58 = vpop.eup %5051  ;;  %v1645_v51 = vmul.f32 %v5997_v18, %v5709_v14  ;;  %v1642_v17 = vsub.f32 0.0, %v1641_v37 }
 0x20d   :  { %5053 = vrcp.f32 %v639_v20  ;;  %v608_v56 = vpop.f32.mrf.mxu3  ;;  %v651_v36 = vand.u32 2147483648, %v639_v20  ;;  %vm645_vm4 = vweird.f32 %v639_v20  ;;  %v1643_v14 = vmul.f32 1.442695, %v1642_v17 }
 0x20e   :  { %5055 = vpow2.f32 %v1410_v2 }
 0x20f   :  { %v632_v33 = vpop.f32.mrf.mxu1  ;;  %5057 = vpow2.f32 %v1416_v28  ;;  %v652_v43 = vor.u32 1.1754944e-38, %v651_v36  ;;  %v1872_v28 = vmul.f32 %v6015_v42, %v5697_v3  ;;  %v9072_v3 = vld [vmem:[#allocation50_spill] sm:$0xff] }
 0x210   :  { %v6008_v6 = vadd.f32 %v632_v33, %v620_v62  ;;  %1204 = vperm.xlu2 %5035, %v5052_v58   ;;  %v1646_v62 = vadd.f32 %v1645_v51, %v5711_v15  ;;  %v649_v33 = vand.u32 2147483647, %v639_v20  ;;  %5059 = vpow2.f32 %v1643_v14 }
 0x212   :  { %vm650_vm6 = vcmp.eq.f32.partialorder %v649_v33, 8.507059e+37 }
 0x213   :  { %v5054_v23 = vpop.eup %5053 }
 0x214   :  { %v641_v56 = vmul.f32 %v5054_v23, %v639_v20  ;;  %v5056_v29 = vpop.eup %5055  ;;  %vm646_vm3 = vweird.f32 %v5054_v23 }
 0x215   :  { %vm647_vm5 = vmor %vm645_vm4, %vm646_vm3  ;;  %v5058_v51 = vpop.eup %5057 }
 0x216   :  { %v642_v16 = vsub.f32 1.0, %v641_v56  ;;  %v1647_v56 = vmax.f32 %v1646_v62, 0.0  ;;  %v5060_v62 = vpop.eup %5059 }
 0x217   :  { %v634_v2 = vpop.f32.mrf.mxu1 }
 0x218   :  { %1425 = vperm.xlu2 %5035, %v5056_v29   ;;  %v643_v58 = vmul.f32 %v5054_v23, %v642_v16  ;;  %v1648_v2 = vsub.f32 0.0, %v1647_v56 }
 0x21a   :  { %v644_v35 = vadd.f32 %v5054_v23, %v643_v58  ;;  %v1873_v58 = vadd.f32 %v1872_v28, %v5701_v5  ;;  %v1649_v36 = vmul.f32 1.442695, %v1648_v2  ;;  %v6051_v2 = vld [vmem:[#allocation12 + $0x28] sm:$0xff] }
 0x21b   :  { %9064 = vst [vmem:[#allocation82_spill] sm:$0xff] %v6051_v2 }
 0x21c   :  { %v648_v37 = vsel %vm647_vm5, %v5054_v23, %v644_v35  ;;  %v1874_v17 = vmax.f32 %v1873_v58, 0.0  ;;  %5061 = vpow2.f32 %v1649_v36  ;;  %v6061_v58 = vld [vmem:[#allocation12 + $0x20] sm:$0xff]  ;;  %v6069_v36 = vld [vmem:[#allocation12 + $0x10] sm:$0xff] }
 0x21d   :  { %v653_v29 = vsel %vm650_vm6, %v652_v43, %v648_v37  ;;  %9065 = vst [vmem:[#allocation83_spill] sm:$0xff] %v6061_v58 }
 0x21e   :  { %v674_v16 = vmul.f32 %v653_v29, %v5805_v11  ;;  %v1875_v23 = vsub.f32 0.0, %v1874_v17  ;;  %v4667_v17 = vmul.f32 -1.442695, %v5992_v22 }
 0x220   :  { %1437 = vperm.xlu2 %5035, %v5058_v51   ;;  %v675_v20 = vpack.c.bf16 %v674_v16, %v674_v16  ;;  %v1876_v43 = vmul.f32 1.442695, %v1875_v23  ;;  %v6039_v51 = vld [vmem:[#allocation12 + $0x38] sm:$0xff]  ;;  %v6047_v16 = vld [vmem:[#allocation12 + $0x30] sm:$0xff]  ;;  %v6079_v23 = vld [vmem:[#allocation12] sm:$0xff] }
 0x221   :  { %824 = vmatpush.bf16.msrb.mxu3 %v6039_v51  ;;  %9063 = vst [vmem:[#allocation81_spill] sm:$0xff] %v6047_v16 }
 0x222   :  { %748 = vmatmul.bf16.vlgmr.msrb.gmra.mxu2 %v675_v20  ;;  %v5062_v14 = vpop.eup %5061  ;;  %5063 = vpow2.f32 %v1876_v43  ;;  %v6065_v20 = vld [vmem:[#allocation12 + $0x18] sm:$0xff] }
 0x223   :  { %1048 = vmatpush.bf16.msrb.mxu2 %v5844_v9  ;;  %5065 = vpow2.f32 %v4667_v17  ;;  %v9070_v17 = vld [vmem:[#allocation63_spill] sm:$0xff] }
 0x225   :  { %825 = vmatpush.bf16.msrb.mxu3 %v6047_v16 }
 0x227   :  { %1049 = vmatpush.bf16.msrb.mxu2 %v5855_v30 }
 0x228   :  { %1658 = vperm.xlu2 %5035, %v5060_v62   ;;  %v5064_v33 = vpop.eup %5063  ;;  %v6074_v62 = vld [vmem:[#allocation12 + $0x8] sm:$0xff] }
 0x229   :  { %826 = vmatpush.bf16.msrb.mxu3 %v6051_v2  ;;  %v5066_v43 = vpop.eup %5065 }
 0x22a   :  { %v658_v22 = vadd.f32 1.0, %v5066_v43 }
 0x22b   :  { %1050 = vmatpush.bf16.msrb.mxu2 %v5863_v46 }
 0x22c   :  { %5067 = vrcp.f32 %v658_v22  ;;  %vm664_vm8 = vweird.f32 %v658_v22 }
 0x22d   :  { %827 = vmatpush.bf16.msrb.mxu3 %v6061_v58 }
 0x22f   :  { %1051 = vmatpush.bf16.msrb.mxu2 %v5882_v45 }
 0x230   :  { %1670 = vperm.xlu2 %5035, %v5062_v14   ;;  %v9066_v14 = vld [vmem:[#allocation61_spill] sm:$0xff] }
 0x231   :  { %828 = vmatpush.bf16.msrb.mxu3 %v6065_v20 }
 0x233   :  { %1052 = vmatpush.bf16.msrb.mxu2 %v5886_v59 }
 0x235   :  { %829 = vmatpush.bf16.msrb.mxu3 %v6069_v36 }
 0x237   :  { %1053 = vmatpush.bf16.msrb.mxu2 %v5889_v7 }
 0x238   :  { %1891 = vperm.xlu2 %5035, %v5064_v33   ;;  %v5068_v33 = vpop.eup %5067 }
 0x239   :  { %830 = vmatpush.bf16.msrb.mxu3 %v6074_v62  ;;  %vm665_vm7 = vweird.f32 %v5068_v33 }
 0x23a   :  { %vm666_vm9 = vmor %vm664_vm8, %vm665_vm7 }
 0x23b   :  { %1054 = vmatpush.bf16.msrb.mxu2 %v5892_v25 }
 0x23d   :  { %831 = vmatpush.bf16.msrb.mxu3 %v6079_v23 }
 0x23f   :  { %1055 = vmatpush.bf16.msrb.mxu2 %v5895_v27 }
 0x241   :  { %1009 = vmatpush.bf16.msra.mxu3 %v5739_v44 }
 0x245   :  { %1010 = vmatpush.bf16.msra.mxu3 %v5748_v54 }
 0x249   :  { %1011 = vmatpush.bf16.msra.mxu3 %v5760_v10 }
 0x25a   :  { %v977_v35 = vpop.permute.xlu2 %976 }
 0x25b   :  { %v979_v56 = vsel %vm140_vm0, %v977_v35, %v5723_v26  ;;  %v8746_v26 = vsub.f32 1.0, %v5963_v55  ;;  %v9067_v35 = vld [vmem:[#allocation37_spill] sm:$0xff] }
 0x25c   :  { %v6033_v28 = vpack.c.bf16 %v979_v56, %v979_v56  ;;  %1012 = vmatpush.bf16.msra.mxu3 %v9067_v35  ;;  %v9068_v56 = vld [vmem:[#allocation62_spill] sm:$0xff] }
 0x25e   :  { %4767 = vmatmul.msk.bf16.vlgmr.msra.gmra.mxu2 %vm5900_vm2, %v6033_v28 }
 0x25f   :  { %1216 = vmatpush.bf16.msra.mxu2 %v5732_v34 }
 0x262   :  { %v1193_v37 = vpop.permute.xlu2 %1192 }
 0x263   :  { %v1195_v29 = vmul.f32 %v1193_v37, %v5990_v49  ;;  %1217 = vmatpush.bf16.msra.mxu2 %v5737_v38  ;;  %v660_v37 = vmul.f32 %v5068_v33, %v658_v22 }
 0x265   :  { %1197 = vrot.lane.b32.xlu1 %v1195_v29, %s5588_s23  ;;  %v9069_v29 = vld [vmem:[#allocation41_spill] sm:$0xff]  ;;  %v661_v43 = vsub.f32 1.0, %v660_v37 }
 0x266   :  { %1013 = vmatpush.bf16.msra.mxu3 %v9069_v29 }
 0x267   :  { %1218 = vmatpush.bf16.msra.mxu2 %v5743_v47  ;;  %v662_v5 = vmul.f32 %v5068_v33, %v661_v43 }
 0x269   :  { %v663_v15 = vadd.f32 %v5068_v33, %v662_v5 }
 0x26b   :  { %1219 = vmatpush.bf16.msra.mxu2 %v5754_v63 }
 0x26d   :  { %1401 = vrot.lane.b32.xlu1 %v8746_v26, %s5596_s22  ;;  %v9071_v26 = vld [vmem:[#allocation45_spill] sm:$0xff] }
 0x26e   :  { %4773 = vmatmul.msk.bf16.vlgmr.msrb.gmra.mxu2 %vm5900_vm2, %v6033_v28  ;;  %1014 = vmatpush.bf16.msra.mxu3 %v9071_v26 }
 0x26f   :  { %1220 = vmatpush.bf16.msra.mxu2 %v5768_v1 }
 0x272   :  { %1015 = vmatpush.bf16.msra.mxu3 %v9072_v3 }
 0x273   :  { %1221 = vmatpush.bf16.msra.mxu2 %v5781_v39  ;;  %v972_v39 = vpop.permute.xlu0 %971 }
 0x277   :  { %1222 = vmatpush.bf16.msra.mxu2 %v5797_v57 }
 0x27b   :  { %1223 = vmatpush.bf16.msra.mxu2 %v5813_v21 }
 0x27f   :  { %1268 = vmatpush.bf16.msrb.mxu2 %v5815_v24  ;;  %v919_v24 = vstv %s918_s29  ;;  %s1850_s29 = scalar_select %p4812_p4, 1, 0 }
 0x280   :  { %vm6101_vm11 = vcmp.eq.s32.totalorder %v919_v24, 1  ;;  %v9079_v24 = vld [vmem:[#allocation72_spill] sm:$0xff] }
 0x283   :  { %1269 = vmatpush.bf16.msrb.mxu2 %v5832_v50 }
 0x287   :  { %1270 = vmatpush.bf16.msrb.mxu2 %v5847_v13  ;;  %v667_v13 = vsel %vm666_vm9, %v5068_v33, %v663_v15  ;;  %v9074_v15 = vmov 0 }
 0x288   :  { %v9075_v15 = vsel %vm6101_vm11, 4294967295, %v9074_v15 }
 0x289   :  { %9076 = vst [vmem:[#allocation37_spill] sm:$0xff] %v9075_v15 }
 0x28b   :  { %1271 = vmatpush.bf16.msrb.mxu2 %v5858_v32  ;;  %v668_v32 = vand.u32 2147483647, %v658_v22 }
 0x28d   :  { %vm669_vm10 = vcmp.eq.f32.partialorder %v668_v32, 8.507059e+37 }
 0x28f   :  { %1272 = vmatpush.bf16.msrb.mxu2 %v5866_v48  ;;  %v670_v48 = vand.u32 2147483648, %v658_v22 }
 0x293   :  { %1273 = vmatpush.bf16.msrb.mxu2 %v9066_v14  ;;  %v9073_v14 = vld [vmem:[#allocation54_spill] sm:$0xff] }
 0x294   :  { %1016 = vmatpush.bf16.msra.mxu3 %v9073_v14 }
 0x297   :  { %1274 = vmatpush.bf16.msrb.mxu2 %v9068_v56 }
 0x29b   :  { %1275 = vmatpush.bf16.msrb.mxu2 %v9070_v17  ;;  %v671_v17 = vor.u32 1.1754944e-38, %v670_v48  ;;  %v9081_v48 = vld [vmem:[#allocation74_spill] sm:$0xff] }
 0x29d   :  { %v672_v43 = vsel %vm669_vm10, %v671_v17, %v667_v13 }
 0x29e   :  { %v755_v5 = vsub.f32 1.0, %v672_v43 }
 0x2a0   :  { %v756_v22 = vmul.f32 %v755_v5, %v5805_v11  ;;  %v9077_v11 = vld [vmem:[#allocation70_spill] sm:$0xff]  ;;  %v6127_v5 = vpop.permute.xlu2 %1204 }
 0x2a5   :  { %v749_v56 = vpop.f32.mrf.mxu2 }
 0x2a6   :  { %v753_v37 = vadd.f32 %v749_v56, %v6008_v6  ;;  %v9082_v6 = vld [vmem:[#allocation75_spill] sm:$0xff] }
 0x2a8   :  { %5069 = vtanh.f32 %v753_v37  ;;  %v9084_v37 = vsub.f32 1.0, %v5912_v0 }
 0x2ad   :  { %v751_v50 = vpop.f32.mrf.mxu2 }
 0x2ae   :  { %v5070_v21 = vpop.eup %5069 }
 0x2af   :  { %v757_v57 = vmul.f32 %v5070_v21, %v672_v43  ;;  %v9078_v21 = vld [vmem:[#allocation71_spill] sm:$0xff] }
 0x2b1   :  { %v758_v33 = vadd.f32 %v757_v57, %v756_v22  ;;  %v9080_v57 = vld [vmem:[#allocation73_spill] sm:$0xff] }
 0x2b2   :  { %v6129_v22 = vld [vmem:[#allocation14 + $0x38] sm:$0xff] }
 0x2b3   :  { %v759_v1 = vpack.c.bf16 %v758_v33, %v758_v33  ;;  %v6107_v32 = vsel %vm6101_vm11, %v758_v33, 0.0  ;;  %903 = vmatpush.bf16.msra.mxu0 %v6129_v22 }
 0x2b4   :  { %v6110_v13 = vmul.f32 %v972_v39, %v6107_v32  ;;  %v9083_v39 = vld [vmem:[#allocation76_spill] sm:$0xff] }
 0x2b5   :  { %832 = vmatmul.bf16.vlgmr.msrb.gmra.mxu3 %v759_v1  ;;  %v1187_v1 = vpop.permute.xlu0 %1186 }
 0x2b6   :  { %v981_v50 = vpack.c.bf16 %v6110_v13, %v6110_v13  ;;  %1101 = vmatpush.bf16.msrb.mxu3 %v9077_v11  ;;  %v1189_v17 = vmul.f32 %v1187_v1, %v5912_v0  ;;  %v6138_v1 = vld [vmem:[#allocation14 + $0x28] sm:$0xff] }
 0x2b8   :  { %991 = vmatmul.bf16.vlgmr.msra.gmra.mxu1 %v981_v50 }
 0x2b9   :  { %1136 = vmatpush.bf16.msra.mxu1 %v6129_v22 }
 0x2ba   :  { %1102 = vmatpush.bf16.msrb.mxu3 %v9078_v21 }
 0x2be   :  { %1103 = vmatpush.bf16.msrb.mxu3 %v9079_v24 }
 0x2c2   :  { %1104 = vmatpush.bf16.msrb.mxu3 %v9080_v57 }
 0x2c5   :  { %1017 = vmatmul.bf16.vlgmr.msra.gmra.mxu3 %v981_v50 }
 0x2c6   :  { %1105 = vmatpush.bf16.msrb.mxu3 %v9081_v48 }
 0x2c8   :  { %1043 = vmatmul.bf16.vlgmr.msrb.gmra.mxu1 %v981_v50  ;;  %v6132_v50 = vld [vmem:[#allocation14 + $0x30] sm:$0xff] }
 0x2c9   :  { %904 = vmatpush.bf16.msra.mxu0 %v6132_v50  ;;  %1137 = vmatpush.bf16.msra.mxu1 %v6132_v50 }
 0x2ca   :  { %1106 = vmatpush.bf16.msrb.mxu3 %v9082_v6 }
 0x2cd   :  { %905 = vmatpush.bf16.msra.mxu0 %v6138_v1  ;;  %1138 = vmatpush.bf16.msra.mxu1 %v6138_v1 }
 0x2ce   :  { %1107 = vmatpush.bf16.msrb.mxu3 %v9083_v39 }
 0x2d2   :  { %1108 = vmatpush.bf16.msrb.mxu3 %v5975_v8 }
 0x2d6   :  { %1229 = vmatpush.bf16.msra.mxu3 %v5746_v53 }
 0x2d7   :  { %v1198_v56 = vpop.permute.xlu1 %1197 }
 0x2d8   :  { %v1200_v43 = vmul.f32 %v1198_v56, %v9084_v37 }
 0x2da   :  { %1230 = vmatpush.bf16.msra.mxu3 %v5751_v60  ;;  %v1201_v33 = vadd.f32 %v1200_v43, %v1189_v17  ;;  %v1426_v43 = vpop.permute.xlu2 %1425  ;;  %v9093_v60 = vld [vmem:[#allocation52_spill] sm:$0xff] }
 0x2dc   :  { %1209 = vrot.lane.b32.xlu0 %v1201_v33, %s5596_s22  ;;  %v6147_v33 = vld [vmem:[#allocation14 + $0x20] sm:$0xff] }
 0x2dd   :  { %906 = vmatpush.bf16.msra.mxu0 %v6147_v33  ;;  %1139 = vmatpush.bf16.msra.mxu1 %v6147_v33 }
 0x2de   :  { %1231 = vmatpush.bf16.msra.mxu3 %v5763_v19  ;;  %v9092_v19 = vld [vmem:[#allocation47_spill] sm:$0xff] }
 0x2df   :  { %v1402_v15 = vpop.permute.xlu1 %1401 }
 0x2e0   :  { %v1404_v56 = vmul.f32 %v1402_v15, %v5990_v49  ;;  %v6156_v49 = vld [vmem:[#allocation14 + $0x18] sm:$0xff] }
 0x2e1   :  { %v1005_v17 = vpop.f32.mrf.mxu2  ;;  %9085 = vst [vmem:[#allocation70_spill] sm:$0xff] %v6156_v49  ;;  %907 = vmatpush.bf16.msra.mxu0 %v6156_v49  ;;  %1140 = vmatpush.bf16.msra.mxu1 %v6156_v49 }
 0x2e2   :  { %1232 = vmatpush.bf16.msra.mxu3 %v5776_v31  ;;  %v6144_v37 = vadd.f32 %v1404_v56, %v5963_v55  ;;  %v8778_v56 = vsub.f32 1.0, %v5997_v18 }
 0x2e4   :  { %1419 = vrot.lane.b32.xlu0 %v6144_v37, %s5588_s23  ;;  %v1428_v31 = vmul.f32 %v1426_v43, %v6144_v37 }
 0x2e6   :  { %1233 = vmatpush.bf16.msra.mxu3 %v5792_v52  ;;  %1430 = vrot.lane.b32.xlu1 %v1428_v31, %s5588_s23  ;;  %v6162_v52 = vld [vmem:[#allocation14 + $0x10] sm:$0xff]  ;;  %v6170_v31 = vld [vmem:[#allocation14 + $0x8] sm:$0xff] }
 0x2e7   :  { %9086 = vst [vmem:[#allocation71_spill] sm:$0xff] %v6162_v52  ;;  %908 = vmatpush.bf16.msra.mxu0 %v6162_v52  ;;  %1141 = vmatpush.bf16.msra.mxu1 %v6162_v52 }
 0x2e8   :  { %9087 = vst [vmem:[#allocation72_spill] sm:$0xff] %v6170_v31 }
 0x2e9   :  { %v1007_v15 = vpop.f32.mrf.mxu2 }
 0x2ea   :  { %1234 = vmatpush.bf16.msra.mxu3 %v5808_v12  ;;  %v6177_v15 = vld [vmem:[#allocation14] sm:$0xff]  ;;  %v9091_v12 = vld [vmem:[#allocation43_spill] sm:$0xff] }
 0x2eb   :  { %909 = vmatpush.bf16.msra.mxu0 %v6170_v31  ;;  %9088 = vst [vmem:[#allocation73_spill] sm:$0xff] %v6177_v15  ;;  %1142 = vmatpush.bf16.msra.mxu1 %v6170_v31 }
 0x2ee   :  { %1235 = vmatpush.bf16.msra.mxu3 %v5826_v40  ;;  %1634 = vrot.lane.b32.xlu1 %v8778_v56, %s5596_s22  ;;  %v9089_v40 = vld [vmem:[#allocation35_spill] sm:$0xff] }
 0x2ef   :  { %910 = vmatpush.bf16.msra.mxu0 %v6177_v15  ;;  %1143 = vmatpush.bf16.msra.mxu1 %v6177_v15  ;;  %v9094_v15 = vld [vmem:[#allocation55_spill] sm:$0xff] }
 0x2f1   :  { %v6174_v43 = vpop.f32.mrf.mxu2 }
 0x2f2   :  { %1236 = vmatpush.bf16.msra.mxu3 %v5842_v4  ;;  %v9090_v4 = vld [vmem:[#allocation39_spill] sm:$0xff] }
 0x2f3   :  { %1022 = vmatpush.bf16.msrb.mxu0 %v9089_v40  ;;  %1255 = vmatpush.bf16.msrb.mxu1 %v9089_v40 }
 0x2f7   :  { %1023 = vmatpush.bf16.msrb.mxu0 %v9090_v4  ;;  %1256 = vmatpush.bf16.msrb.mxu1 %v9090_v4  ;;  %v9096_v4 = vld [vmem:[#allocation64_spill] sm:$0xff] }
 0x2f9   :  { %v1059_v56 = vpop.f32.mrf.mxu2 }
 0x2fa   :  { %v9095_v56 = vld [vmem:[#allocation58_spill] sm:$0xff] }
 0x2fb   :  { %1024 = vmatpush.bf16.msrb.mxu0 %v9091_v12  ;;  %1257 = vmatpush.bf16.msrb.mxu1 %v9091_v12 }
 0x2ff   :  { %1025 = vmatpush.bf16.msrb.mxu0 %v9092_v19  ;;  %1258 = vmatpush.bf16.msrb.mxu1 %v9092_v19  ;;  %v6201_v19 = vld [vmem:[%s8686_s8] ss:$0 sm:$0xff] }
 0x303   :  { %1026 = vmatpush.bf16.msrb.mxu0 %v9093_v60  ;;  %1259 = vmatpush.bf16.msrb.mxu1 %v9093_v60 }
 0x307   :  { %1027 = vmatpush.bf16.msrb.mxu0 %v9094_v15  ;;  %1260 = vmatpush.bf16.msrb.mxu1 %v9094_v15 }
 0x30b   :  { %1028 = vmatpush.bf16.msrb.mxu0 %v9095_v56  ;;  %1261 = vmatpush.bf16.msrb.mxu1 %v9095_v56 }
 0x30f   :  { %1029 = vmatpush.bf16.msrb.mxu0 %v9096_v4  ;;  %1262 = vmatpush.bf16.msrb.mxu1 %v9096_v4 }
 0x335   :  { %v992_v12 = vpop.f32.mrf.mxu1 }
 0x336   :  { %v993_v60 = vadd.f32 %v992_v12, %v5967_v41 }
 0x338   :  { %v1006_v40 = vadd.f32 %v1005_v17, %v993_v60  ;;  %v833_v53 = vpop.f32.mrf.mxu3 }
 0x339   :  { %v834_v15 = vadd.f32 %v6201_v19, %v833_v53 }
 0x33a   :  { %v4774_v8 = vmul.f32 -1.442695, %v1006_v40 }
 0x33b   :  { %v837_v31 = vmax.f32 %v834_v15, 0.0 }
 0x33c   :  { %5071 = vpow2.f32 %v4774_v8 }
 0x33d   :  { %v838_v56 = vpack.c.bf16 %v837_v31, %v837_v31  ;;  %v994_v39 = vpop.f32.mrf.mxu1 }
 0x33f   :  { %911 = vmatmul.bf16.vlgmr.msra.gmra.mxu0 %v838_v56 }
 0x340   :  { %v835_v52 = vpop.f32.mrf.mxu3  ;;  %1121 = vmatpush.bf16.msra.mxu0 %v6039_v51 }
 0x342   :  { %v5072_v4 = vpop.eup %5071 }
 0x343   :  { %v1064_v6 = vadd.f32 1.0, %v5072_v4 }
 0x344   :  { %1122 = vmatpush.bf16.msra.mxu0 %v6047_v16 }
 0x345   :  { %5073 = vrcp.f32 %v1064_v6  ;;  %v6207_v49 = vpop.f32.mrf.mxu1  ;;  %v1076_v4 = vand.u32 2147483648, %v1064_v6  ;;  %v1074_v31 = vand.u32 2147483647, %v1064_v6  ;;  %vm1070_vm13 = vweird.f32 %v1064_v6 }
 0x347   :  { %v1077_v56 = vor.u32 1.1754944e-38, %v1076_v4  ;;  %vm1075_vm15 = vcmp.eq.f32.partialorder %v1074_v31, 8.507059e+37 }
 0x348   :  { %v6209_v60 = vpop.f32.mrf.mxu3  ;;  %1123 = vmatpush.bf16.msra.mxu0 %v6051_v2 }
 0x34b   :  { %v5074_v53 = vpop.eup %5073 }
 0x34c   :  { %v1066_v12 = vmul.f32 %v5074_v53, %v1064_v6  ;;  %1124 = vmatpush.bf16.msra.mxu0 %v6061_v58  ;;  %vm1071_vm12 = vweird.f32 %v5074_v53  ;;  %v6223_v6 = vpop.permute.xlu2 %1437 }
 0x34d   :  { %v1046_v8 = vpop.f32.mrf.mxu1  ;;  %vm1072_vm14 = vmor %vm1070_vm13, %vm1071_vm12  ;;  %9098 = vst [vmem:[#allocation74_spill] sm:$0xff] %v6223_v6 }
 0x34e   :  { %v1067_v40 = vsub.f32 1.0, %v1066_v12  ;;  %v1210_v52 = vpop.permute.xlu0 %1209 }
 0x34f   :  { %4770 = vmatmul.msk.bf16.vlgmr.msrb.gmra.mxu0 %vm5900_vm2, %v6033_v28  ;;  %v1212_v4 = vsel %vm140_vm0, %v1210_v52, %v5912_v0  ;;  %v8809_v0 = vsub.f32 1.0, %v6015_v42  ;;  %v9099_v52 = vld [vmem:[#allocation36_spill] sm:$0xff] }
 0x350   :  { %v1020_v39 = vpop.f32.mrf.mxu3  ;;  %v1068_v17 = vmul.f32 %v5074_v53, %v1067_v40  ;;  %1125 = vmatpush.bf16.msra.mxu0 %v6065_v20 }
 0x351   :  { %v9097_v39 = vsub.f32 1.0, %v5963_v55 }
 0x352   :  { %v1069_v15 = vadd.f32 %v5074_v53, %v1068_v17 }
 0x354   :  { %v1073_v2 = vsel %vm1072_vm14, %v5074_v53, %v1069_v15  ;;  %1126 = vmatpush.bf16.msra.mxu0 %v6069_v36  ;;  %v9100_v15 = vld [vmem:[#allocation40_spill] sm:$0xff] }
 0x355   :  { %v1078_v12 = vsel %vm1075_vm15, %v1077_v56, %v1073_v2  ;;  %v9101_v56 = vld [vmem:[#allocation44_spill] sm:$0xff] }
 0x356   :  { %v1420_v8 = vpop.permute.xlu0 %1419  ;;  %v1099_v58 = vmul.f32 %v1078_v12, %v6110_v13  ;;  %v9102_v12 = vld [vmem:[#allocation48_spill] sm:$0xff] }
 0x357   :  { %v1422_v40 = vmul.f32 %v1420_v8, %v5963_v55  ;;  %v9103_v8 = vld [vmem:[#allocation49_spill] sm:$0xff] }
 0x358   :  { %v1431_v28 = vpop.permute.xlu1 %1430  ;;  %v1100_v16 = vpack.c.bf16 %v1099_v58, %v1099_v58  ;;  %1127 = vmatpush.bf16.msra.mxu0 %v6074_v62 }
 0x359   :  { %v1433_v17 = vmul.f32 %v1431_v28, %v9097_v39  ;;  %v9104_v28 = vld [vmem:[#allocation53_spill] sm:$0xff]  ;;  %v9106_v39 = vld [vmem:[#allocation59_spill] sm:$0xff] }
 0x35a   :  { %1109 = vmatmul.bf16.vlgmr.msrb.gmra.mxu3 %v1100_v16  ;;  %v1659_v16 = vpop.permute.xlu2 %1658 }
 0x35b   :  { %v1434_v53 = vadd.f32 %v1433_v17, %v1422_v40  ;;  %1281 = vmatpush.bf16.msrb.mxu3 %v5844_v9  ;;  %v9105_v40 = vld [vmem:[#allocation57_spill] sm:$0xff]  ;;  %v9107_v17 = vld [vmem:[#allocation60_spill] sm:$0xff] }
 0x35c   :  { %1128 = vmatpush.bf16.msra.mxu0 %v6079_v23 }
 0x35d   :  { %1442 = vrot.lane.b32.xlu0 %v1434_v53, %s5596_s22  ;;  %v9108_v53 = vld [vmem:[#allocation61_spill] sm:$0xff] }
 0x35f   :  { %1282 = vmatpush.bf16.msrb.mxu3 %v5855_v30 }
 0x360   :  { %1242 = vmatpush.bf16.msrb.mxu0 %v5739_v44  ;;  %v1635_v2 = vpop.permute.xlu1 %1634 }
 0x361   :  { %v1637_v58 = vmul.f32 %v1635_v2, %v6144_v37  ;;  %v6244_v37 = vpack.c.bf16 %v1212_v4, %v1212_v4  ;;  %v9109_v2 = vld [vmem:[#allocation62_spill] sm:$0xff] }
 0x363   :  { %v6233_v55 = vadd.f32 %v1637_v58, %v5997_v18  ;;  %1283 = vmatpush.bf16.msrb.mxu3 %v5863_v46  ;;  %v9110_v58 = vld [vmem:[#allocation63_spill] sm:$0xff] }
 0x364   :  { %1243 = vmatpush.bf16.msrb.mxu0 %v5748_v54 }
 0x365   :  { %1652 = vrot.lane.b32.xlu0 %v6233_v55, %s5588_s23  ;;  %v1661_v31 = vmul.f32 %v1659_v16, %v6233_v55 }
 0x367   :  { %1663 = vrot.lane.b32.xlu1 %v1661_v31, %s5588_s23  ;;  %1284 = vmatpush.bf16.msrb.mxu3 %v5882_v45  ;;  %v9112_v31 = vld [vmem:[#allocation79_spill] sm:$0xff] }
 0x368   :  { %1244 = vmatpush.bf16.msrb.mxu0 %v5760_v10 }
 0x36a   :  { %4779 = vmatmul.msk.bf16.vlgmr.msra.gmra.mxu3 %vm5900_vm2, %v6244_v37 }
 0x36b   :  { %1285 = vmatpush.bf16.msrb.mxu3 %v5886_v59 }
 0x36c   :  { %1245 = vmatpush.bf16.msrb.mxu0 %v9067_v35 }
 0x36f   :  { %1867 = vrot.lane.b32.xlu1 %v8809_v0, %s5596_s22  ;;  %1286 = vmatpush.bf16.msrb.mxu3 %v5889_v7  ;;  %v1019_v0 = vadd.f32 %v6209_v60, %v9112_v31 }
 0x370   :  { %1246 = vmatpush.bf16.msrb.mxu0 %v9069_v29 }
 0x373   :  { %1287 = vmatpush.bf16.msrb.mxu3 %v5892_v25 }
 0x374   :  { %1247 = vmatpush.bf16.msrb.mxu0 %v9071_v26 }
 0x377   :  { %1288 = vmatpush.bf16.msrb.mxu3 %v5895_v27 }
 0x378   :  { %1248 = vmatpush.bf16.msrb.mxu0 %v9072_v3 }
 0x37a   :  { %4785 = vmatmul.msk.bf16.vlgmr.msrb.gmra.mxu3 %vm5900_vm2, %v6244_v37 }
 0x37b   :  { %1449 = vmatpush.bf16.msra.mxu3 %v5732_v34 }
 0x37c   :  { %1249 = vmatpush.bf16.msrb.mxu0 %v9073_v14 }
 0x37f   :  { %1450 = vmatpush.bf16.msra.mxu3 %v5737_v38 }
 0x383   :  { %1451 = vmatpush.bf16.msra.mxu3 %v5743_v47 }
 0x387   :  { %1452 = vmatpush.bf16.msra.mxu3 %v5754_v63 }
 0x38b   :  { %1453 = vmatpush.bf16.msra.mxu3 %v9099_v52  ;;  %v9115_v52 = vld [vmem:[#allocation80_spill] sm:$0xff] }
 0x38c   :  { %v1045_v60 = vadd.f32 %v6207_v49, %v9115_v52 }
 0x38f   :  { %1454 = vmatpush.bf16.msra.mxu3 %v9100_v15 }
 0x393   :  { %1455 = vmatpush.bf16.msra.mxu3 %v9101_v56 }
 0x397   :  { %1456 = vmatpush.bf16.msra.mxu3 %v9102_v12  ;;  %v9114_v12 = vld [vmem:[#allocation27_spill] sm:$0xff] }
 0x39b   :  { %1501 = vmatpush.bf16.msrb.mxu3 %v9103_v8 }
 0x39f   :  { %1502 = vmatpush.bf16.msrb.mxu3 %v9104_v28 }
 0x3a3   :  { %1503 = vmatpush.bf16.msrb.mxu3 %v9105_v40 }
 0x3a7   :  { %1504 = vmatpush.bf16.msrb.mxu3 %v9106_v39  ;;  %v9113_v39 = vld [vmem:[#allocation26_spill] sm:$0xff] }
 0x3ab   :  { %1505 = vmatpush.bf16.msrb.mxu3 %v9107_v17  ;;  %v1878_v17 = vmul.f32 %v6015_v42, %v9113_v39 }
 0x3af   :  { %1506 = vmatpush.bf16.msrb.mxu3 %v9108_v53 }
 0x3b3   :  { %1507 = vmatpush.bf16.msrb.mxu3 %v9109_v2  ;;  %v1879_v2 = vadd.f32 %v1878_v17, %v9114_v12  ;;  %v1058_v17 = vadd.f32 %v6174_v43, %v1045_v60 }
 0x3b7   :  { %1508 = vmatpush.bf16.msrb.mxu3 %v9110_v58 }
 0x3bc   :  { %v6281_v16 = vpop.f32.mrf.mxu0 }
 0x3bd   :  { %9111 = vst [vmem:[#allocation84_spill] sm:$0xff] %v6281_v16 }
 0x3c4   :  { %v914_v4 = vpop.f32.mrf.mxu0 }
 0x3c5   :  { %v1880_v4 = vmax.f32 %v1879_v2, 0.0 }
 0x3c7   :  { %v1881_v63 = vsub.f32 0.0, %v1880_v4 }
 0x3c9   :  { %v1882_v49 = vmul.f32 1.442695, %v1881_v63 }
 0x3cc   :  { %v1031_v6 = vpop.f32.mrf.mxu0 }
 0x3cd   :  { %v1032_v28 = vadd.f32 %v1031_v6, %v1019_v0  ;;  %v9116_v0 = vsub.f32 1.0, %v5997_v18 }
 0x3cf   :  { %v4775_v8 = vmul.f32 -1.442695, %v1032_v28  ;;  %v6285_v40 = vpop.permute.xlu0 %1442  ;;  %v6295_v28 = vpop.permute.xlu2 %1670 }
 0x3d0   :  { %9117 = vst [vmem:[#allocation85_spill] sm:$0xff] %v6295_v28  ;;  %v9144_v28 = vld [vmem:[#allocation25_spill] sm:$0xff] }
 0x3d1   :  { %5075 = vpow2.f32 %v4775_v8 }
 0x3d4   :  { %v1033_v53 = vpop.f32.mrf.mxu0 }
 0x3d7   :  { %v5076_v56 = vpop.eup %5075  ;;  %v1653_v58 = vpop.permute.xlu0 %1652 }
 0x3d8   :  { %v1083_v15 = vadd.f32 1.0, %v5076_v56  ;;  %v1655_v6 = vmul.f32 %v1653_v58, %v5997_v18  ;;  %v1892_v43 = vpop.permute.xlu2 %1891 }
 0x3d9   :  { %v1664_v16 = vpop.permute.xlu1 %1663 }
 0x3da   :  { %5077 = vrcp.f32 %v1083_v15  ;;  %v1666_v8 = vmul.f32 %v1664_v16, %v9116_v0  ;;  %v1095_v18 = vand.u32 2147483648, %v1083_v15  ;;  %vm1089_vm3 = vweird.f32 %v1083_v15 }
 0x3dc   :  { %v1667_v31 = vadd.f32 %v1666_v8, %v1655_v6  ;;  %v1096_v63 = vor.u32 1.1754944e-38, %v1095_v18 }
 0x3dd   :  { %v1110_v53 = vpop.f32.mrf.mxu3 }
 0x3de   :  { %1675 = vrot.lane.b32.xlu0 %v1667_v31, %s5596_s22  ;;  %v1114_v2 = vadd.f32 %v1110_v53, %v1058_v17  ;;  %v1093_v31 = vand.u32 2147483647, %v1083_v15 }
 0x3e0   :  { %v5078_v56 = vpop.eup %5077  ;;  %5079 = vtanh.f32 %v1114_v2  ;;  %vm1094_vm5 = vcmp.eq.f32.partialorder %v1093_v31, 8.507059e+37  ;;  %v1152_v2 = vstv %s1151_s18  ;;  %s2316_s18 = scalar_select %p4836_p6, 1, 0 }
 0x3e1   :  { %v1085_v47 = vmul.f32 %v5078_v56, %v1083_v15  ;;  %v1868_v38 = vpop.permute.xlu1 %1867  ;;  %vm1090_vm1 = vweird.f32 %v5078_v56  ;;  %5081 = vpow2.f32 %v1882_v49  ;;  %vm6320_vm6 = vcmp.eq.s32.totalorder %v1152_v2, 1  ;;  %v9134_v2 = vld [vmem:[#allocation47_spill] sm:$0xff] }
 0x3e2   :  { %v1870_v52 = vmul.f32 %v1868_v38, %v6233_v55  ;;  %vm1091_vm4 = vmor %vm1089_vm3, %vm1090_vm1 }
 0x3e3   :  { %v1086_v58 = vsub.f32 1.0, %v1085_v47 }
 0x3e4   :  { %v6304_v16 = vadd.f32 %v1870_v52, %v6015_v42  ;;  %v6314_v52 = vld [vmem:[#allocation8 + $0x30] sm:$0xff] }
 0x3e5   :  { %v1087_v4 = vmul.f32 %v5078_v56, %v1086_v58  ;;  %v1112_v60 = vpop.f32.mrf.mxu3  ;;  %v8816_v15 = vsub.f32 1.0, %v6314_v52 }
 0x3e6   :  { %1885 = vrot.lane.b32.xlu0 %v6304_v16, %s5588_s23  ;;  %v1894_v38 = vmul.f32 %v1892_v43, %v6304_v16  ;;  %v5080_v6 = vpop.eup %5079 }
 0x3e7   :  { %v1088_v47 = vadd.f32 %v5078_v56, %v1087_v4  ;;  %v5082_v8 = vpop.eup %5081 }
 0x3e8   :  { %1896 = vrot.lane.b32.xlu1 %v1894_v38, %s5588_s23  ;;  %v9122_v38 = vld [vmem:[#allocation71_spill] sm:$0xff] }
 0x3e9   :  { %v1092_v55 = vsel %vm1091_vm4, %v5078_v56, %v1088_v47  ;;  %v9124_v47 = vld [vmem:[#allocation72_spill] sm:$0xff] }
 0x3ea   :  { %v1097_v0 = vsel %vm1094_vm5, %v1096_v63, %v1092_v55  ;;  %v9125_v63 = vld [vmem:[#allocation78_spill] sm:$0xff]  ;;  %v9127_v55 = vld [vmem:[#allocation73_spill] sm:$0xff] }
 0x3eb   :  { %v1116_v53 = vsub.f32 1.0, %v1097_v0  ;;  %v1118_v17 = vmul.f32 %v5080_v6, %v1097_v0  ;;  %v9128_v6 = vld [vmem:[#allocation35_spill] sm:$0xff] }
 0x3ec   :  { %v9130_v0 = vld [vmem:[#allocation39_spill] sm:$0xff] }
 0x3ed   :  { %v6317_v49 = vpop.f32.mrf.mxu3  ;;  %v1117_v58 = vmul.f32 %v1116_v53, %v6110_v13  ;;  %v9132_v53 = vld [vmem:[#allocation43_spill] sm:$0xff] }
 0x3ee   :  { %1903 = vperm.xlu0 %5034, %v5082_v8   ;;  %v9131_v8 = vld [vmem:[#allocation34_spill] sm:$0xff] }
 0x3ef   :  { %v1119_v56 = vadd.f32 %v1118_v17, %v1117_v58  ;;  %v9133_v17 = vld [vmem:[#allocation38_spill] sm:$0xff] }
 0x3f0   :  { %2100 = vrot.lane.b32.xlu1 %v8816_v15, %s5596_s22  ;;  %v9135_v58 = vld [vmem:[#allocation42_spill] sm:$0xff] }
 0x3f1   :  { %v1120_v43 = vpack.c.bf16 %v1119_v56, %v1119_v56  ;;  %v6330_v4 = vsel %vm6320_vm6, %v1119_v56, %v6107_v32  ;;  %v9136_v56 = vld [vmem:[#allocation52_spill] sm:$0xff] }
 0x3f2   :  { %v6334_v31 = vmul.f32 %v6127_v5, %v6330_v4  ;;  %v9120_v5 = vld [vmem:[#allocation70_spill] sm:$0xff] }
 0x3f3   :  { %1129 = vmatmul.bf16.vlgmr.msra.gmra.mxu0 %v1120_v43  ;;  %v9137_v43 = vld [vmem:[#allocation46_spill] sm:$0xff] }
 0x3f4   :  { %v1214_v13 = vpack.c.bf16 %v6334_v31, %v6334_v31  ;;  %1334 = vmatpush.bf16.msra.mxu0 %v9077_v11 }
 0x3f5   :  { %v1240_v60 = vpop.f32.mrf.mxu3 }
 0x3f6   :  { %1224 = vmatmul.bf16.vlgmr.msra.gmra.mxu2 %v1214_v13  ;;  %v9139_v60 = vld [vmem:[#allocation51_spill] sm:$0xff] }
 0x3f7   :  { %1369 = vmatpush.bf16.msra.mxu2 %v6129_v22 }
 0x3f8   :  { %1335 = vmatpush.bf16.msra.mxu0 %v9078_v21  ;;  %v9121_v21 = vld [vmem:[#allocation75_spill] sm:$0xff] }
 0x3fb   :  { %1370 = vmatpush.bf16.msra.mxu2 %v6132_v50 }
 0x3fc   :  { %1336 = vmatpush.bf16.msra.mxu0 %v9079_v24  ;;  %v9123_v24 = vld [vmem:[#allocation76_spill] sm:$0xff] }
 0x3fd   :  { %v6343_v32 = vpop.f32.mrf.mxu3 }
 0x3ff   :  { %1371 = vmatpush.bf16.msra.mxu2 %v6138_v1 }
 0x400   :  { %1337 = vmatpush.bf16.msra.mxu0 %v9080_v57  ;;  %v9126_v57 = vld [vmem:[#allocation31_spill] sm:$0xff] }
 0x403   :  { %1250 = vmatmul.bf16.vlgmr.msrb.gmra.mxu0 %v1214_v13  ;;  %1372 = vmatpush.bf16.msra.mxu2 %v6147_v33 }
 0x404   :  { %1338 = vmatpush.bf16.msra.mxu0 %v9081_v48  ;;  %v9129_v48 = vld [vmem:[#allocation32_spill] sm:$0xff] }
 0x405   :  { %v1292_v11 = vpop.f32.mrf.mxu3 }
 0x406   :  { %1276 = vmatmul.bf16.vlgmr.msrb.gmra.mxu2 %v1214_v13  ;;  %v9138_v13 = vld [vmem:[#allocation55_spill] sm:$0xff]  ;;  %v9140_v11 = vld [vmem:[#allocation58_spill] sm:$0xff] }
 0x407   :  { %1373 = vmatpush.bf16.msra.mxu2 %v9120_v5 }
 0x408   :  { %1339 = vmatpush.bf16.msra.mxu0 %v9121_v21  ;;  %v9141_v21 = vld [vmem:[#allocation56_spill] sm:$0xff] }
 0x40b   :  { %1374 = vmatpush.bf16.msra.mxu2 %v9122_v38 }
 0x40c   :  { %1340 = vmatpush.bf16.msra.mxu0 %v9123_v24  ;;  %v9142_v24 = vld [vmem:[#allocation64_spill] sm:$0xff] }
 0x40f   :  { %1375 = vmatpush.bf16.msra.mxu2 %v9124_v47 }
 0x410   :  { %1341 = vmatpush.bf16.msra.mxu0 %v9125_v63  ;;  %v9143_v63 = vld [vmem:[#allocation24_spill] sm:$0xff] }
 0x411   :  { %v2105_v15 = vmul.f32 %v6314_v52, %v9143_v63 }
 0x413   :  { %1376 = vmatpush.bf16.msra.mxu2 %v9127_v55 }
 0x414   :  { %1462 = vmatpush.bf16.msrb.mxu0 %v9126_v57 }
 0x417   :  { %1488 = vmatpush.bf16.msrb.mxu2 %v9128_v6 }
 0x418   :  { %1463 = vmatpush.bf16.msrb.mxu0 %v9129_v48 }
 0x41b   :  { %1489 = vmatpush.bf16.msrb.mxu2 %v9130_v0 }
 0x41c   :  { %1464 = vmatpush.bf16.msrb.mxu0 %v9131_v8 }
 0x41f   :  { %1490 = vmatpush.bf16.msrb.mxu2 %v9132_v53  ;;  %v6380_v53 = vld [vmem:[#allocation8 + $0x38] sm:$0xff] }
 0x420   :  { %1465 = vmatpush.bf16.msrb.mxu0 %v9133_v17  ;;  %v2338_v0 = vmul.f32 %v6380_v53, %v9143_v63 }
 0x423   :  { %1491 = vmatpush.bf16.msrb.mxu2 %v9134_v2  ;;  %v2106_v2 = vadd.f32 %v2105_v15, %v9144_v28 }
 0x424   :  { %1466 = vmatpush.bf16.msrb.mxu0 %v9135_v58 }
 0x427   :  { %1492 = vmatpush.bf16.msrb.mxu2 %v9136_v56  ;;  %v2107_v56 = vmax.f32 %v2106_v2, 0.0 }
 0x428   :  { %1467 = vmatpush.bf16.msrb.mxu0 %v9137_v43  ;;  %v2111_v43 = vmul.f32 %v6314_v52, %v9113_v39 }
 0x42b   :  { %1493 = vmatpush.bf16.msrb.mxu2 %v9138_v13  ;;  %v2108_v13 = vsub.f32 0.0, %v2107_v56  ;;  %v2339_v56 = vadd.f32 %v2338_v0, %v9144_v28  ;;  %v6398_v0 = vld [vmem:[#allocation8 + $0x40] sm:$0xff] }
 0x42c   :  { %1468 = vmatpush.bf16.msrb.mxu0 %v9139_v60  ;;  %v2112_v60 = vadd.f32 %v2111_v43, %v9114_v12 }
 0x42d   :  { %v2109_v17 = vmul.f32 1.442695, %v2108_v13  ;;  %v2340_v55 = vmax.f32 %v2339_v56, 0.0  ;;  %v2344_v13 = vmul.f32 %v6380_v53, %v9113_v39 }
 0x42f   :  { %1494 = vmatpush.bf16.msrb.mxu2 %v9140_v11  ;;  %5083 = vpow2.f32 %v2109_v17  ;;  %v2345_v17 = vadd.f32 %v2344_v13, %v9114_v12 }
 0x430   :  { %1469 = vmatpush.bf16.msrb.mxu0 %v9141_v21 }
 0x433   :  { %1495 = vmatpush.bf16.msrb.mxu2 %v9142_v24  ;;  %v2113_v24 = vmax.f32 %v2112_v60, 0.0 }
 0x435   :  { %v2114_v6 = vsub.f32 0.0, %v2113_v24  ;;  %v5084_v57 = vpop.eup %5083 }
 0x437   :  { %v2115_v48 = vmul.f32 1.442695, %v2114_v6 }
 0x439   :  { %5085 = vpow2.f32 %v2115_v48 }
 0x450   :  { %v6375_v58 = vpop.permute.xlu0 %1675 }
 0x451   :  { %9145 = vst [vmem:[#allocation70_spill] sm:$0xff] %v6375_v58  ;;  %v9146_v58 = vsub.f32 1.0, %v6015_v42 }
 0x458   :  { %v1886_v11 = vpop.permute.xlu0 %1885 }
 0x459   :  { %v1888_v15 = vmul.f32 %v1886_v11, %v6015_v42  ;;  %v2341_v42 = vsub.f32 0.0, %v2340_v55 }
 0x45a   :  { %v1897_v21 = vpop.permute.xlu1 %1896 }
 0x45b   :  { %v1899_v2 = vmul.f32 %v1897_v21, %v9146_v58  ;;  %v2342_v6 = vmul.f32 1.442695, %v2341_v42  ;;  %v2571_v58 = vmul.f32 %v6398_v0, %v9143_v63 }
 0x45d   :  { %v1900_v8 = vadd.f32 %v1899_v2, %v1888_v15  ;;  %5087 = vpow2.f32 %v2342_v6  ;;  %v2572_v24 = vadd.f32 %v2571_v58, %v9144_v28  ;;  %v2577_v2 = vmul.f32 %v6398_v0, %v9113_v39 }
 0x45f   :  { %1908 = vrot.lane.b32.xlu2 %v1900_v8, %s5596_s22  ;;  %v2346_v8 = vmax.f32 %v2345_v17, 0.0  ;;  %v2573_v15 = vmax.f32 %v2572_v24, 0.0  ;;  %v2578_v42 = vadd.f32 %v2577_v2, %v9114_v12  ;;  %v6407_v17 = vld [vmem:[#allocation8 + $0x48] sm:$0xff] }
 0x460   :  { %v2804_v24 = vmul.f32 %v6407_v17, %v9143_v63 }
 0x461   :  { %v2347_v21 = vsub.f32 0.0, %v2346_v8 }
 0x462   :  { %v2101_v43 = vpop.permute.xlu1 %2100 }
 0x463   :  { %v2103_v60 = vmul.f32 %v2101_v43, %v6304_v16  ;;  %v5086_v16 = vpop.eup %5085 }
 0x464   :  { %v5088_v43 = vpop.eup %5087 }
 0x465   :  { %v6393_v11 = vadd.f32 %v2103_v60, %v6314_v52  ;;  %v2574_v60 = vsub.f32 0.0, %v2573_v15 }
 0x467   :  { %2124 = vperm.xlu2 %5035, %v5084_v57   ;;  %2118 = vrot.lane.b32.xlu0 %v6393_v11, %s5588_s23  ;;  %v2348_v57 = vmul.f32 1.442695, %v2347_v21  ;;  %v2579_v21 = vmax.f32 %v2578_v42, 0.0 }
 0x469   :  { %5089 = vpow2.f32 %v2348_v57  ;;  %v9147_v57 = vld [vmem:[#allocation81_spill] sm:$0xff]  ;;  %v2580_v2 = vsub.f32 0.0, %v2579_v21 }
 0x46f   :  { %2136 = vperm.xlu2 %5035, %v5086_v16   ;;  %v2575_v16 = vmul.f32 1.442695, %v2574_v60  ;;  %v2581_v60 = vmul.f32 1.442695, %v2580_v2 }
 0x470   :  { %v1130_v55 = vpop.f32.mrf.mxu0 }
 0x471   :  { %v1131_v48 = vadd.f32 %v6201_v19, %v1130_v55  ;;  %v5090_v55 = vpop.eup %5089  ;;  %5091 = vpow2.f32 %v2575_v16 }
 0x473   :  { %v1134_v56 = vmax.f32 %v1131_v48, 0.0 }
 0x475   :  { %v1135_v13 = vpack.c.bf16 %v1134_v56, %v1134_v56  ;;  %v2805_v56 = vadd.f32 %v2804_v24, %v9144_v28  ;;  %v9172_v28 = vld [vmem:[#allocation80_spill] sm:$0xff] }
 0x477   :  { %2357 = vperm.xlu2 %5035, %v5088_v43   ;;  %1144 = vmatmul.bf16.vlgmr.msra.gmra.mxu1 %v1135_v13  ;;  %v9148_v43 = vld [vmem:[#allocation82_spill] sm:$0xff]  ;;  %v2806_v42 = vmax.f32 %v2805_v56, 0.0 }
 0x478   :  { %v1132_v6 = vpop.f32.mrf.mxu0  ;;  %1354 = vmatpush.bf16.msra.mxu1 %v6039_v51 }
 0x479   :  { %v1225_v8 = vpop.f32.mrf.mxu2  ;;  %v5092_v6 = vpop.eup %5091 }
 0x47a   :  { %v1226_v58 = vadd.f32 %v1225_v8, %v5967_v41  ;;  %v9149_v8 = vld [vmem:[#allocation83_spill] sm:$0xff] }
 0x47c   :  { %v1239_v48 = vadd.f32 %v6317_v49, %v1226_v58  ;;  %1355 = vmatpush.bf16.msra.mxu1 %v9147_v57  ;;  %v2807_v58 = vsub.f32 0.0, %v2806_v42 }
 0x47e   :  { %v4786_v15 = vmul.f32 -1.442695, %v1239_v48  ;;  %v2808_v24 = vmul.f32 1.442695, %v2807_v58 }
 0x47f   :  { %2369 = vperm.xlu2 %5035, %v5090_v55  }
 0x480   :  { %5093 = vpow2.f32 %v4786_v15  ;;  %v6416_v51 = vpop.f32.mrf.mxu0  ;;  %1356 = vmatpush.bf16.msra.mxu1 %v9148_v43 }
 0x481   :  { %v1227_v13 = vpop.f32.mrf.mxu2  ;;  %5095 = vpow2.f32 %v2581_v60 }
 0x484   :  { %1357 = vmatpush.bf16.msra.mxu1 %v9149_v8 }
 0x486   :  { %v5094_v49 = vpop.eup %5093 }
 0x487   :  { %v1297_v48 = vadd.f32 1.0, %v5094_v49  ;;  %2590 = vperm.xlu2 %5035, %v5092_v6   ;;  %4782 = vmatmul.msk.bf16.vlgmr.msrb.gmra.mxu1 %vm5900_vm2, %v6244_v37  ;;  %v5096_v55 = vpop.eup %5095 }
 0x488   :  { %v1253_v16 = vpop.f32.mrf.mxu0  ;;  %1358 = vmatpush.bf16.msra.mxu1 %v6065_v20 }
 0x489   :  { %5097 = vrcp.f32 %v1297_v48  ;;  %v6424_v21 = vpop.f32.mrf.mxu2  ;;  %v1309_v43 = vand.u32 2147483648, %v1297_v48  ;;  %v1307_v20 = vand.u32 2147483647, %v1297_v48  ;;  %vm1303_vm8 = vweird.f32 %v1297_v48 }
 0x48a   :  { %5099 = vpow2.f32 %v2808_v24 }
 0x48b   :  { %vm1308_vm10 = vcmp.eq.f32.partialorder %v1307_v20, 8.507059e+37  ;;  %v9159_v20 = vld [vmem:[#allocation53_spill] sm:$0xff] }
 0x48c   :  { %1359 = vmatpush.bf16.msra.mxu1 %v6069_v36  ;;  %v1310_v36 = vor.u32 1.1754944e-38, %v1309_v43  ;;  %v9156_v43 = vld [vmem:[#allocation44_spill] sm:$0xff] }
 0x48f   :  { %v5098_v57 = vpop.eup %5097  ;;  %2602 = vperm.xlu2 %5035, %v5096_v55   ;;  %v9152_v55 = vld [vmem:[#allocation30_spill] sm:$0xff] }
 0x490   :  { %v1299_v15 = vmul.f32 %v5098_v57, %v1297_v48  ;;  %1360 = vmatpush.bf16.msra.mxu1 %v6074_v62  ;;  %v5100_v37 = vpop.eup %5099  ;;  %vm1304_vm7 = vweird.f32 %v5098_v57  ;;  %v9151_v48 = vld [vmem:[#allocation29_spill] sm:$0xff] }
 0x491   :  { %v1279_v2 = vpop.f32.mrf.mxu2  ;;  %vm1305_vm9 = vmor %vm1303_vm8, %vm1304_vm7 }
 0x492   :  { %v1300_v56 = vsub.f32 1.0, %v1299_v15  ;;  %v9153_v15 = vld [vmem:[#allocation33_spill] sm:$0xff]  ;;  %v9154_v2 = vld [vmem:[#allocation36_spill] sm:$0xff] }
 0x494   :  { %v1301_v13 = vmul.f32 %v5098_v57, %v1300_v56  ;;  %1361 = vmatpush.bf16.msra.mxu1 %v6079_v23  ;;  %v5263_v23 = vld [vmem:[#allocation8 + $0x18] sm:$0xff]  ;;  %v9155_v56 = vld [vmem:[#allocation40_spill] sm:$0xff] }
 0x495   :  { %v1445_v49 = vsel %vm140_vm0, %v6285_v40, %v5263_v23  ;;  %v9166_v23 = vld [vmem:[#allocation84_spill] sm:$0xff] }
 0x496   :  { %v1302_v60 = vadd.f32 %v5098_v57, %v1301_v13  ;;  %v6442_v58 = vpack.c.bf16 %v1445_v49, %v1445_v49  ;;  %v9158_v13 = vld [vmem:[#allocation49_spill] sm:$0xff] }
 0x497   :  { %2823 = vperm.xlu2 %5035, %v5100_v37   ;;  %v9157_v37 = vld [vmem:[#allocation48_spill] sm:$0xff] }
 0x498   :  { %1475 = vmatpush.bf16.msrb.mxu1 %v5739_v44  ;;  %v1306_v42 = vsel %vm1305_vm9, %v5098_v57, %v1302_v60  ;;  %v8817_v57 = vsub.f32 1.0, %v6380_v53  ;;  %v9160_v60 = vld [vmem:[#allocation57_spill] sm:$0xff] }
 0x499   :  { %v1311_v6 = vsel %vm1308_vm10, %v1310_v36, %v1306_v42  ;;  %v9161_v36 = vld [vmem:[#allocation59_spill] sm:$0xff]  ;;  %v9162_v42 = vld [vmem:[#allocation60_spill] sm:$0xff] }
 0x49a   :  { %v1332_v62 = vmul.f32 %v1311_v6, %v6334_v31  ;;  %v9163_v6 = vld [vmem:[#allocation61_spill] sm:$0xff] }
 0x49c   :  { %1476 = vmatpush.bf16.msrb.mxu1 %v5748_v54  ;;  %v1333_v8 = vpack.c.bf16 %v1332_v62, %v1332_v62  ;;  %v6481_v62 = vld [vmem:[%s8688_s10] ss:$0 sm:$0xff] }
 0x49d   :  { %9164 = vst [vmem:[#allocation71_spill] sm:$0xff] %v6481_v62  ;;  %v913_v49 = vadd.f32 %v6481_v62, %v9166_v23  ;;  %v9171_v23 = vld [vmem:[#allocation79_spill] sm:$0xff] }
 0x49e   :  { %1342 = vmatmul.bf16.vlgmr.msra.gmra.mxu0 %v1333_v8  ;;  %v9165_v8 = vld [vmem:[#allocation62_spill] sm:$0xff] }
 0x49f   :  { %1514 = vmatpush.bf16.msra.mxu0 %v5844_v9 }
 0x4a0   :  { %1477 = vmatpush.bf16.msrb.mxu1 %v5760_v10 }
 0x4a3   :  { %1515 = vmatpush.bf16.msra.mxu0 %v5855_v30 }
 0x4a4   :  { %1478 = vmatpush.bf16.msrb.mxu1 %v9067_v35 }
 0x4a7   :  { %1516 = vmatpush.bf16.msra.mxu0 %v5863_v46 }
 0x4a8   :  { %1479 = vmatpush.bf16.msrb.mxu1 %v9069_v29 }
 0x4ab   :  { %1517 = vmatpush.bf16.msra.mxu0 %v5882_v45 }
 0x4ac   :  { %1480 = vmatpush.bf16.msrb.mxu1 %v9071_v26 }
 0x4ae   :  { %4791 = vmatmul.msk.bf16.vlgmr.msrb.gmra.mxu0 %vm5900_vm2, %v6442_v58 }
 0x4af   :  { %1518 = vmatpush.bf16.msra.mxu0 %v5886_v59 }
 0x4b0   :  { %1481 = vmatpush.bf16.msrb.mxu1 %v9072_v3 }
 0x4b3   :  { %1519 = vmatpush.bf16.msra.mxu0 %v5889_v7 }
 0x4b4   :  { %1482 = vmatpush.bf16.msrb.mxu1 %v9073_v14 }
 0x4b7   :  { %1520 = vmatpush.bf16.msra.mxu0 %v5892_v25 }
 0x4b9   :  { %v6452_v40 = vpop.permute.xlu2 %1908 }
 0x4ba   :  { %9150 = vst [vmem:[#allocation75_spill] sm:$0xff] %v6452_v40  ;;  %v9167_v40 = vld [vmem:[#allocation63_spill] sm:$0xff] }
 0x4bb   :  { %1521 = vmatpush.bf16.msra.mxu0 %v5895_v27 }
 0x4be   :  { %4797 = vmatmul.msk.bf16.vlgmr.msra.gmra.mxu0 %vm5900_vm2, %v6442_v58 }
 0x4bf   :  { %1682 = vmatpush.bf16.msrb.mxu0 %v5732_v34 }
 0x4c1   :  { %v2125_v16 = vpop.permute.xlu2 %2124 }
 0x4c2   :  { %v2127_v24 = vmul.f32 %v2125_v16, %v6393_v11  ;;  %v5038_v16 = vld [vmem:[%s8681_s3] ss:$0 sm:$0xff] }
 0x4c3   :  { %1683 = vmatpush.bf16.msrb.mxu0 %v9151_v48  ;;  %v6493_v63 = vsel %vm6101_vm11, %v913_v49, %v5038_v16  ;;  %v1278_v49 = vadd.f32 %v6424_v21, %v9172_v28 }
 0x4c4   :  { %2129 = vrot.lane.b32.xlu1 %v2127_v24, %s5588_s23  ;;  %9169 = vst [vmem:[#allocation76_spill] sm:$0xff] %v6493_v63 }
 0x4c5   :  { %v1291_v18 = vadd.f32 %v6343_v32, %v1278_v49  ;;  %v1385_v49 = vstv %s1384_s4  ;;  %s2549_s4 = scalar_select %p4848_p7, 1, 0 }
 0x4c6   :  { %vm6509_vm15 = vcmp.eq.s32.totalorder %v1385_v49, 1  ;;  %v6551_v49 = vld [vmem:[#allocation11 + $0x18] sm:$0xff] }
 0x4c7   :  { %1684 = vmatpush.bf16.msrb.mxu0 %v9152_v55  ;;  %9179 = vst [vmem:[#allocation82_spill] sm:$0xff] %v6551_v49 }
 0x4cb   :  { %1685 = vmatpush.bf16.msrb.mxu0 %v9153_v15 }
 0x4cc   :  { %2333 = vrot.lane.b32.xlu1 %v8817_v57, %s5596_s22 }
 0x4cf   :  { %1686 = vmatpush.bf16.msrb.mxu0 %v9154_v2 }
 0x4d3   :  { %1687 = vmatpush.bf16.msrb.mxu0 %v9155_v56 }
 0x4d7   :  { %1688 = vmatpush.bf16.msrb.mxu0 %v9156_v43 }
 0x4db   :  { %1689 = vmatpush.bf16.msrb.mxu0 %v9157_v37 }
 0x4df   :  { %1734 = vmatpush.bf16.msra.mxu0 %v9158_v13 }
 0x4e3   :  { %1735 = vmatpush.bf16.msra.mxu0 %v9159_v20 }
 0x4e7   :  { %1736 = vmatpush.bf16.msra.mxu0 %v9160_v60 }
 0x4eb   :  { %1737 = vmatpush.bf16.msra.mxu0 %v9161_v36 }
 0x4ef   :  { %1738 = vmatpush.bf16.msra.mxu0 %v9162_v42 }
 0x4f3   :  { %1739 = vmatpush.bf16.msra.mxu0 %v9163_v6 }
 0x4f4   :  { %v1145_v24 = vpop.f32.mrf.mxu1 }
 0x4f5   :  { %v1146_v57 = vadd.f32 %v6481_v62, %v1145_v24 }
 0x4f7   :  { %1740 = vmatpush.bf16.msra.mxu0 %v9165_v8  ;;  %v6498_v12 = vsel %vm6320_vm6, %v1146_v57, %v6493_v63  ;;  %v1252_v8 = vadd.f32 %v6416_v51, %v9171_v23 }
 0x4f8   :  { %9170 = vst [vmem:[#allocation72_spill] sm:$0xff] %v6498_v12 }
 0x4fb   :  { %1741 = vmatpush.bf16.msra.mxu0 %v9167_v40 }
 0x4fc   :  { %v1147_v39 = vpop.f32.mrf.mxu1 }
 0x504   :  { %v1264_v6 = vpop.f32.mrf.mxu1 }
 0x505   :  { %v1265_v42 = vadd.f32 %v1264_v6, %v1252_v8 }
 0x507   :  { %v4787_v36 = vmul.f32 -1.442695, %v1265_v42 }
 0x509   :  { %5101 = vpow2.f32 %v4787_v36 }
 0x50c   :  { %v1266_v24 = vpop.f32.mrf.mxu1 }
 0x50f   :  { %v5102_v62 = vpop.eup %5101 }
 0x510   :  { %v1316_v40 = vadd.f32 1.0, %v5102_v62 }
 0x512   :  { %5103 = vrcp.f32 %v1316_v40  ;;  %v1328_v51 = vand.u32 2147483648, %v1316_v40  ;;  %v1326_v6 = vand.u32 2147483647, %v1316_v40  ;;  %vm1322_vm12 = vweird.f32 %v1316_v40 }
 0x514   :  { %v1329_v21 = vor.u32 1.1754944e-38, %v1328_v51  ;;  %vm1327_vm14 = vcmp.eq.f32.partialorder %v1326_v6, 8.507059e+37  ;;  %v6536_v6 = vld [vmem:[#allocation11 + $0x28] sm:$0xff] }
 0x518   :  { %v5104_v16 = vpop.eup %5103 }
 0x519   :  { %v1318_v60 = vmul.f32 %v5104_v16, %v1316_v40  ;;  %vm1323_vm11 = vweird.f32 %v5104_v16 }
 0x51a   :  { %vm1324_vm13 = vmor %vm1322_vm12, %vm1323_vm11 }
 0x51b   :  { %v1319_v57 = vsub.f32 1.0, %v1318_v60  ;;  %v1343_v39 = vpop.f32.mrf.mxu0 }
 0x51c   :  { %v1347_v42 = vadd.f32 %v1343_v39, %v1291_v18  ;;  %v9224_v18 = vld [vmem:[#allocation79_spill] sm:$0xff] }
 0x51d   :  { %v1320_v36 = vmul.f32 %v5104_v16, %v1319_v57 }
 0x51e   :  { %5105 = vtanh.f32 %v1347_v42 }
 0x51f   :  { %v1321_v62 = vadd.f32 %v5104_v16, %v1320_v36  ;;  %v6528_v36 = vld [vmem:[#allocation11 + $0x38] sm:$0xff] }
 0x521   :  { %v1325_v8 = vsel %vm1324_vm13, %v5104_v16, %v1321_v62  ;;  %v9175_v16 = vld [vmem:[#allocation74_spill] sm:$0xff] }
 0x522   :  { %v1330_v32 = vsel %vm1327_vm14, %v1329_v21, %v1325_v8  ;;  %v9177_v8 = vsub.f32 1.0, %v6314_v52 }
 0x523   :  { %v1349_v60 = vsub.f32 1.0, %v1330_v32  ;;  %v1345_v24 = vpop.f32.mrf.mxu0 }
 0x524   :  { %v5106_v63 = vpop.eup %5105 }
 0x525   :  { %v1351_v28 = vmul.f32 %v5106_v63, %v1330_v32  ;;  %v1350_v23 = vmul.f32 %v1349_v60, %v6334_v31  ;;  %v6524_v63 = vpop.permute.xlu0 %1903  ;;  %v6545_v60 = vld [vmem:[#allocation11 + $0x20] sm:$0xff] }
 0x526   :  { %9176 = vst [vmem:[#allocation78_spill] sm:$0xff] %v6524_v63  ;;  %v9199_v63 = vld [vmem:[#allocation64_spill] sm:$0xff] }
 0x527   :  { %v1352_v57 = vadd.f32 %v1351_v28, %v1350_v23 }
 0x529   :  { %v1353_v39 = vpack.c.bf16 %v1352_v57, %v1352_v57  ;;  %v6516_v40 = vsel %vm6509_vm15, %v1352_v57, %v6330_v4  ;;  %v6532_v4 = vld [vmem:[#allocation11 + $0x30] sm:$0xff] }
 0x52a   :  { %v6520_v51 = vmul.f32 %v9175_v16, %v6516_v40  ;;  %v6556_v57 = vld [vmem:[#allocation11 + $0x10] sm:$0xff] }
 0x52b   :  { %1362 = vmatmul.bf16.vlgmr.msra.gmra.mxu1 %v1353_v39  ;;  %v6522_v42 = vpop.f32.mrf.mxu0  ;;  %9180 = vst [vmem:[#allocation83_spill] sm:$0xff] %v6556_v57 }
 0x52c   :  { %v1447_v31 = vpack.c.bf16 %v6520_v51, %v6520_v51  ;;  %1567 = vmatpush.bf16.msra.mxu1 %v6528_v36 }
 0x52d   :  { %v2119_v28 = vpop.permute.xlu0 %2118 }
 0x52e   :  { %1457 = vmatmul.bf16.vlgmr.msra.gmra.mxu3 %v1447_v31  ;;  %v2121_v21 = vmul.f32 %v2119_v28, %v6314_v52  ;;  %v6566_v28 = vld [vmem:[#allocation11 + $0x8] sm:$0xff] }
 0x52f   :  { %1602 = vmatpush.bf16.msra.mxu3 %v6129_v22  ;;  %v6543_v22 = vpop.permute.xlu2 %2136  ;;  %9181 = vst [vmem:[#allocation84_spill] sm:$0xff] %v6566_v28 }
 0x530   :  { %1568 = vmatpush.bf16.msra.mxu1 %v6532_v4  ;;  %9178 = vst [vmem:[#allocation81_spill] sm:$0xff] %v6543_v22  ;;  %v9198_v22 = vld [vmem:[#allocation58_spill] sm:$0xff] }
 0x533   :  { %v1473_v23 = vpop.f32.mrf.mxu0  ;;  %1603 = vmatpush.bf16.msra.mxu3 %v6132_v50 }
 0x534   :  { %1569 = vmatpush.bf16.msra.mxu1 %v6536_v6 }
 0x536   :  { %v2130_v62 = vpop.permute.xlu1 %2129 }
 0x537   :  { %v2132_v32 = vmul.f32 %v2130_v62, %v9177_v8  ;;  %1604 = vmatpush.bf16.msra.mxu3 %v6138_v1  ;;  %v2358_v16 = vpop.permute.xlu2 %2357  ;;  %v9184_v62 = vld [vmem:[#allocation73_spill] sm:$0xff]  ;;  %v9187_v8 = vld [vmem:[#allocation34_spill] sm:$0xff] }
 0x538   :  { %1570 = vmatpush.bf16.msra.mxu1 %v6545_v60 }
 0x539   :  { %v2133_v50 = vadd.f32 %v2132_v32, %v2121_v21  ;;  %v9185_v21 = vld [vmem:[#allocation32_spill] sm:$0xff]  ;;  %v9188_v32 = vld [vmem:[#allocation39_spill] sm:$0xff] }
 0x53b   :  { %2141 = vrot.lane.b32.xlu0 %v2133_v50, %s5596_s22  ;;  %1483 = vmatmul.bf16.vlgmr.msrb.gmra.mxu1 %v1447_v31  ;;  %v6549_v24 = vpop.f32.mrf.mxu0  ;;  %v9189_v50 = vld [vmem:[#allocation38_spill] sm:$0xff] }
 0x53c   :  { %1571 = vmatpush.bf16.msra.mxu1 %v6551_v49  ;;  %1605 = vmatpush.bf16.msra.mxu3 %v6147_v33 }
 0x53e   :  { %v2334_v52 = vpop.permute.xlu1 %2333  ;;  %1509 = vmatmul.bf16.vlgmr.msrb.gmra.mxu3 %v1447_v31  ;;  %v9183_v31 = vld [vmem:[#allocation31_spill] sm:$0xff] }
 0x53f   :  { %v2336_v1 = vmul.f32 %v2334_v52, %v6393_v11  ;;  %v6571_v11 = vld [vmem:[#allocation11] sm:$0xff] }
 0x540   :  { %1572 = vmatpush.bf16.msra.mxu1 %v6556_v57  ;;  %1606 = vmatpush.bf16.msra.mxu3 %v9120_v5  ;;  %9182 = vst [vmem:[#allocation37_spill] sm:$0xff] %v6571_v11  ;;  %v8825_v5 = vsub.f32 1.0, %v6398_v0  ;;  %v9191_v52 = vld [vmem:[#allocation42_spill] sm:$0xff] }
 0x541   :  { %v6561_v39 = vadd.f32 %v2336_v1, %v6380_v53  ;;  %v9192_v1 = vld [vmem:[#allocation47_spill] sm:$0xff] }
 0x543   :  { %2351 = vrot.lane.b32.xlu0 %v6561_v39, %s5588_s23  ;;  %v1525_v23 = vpop.f32.mrf.mxu0  ;;  %v2360_v33 = vmul.f32 %v2358_v16, %v6561_v39  ;;  %v9193_v16 = vld [vmem:[#allocation46_spill] sm:$0xff] }
 0x544   :  { %1573 = vmatpush.bf16.msra.mxu1 %v6566_v28  ;;  %1607 = vmatpush.bf16.msra.mxu3 %v9122_v38  ;;  %v9186_v38 = vld [vmem:[#allocation35_spill] sm:$0xff]  ;;  %v9194_v23 = vld [vmem:[#allocation52_spill] sm:$0xff] }
 0x545   :  { %2362 = vrot.lane.b32.xlu1 %v2360_v33, %s5588_s23  ;;  %v9195_v33 = vld [vmem:[#allocation51_spill] sm:$0xff] }
 0x548   :  { %1574 = vmatpush.bf16.msra.mxu1 %v6571_v11  ;;  %1608 = vmatpush.bf16.msra.mxu3 %v9124_v47  ;;  %v9190_v47 = vld [vmem:[#allocation43_spill] sm:$0xff] }
 0x54c   :  { %1695 = vmatpush.bf16.msrb.mxu1 %v9183_v31  ;;  %1609 = vmatpush.bf16.msra.mxu3 %v9184_v62  ;;  %v9196_v62 = vld [vmem:[#allocation55_spill] sm:$0xff] }
 0x54d   :  { %2566 = vrot.lane.b32.xlu1 %v8825_v5, %s5596_s22  ;;  %v9197_v5 = vld [vmem:[#allocation56_spill] sm:$0xff] }
 0x550   :  { %1696 = vmatpush.bf16.msrb.mxu1 %v9185_v21  ;;  %1721 = vmatpush.bf16.msrb.mxu3 %v9186_v38 }
 0x554   :  { %1697 = vmatpush.bf16.msrb.mxu1 %v9187_v8  ;;  %1722 = vmatpush.bf16.msrb.mxu3 %v9188_v32 }
 0x558   :  { %1698 = vmatpush.bf16.msrb.mxu1 %v9189_v50  ;;  %1723 = vmatpush.bf16.msrb.mxu3 %v9190_v47 }
 0x55c   :  { %1699 = vmatpush.bf16.msrb.mxu1 %v9191_v52  ;;  %1724 = vmatpush.bf16.msrb.mxu3 %v9192_v1 }
 0x560   :  { %1700 = vmatpush.bf16.msrb.mxu1 %v9193_v16  ;;  %1725 = vmatpush.bf16.msrb.mxu3 %v9194_v23  ;;  %v6599_v23 = vld [vmem:[#allocation12 + $0x38] sm:$0xff] }
 0x561   :  { %9201 = vst [vmem:[#allocation73_spill] sm:$0xff] %v6599_v23 }
 0x564   :  { %1701 = vmatpush.bf16.msrb.mxu1 %v9195_v33  ;;  %1726 = vmatpush.bf16.msrb.mxu3 %v9196_v62  ;;  %v6604_v62 = vld [vmem:[#allocation12 + $0x30] sm:$0xff] }
 0x565   :  { %9202 = vst [vmem:[#allocation86_spill] sm:$0xff] %v6604_v62 }
 0x568   :  { %1702 = vmatpush.bf16.msrb.mxu1 %v9197_v5  ;;  %1727 = vmatpush.bf16.msrb.mxu3 %v9198_v22 }
 0x56c   :  { %1728 = vmatpush.bf16.msrb.mxu3 %v9199_v63 }
 0x5a8   :  { %v1363_v50 = vpop.f32.mrf.mxu1 }
 0x5a9   :  { %v1364_v47 = vadd.f32 %v6201_v19, %v1363_v50 }
 0x5ab   :  { %v1367_v52 = vmax.f32 %v1364_v47, 0.0 }
 0x5ad   :  { %v1368_v8 = vpack.c.bf16 %v1367_v52, %v1367_v52  ;;  %v6597_v1 = vpop.permute.xlu0 %2141  ;;  %v9203_v52 = vsub.f32 1.0, %v6380_v53 }
 0x5ae   :  { %9200 = vst [vmem:[#allocation74_spill] sm:$0xff] %v6597_v1 }
 0x5af   :  { %1377 = vmatmul.bf16.vlgmr.msra.gmra.mxu2 %v1368_v8 }
 0x5b0   :  { %v1365_v16 = vpop.f32.mrf.mxu1  ;;  %1587 = vmatpush.bf16.msra.mxu2 %v6599_v23  ;;  %v6612_v23 = vld [vmem:[#allocation12 + $0x28] sm:$0xff] }
 0x5b1   :  { %v1458_v33 = vpop.f32.mrf.mxu3  ;;  %9204 = vst [vmem:[#allocation87_spill] sm:$0xff] %v6612_v23 }
 0x5b2   :  { %v1459_v5 = vadd.f32 %v1458_v33, %v5967_v41 }
 0x5b4   :  { %v1472_v22 = vadd.f32 %v6522_v42, %v1459_v5  ;;  %1588 = vmatpush.bf16.msra.mxu2 %v6604_v62  ;;  %v6615_v42 = vpop.permute.xlu2 %2369  ;;  %v6644_v62 = vld [vmem:[#allocation12] sm:$0xff] }
 0x5b5   :  { %v2352_v19 = vpop.permute.xlu0 %2351  ;;  %9205 = vst [vmem:[#allocation88_spill] sm:$0xff] %v6615_v42  ;;  %v8840_v42 = vsub.f32 1.0, %v6407_v17 }
 0x5b6   :  { %v4798_v50 = vmul.f32 -1.442695, %v1472_v22  ;;  %v2354_v8 = vmul.f32 %v2352_v19, %v6380_v53  ;;  %v6618_v22 = vld [vmem:[#allocation12 + $0x20] sm:$0xff] }
 0x5b7   :  { %v2363_v47 = vpop.permute.xlu1 %2362  ;;  %9206 = vst [vmem:[#allocation89_spill] sm:$0xff] %v6618_v22 }
 0x5b8   :  { %5107 = vpow2.f32 %v4798_v50  ;;  %v2365_v16 = vmul.f32 %v2363_v47, %v9203_v52  ;;  %v6610_v1 = vpop.f32.mrf.mxu1  ;;  %1589 = vmatpush.bf16.msra.mxu2 %v6612_v23  ;;  %v6625_v23 = vld [vmem:[#allocation12 + $0x18] sm:$0xff] }
 0x5b9   :  { %v1460_v5 = vpop.f32.mrf.mxu3  ;;  %9207 = vst [vmem:[#allocation90_spill] sm:$0xff] %v6625_v23 }
 0x5ba   :  { %v2366_v33 = vadd.f32 %v2365_v16, %v2354_v8 }
 0x5bc   :  { %2374 = vrot.lane.b32.xlu0 %v2366_v33, %s5596_s22  ;;  %1590 = vmatpush.bf16.msra.mxu2 %v6618_v22  ;;  %v2591_v5 = vpop.permute.xlu2 %2590 }
 0x5be   :  { %v5108_v19 = vpop.eup %5107 }
 0x5bf   :  { %v1530_v50 = vadd.f32 1.0, %v5108_v19  ;;  %v2567_v53 = vpop.permute.xlu1 %2566  ;;  %4794 = vmatmul.msk.bf16.vlgmr.msrb.gmra.mxu2 %vm5900_vm2, %v6442_v58  ;;  %v6636_v58 = vld [vmem:[#allocation12 + $0x10] sm:$0xff] }
 0x5c0   :  { %v2569_v47 = vmul.f32 %v2567_v53, %v6561_v39  ;;  %v1486_v52 = vpop.f32.mrf.mxu1  ;;  %1591 = vmatpush.bf16.msra.mxu2 %v6625_v23  ;;  %9208 = vst [vmem:[#allocation91_spill] sm:$0xff] %v6636_v58  ;;  %v6640_v53 = vld [vmem:[#allocation12 + $0x8] sm:$0xff] }
 0x5c1   :  { %5109 = vrcp.f32 %v1530_v50  ;;  %v6628_v8 = vpop.f32.mrf.mxu3  ;;  %9209 = vst [vmem:[#allocation92_spill] sm:$0xff] %v6640_v53  ;;  %v1542_v23 = vand.u32 2147483648, %v1530_v50  ;;  %vm1536_vm3 = vweird.f32 %v1530_v50 }
 0x5c2   :  { %v6631_v16 = vadd.f32 %v2569_v47, %v6398_v0 }
 0x5c4   :  { %2584 = vrot.lane.b32.xlu0 %v6631_v16, %s5588_s23  ;;  %v2593_v33 = vmul.f32 %v2591_v5, %v6631_v16  ;;  %1592 = vmatpush.bf16.msra.mxu2 %v6636_v58  ;;  %v1540_v5 = vand.u32 2147483647, %v1530_v50 }
 0x5c6   :  { %2595 = vrot.lane.b32.xlu1 %v2593_v33, %s5588_s23  ;;  %vm1541_vm5 = vcmp.eq.f32.partialorder %v1540_v5, 8.507059e+37  ;;  %v9213_v5 = vld [vmem:[#allocation60_spill] sm:$0xff] }
 0x5c7   :  { %v5110_v39 = vpop.eup %5109 }
 0x5c8   :  { %v1532_v19 = vmul.f32 %v5110_v39, %v1530_v50  ;;  %1593 = vmatpush.bf16.msra.mxu2 %v6640_v53  ;;  %vm1537_vm1 = vweird.f32 %v5110_v39 }
 0x5c9   :  { %v1512_v47 = vpop.f32.mrf.mxu3  ;;  %vm1538_vm4 = vmor %vm1536_vm3, %vm1537_vm1 }
 0x5ca   :  { %v1533_v52 = vsub.f32 1.0, %v1532_v19  ;;  %v1543_v19 = vor.u32 1.1754944e-38, %v1542_v23  ;;  %v5280_v23 = vld [vmem:[#allocation8 + $0x20] sm:$0xff] }
 0x5cc   :  { %v1534_v22 = vmul.f32 %v5110_v39, %v1533_v52  ;;  %1594 = vmatpush.bf16.msra.mxu2 %v6644_v62 }
 0x5ce   :  { %2799 = vrot.lane.b32.xlu1 %v8840_v42, %s5596_s22  ;;  %v1535_v33 = vadd.f32 %v5110_v39, %v1534_v22  ;;  %v9210_v22 = vld [vmem:[#allocation70_spill] sm:$0xff]  ;;  %v9219_v42 = vld [vmem:[#allocation71_spill] sm:$0xff] }
 0x5cf   :  { %v1678_v50 = vsel %vm140_vm0, %v9210_v22, %v5280_v23  ;;  %v9218_v23 = vld [vmem:[#allocation26_spill] sm:$0xff] }
 0x5d0   :  { %1708 = vmatpush.bf16.msrb.mxu2 %v5739_v44  ;;  %v1539_v47 = vsel %vm1538_vm4, %v5110_v39, %v1535_v33  ;;  %v6663_v39 = vpack.c.bf16 %v1678_v50, %v1678_v50  ;;  %v9214_v33 = vld [vmem:[#allocation61_spill] sm:$0xff]  ;;  %v2810_v22 = vmul.f32 %v6407_v17, %v9218_v23 }
 0x5d1   :  { %v1544_v53 = vsel %vm1541_vm5, %v1543_v19, %v1539_v47  ;;  %v9215_v19 = vld [vmem:[#allocation62_spill] sm:$0xff]  ;;  %v9216_v47 = vld [vmem:[#allocation63_spill] sm:$0xff] }
 0x5d2   :  { %v1565_v52 = vmul.f32 %v1544_v53, %v6520_v51  ;;  %v9212_v53 = vld [vmem:[#allocation59_spill] sm:$0xff] }
 0x5d4   :  { %1709 = vmatpush.bf16.msrb.mxu2 %v5748_v54  ;;  %v1566_v58 = vpack.c.bf16 %v1565_v52, %v1565_v52 }
 0x5d6   :  { %1575 = vmatmul.bf16.vlgmr.msra.gmra.mxu1 %v1566_v58  ;;  %v9211_v58 = vld [vmem:[#allocation57_spill] sm:$0xff] }
 0x5d7   :  { %1747 = vmatpush.bf16.msra.mxu1 %v5844_v9 }
 0x5d8   :  { %1710 = vmatpush.bf16.msrb.mxu2 %v5760_v10 }
 0x5db   :  { %1748 = vmatpush.bf16.msra.mxu1 %v5855_v30 }
 0x5dc   :  { %1711 = vmatpush.bf16.msrb.mxu2 %v9067_v35 }
 0x5df   :  { %1749 = vmatpush.bf16.msra.mxu1 %v5863_v46 }
 0x5e0   :  { %1712 = vmatpush.bf16.msrb.mxu2 %v9069_v29 }
 0x5e3   :  { %1750 = vmatpush.bf16.msra.mxu1 %v5882_v45 }
 0x5e4   :  { %1713 = vmatpush.bf16.msrb.mxu2 %v9071_v26 }
 0x5e6   :  { %4803 = vmatmul.msk.bf16.vlgmr.msrb.gmra.mxu1 %vm5900_vm2, %v6663_v39 }
 0x5e7   :  { %1751 = vmatpush.bf16.msra.mxu1 %v5886_v59 }
 0x5e8   :  { %1714 = vmatpush.bf16.msrb.mxu2 %v9072_v3 }
 0x5eb   :  { %1752 = vmatpush.bf16.msra.mxu1 %v5889_v7 }
 0x5ec   :  { %1715 = vmatpush.bf16.msrb.mxu2 %v9073_v14 }
 0x5ef   :  { %1753 = vmatpush.bf16.msra.mxu1 %v5892_v25 }
 0x5f3   :  { %1754 = vmatpush.bf16.msra.mxu1 %v5895_v27 }
 0x5f6   :  { %4809 = vmatmul.msk.bf16.vlgmr.msra.gmra.mxu1 %vm5900_vm2, %v6663_v39 }
 0x5f7   :  { %1915 = vmatpush.bf16.msrb.mxu1 %v5732_v34 }
 0x5fb   :  { %1916 = vmatpush.bf16.msrb.mxu1 %v9151_v48 }
 0x5ff   :  { %1917 = vmatpush.bf16.msrb.mxu1 %v9152_v55 }
 0x603   :  { %1918 = vmatpush.bf16.msrb.mxu1 %v9153_v15 }
 0x607   :  { %1919 = vmatpush.bf16.msrb.mxu1 %v9154_v2 }
 0x60b   :  { %1920 = vmatpush.bf16.msrb.mxu1 %v9155_v56 }
 0x60f   :  { %1921 = vmatpush.bf16.msrb.mxu1 %v9156_v43  ;;  %v6707_v43 = vpop.permute.xlu2 %2602 }
 0x610   :  { %9223 = vst [vmem:[#allocation94_spill] sm:$0xff] %v6707_v43 }
 0x613   :  { %1922 = vmatpush.bf16.msrb.mxu1 %v9157_v37 }
 0x617   :  { %1967 = vmatpush.bf16.msra.mxu1 %v9158_v13  ;;  %v9220_v13 = vld [vmem:[#allocation27_spill] sm:$0xff] }
 0x61b   :  { %1968 = vmatpush.bf16.msra.mxu1 %v9159_v20 }
 0x61f   :  { %1969 = vmatpush.bf16.msra.mxu1 %v9211_v58  ;;  %v2811_v58 = vadd.f32 %v2810_v22, %v9220_v13 }
 0x623   :  { %1970 = vmatpush.bf16.msra.mxu1 %v9212_v53 }
 0x627   :  { %1971 = vmatpush.bf16.msra.mxu1 %v9213_v5 }
 0x62b   :  { %1972 = vmatpush.bf16.msra.mxu1 %v9214_v33 }
 0x62e   :  { %v6693_v52 = vpop.permute.xlu0 %2374 }
 0x62f   :  { %1973 = vmatpush.bf16.msra.mxu1 %v9215_v19  ;;  %9217 = vst [vmem:[#allocation70_spill] sm:$0xff] %v6693_v52  ;;  %v2812_v19 = vmax.f32 %v2811_v58, 0.0  ;;  %v9222_v52 = vsub.f32 1.0, %v6398_v0 }
 0x632   :  { %v1378_v50 = vpop.f32.mrf.mxu2 }
 0x633   :  { %1974 = vmatpush.bf16.msra.mxu1 %v9216_v47  ;;  %v1379_v20 = vadd.f32 %v9219_v42, %v1378_v50  ;;  %v2813_v50 = vsub.f32 0.0, %v2812_v19 }
 0x635   :  { %v6702_v5 = vsel %vm6509_vm15, %v1379_v20, %v6498_v12  ;;  %v2814_v42 = vmul.f32 1.442695, %v2813_v50  ;;  %v1485_v20 = vadd.f32 %v6610_v1, %v9224_v18 }
 0x636   :  { %9221 = vst [vmem:[#allocation93_spill] sm:$0xff] %v6702_v5  ;;  %v2585_v33 = vpop.permute.xlu0 %2584 }
 0x637   :  { %v2587_v47 = vmul.f32 %v2585_v33, %v6398_v0  ;;  %5111 = vpow2.f32 %v2814_v42  ;;  %v9225_v42 = vld [vmem:[#allocation80_spill] sm:$0xff] }
 0x638   :  { %v2596_v53 = vpop.permute.xlu1 %2595 }
 0x639   :  { %v2598_v37 = vmul.f32 %v2596_v53, %v9222_v52  ;;  %v2824_v53 = vpop.permute.xlu2 %2823 }
 0x63a   :  { %v1380_v56 = vpop.f32.mrf.mxu2 }
 0x63b   :  { %v2599_v2 = vadd.f32 %v2598_v37, %v2587_v47  ;;  %v6720_v56 = vld [vmem:[#allocation8 + $0x50] sm:$0xff]  ;;  %v1511_v47 = vadd.f32 %v6628_v8, %v9225_v42 }
 0x63d   :  { %2607 = vrot.lane.b32.xlu0 %v2599_v2, %s5596_s22  ;;  %v5112_v37 = vpop.eup %5111 }
 0x640   :  { %v2800_v22 = vpop.permute.xlu1 %2799 }
 0x641   :  { %v2802_v12 = vmul.f32 %v2800_v22, %v6631_v16  ;;  %v8848_v16 = vsub.f32 1.0, %v6720_v56  ;;  %v1524_v22 = vadd.f32 %v6549_v24, %v1511_v47 }
 0x642   :  { %v1497_v58 = vpop.f32.mrf.mxu2 }
 0x643   :  { %v6714_v33 = vadd.f32 %v2802_v12, %v6407_v17  ;;  %v1498_v0 = vadd.f32 %v1497_v58, %v1485_v20 }
 0x645   :  { %v4799_v52 = vmul.f32 -1.442695, %v1498_v0  ;;  %2817 = vrot.lane.b32.xlu0 %v6714_v33, %s5588_s23  ;;  %v2826_v2 = vmul.f32 %v2824_v53, %v6714_v33 }
 0x647   :  { %5113 = vpow2.f32 %v4799_v52  ;;  %2828 = vrot.lane.b32.xlu1 %v2826_v2, %s5588_s23 }
 0x64a   :  { %v1499_v1 = vpop.f32.mrf.mxu2 }
 0x64d   :  { %v5114_v12 = vpop.eup %5113  ;;  %2835 = vperm.xlu0 %5034, %v5112_v37  }
 0x64e   :  { %v1549_v19 = vadd.f32 1.0, %v5114_v12 }
 0x64f   :  { %3032 = vrot.lane.b32.xlu1 %v8848_v16, %s5596_s22  ;;  %v1618_v16 = vstv %s1617_s26  ;;  %s4180_s26 = scalar_select %p4932_p0, 1, 0 }
 0x650   :  { %5115 = vrcp.f32 %v1549_v19  ;;  %v1561_v52 = vand.u32 2147483648, %v1549_v19  ;;  %v1559_v37 = vand.u32 2147483647, %v1549_v19  ;;  %vm1555_vm7 = vweird.f32 %v1549_v19 }
 0x651   :  { %vm6735_vm10 = vcmp.eq.s32.totalorder %v1618_v16, 1  ;;  %v6751_v16 = vld [vmem:[#allocation14 + $0x38] sm:$0xff] }
 0x652   :  { %v1562_v8 = vor.u32 1.1754944e-38, %v1561_v52  ;;  %vm1560_vm9 = vcmp.eq.f32.partialorder %v1559_v37, 8.507059e+37  ;;  %v9228_v52 = vld [vmem:[#allocation85_spill] sm:$0xff] }
 0x653   :  { %v1576_v50 = vpop.f32.mrf.mxu1 }
 0x654   :  { %v1580_v58 = vadd.f32 %v1576_v50, %v1524_v22 }
 0x656   :  { %v5116_v20 = vpop.eup %5115  ;;  %5117 = vtanh.f32 %v1580_v58 }
 0x657   :  { %v1551_v0 = vmul.f32 %v5116_v20, %v1549_v19  ;;  %vm1556_vm6 = vweird.f32 %v5116_v20 }
 0x658   :  { %vm1557_vm8 = vmor %vm1555_vm7, %vm1556_vm6 }
 0x659   :  { %v1552_v53 = vsub.f32 1.0, %v1551_v0 }
 0x65b   :  { %v1553_v2 = vmul.f32 %v5116_v20, %v1552_v53  ;;  %v1578_v1 = vpop.f32.mrf.mxu1 }
 0x65c   :  { %v5118_v47 = vpop.eup %5117 }
 0x65d   :  { %v1554_v12 = vadd.f32 %v5116_v20, %v1553_v2 }
 0x65f   :  { %v1558_v24 = vsel %vm1557_vm8, %v5116_v20, %v1554_v12 }
 0x660   :  { %v1563_v50 = vsel %vm1560_vm9, %v1562_v8, %v1558_v24  ;;  %v6761_v8 = vld [vmem:[#allocation14 + $0x28] sm:$0xff]  ;;  %v6765_v24 = vld [vmem:[#allocation14 + $0x20] sm:$0xff] }
 0x661   :  { %v1582_v22 = vsub.f32 1.0, %v1563_v50  ;;  %v1584_v0 = vmul.f32 %v5118_v47, %v1563_v50  ;;  %9229 = vst [vmem:[#allocation85_spill] sm:$0xff] %v6765_v24  ;;  %v6769_v50 = vld [vmem:[#allocation14 + $0x18] sm:$0xff] }
 0x662   :  { %9230 = vst [vmem:[#allocation95_spill] sm:$0xff] %v6769_v50 }
 0x663   :  { %v6732_v43 = vpop.f32.mrf.mxu1  ;;  %v1583_v58 = vmul.f32 %v1582_v22, %v6520_v51  ;;  %v6773_v22 = vld [vmem:[#allocation14 + $0x10] sm:$0xff] }
 0x664   :  { %9231 = vst [vmem:[#allocation96_spill] sm:$0xff] %v6773_v22 }
 0x665   :  { %v1585_v2 = vadd.f32 %v1584_v0, %v1583_v58  ;;  %v6777_v0 = vld [vmem:[#allocation14 + $0x8] sm:$0xff]  ;;  %v6782_v58 = vld [vmem:[#allocation14] sm:$0xff] }
 0x666   :  { %9232 = vst [vmem:[#allocation97_spill] sm:$0xff] %v6777_v0 }
 0x667   :  { %v1586_v19 = vpack.c.bf16 %v1585_v2, %v1585_v2  ;;  %v6742_v20 = vsel %vm6735_vm10, %v1585_v2, %v6516_v40  ;;  %v6755_v40 = vld [vmem:[#allocation14 + $0x30] sm:$0xff]  ;;  %9233 = vst [vmem:[#allocation98_spill] sm:$0xff] %v6782_v58  ;;  %v9234_v2 = vld [vmem:[#allocation34_spill] sm:$0xff] }
 0x668   :  { %v6746_v37 = vmul.f32 %v9228_v52, %v6742_v20  ;;  %v9236_v52 = vld [vmem:[#allocation38_spill] sm:$0xff] }
 0x669   :  { %1595 = vmatmul.bf16.vlgmr.msra.gmra.mxu2 %v1586_v19  ;;  %v9235_v19 = vld [vmem:[#allocation43_spill] sm:$0xff] }
 0x66a   :  { %v1680_v1 = vpack.c.bf16 %v6746_v37, %v6746_v37  ;;  %1800 = vmatpush.bf16.msra.mxu2 %v6528_v36 }
 0x66b   :  { %v1706_v51 = vpop.f32.mrf.mxu1 }
 0x66c   :  { %1690 = vmatmul.bf16.vlgmr.msrb.gmra.mxu0 %v1680_v1  ;;  %v9238_v51 = vld [vmem:[#allocation42_spill] sm:$0xff] }
 0x66d   :  { %1835 = vmatpush.bf16.msrb.mxu0 %v6751_v16 }
 0x66e   :  { %1801 = vmatpush.bf16.msra.mxu2 %v6532_v4 }
 0x671   :  { %1836 = vmatpush.bf16.msrb.mxu0 %v6755_v40 }
 0x672   :  { %1802 = vmatpush.bf16.msra.mxu2 %v6536_v6 }
 0x673   :  { %v6759_v12 = vpop.f32.mrf.mxu1 }
 0x675   :  { %1837 = vmatpush.bf16.msrb.mxu0 %v6761_v8 }
 0x676   :  { %1803 = vmatpush.bf16.msra.mxu2 %v6545_v60 }
 0x679   :  { %1716 = vmatmul.bf16.vlgmr.msrb.gmra.mxu2 %v1680_v1  ;;  %1838 = vmatpush.bf16.msrb.mxu0 %v6765_v24 }
 0x67a   :  { %1804 = vmatpush.bf16.msra.mxu2 %v6551_v49 }
 0x67b   :  { %v1758_v47 = vpop.f32.mrf.mxu1 }
 0x67c   :  { %1742 = vmatmul.bf16.vlgmr.msra.gmra.mxu0 %v1680_v1  ;;  %v9237_v1 = vld [vmem:[#allocation47_spill] sm:$0xff]  ;;  %v9239_v47 = vld [vmem:[#allocation52_spill] sm:$0xff] }
 0x67d   :  { %1839 = vmatpush.bf16.msrb.mxu0 %v6769_v50 }
 0x67e   :  { %1805 = vmatpush.bf16.msra.mxu2 %v6556_v57 }
 0x681   :  { %1840 = vmatpush.bf16.msrb.mxu0 %v6773_v22 }
 0x682   :  { %1806 = vmatpush.bf16.msra.mxu2 %v6566_v28 }
 0x685   :  { %1841 = vmatpush.bf16.msrb.mxu0 %v6777_v0 }
 0x686   :  { %1807 = vmatpush.bf16.msra.mxu2 %v6571_v11  ;;  %v6808_v11 = vld [vmem:[#allocation8 + $0x58] sm:$0xff] }
 0x689   :  { %1842 = vmatpush.bf16.msrb.mxu0 %v6782_v58  ;;  %v9241_v58 = vld [vmem:[#allocation55_spill] sm:$0xff] }
 0x68a   :  { %1928 = vmatpush.bf16.msrb.mxu2 %v9183_v31  ;;  %v9240_v31 = vld [vmem:[#allocation46_spill] sm:$0xff] }
 0x68d   :  { %1954 = vmatpush.bf16.msra.mxu0 %v9186_v38  ;;  %v9242_v38 = vld [vmem:[#allocation51_spill] sm:$0xff] }
 0x68e   :  { %1929 = vmatpush.bf16.msrb.mxu2 %v9185_v21  ;;  %v9243_v21 = vld [vmem:[#allocation58_spill] sm:$0xff] }
 0x691   :  { %1955 = vmatpush.bf16.msra.mxu0 %v9188_v32  ;;  %v9244_v32 = vld [vmem:[#allocation56_spill] sm:$0xff] }
 0x692   :  { %1930 = vmatpush.bf16.msrb.mxu2 %v9234_v2 }
 0x695   :  { %1956 = vmatpush.bf16.msra.mxu0 %v9235_v19  ;;  %v9245_v19 = vld [vmem:[#allocation24_spill] sm:$0xff] }
 0x696   :  { %1931 = vmatpush.bf16.msrb.mxu2 %v9236_v52  ;;  %v3037_v52 = vmul.f32 %v6720_v56, %v9245_v19  ;;  %v3270_v28 = vmul.f32 %v6808_v11, %v9245_v19 }
 0x699   :  { %1957 = vmatpush.bf16.msra.mxu0 %v9237_v1  ;;  %v9246_v1 = vld [vmem:[#allocation25_spill] sm:$0xff] }
 0x69a   :  { %1932 = vmatpush.bf16.msrb.mxu2 %v9238_v51  ;;  %v3038_v2 = vadd.f32 %v3037_v52, %v9246_v1 }
 0x69d   :  { %1958 = vmatpush.bf16.msra.mxu0 %v9239_v47  ;;  %v3039_v47 = vmax.f32 %v3038_v2, 0.0 }
 0x69e   :  { %1933 = vmatpush.bf16.msrb.mxu2 %v9240_v31  ;;  %v3043_v31 = vmul.f32 %v6720_v56, %v9218_v23 }
 0x6a1   :  { %1959 = vmatpush.bf16.msra.mxu0 %v9241_v58  ;;  %v3040_v58 = vsub.f32 0.0, %v3039_v47  ;;  %v3271_v47 = vadd.f32 %v3270_v28, %v9246_v1  ;;  %v6826_v28 = vld [vmem:[#allocation8 + $0x60] sm:$0xff] }
 0x6a2   :  { %1934 = vmatpush.bf16.msrb.mxu2 %v9242_v38  ;;  %v3044_v38 = vadd.f32 %v3043_v31, %v9220_v13 }
 0x6a3   :  { %v3041_v0 = vmul.f32 1.442695, %v3040_v58  ;;  %v3272_v49 = vmax.f32 %v3271_v47, 0.0 }
 0x6a5   :  { %1960 = vmatpush.bf16.msra.mxu0 %v9243_v21  ;;  %5119 = vpow2.f32 %v3041_v0 }
 0x6a6   :  { %1935 = vmatpush.bf16.msrb.mxu2 %v9244_v32 }
 0x6a9   :  { %1961 = vmatpush.bf16.msra.mxu0 %v9199_v63  ;;  %v3045_v63 = vmax.f32 %v3044_v38, 0.0  ;;  %v3276_v38 = vmul.f32 %v6808_v11, %v9218_v23 }
 0x6ab   :  { %v3046_v57 = vsub.f32 0.0, %v3045_v63  ;;  %v5120_v24 = vpop.eup %5119  ;;  %v3277_v63 = vadd.f32 %v3276_v38, %v9220_v13 }
 0x6ad   :  { %v3047_v50 = vmul.f32 1.442695, %v3046_v57 }
 0x6af   :  { %v6803_v51 = vpop.permute.xlu0 %2607  ;;  %5121 = vpow2.f32 %v3047_v50 }
 0x6b0   :  { %9247 = vst [vmem:[#allocation99_spill] sm:$0xff] %v6803_v51  ;;  %v9248_v51 = vsub.f32 1.0, %v6407_v17 }
 0x6b7   :  { %v2818_v21 = vpop.permute.xlu0 %2817 }
 0x6b8   :  { %v2820_v52 = vmul.f32 %v2818_v21, %v6407_v17  ;;  %v3273_v17 = vsub.f32 0.0, %v3272_v49 }
 0x6b9   :  { %v2829_v32 = vpop.permute.xlu1 %2828 }
 0x6ba   :  { %v2831_v2 = vmul.f32 %v2829_v32, %v9248_v51  ;;  %v3274_v57 = vmul.f32 1.442695, %v3273_v17  ;;  %v3278_v32 = vmax.f32 %v3277_v63, 0.0 }
 0x6bc   :  { %v2832_v22 = vadd.f32 %v2831_v2, %v2820_v52  ;;  %5123 = vpow2.f32 %v3274_v57  ;;  %v3279_v0 = vsub.f32 0.0, %v3278_v32 }
 0x6be   :  { %2840 = vrot.lane.b32.xlu2 %v2832_v22, %s5596_s22  ;;  %v3503_v22 = vmul.f32 %v6826_v28, %v9245_v19  ;;  %v3280_v49 = vmul.f32 1.442695, %v3279_v0 }
 0x6c0   :  { %v3504_v51 = vadd.f32 %v3503_v22, %v9246_v1  ;;  %5125 = vpow2.f32 %v3280_v49 }
 0x6c1   :  { %v3033_v31 = vpop.permute.xlu1 %3032 }
 0x6c2   :  { %v3035_v58 = vmul.f32 %v3033_v31, %v6714_v33  ;;  %v5122_v33 = vpop.eup %5121  ;;  %v3505_v50 = vmax.f32 %v3504_v51, 0.0  ;;  %v6834_v31 = vld [vmem:[#allocation8 + $0x68] sm:$0xff] }
 0x6c3   :  { %v5124_v52 = vpop.eup %5123  ;;  %v3736_v17 = vmul.f32 %v6834_v31, %v9245_v19 }
 0x6c4   :  { %v6821_v21 = vadd.f32 %v3035_v58, %v6720_v56  ;;  %v3506_v2 = vsub.f32 0.0, %v3505_v50 }
 0x6c5   :  { %v3737_v32 = vadd.f32 %v3736_v17, %v9246_v1 }
 0x6c6   :  { %3056 = vperm.xlu2 %5035, %v5120_v24   ;;  %3050 = vrot.lane.b32.xlu0 %v6821_v21, %s5588_s23  ;;  %v3509_v24 = vmul.f32 %v6826_v28, %v9218_v23  ;;  %v3507_v38 = vmul.f32 1.442695, %v3506_v2  ;;  %v5126_v63 = vpop.eup %5125  ;;  %v9254_v23 = vld [vmem:[#allocation91_spill] sm:$0xff] }
 0x6c8   :  { %v3510_v47 = vadd.f32 %v3509_v24, %v9220_v13  ;;  %5127 = vpow2.f32 %v3507_v38  ;;  %v6844_v38 = vld [vmem:[%s8686_s8] ss:$0 sm:$0xff] }
 0x6ca   :  { %v3511_v58 = vmax.f32 %v3510_v47, 0.0 }
 0x6cc   :  { %v3512_v57 = vsub.f32 0.0, %v3511_v58 }
 0x6ce   :  { %3068 = vperm.xlu2 %5035, %v5122_v33   ;;  %v3513_v22 = vmul.f32 1.442695, %v3512_v57  ;;  %v3738_v33 = vmax.f32 %v3737_v32, 0.0  ;;  %v5128_v0 = vpop.eup %5127 }
 0x6d0   :  { %5129 = vpow2.f32 %v3513_v22  ;;  %v3739_v51 = vsub.f32 0.0, %v3738_v33 }
 0x6d2   :  { %v3740_v50 = vmul.f32 1.442695, %v3739_v51 }
 0x6d4   :  { %5131 = vpow2.f32 %v3740_v50 }
 0x6d6   :  { %3289 = vperm.xlu2 %5035, %v5124_v52   ;;  %v5130_v52 = vpop.eup %5129 }
 0x6da   :  { %v5132_v22 = vpop.eup %5131 }
 0x6de   :  { %3301 = vperm.xlu2 %5035, %v5126_v63  }
 0x6e6   :  { %3522 = vperm.xlu2 %5035, %v5128_v0   ;;  %v9249_v0 = vld [vmem:[#allocation73_spill] sm:$0xff] }
 0x6e9   :  { %v1691_v49 = vpop.f32.mrf.mxu0 }
 0x6ea   :  { %v1692_v24 = vadd.f32 %v1691_v49, %v5967_v41  ;;  %v9250_v49 = vld [vmem:[#allocation86_spill] sm:$0xff] }
 0x6ec   :  { %v1705_v2 = vadd.f32 %v6732_v43, %v1692_v24  ;;  %v1596_v47 = vpop.f32.mrf.mxu2 }
 0x6ed   :  { %v1597_v58 = vadd.f32 %v6844_v38, %v1596_v47 }
 0x6ee   :  { %v4810_v17 = vmul.f32 -1.442695, %v1705_v2  ;;  %3534 = vperm.xlu2 %5035, %v5130_v52   ;;  %v9251_v52 = vld [vmem:[#allocation87_spill] sm:$0xff] }
 0x6ef   :  { %v1600_v63 = vmax.f32 %v1597_v58, 0.0  ;;  %v9252_v58 = vld [vmem:[#allocation89_spill] sm:$0xff] }
 0x6f0   :  { %5133 = vpow2.f32 %v4810_v17 }
 0x6f1   :  { %v1601_v57 = vpack.c.bf16 %v1600_v63, %v1600_v63  ;;  %v1693_v32 = vpop.f32.mrf.mxu0 }
 0x6f3   :  { %1610 = vmatmul.bf16.vlgmr.msra.gmra.mxu3 %v1601_v57 }
 0x6f4   :  { %v1598_v33 = vpop.f32.mrf.mxu2  ;;  %1820 = vmatpush.bf16.msra.mxu3 %v9249_v0 }
 0x6f6   :  { %v5134_v43 = vpop.eup %5133  ;;  %3755 = vperm.xlu2 %5035, %v5132_v22  }
 0x6f7   :  { %v1763_v51 = vadd.f32 1.0, %v5134_v43  ;;  %v9253_v43 = vld [vmem:[#allocation90_spill] sm:$0xff] }
 0x6f8   :  { %1821 = vmatpush.bf16.msra.mxu3 %v9250_v49 }
 0x6f9   :  { %5135 = vrcp.f32 %v1763_v51  ;;  %v6849_v24 = vpop.f32.mrf.mxu0  ;;  %v1775_v57 = vand.u32 2147483648, %v1763_v51  ;;  %v1773_v33 = vand.u32 2147483647, %v1763_v51  ;;  %vm1769_vm12 = vweird.f32 %v1763_v51 }
 0x6fa   :  { %v1744_v53 = vadd.f32 %v6849_v24, %v9225_v42 }
 0x6fb   :  { %v1776_v19 = vor.u32 1.1754944e-38, %v1775_v57  ;;  %vm1774_vm14 = vcmp.eq.f32.partialorder %v1773_v33, 8.507059e+37  ;;  %v8872_v57 = vsub.f32 1.0, %v6808_v11  ;;  %v9260_v33 = vld [vmem:[#allocation44_spill] sm:$0xff] }
 0x6fc   :  { %v6851_v50 = vpop.f32.mrf.mxu2  ;;  %1822 = vmatpush.bf16.msra.mxu3 %v9251_v52 }
 0x6ff   :  { %v5136_v2 = vpop.eup %5135 }
 0x700   :  { %v1765_v47 = vmul.f32 %v5136_v2, %v1763_v51  ;;  %1823 = vmatpush.bf16.msra.mxu3 %v9252_v58  ;;  %vm1770_vm11 = vweird.f32 %v5136_v2 }
 0x701   :  { %v1745_v17 = vpop.f32.mrf.mxu0  ;;  %vm1771_vm13 = vmor %vm1769_vm12, %vm1770_vm11 }
 0x702   :  { %v1766_v63 = vsub.f32 1.0, %v1765_v47 }
 0x703   :  { %4806 = vmatmul.msk.bf16.vlgmr.msrb.gmra.mxu3 %vm5900_vm2, %v6663_v39  ;;  %v9255_v39 = vld [vmem:[#allocation92_spill] sm:$0xff] }
 0x704   :  { %v1719_v32 = vpop.f32.mrf.mxu2  ;;  %v1767_v22 = vmul.f32 %v5136_v2, %v1766_v63  ;;  %1824 = vmatpush.bf16.msra.mxu3 %v9253_v43 }
 0x705   :  { %v9258_v32 = vld [vmem:[#allocation36_spill] sm:$0xff] }
 0x706   :  { %v1768_v1 = vadd.f32 %v5136_v2, %v1767_v22  ;;  %v9259_v22 = vld [vmem:[#allocation40_spill] sm:$0xff] }
 0x708   :  { %v1772_v13 = vsel %vm1771_vm13, %v5136_v2, %v1768_v1  ;;  %1825 = vmatpush.bf16.msra.mxu3 %v9254_v23 }
 0x709   :  { %v1777_v47 = vsel %vm1774_vm14, %v1776_v19, %v1772_v13  ;;  %v5290_v13 = vld [vmem:[#allocation8 + $0x28] sm:$0xff] }
 0x70a   :  { %v1798_v17 = vmul.f32 %v1777_v47, %v6746_v37  ;;  %v9257_v19 = vld [vmem:[#allocation75_spill] sm:$0xff]  ;;  %v9261_v47 = vld [vmem:[#allocation48_spill] sm:$0xff] }
 0x70b   :  { %v1911_v51 = vsel %vm140_vm0, %v9257_v19, %v5290_v13  ;;  %v9263_v13 = vld [vmem:[#allocation53_spill] sm:$0xff] }
 0x70c   :  { %v1799_v58 = vpack.c.bf16 %v1798_v17, %v1798_v17  ;;  %1826 = vmatpush.bf16.msra.mxu3 %v9255_v39  ;;  %v6874_v2 = vpack.c.bf16 %v1911_v51, %v1911_v51  ;;  %v9262_v17 = vld [vmem:[#allocation49_spill] sm:$0xff]  ;;  %v9265_v51 = vld [vmem:[#allocation59_spill] sm:$0xff] }
 0x70d   :  { %v9264_v19 = vld [vmem:[#allocation57_spill] sm:$0xff] }
 0x70e   :  { %1808 = vmatmul.bf16.vlgmr.msra.gmra.mxu2 %v1799_v58 }
 0x70f   :  { %1980 = vmatpush.bf16.msra.mxu2 %v5844_v9 }
 0x710   :  { %1827 = vmatpush.bf16.msra.mxu3 %v6644_v62 }
 0x713   :  { %1981 = vmatpush.bf16.msra.mxu2 %v5855_v30 }
 0x714   :  { %1941 = vmatpush.bf16.msrb.mxu3 %v5739_v44 }
 0x717   :  { %1982 = vmatpush.bf16.msra.mxu2 %v5863_v46 }
 0x718   :  { %1942 = vmatpush.bf16.msrb.mxu3 %v5748_v54  ;;  %v6868_v1 = vpop.permute.xlu2 %2840 }
 0x719   :  { %9256 = vst [vmem:[#allocation73_spill] sm:$0xff] %v6868_v1  ;;  %v9269_v1 = vld [vmem:[#allocation63_spill] sm:$0xff] }
 0x71b   :  { %1983 = vmatpush.bf16.msra.mxu2 %v5882_v45 }
 0x71c   :  { %1943 = vmatpush.bf16.msrb.mxu3 %v5760_v10 }
 0x71e   :  { %4815 = vmatmul.msk.bf16.vlgmr.msrb.gmra.mxu2 %vm5900_vm2, %v6874_v2 }
 0x71f   :  { %1984 = vmatpush.bf16.msra.mxu2 %v5886_v59 }
 0x720   :  { %1944 = vmatpush.bf16.msrb.mxu3 %v9067_v35  ;;  %v3057_v58 = vpop.permute.xlu2 %3056 }
 0x721   :  { %v3059_v63 = vmul.f32 %v3057_v58, %v6821_v21  ;;  %v9266_v58 = vld [vmem:[#allocation60_spill] sm:$0xff] }
 0x723   :  { %3061 = vrot.lane.b32.xlu1 %v3059_v63, %s5588_s23  ;;  %1985 = vmatpush.bf16.msra.mxu2 %v5889_v7  ;;  %v9267_v63 = vld [vmem:[#allocation61_spill] sm:$0xff] }
 0x724   :  { %1945 = vmatpush.bf16.msrb.mxu3 %v9069_v29 }
 0x727   :  { %1986 = vmatpush.bf16.msra.mxu2 %v5892_v25 }
 0x728   :  { %1946 = vmatpush.bf16.msrb.mxu3 %v9071_v26 }
 0x72b   :  { %3265 = vrot.lane.b32.xlu1 %v8872_v57, %s5596_s22  ;;  %1987 = vmatpush.bf16.msra.mxu2 %v5895_v27  ;;  %v9268_v57 = vld [vmem:[#allocation62_spill] sm:$0xff] }
 0x72c   :  { %1947 = vmatpush.bf16.msrb.mxu3 %v9072_v3 }
 0x72e   :  { %4821 = vmatmul.msk.bf16.vlgmr.msra.gmra.mxu2 %vm5900_vm2, %v6874_v2 }
 0x72f   :  { %2148 = vmatpush.bf16.msrb.mxu2 %v5732_v34 }
 0x730   :  { %1948 = vmatpush.bf16.msrb.mxu3 %v9073_v14 }
 0x733   :  { %2149 = vmatpush.bf16.msrb.mxu2 %v9151_v48 }
 0x737   :  { %2150 = vmatpush.bf16.msrb.mxu2 %v9152_v55 }
 0x73b   :  { %2151 = vmatpush.bf16.msrb.mxu2 %v9153_v15 }
 0x73f   :  { %2152 = vmatpush.bf16.msrb.mxu2 %v9258_v32 }
 0x743   :  { %2153 = vmatpush.bf16.msrb.mxu2 %v9259_v22 }
 0x747   :  { %2154 = vmatpush.bf16.msrb.mxu2 %v9260_v33  ;;  %v9270_v33 = vld [vmem:[#allocation71_spill] sm:$0xff] }
 0x74b   :  { %2155 = vmatpush.bf16.msrb.mxu2 %v9261_v47 }
 0x74f   :  { %2200 = vmatpush.bf16.msra.mxu2 %v9262_v17 }
 0x753   :  { %2201 = vmatpush.bf16.msra.mxu2 %v9263_v13 }
 0x757   :  { %2202 = vmatpush.bf16.msra.mxu2 %v9264_v19 }
 0x75b   :  { %2203 = vmatpush.bf16.msra.mxu2 %v9265_v51  ;;  %v1718_v51 = vadd.f32 %v6851_v50, %v9224_v18  ;;  %v9273_v50 = vsub.f32 1.0, %v6720_v56 }
 0x75f   :  { %2204 = vmatpush.bf16.msra.mxu2 %v9266_v58 }
 0x763   :  { %2205 = vmatpush.bf16.msra.mxu2 %v9267_v63  ;;  %v6921_v63 = vpop.permute.xlu0 %2835 }
 0x764   :  { %9272 = vst [vmem:[#allocation87_spill] sm:$0xff] %v6921_v63 }
 0x767   :  { %2206 = vmatpush.bf16.msra.mxu2 %v9268_v57 }
 0x76b   :  { %2207 = vmatpush.bf16.msra.mxu2 %v9269_v1 }
 0x776   :  { %v1611_v22 = vpop.f32.mrf.mxu3 }
 0x777   :  { %v1612_v32 = vadd.f32 %v9270_v33, %v1611_v22  ;;  %v3051_v22 = vpop.permute.xlu0 %3050 }
 0x778   :  { %v3053_v33 = vmul.f32 %v3051_v22, %v6720_v56 }
 0x779   :  { %v6917_v17 = vsel %vm6735_vm10, %v1612_v32, %v6702_v5 }
 0x77a   :  { %9271 = vst [vmem:[#allocation86_spill] sm:$0xff] %v6917_v17 }
 0x77e   :  { %v1613_v13 = vpop.f32.mrf.mxu3 }
 0x786   :  { %v1730_v19 = vpop.f32.mrf.mxu3 }
 0x787   :  { %v1731_v58 = vadd.f32 %v1730_v19, %v1718_v51  ;;  %v6928_v19 = vpop.permute.xlu2 %3068  ;;  %v1757_v51 = vadd.f32 %v6759_v12, %v1744_v53 }
 0x788   :  { %9274 = vst [vmem:[#allocation90_spill] sm:$0xff] %v6928_v19  ;;  %v9301_v19 = vld [vmem:[#allocation56_spill] sm:$0xff] }
 0x789   :  { %v4811_v47 = vmul.f32 -1.442695, %v1731_v58 }
 0x78b   :  { %5137 = vpow2.f32 %v4811_v47 }
 0x78e   :  { %v1732_v57 = vpop.f32.mrf.mxu3 }
 0x791   :  { %v5138_v1 = vpop.eup %5137  ;;  %v1809_v15 = vpop.f32.mrf.mxu2 }
 0x792   :  { %v1782_v55 = vadd.f32 1.0, %v5138_v1  ;;  %v1813_v63 = vadd.f32 %v1809_v15, %v1757_v51  ;;  %v3290_v15 = vpop.permute.xlu2 %3289 }
 0x794   :  { %5139 = vrcp.f32 %v1782_v55  ;;  %v1794_v22 = vand.u32 2147483648, %v1782_v55  ;;  %v1792_v12 = vand.u32 2147483647, %v1782_v55  ;;  %vm1788_vm1 = vweird.f32 %v1782_v55 }
 0x795   :  { %v3062_v32 = vpop.permute.xlu1 %3061  ;;  %5141 = vtanh.f32 %v1813_v63 }
 0x796   :  { %v3064_v13 = vmul.f32 %v3062_v32, %v9273_v50  ;;  %vm1793_vm4 = vcmp.eq.f32.partialorder %v1792_v12, 8.507059e+37 }
 0x798   :  { %v3065_v47 = vadd.f32 %v3064_v13, %v3053_v33  ;;  %v1795_v13 = vor.u32 1.1754944e-38, %v1794_v22 }
 0x799   :  { %v1811_v57 = vpop.f32.mrf.mxu2 }
 0x79a   :  { %v5140_v58 = vpop.eup %5139  ;;  %3073 = vrot.lane.b32.xlu0 %v3065_v47, %s5596_s22 }
 0x79b   :  { %v1784_v1 = vmul.f32 %v5140_v58, %v1782_v55  ;;  %vm1789_vm15 = vweird.f32 %v5140_v58 }
 0x79c   :  { %vm1790_vm3 = vmor %vm1788_vm1, %vm1789_vm15 }
 0x79d   :  { %v1785_v5 = vsub.f32 1.0, %v1784_v1  ;;  %v3266_v24 = vpop.permute.xlu1 %3265  ;;  %v1851_v1 = vstv %s1850_s29  ;;  %s3015_s29 = scalar_select %p4872_p9, 1, 0 }
 0x79e   :  { %v3268_v56 = vmul.f32 %v3266_v24, %v6821_v21  ;;  %v8876_v24 = vsub.f32 1.0, %v6826_v28  ;;  %vm6947_vm5 = vcmp.eq.s32.totalorder %v1851_v1, 1  ;;  %v9288_v1 = vld [vmem:[#allocation35_spill] sm:$0xff] }
 0x79f   :  { %v1786_v32 = vmul.f32 %v5140_v58, %v1785_v5  ;;  %v5142_v5 = vpop.eup %5141 }
 0x7a0   :  { %v6937_v53 = vadd.f32 %v3268_v56, %v6808_v11 }
 0x7a1   :  { %v1787_v33 = vadd.f32 %v5140_v58, %v1786_v32  ;;  %v6939_v50 = vpop.f32.mrf.mxu2 }
 0x7a2   :  { %3283 = vrot.lane.b32.xlu0 %v6937_v53, %s5588_s23  ;;  %v3292_v63 = vmul.f32 %v3290_v15, %v6937_v53 }
 0x7a3   :  { %v1791_v21 = vsel %vm1790_vm3, %v5140_v58, %v1787_v33 }
 0x7a4   :  { %v1796_v51 = vsel %vm1793_vm4, %v1795_v13, %v1791_v21  ;;  %3294 = vrot.lane.b32.xlu1 %v3292_v63, %s5588_s23  ;;  %v9278_v63 = vld [vmem:[#allocation85_spill] sm:$0xff]  ;;  %v9280_v21 = vld [vmem:[#allocation95_spill] sm:$0xff] }
 0x7a5   :  { %v1815_v47 = vsub.f32 1.0, %v1796_v51  ;;  %v1817_v57 = vmul.f32 %v5142_v5, %v1796_v51  ;;  %v9281_v5 = vld [vmem:[#allocation83_spill] sm:$0xff]  ;;  %v9283_v51 = vld [vmem:[#allocation84_spill] sm:$0xff] }
 0x7a7   :  { %v1816_v55 = vmul.f32 %v1815_v47, %v6746_v37  ;;  %v9277_v37 = vld [vmem:[#allocation78_spill] sm:$0xff]  ;;  %v9285_v47 = vld [vmem:[#allocation37_spill] sm:$0xff] }
 0x7a9   :  { %v1939_v56 = vpop.f32.mrf.mxu2  ;;  %v1818_v32 = vadd.f32 %v1817_v57, %v1816_v55  ;;  %v9286_v57 = vld [vmem:[#allocation31_spill] sm:$0xff]  ;;  %v9289_v55 = vld [vmem:[#allocation32_spill] sm:$0xff] }
 0x7aa   :  { %v9290_v56 = vld [vmem:[#allocation39_spill] sm:$0xff] }
 0x7ab   :  { %v1819_v15 = vpack.c.bf16 %v1818_v32, %v1818_v32  ;;  %v6954_v58 = vsel %vm6947_vm5, %v1818_v32, %v6742_v20  ;;  %v9291_v32 = vld [vmem:[#allocation34_spill] sm:$0xff] }
 0x7ac   :  { %3498 = vrot.lane.b32.xlu1 %v8876_v24, %s5596_s22  ;;  %v6961_v12 = vmul.f32 %v9277_v37, %v6954_v58  ;;  %v9293_v37 = vld [vmem:[#allocation38_spill] sm:$0xff] }
 0x7ad   :  { %1828 = vmatmul.bf16.vlgmr.msra.gmra.mxu3 %v1819_v15  ;;  %v9292_v15 = vld [vmem:[#allocation43_spill] sm:$0xff]  ;;  %v9300_v24 = vld [vmem:[#allocation58_spill] sm:$0xff] }
 0x7ae   :  { %v1913_v33 = vpack.c.bf16 %v6961_v12, %v6961_v12  ;;  %2033 = vmatpush.bf16.msra.mxu3 %v6528_v36  ;;  %v9279_v36 = vld [vmem:[#allocation82_spill] sm:$0xff] }
 0x7b0   :  { %1923 = vmatmul.bf16.vlgmr.msrb.gmra.mxu1 %v1913_v33 }
 0x7b1   :  { %v6966_v13 = vpop.f32.mrf.mxu2  ;;  %2068 = vmatpush.bf16.msrb.mxu1 %v6751_v16 }
 0x7b2   :  { %2034 = vmatpush.bf16.msra.mxu3 %v6532_v4  ;;  %v9282_v4 = vld [vmem:[#allocation96_spill] sm:$0xff] }
 0x7b5   :  { %2069 = vmatpush.bf16.msrb.mxu1 %v6755_v40 }
 0x7b6   :  { %2035 = vmatpush.bf16.msra.mxu3 %v6536_v6  ;;  %v9284_v6 = vld [vmem:[#allocation97_spill] sm:$0xff] }
 0x7b9   :  { %v1991_v20 = vpop.f32.mrf.mxu2  ;;  %2070 = vmatpush.bf16.msrb.mxu1 %v6761_v8 }
 0x7ba   :  { %2036 = vmatpush.bf16.msra.mxu3 %v6545_v60  ;;  %v9287_v60 = vld [vmem:[#allocation98_spill] sm:$0xff] }
 0x7bb   :  { %v9295_v20 = vld [vmem:[#allocation42_spill] sm:$0xff] }
 0x7bd   :  { %1949 = vmatmul.bf16.vlgmr.msrb.gmra.mxu3 %v1913_v33  ;;  %2071 = vmatpush.bf16.msrb.mxu1 %v9278_v63 }
 0x7be   :  { %2037 = vmatpush.bf16.msra.mxu3 %v9279_v36  ;;  %v9296_v36 = vld [vmem:[#allocation52_spill] sm:$0xff] }
 0x7c0   :  { %1975 = vmatmul.bf16.vlgmr.msra.gmra.mxu1 %v1913_v33  ;;  %v9294_v33 = vld [vmem:[#allocation47_spill] sm:$0xff] }
 0x7c1   :  { %2072 = vmatpush.bf16.msrb.mxu1 %v9280_v21 }
 0x7c2   :  { %2038 = vmatpush.bf16.msra.mxu3 %v9281_v5  ;;  %v9297_v5 = vld [vmem:[#allocation46_spill] sm:$0xff] }
 0x7c5   :  { %2073 = vmatpush.bf16.msrb.mxu1 %v9282_v4 }
 0x7c6   :  { %2039 = vmatpush.bf16.msra.mxu3 %v9283_v51  ;;  %v9298_v51 = vld [vmem:[#allocation55_spill] sm:$0xff] }
 0x7c9   :  { %2074 = vmatpush.bf16.msrb.mxu1 %v9284_v6 }
 0x7ca   :  { %2040 = vmatpush.bf16.msra.mxu3 %v9285_v47  ;;  %v9299_v47 = vld [vmem:[#allocation51_spill] sm:$0xff] }
 0x7cd   :  { %2075 = vmatpush.bf16.msrb.mxu1 %v9287_v60 }
 0x7ce   :  { %2161 = vmatpush.bf16.msrb.mxu3 %v9286_v57 }
 0x7d1   :  { %2187 = vmatpush.bf16.msra.mxu1 %v9288_v1 }
 0x7d2   :  { %2162 = vmatpush.bf16.msrb.mxu3 %v9289_v55 }
 0x7d5   :  { %2188 = vmatpush.bf16.msra.mxu1 %v9290_v56 }
 0x7d6   :  { %2163 = vmatpush.bf16.msrb.mxu3 %v9291_v32  ;;  %v9302_v32 = vld [vmem:[#allocation64_spill] sm:$0xff] }
 0x7d9   :  { %2189 = vmatpush.bf16.msra.mxu1 %v9292_v15 }
 0x7da   :  { %2164 = vmatpush.bf16.msrb.mxu3 %v9293_v37 }
 0x7dd   :  { %2190 = vmatpush.bf16.msra.mxu1 %v9294_v33 }
 0x7de   :  { %2165 = vmatpush.bf16.msrb.mxu3 %v9295_v20 }
 0x7e1   :  { %2191 = vmatpush.bf16.msra.mxu1 %v9296_v36  ;;  %v9304_v36 = vsub.f32 1.0, %v6808_v11 }
 0x7e2   :  { %2166 = vmatpush.bf16.msrb.mxu3 %v9297_v5  ;;  %v7004_v5 = vpop.permute.xlu2 %3301 }
 0x7e3   :  { %9305 = vst [vmem:[#allocation92_spill] sm:$0xff] %v7004_v5 }
 0x7e5   :  { %2192 = vmatpush.bf16.msra.mxu1 %v9298_v51 }
 0x7e6   :  { %2167 = vmatpush.bf16.msrb.mxu3 %v9299_v47 }
 0x7e9   :  { %2193 = vmatpush.bf16.msra.mxu1 %v9300_v24 }
 0x7ea   :  { %2168 = vmatpush.bf16.msrb.mxu3 %v9301_v19 }
 0x7ed   :  { %2194 = vmatpush.bf16.msra.mxu1 %v9302_v32  ;;  %v3523_v32 = vpop.permute.xlu2 %3522 }
 0x80c   :  { %v6999_v15 = vpop.permute.xlu0 %3073 }
 0x80d   :  { %9303 = vst [vmem:[#allocation91_spill] sm:$0xff] %v6999_v15 }
 0x814   :  { %v3284_v37 = vpop.permute.xlu0 %3283 }
 0x815   :  { %v3286_v20 = vmul.f32 %v3284_v37, %v6808_v11  ;;  %v8877_v11 = vsub.f32 1.0, %v6834_v31 }
 0x816   :  { %v3295_v33 = vpop.permute.xlu1 %3294 }
 0x817   :  { %v3297_v56 = vmul.f32 %v3295_v33, %v9304_v36 }
 0x819   :  { %v3298_v51 = vadd.f32 %v3297_v56, %v3286_v20 }
 0x81b   :  { %3306 = vrot.lane.b32.xlu0 %v3298_v51, %s5596_s22 }
 0x81e   :  { %v3499_v47 = vpop.permute.xlu1 %3498 }
 0x81f   :  { %v3501_v24 = vmul.f32 %v3499_v47, %v6937_v53 }
 0x821   :  { %v7009_v19 = vadd.f32 %v3501_v24, %v6826_v28 }
 0x823   :  { %3516 = vrot.lane.b32.xlu0 %v7009_v19, %s5588_s23  ;;  %v3525_v37 = vmul.f32 %v3523_v32, %v7009_v19 }
 0x825   :  { %3527 = vrot.lane.b32.xlu1 %v3525_v37, %s5588_s23 }
 0x82d   :  { %3731 = vrot.lane.b32.xlu1 %v8877_v11, %s5596_s22  ;;  %v1924_v56 = vpop.f32.mrf.mxu1 }
 0x82e   :  { %v1925_v53 = vadd.f32 %v1924_v56, %v5967_v41 }
 0x830   :  { %v1938_v24 = vadd.f32 %v6939_v50, %v1925_v53  ;;  %v1829_v33 = vpop.f32.mrf.mxu3 }
 0x831   :  { %v1830_v20 = vadd.f32 %v6844_v38, %v1829_v33  ;;  %v9306_v33 = vld [vmem:[#allocation89_spill] sm:$0xff] }
 0x832   :  { %v4822_v36 = vmul.f32 -1.442695, %v1938_v24 }
 0x833   :  { %v1833_v51 = vmax.f32 %v1830_v20, 0.0 }
 0x834   :  { %5143 = vpow2.f32 %v4822_v36 }
 0x835   :  { %v1834_v32 = vpack.c.bf16 %v1833_v51, %v1833_v51  ;;  %v1926_v47 = vpop.f32.mrf.mxu1 }
 0x837   :  { %1843 = vmatmul.bf16.vlgmr.msrb.gmra.mxu0 %v1834_v32 }
 0x838   :  { %v1831_v37 = vpop.f32.mrf.mxu3  ;;  %2053 = vmatpush.bf16.msrb.mxu0 %v9249_v0 }
 0x83a   :  { %v5144_v5 = vpop.eup %5143 }
 0x83b   :  { %v1996_v15 = vadd.f32 1.0, %v5144_v5 }
 0x83c   :  { %2054 = vmatpush.bf16.msrb.mxu0 %v9250_v49 }
 0x83d   :  { %5145 = vrcp.f32 %v1996_v15  ;;  %v7024_v56 = vpop.f32.mrf.mxu1  ;;  %v2008_v51 = vand.u32 2147483648, %v1996_v15  ;;  %v2006_v5 = vand.u32 2147483647, %v1996_v15  ;;  %vm2002_vm7 = vweird.f32 %v1996_v15 }
 0x83f   :  { %vm2007_vm9 = vcmp.eq.f32.partialorder %v2006_v5, 8.507059e+37  ;;  %v9317_v5 = vld [vmem:[#allocation26_spill] sm:$0xff] }
 0x840   :  { %v7026_v50 = vpop.f32.mrf.mxu3  ;;  %2055 = vmatpush.bf16.msrb.mxu0 %v9251_v52  ;;  %v2009_v52 = vor.u32 1.1754944e-38, %v2008_v51  ;;  %v9314_v51 = vld [vmem:[#allocation48_spill] sm:$0xff] }
 0x843   :  { %v5146_v53 = vpop.eup %5145 }
 0x844   :  { %v1998_v24 = vmul.f32 %v5146_v53, %v1996_v15  ;;  %2056 = vmatpush.bf16.msrb.mxu0 %v9306_v33  ;;  %vm2003_vm6 = vweird.f32 %v5146_v53  ;;  %v9310_v15 = vld [vmem:[#allocation33_spill] sm:$0xff] }
 0x845   :  { %v1978_v20 = vpop.f32.mrf.mxu1  ;;  %vm2004_vm8 = vmor %vm2002_vm7, %vm2003_vm6 }
 0x846   :  { %v1999_v36 = vsub.f32 1.0, %v1998_v24  ;;  %v9312_v20 = vld [vmem:[#allocation40_spill] sm:$0xff] }
 0x847   :  { %4818 = vmatmul.msk.bf16.vlgmr.msra.gmra.mxu0 %vm5900_vm2, %v6874_v2 }
 0x848   :  { %v2000_v0 = vmul.f32 %v5146_v53, %v1999_v36  ;;  %v1952_v49 = vpop.f32.mrf.mxu3  ;;  %2057 = vmatpush.bf16.msrb.mxu0 %v9253_v43  ;;  %v9308_v43 = vld [vmem:[#allocation74_spill] sm:$0xff]  ;;  %v9313_v36 = vld [vmem:[#allocation44_spill] sm:$0xff] }
 0x849   :  { %v9316_v49 = vld [vmem:[#allocation49_spill] sm:$0xff] }
 0x84a   :  { %v2001_v32 = vadd.f32 %v5146_v53, %v2000_v0 }
 0x84c   :  { %v2005_v47 = vsel %vm2004_vm8, %v5146_v53, %v2001_v32  ;;  %2058 = vmatpush.bf16.msrb.mxu0 %v9254_v23  ;;  %v7043_v23 = vld [vmem:[#allocation8 + $0x30] sm:$0xff]  ;;  %v3742_v32 = vmul.f32 %v6834_v31, %v9317_v5 }
 0x84d   :  { %v2010_v37 = vsel %vm2007_vm9, %v2009_v52, %v2005_v47  ;;  %9307 = vst [vmem:[#allocation75_spill] sm:$0xff] %v7043_v23  ;;  %v2144_v2 = vsel %vm140_vm0, %v9308_v43, %v7043_v23  ;;  %v9311_v53 = vld [vmem:[#allocation36_spill] sm:$0xff]  ;;  %v9318_v52 = vld [vmem:[#allocation53_spill] sm:$0xff]  ;;  %v9319_v47 = vld [vmem:[#allocation27_spill] sm:$0xff]  ;;  %v9321_v23 = vsub.f32 1.0, %v6826_v28 }
 0x84e   :  { %v2031_v24 = vmul.f32 %v2010_v37, %v6961_v12  ;;  %v3743_v37 = vadd.f32 %v3742_v32, %v9319_v47 }
 0x850   :  { %v2032_v33 = vpack.c.bf16 %v2031_v24, %v2031_v24  ;;  %2059 = vmatpush.bf16.msrb.mxu0 %v9255_v39  ;;  %v7050_v39 = vpack.c.bf16 %v2144_v2, %v2144_v2  ;;  %v3744_v2 = vmax.f32 %v3743_v37, 0.0  ;;  %v9325_v37 = vld [vmem:[#allocation61_spill] sm:$0xff] }
 0x852   :  { %2041 = vmatmul.bf16.vlgmr.msra.gmra.mxu3 %v2032_v33  ;;  %v9320_v33 = vld [vmem:[#allocation57_spill] sm:$0xff] }
 0x853   :  { %2213 = vmatpush.bf16.msra.mxu3 %v5844_v9 }
 0x854   :  { %2060 = vmatpush.bf16.msrb.mxu0 %v6644_v62  ;;  %v9309_v62 = vld [vmem:[#allocation30_spill] sm:$0xff] }
 0x857   :  { %2214 = vmatpush.bf16.msra.mxu3 %v5855_v30 }
 0x858   :  { %2174 = vmatpush.bf16.msra.mxu0 %v5739_v44 }
 0x85b   :  { %2215 = vmatpush.bf16.msra.mxu3 %v5863_v46 }
 0x85c   :  { %2175 = vmatpush.bf16.msra.mxu0 %v5748_v54 }
 0x85f   :  { %2216 = vmatpush.bf16.msra.mxu3 %v5882_v45 }
 0x860   :  { %2176 = vmatpush.bf16.msra.mxu0 %v5760_v10 }
 0x862   :  { %4827 = vmatmul.msk.bf16.vlgmr.msrb.gmra.mxu3 %vm5900_vm2, %v7050_v39 }
 0x863   :  { %2217 = vmatpush.bf16.msra.mxu3 %v5886_v59 }
 0x864   :  { %2177 = vmatpush.bf16.msra.mxu0 %v9067_v35 }
 0x867   :  { %2218 = vmatpush.bf16.msra.mxu3 %v5889_v7 }
 0x868   :  { %2178 = vmatpush.bf16.msra.mxu0 %v9069_v29 }
 0x86b   :  { %2219 = vmatpush.bf16.msra.mxu3 %v5892_v25 }
 0x86c   :  { %2179 = vmatpush.bf16.msra.mxu0 %v9071_v26 }
 0x86f   :  { %2220 = vmatpush.bf16.msra.mxu3 %v5895_v27 }
 0x870   :  { %2180 = vmatpush.bf16.msra.mxu0 %v9072_v3 }
 0x872   :  { %4833 = vmatmul.msk.bf16.vlgmr.msra.gmra.mxu3 %vm5900_vm2, %v7050_v39 }
 0x873   :  { %2381 = vmatpush.bf16.msrb.mxu3 %v5732_v34 }
 0x874   :  { %2181 = vmatpush.bf16.msra.mxu0 %v9073_v14 }
 0x877   :  { %2382 = vmatpush.bf16.msrb.mxu3 %v9151_v48 }
 0x87b   :  { %2383 = vmatpush.bf16.msrb.mxu3 %v9309_v62 }
 0x87f   :  { %2384 = vmatpush.bf16.msrb.mxu3 %v9310_v15 }
 0x883   :  { %2385 = vmatpush.bf16.msrb.mxu3 %v9311_v53 }
 0x887   :  { %2386 = vmatpush.bf16.msrb.mxu3 %v9312_v20  ;;  %v3745_v20 = vsub.f32 0.0, %v3744_v2 }
 0x889   :  { %v3746_v53 = vmul.f32 1.442695, %v3745_v20 }
 0x88b   :  { %2387 = vmatpush.bf16.msrb.mxu3 %v9313_v36  ;;  %5147 = vpow2.f32 %v3746_v53 }
 0x88d   :  { %v7075_v0 = vpop.permute.xlu0 %3306 }
 0x88e   :  { %9315 = vst [vmem:[#allocation71_spill] sm:$0xff] %v7075_v0  ;;  %v7086_v0 = vpop.permute.xlu2 %3534 }
 0x88f   :  { %2388 = vmatpush.bf16.msrb.mxu3 %v9314_v51  ;;  %9322 = vst [vmem:[#allocation78_spill] sm:$0xff] %v7086_v0 }
 0x891   :  { %v5148_v20 = vpop.eup %5147 }
 0x893   :  { %2433 = vmatpush.bf16.msra.mxu3 %v9316_v49  ;;  %v9323_v49 = vld [vmem:[#allocation59_spill] sm:$0xff] }
 0x895   :  { %v3517_v24 = vpop.permute.xlu0 %3516 }
 0x896   :  { %v3519_v11 = vmul.f32 %v3517_v24, %v6826_v28  ;;  %v3756_v28 = vpop.permute.xlu2 %3755 }
 0x897   :  { %2434 = vmatpush.bf16.msra.mxu3 %v9318_v52  ;;  %v3528_v43 = vpop.permute.xlu1 %3527  ;;  %v9324_v52 = vld [vmem:[#allocation60_spill] sm:$0xff] }
 0x898   :  { %v3530_v51 = vmul.f32 %v3528_v43, %v9321_v23  ;;  %v9326_v23 = vld [vmem:[#allocation62_spill] sm:$0xff] }
 0x89a   :  { %v3531_v36 = vadd.f32 %v3530_v51, %v3519_v11 }
 0x89b   :  { %2435 = vmatpush.bf16.msra.mxu3 %v9320_v33 }
 0x89c   :  { %3539 = vrot.lane.b32.xlu0 %v3531_v36, %s5596_s22  ;;  %v7101_v36 = vld [vmem:[#allocation8 + $0x70] sm:$0xff] }
 0x89d   :  { %v8880_v51 = vsub.f32 1.0, %v7101_v36 }
 0x89f   :  { %2436 = vmatpush.bf16.msra.mxu3 %v9323_v49  ;;  %v3732_v32 = vpop.permute.xlu1 %3731 }
 0x8a0   :  { %v3734_v33 = vmul.f32 %v3732_v32, %v7009_v19  ;;  %v9327_v19 = vld [vmem:[#allocation63_spill] sm:$0xff] }
 0x8a2   :  { %v7094_v24 = vadd.f32 %v3734_v33, %v6834_v31  ;;  %v7111_v33 = vld [vmem:[%s8688_s10] ss:$0 sm:$0xff] }
 0x8a3   :  { %2437 = vmatpush.bf16.msra.mxu3 %v9324_v52  ;;  %9328 = vst [vmem:[#allocation85_spill] sm:$0xff] %v7111_v33 }
 0x8a4   :  { %3749 = vrot.lane.b32.xlu0 %v7094_v24, %s5588_s23  ;;  %v3758_v11 = vmul.f32 %v3756_v28, %v7094_v24  ;;  %v1951_v28 = vadd.f32 %v7026_v50, %v9224_v18 }
 0x8a6   :  { %3760 = vrot.lane.b32.xlu1 %v3758_v11, %s5588_s23 }
 0x8a7   :  { %2438 = vmatpush.bf16.msra.mxu3 %v9325_v37  ;;  %v1977_v37 = vadd.f32 %v7024_v56, %v9225_v42 }
 0x8a9   :  { %v1990_v22 = vadd.f32 %v6966_v13, %v1977_v37 }
 0x8ab   :  { %2439 = vmatpush.bf16.msra.mxu3 %v9326_v23 }
 0x8ac   :  { %3767 = vperm.xlu0 %5034, %v5148_v20  }
 0x8ae   :  { %3964 = vrot.lane.b32.xlu1 %v8880_v51, %s5596_s22 }
 0x8af   :  { %2440 = vmatpush.bf16.msra.mxu3 %v9327_v19 }
 0x8b4   :  { %v1844_v53 = vpop.f32.mrf.mxu0 }
 0x8b5   :  { %v1845_v43 = vadd.f32 %v7111_v33, %v1844_v53 }
 0x8b7   :  { %v7117_v2 = vsel %vm6947_vm5, %v1845_v43, %v6917_v17 }
 0x8b8   :  { %9329 = vst [vmem:[#allocation82_spill] sm:$0xff] %v7117_v2 }
 0x8bc   :  { %v1846_v32 = vpop.f32.mrf.mxu0 }
 0x8c4   :  { %v1963_v11 = vpop.f32.mrf.mxu0 }
 0x8c5   :  { %v1964_v20 = vadd.f32 %v1963_v11, %v1951_v28 }
 0x8c7   :  { %v4823_v51 = vmul.f32 -1.442695, %v1964_v20 }
 0x8c9   :  { %5149 = vpow2.f32 %v4823_v51 }
 0x8cc   :  { %v1965_v0 = vpop.f32.mrf.mxu0 }
 0x8cf   :  { %v5150_v19 = vpop.eup %5149 }
 0x8d0   :  { %v2015_v23 = vadd.f32 1.0, %v5150_v19 }
 0x8d2   :  { %5151 = vrcp.f32 %v2015_v23  ;;  %v2027_v50 = vand.u32 2147483648, %v2015_v23  ;;  %v2025_v19 = vand.u32 2147483647, %v2015_v23  ;;  %vm2021_vm11 = vweird.f32 %v2015_v23 }
 0x8d4   :  { %v2028_v56 = vor.u32 1.1754944e-38, %v2027_v50  ;;  %vm2026_vm13 = vcmp.eq.f32.partialorder %v2025_v19, 8.507059e+37  ;;  %v9332_v50 = vld [vmem:[#allocation81_spill] sm:$0xff] }
 0x8d5   :  { %v2042_v53 = vpop.f32.mrf.mxu3  ;;  %v7145_v19 = vld [vmem:[#allocation11 + $0x38] sm:$0xff] }
 0x8d6   :  { %v2046_v17 = vadd.f32 %v2042_v53, %v1990_v22  ;;  %v2084_v22 = vstv %s2083_s16  ;;  %s3248_s16 = scalar_select %p4884_p10, 1, 0 }
 0x8d7   :  { %vm7130_vm14 = vcmp.eq.s32.totalorder %v2084_v22, 1  ;;  %v3975_v22 = vmul.f32 %v7101_v36, %v9317_v5 }
 0x8d8   :  { %v5152_v43 = vpop.eup %5151  ;;  %5153 = vtanh.f32 %v2046_v17 }
 0x8d9   :  { %v2017_v32 = vmul.f32 %v5152_v43, %v2015_v23  ;;  %vm2022_vm10 = vweird.f32 %v5152_v43 }
 0x8da   :  { %vm2023_vm12 = vmor %vm2021_vm11, %vm2022_vm10 }
 0x8db   :  { %v2018_v2 = vsub.f32 1.0, %v2017_v32 }
 0x8dd   :  { %v2019_v0 = vmul.f32 %v5152_v43, %v2018_v2  ;;  %v2044_v51 = vpop.f32.mrf.mxu3 }
 0x8de   :  { %v5154_v37 = vpop.eup %5153 }
 0x8df   :  { %v2020_v28 = vadd.f32 %v5152_v43, %v2019_v0 }
 0x8e1   :  { %v2024_v13 = vsel %vm2023_vm12, %v5152_v43, %v2020_v28  ;;  %v7149_v28 = vld [vmem:[#allocation11 + $0x30] sm:$0xff] }
 0x8e2   :  { %v2029_v11 = vsel %vm2026_vm13, %v2028_v56, %v2024_v13  ;;  %v7159_v13 = vld [vmem:[#allocation11 + $0x20] sm:$0xff] }
 0x8e3   :  { %v2048_v20 = vsub.f32 1.0, %v2029_v11  ;;  %v2050_v53 = vmul.f32 %v5154_v37, %v2029_v11  ;;  %v7167_v37 = vld [vmem:[#allocation11 + $0x10] sm:$0xff] }
 0x8e5   :  { %v2049_v32 = vmul.f32 %v2048_v20, %v6961_v12  ;;  %v7128_v42 = vpop.f32.mrf.mxu3  ;;  %v7177_v20 = vld [vmem:[#allocation11] sm:$0xff] }
 0x8e6   :  { %9335 = vst [vmem:[#allocation83_spill] sm:$0xff] %v7177_v20 }
 0x8e7   :  { %v2051_v2 = vadd.f32 %v2050_v53, %v2049_v32  ;;  %v9338_v32 = vld [vmem:[#allocation39_spill] sm:$0xff] }
 0x8e9   :  { %v7137_v23 = vsel %vm7130_vm14, %v2051_v2, %v6954_v58  ;;  %v2052_v43 = vpack.c.bf16 %v2051_v2, %v2051_v2  ;;  %v7153_v58 = vld [vmem:[#allocation11 + $0x28] sm:$0xff]  ;;  %v9339_v2 = vld [vmem:[#allocation34_spill] sm:$0xff] }
 0x8ea   :  { %v7141_v0 = vmul.f32 %v9332_v50, %v7137_v23  ;;  %v3976_v50 = vadd.f32 %v3975_v22, %v9319_v47 }
 0x8eb   :  { %2061 = vmatmul.bf16.vlgmr.msrb.gmra.mxu0 %v2052_v43 }
 0x8ec   :  { %v2146_v12 = vpack.c.bf16 %v7141_v0, %v7141_v0  ;;  %2266 = vmatpush.bf16.msrb.mxu0 %v7145_v19 }
 0x8ed   :  { %v2172_v51 = vpop.f32.mrf.mxu3 }
 0x8ee   :  { %2156 = vmatmul.bf16.vlgmr.msrb.gmra.mxu2 %v2146_v12  ;;  %v9341_v51 = vld [vmem:[#allocation38_spill] sm:$0xff] }
 0x8ef   :  { %2301 = vmatpush.bf16.msrb.mxu2 %v6751_v16  ;;  %v7163_v16 = vld [vmem:[#allocation11 + $0x18] sm:$0xff] }
 0x8f0   :  { %2267 = vmatpush.bf16.msrb.mxu0 %v7149_v28 }
 0x8f3   :  { %2302 = vmatpush.bf16.msrb.mxu2 %v6755_v40 }
 0x8f4   :  { %2268 = vmatpush.bf16.msrb.mxu0 %v7153_v58 }
 0x8f5   :  { %v7156_v56 = vpop.f32.mrf.mxu3 }
 0x8f7   :  { %2303 = vmatpush.bf16.msrb.mxu2 %v6761_v8  ;;  %v7171_v8 = vld [vmem:[#allocation11 + $0x8] sm:$0xff] }
 0x8f8   :  { %2269 = vmatpush.bf16.msrb.mxu0 %v7159_v13  ;;  %9333 = vst [vmem:[#allocation95_spill] sm:$0xff] %v7171_v8 }
 0x8fb   :  { %2182 = vmatmul.bf16.vlgmr.msra.gmra.mxu0 %v2146_v12  ;;  %2304 = vmatpush.bf16.msrb.mxu2 %v9278_v63  ;;  %v9334_v63 = vld [vmem:[#allocation24_spill] sm:$0xff] }
 0x8fc   :  { %2270 = vmatpush.bf16.msrb.mxu0 %v7163_v16  ;;  %v3969_v11 = vmul.f32 %v7101_v36, %v9334_v63 }
 0x8fd   :  { %v2224_v40 = vpop.f32.mrf.mxu3 }
 0x8fe   :  { %2208 = vmatmul.bf16.vlgmr.msra.gmra.mxu2 %v2146_v12  ;;  %v7193_v12 = vld [vmem:[#allocation8 + $0x78] sm:$0xff] }
 0x8ff   :  { %2305 = vmatpush.bf16.msrb.mxu2 %v9280_v21  ;;  %v9336_v21 = vld [vmem:[#allocation25_spill] sm:$0xff] }
 0x900   :  { %2271 = vmatpush.bf16.msrb.mxu0 %v7167_v37  ;;  %v3970_v53 = vadd.f32 %v3969_v11, %v9336_v21 }
 0x903   :  { %2306 = vmatpush.bf16.msrb.mxu2 %v9282_v4 }
 0x904   :  { %2272 = vmatpush.bf16.msrb.mxu0 %v7171_v8 }
 0x907   :  { %2307 = vmatpush.bf16.msrb.mxu2 %v9284_v6  ;;  %v3971_v6 = vmax.f32 %v3970_v53, 0.0  ;;  %v3977_v53 = vmax.f32 %v3976_v50, 0.0 }
 0x908   :  { %2273 = vmatpush.bf16.msrb.mxu0 %v7177_v20  ;;  %v9345_v20 = vld [vmem:[#allocation52_spill] sm:$0xff] }
 0x909   :  { %v3972_v43 = vsub.f32 0.0, %v3971_v6  ;;  %v9343_v6 = vsub.f32 1.0, %v6834_v31 }
 0x90b   :  { %2308 = vmatpush.bf16.msrb.mxu2 %v9287_v60  ;;  %v9340_v60 = vld [vmem:[#allocation43_spill] sm:$0xff] }
 0x90c   :  { %2394 = vmatpush.bf16.msra.mxu0 %v9286_v57  ;;  %v3978_v57 = vsub.f32 0.0, %v3977_v53 }
 0x90e   :  { %v7185_v4 = vpop.permute.xlu0 %3539  ;;  %v3979_v50 = vmul.f32 1.442695, %v3978_v57  ;;  %v9350_v57 = vld [vmem:[#allocation56_spill] sm:$0xff] }
 0x90f   :  { %2420 = vmatpush.bf16.msra.mxu2 %v9288_v1  ;;  %9337 = vst [vmem:[#allocation96_spill] sm:$0xff] %v7185_v4  ;;  %v3973_v4 = vmul.f32 1.442695, %v3972_v43  ;;  %v9342_v1 = vld [vmem:[#allocation47_spill] sm:$0xff]  ;;  %v9346_v43 = vld [vmem:[#allocation46_spill] sm:$0xff] }
 0x910   :  { %2395 = vmatpush.bf16.msra.mxu0 %v9289_v55  ;;  %v4202_v55 = vmul.f32 %v7193_v12, %v9334_v63 }
 0x911   :  { %5155 = vpow2.f32 %v3973_v4  ;;  %v9348_v4 = vld [vmem:[#allocation51_spill] sm:$0xff] }
 0x912   :  { %5157 = vpow2.f32 %v3979_v50 }
 0x913   :  { %2421 = vmatpush.bf16.msra.mxu2 %v9338_v32  ;;  %v9344_v32 = vld [vmem:[#allocation42_spill] sm:$0xff] }
 0x914   :  { %2396 = vmatpush.bf16.msra.mxu0 %v9339_v2 }
 0x916   :  { %v3750_v40 = vpop.permute.xlu0 %3749 }
 0x917   :  { %2422 = vmatpush.bf16.msra.mxu2 %v9340_v60  ;;  %v3752_v2 = vmul.f32 %v3750_v40, %v6834_v31  ;;  %v4208_v40 = vmul.f32 %v7193_v12, %v9317_v5  ;;  %v5156_v53 = vpop.eup %5155 }
 0x918   :  { %2397 = vmatpush.bf16.msra.mxu0 %v9341_v51  ;;  %v3761_v11 = vpop.permute.xlu1 %3760  ;;  %v4203_v51 = vadd.f32 %v4202_v55, %v9336_v21 }
 0x919   :  { %v3763_v22 = vmul.f32 %v3761_v11, %v9343_v6  ;;  %v9347_v11 = vld [vmem:[#allocation55_spill] sm:$0xff]  ;;  %v9349_v6 = vld [vmem:[#allocation58_spill] sm:$0xff] }
 0x91b   :  { %2423 = vmatpush.bf16.msra.mxu2 %v9342_v1  ;;  %v3764_v60 = vadd.f32 %v3763_v22, %v3752_v2  ;;  %v4204_v1 = vmax.f32 %v4203_v51, 0.0  ;;  %v9351_v51 = vld [vmem:[#allocation64_spill] sm:$0xff]  ;;  %v5158_v22 = vpop.eup %5157 }
 0x91c   :  { %2398 = vmatpush.bf16.msra.mxu0 %v9344_v32 }
 0x91d   :  { %3772 = vrot.lane.b32.xlu2 %v3764_v60, %s5596_s22  ;;  %v4205_v21 = vsub.f32 0.0, %v4204_v1  ;;  %v4209_v60 = vadd.f32 %v4208_v40, %v9319_v47  ;;  %v7221_v40 = vld [vmem:[#allocation8 + $0x8] sm:$0xff] }
 0x91e   :  { %9352 = vst [vmem:[#allocation84_spill] sm:$0xff] %v7221_v40 }
 0x91f   :  { %2424 = vmatpush.bf16.msra.mxu2 %v9345_v20  ;;  %v4206_v5 = vmul.f32 1.442695, %v4205_v21  ;;  %v5304_v21 = vld [vmem:[#allocation8 + $0x50] sm:$0xff] }
 0x920   :  { %2399 = vmatpush.bf16.msra.mxu0 %v9346_v43  ;;  %v3965_v63 = vpop.permute.xlu1 %3964 }
 0x921   :  { %v3967_v2 = vmul.f32 %v3965_v63, %v7094_v24  ;;  %v4210_v24 = vmax.f32 %v4209_v60, 0.0  ;;  %5159 = vpow2.f32 %v4206_v5 }
 0x923   :  { %2425 = vmatpush.bf16.msra.mxu2 %v9347_v11  ;;  %v7213_v55 = vadd.f32 %v3967_v2, %v7101_v36  ;;  %v4211_v63 = vsub.f32 0.0, %v4210_v24  ;;  %v7225_v2 = vld [vmem:[#allocation8 + $0x20] sm:$0xff] }
 0x924   :  { %2400 = vmatpush.bf16.msra.mxu0 %v9348_v4  ;;  %9353 = vst [vmem:[#allocation97_spill] sm:$0xff] %v7225_v2 }
 0x925   :  { %3988 = vperm.xlu2 %5035, %v5156_v53   ;;  %3982 = vrot.lane.b32.xlu0 %v7213_v55, %s5588_s23  ;;  %v4212_v50 = vmul.f32 1.442695, %v4211_v63  ;;  %v7229_v53 = vld [vmem:[#allocation8 + $0x38] sm:$0xff] }
 0x926   :  { %9354 = vst [vmem:[#allocation37_spill] sm:$0xff] %v7229_v53 }
 0x927   :  { %2426 = vmatpush.bf16.msra.mxu2 %v9349_v6  ;;  %v5160_v1 = vpop.eup %5159  ;;  %5161 = vpow2.f32 %v4212_v50  ;;  %v7237_v50 = vld [vmem:[#allocation12 + $0x38] sm:$0xff] }
 0x928   :  { %2401 = vmatpush.bf16.msra.mxu0 %v9350_v57  ;;  %9355 = vst [vmem:[#allocation98_spill] sm:$0xff] %v7237_v50 }
 0x92b   :  { %2427 = vmatpush.bf16.msra.mxu2 %v9351_v51 }
 0x92d   :  { %4000 = vperm.xlu2 %5035, %v5158_v22   ;;  %v5162_v47 = vpop.eup %5161 }
 0x935   :  { %4221 = vperm.xlu2 %5035, %v5160_v1  }
 0x93d   :  { %4233 = vperm.xlu2 %5035, %v5162_v47  }
 0x945   :  { %928 = vrot.lane.b32.xlu2 %v7221_v40, %s5596_s22 }
 0x94d   :  { %1627 = vrot.lane.b32.xlu2 %v7225_v2, %s5596_s22 }
 0x955   :  { %2326 = vrot.lane.b32.xlu2 %v7229_v53, %s5596_s22 }
 0x95d   :  { %3025 = vrot.lane.b32.xlu2 %v5304_v21, %s5596_s22  ;;  %v7242_v21 = vld [vmem:[#allocation12 + $0x30] sm:$0xff] }
 0x95e   :  { %9356 = vst [vmem:[#allocation89_spill] sm:$0xff] %v7242_v21 }
 0x965   :  { %3724 = vrot.lane.b32.xlu2 %v6834_v31, %s5596_s22 }
 0x968   :  { %v2062_v60 = vpop.f32.mrf.mxu0 }
 0x969   :  { %v2063_v5 = vadd.f32 %v6844_v38, %v2062_v60  ;;  %v7249_v60 = vld [vmem:[#allocation12 + $0x28] sm:$0xff] }
 0x96a   :  { %9358 = vst [vmem:[#allocation26_spill] sm:$0xff] %v7249_v60 }
 0x96b   :  { %v2066_v24 = vmax.f32 %v2063_v5, 0.0 }
 0x96d   :  { %v2067_v22 = vpack.c.bf16 %v2066_v24, %v2066_v24  ;;  %v7252_v24 = vld [vmem:[#allocation12 + $0x20] sm:$0xff] }
 0x96e   :  { %9359 = vst [vmem:[#allocation27_spill] sm:$0xff] %v7252_v24 }
 0x96f   :  { %2076 = vmatmul.bf16.vlgmr.msrb.gmra.mxu1 %v2067_v22 }
 0x970   :  { %v2064_v63 = vpop.f32.mrf.mxu0  ;;  %2286 = vmatpush.bf16.msrb.mxu1 %v7237_v50 }
 0x971   :  { %v2157_v1 = vpop.f32.mrf.mxu2 }
 0x972   :  { %v2158_v47 = vadd.f32 %v2157_v1, %v5967_v41 }
 0x974   :  { %v2171_v2 = vadd.f32 %v7128_v42, %v2158_v47  ;;  %2287 = vmatpush.bf16.msrb.mxu1 %v7242_v21  ;;  %v7259_v47 = vld [vmem:[#allocation12 + $0x18] sm:$0xff]  ;;  %v7275_v21 = vld [vmem:[#allocation12] sm:$0xff] }
 0x975   :  { %9360 = vst [vmem:[#allocation81_spill] sm:$0xff] %v7259_v47 }
 0x976   :  { %v4834_v31 = vmul.f32 -1.442695, %v2171_v2 }
 0x977   :  { %v7245_v40 = vpop.permute.xlu2 %3772 }
 0x978   :  { %9357 = vst [vmem:[#allocation74_spill] sm:$0xff] %v7245_v40  ;;  %5163 = vpow2.f32 %v4834_v31  ;;  %v7247_v38 = vpop.f32.mrf.mxu0  ;;  %2288 = vmatpush.bf16.msrb.mxu1 %v7249_v60 }
 0x979   :  { %v2159_v5 = vpop.f32.mrf.mxu2 }
 0x97a   :  { %v7265_v5 = vld [vmem:[#allocation12 + $0x10] sm:$0xff] }
 0x97b   :  { %9361 = vst [vmem:[#allocation24_spill] sm:$0xff] %v7265_v5 }
 0x97c   :  { %2289 = vmatpush.bf16.msrb.mxu1 %v7252_v24  ;;  %v7269_v24 = vld [vmem:[#allocation12 + $0x8] sm:$0xff] }
 0x97d   :  { %9362 = vst [vmem:[#allocation25_spill] sm:$0xff] %v7269_v24 }
 0x97e   :  { %v5164_v42 = vpop.eup %5163 }
 0x97f   :  { %v2229_v22 = vadd.f32 1.0, %v5164_v42  ;;  %v3989_v63 = vpop.permute.xlu2 %3988  ;;  %4830 = vmatmul.msk.bf16.vlgmr.msra.gmra.mxu1 %vm5900_vm2, %v7050_v39  ;;  %v8903_v42 = vsub.f32 1.0, %v7193_v12 }
 0x980   :  { %v3991_v2 = vmul.f32 %v3989_v63, %v7213_v55  ;;  %v2185_v1 = vpop.f32.mrf.mxu0  ;;  %2290 = vmatpush.bf16.msrb.mxu1 %v7259_v47 }
 0x981   :  { %5165 = vrcp.f32 %v2229_v22  ;;  %v7262_v31 = vpop.f32.mrf.mxu2  ;;  %v2241_v47 = vand.u32 2147483648, %v2229_v22  ;;  %v2239_v60 = vand.u32 2147483647, %v2229_v22  ;;  %vm2235_vm1 = vweird.f32 %v2229_v22 }
 0x982   :  { %3993 = vrot.lane.b32.xlu1 %v3991_v2, %s5588_s23 }
 0x983   :  { %vm2240_vm4 = vcmp.eq.f32.partialorder %v2239_v60, 8.507059e+37 }
 0x984   :  { %2291 = vmatpush.bf16.msrb.mxu1 %v7265_v5 }
 0x987   :  { %v5166_v40 = vpop.eup %5165 }
 0x988   :  { %v2231_v39 = vmul.f32 %v5166_v40, %v2229_v22  ;;  %2292 = vmatpush.bf16.msrb.mxu1 %v7269_v24  ;;  %vm2236_vm15 = vweird.f32 %v5166_v40  ;;  %v2242_v24 = vor.u32 1.1754944e-38, %v2241_v47  ;;  %v9364_v22 = vld [vmem:[#allocation36_spill] sm:$0xff] }
 0x989   :  { %v2211_v63 = vpop.f32.mrf.mxu2  ;;  %vm2237_vm3 = vmor %vm2235_vm1, %vm2236_vm15  ;;  %v9365_v47 = vld [vmem:[#allocation40_spill] sm:$0xff] }
 0x98a   :  { %v2232_v1 = vsub.f32 1.0, %v2231_v39  ;;  %4197 = vrot.lane.b32.xlu1 %v8903_v42, %s5596_s22 }
 0x98c   :  { %v2233_v2 = vmul.f32 %v5166_v40, %v2232_v1  ;;  %2293 = vmatpush.bf16.msrb.mxu1 %v7275_v21 }
 0x98e   :  { %v2234_v5 = vadd.f32 %v5166_v40, %v2233_v2  ;;  %v9368_v2 = vld [vmem:[#allocation49_spill] sm:$0xff] }
 0x990   :  { %2407 = vmatpush.bf16.msra.mxu1 %v5739_v44  ;;  %v2238_v63 = vsel %vm2237_vm3, %v5166_v40, %v2234_v5  ;;  %v9363_v40 = vld [vmem:[#allocation70_spill] sm:$0xff]  ;;  %v9366_v5 = vld [vmem:[#allocation44_spill] sm:$0xff] }
 0x991   :  { %v2243_v39 = vsel %vm2240_vm4, %v2242_v24, %v2238_v63  ;;  %v2377_v60 = vsel %vm140_vm0, %v9363_v40, %v7229_v53  ;;  %v9369_v63 = vld [vmem:[#allocation53_spill] sm:$0xff]  ;;  %v9372_v40 = vld [vmem:[#allocation62_spill] sm:$0xff] }
 0x992   :  { %v2264_v42 = vmul.f32 %v2243_v39, %v7141_v0  ;;  %v7292_v24 = vpack.c.bf16 %v2377_v60, %v2377_v60  ;;  %v9370_v39 = vld [vmem:[#allocation57_spill] sm:$0xff]  ;;  %v7321_v60 = vpop.permute.xlu0 %3767 }
 0x993   :  { %9373 = vst [vmem:[#allocation70_spill] sm:$0xff] %v7321_v60 }
 0x994   :  { %2408 = vmatpush.bf16.msra.mxu1 %v5748_v54  ;;  %v2265_v1 = vpack.c.bf16 %v2264_v42, %v2264_v42  ;;  %v9367_v42 = vld [vmem:[#allocation48_spill] sm:$0xff] }
 0x996   :  { %2274 = vmatmul.bf16.vlgmr.msrb.gmra.mxu0 %v2265_v1  ;;  %v9371_v1 = vld [vmem:[#allocation61_spill] sm:$0xff] }
 0x997   :  { %2446 = vmatpush.bf16.msrb.mxu0 %v5844_v9 }
 0x998   :  { %2409 = vmatpush.bf16.msra.mxu1 %v5760_v10 }
 0x99b   :  { %2447 = vmatpush.bf16.msrb.mxu0 %v5855_v30 }
 0x99c   :  { %2410 = vmatpush.bf16.msra.mxu1 %v9067_v35 }
 0x99f   :  { %2448 = vmatpush.bf16.msrb.mxu0 %v5863_v46 }
 0x9a0   :  { %2411 = vmatpush.bf16.msra.mxu1 %v9069_v29 }
 0x9a3   :  { %2449 = vmatpush.bf16.msrb.mxu0 %v5882_v45 }
 0x9a4   :  { %2412 = vmatpush.bf16.msra.mxu1 %v9071_v26 }
 0x9a6   :  { %4839 = vmatmul.msk.bf16.vlgmr.msra.gmra.mxu0 %vm5900_vm2, %v7292_v24 }
 0x9a7   :  { %2450 = vmatpush.bf16.msrb.mxu0 %v5886_v59 }
 0x9a8   :  { %2413 = vmatpush.bf16.msra.mxu1 %v9072_v3 }
 0x9ab   :  { %2451 = vmatpush.bf16.msrb.mxu0 %v5889_v7 }
 0x9ac   :  { %2414 = vmatpush.bf16.msra.mxu1 %v9073_v14 }
 0x9af   :  { %2452 = vmatpush.bf16.msrb.mxu0 %v5892_v25 }
 0x9b3   :  { %2453 = vmatpush.bf16.msrb.mxu0 %v5895_v27 }
 0x9b6   :  { %4845 = vmatmul.msk.bf16.vlgmr.msrb.gmra.mxu0 %vm5900_vm2, %v7292_v24 }
 0x9b7   :  { %2614 = vmatpush.bf16.msra.mxu0 %v5732_v34 }
 0x9bb   :  { %2615 = vmatpush.bf16.msra.mxu0 %v9151_v48 }
 0x9bf   :  { %2616 = vmatpush.bf16.msra.mxu0 %v9309_v62 }
 0x9c3   :  { %2617 = vmatpush.bf16.msra.mxu0 %v9310_v15 }
 0x9c7   :  { %2618 = vmatpush.bf16.msra.mxu0 %v9364_v22  ;;  %v7333_v22 = vpop.permute.xlu2 %4000 }
 0x9c8   :  { %9378 = vst [vmem:[#allocation100_spill] sm:$0xff] %v7333_v22  ;;  %v2317_v22 = vstv %s2316_s18 }
 0x9c9   :  { %vm7360_vm9 = vcmp.eq.s32.totalorder %v2317_v22, 1 }
 0x9cb   :  { %2619 = vmatpush.bf16.msra.mxu0 %v9365_v47 }
 0x9cf   :  { %2620 = vmatpush.bf16.msra.mxu0 %v9366_v5 }
 0x9d3   :  { %2621 = vmatpush.bf16.msra.mxu0 %v9367_v42  ;;  %v9374_v42 = vld [vmem:[#allocation63_spill] sm:$0xff] }
 0x9d7   :  { %2666 = vmatpush.bf16.msrb.mxu0 %v9368_v2  ;;  %v9375_v2 = vld [vmem:[#allocation82_spill] sm:$0xff] }
 0x9db   :  { %2667 = vmatpush.bf16.msrb.mxu0 %v9369_v63 }
 0x9df   :  { %2668 = vmatpush.bf16.msrb.mxu0 %v9370_v39  ;;  %v3983_v39 = vpop.permute.xlu0 %3982 }
 0x9e3   :  { %2669 = vmatpush.bf16.msrb.mxu0 %v9323_v49 }
 0x9e7   :  { %2670 = vmatpush.bf16.msrb.mxu0 %v9324_v52  ;;  %v3985_v52 = vmul.f32 %v3983_v39, %v7101_v36  ;;  %v4222_v39 = vpop.permute.xlu2 %4221 }
 0x9eb   :  { %2671 = vmatpush.bf16.msrb.mxu0 %v9371_v1  ;;  %v9377_v1 = vsub.f32 1.0, %v7101_v36 }
 0x9ec   :  { %v2077_v53 = vpop.f32.mrf.mxu1 }
 0x9ed   :  { %v2078_v5 = vadd.f32 %v7111_v33, %v2077_v53  ;;  %v2184_v53 = vadd.f32 %v7247_v38, %v9224_v18 }
 0x9ef   :  { %2672 = vmatpush.bf16.msrb.mxu0 %v9372_v40  ;;  %v7328_v63 = vsel %vm7130_vm14, %v2078_v5, %v9375_v2 }
 0x9f0   :  { %9376 = vst [vmem:[#allocation82_spill] sm:$0xff] %v7328_v63 }
 0x9f3   :  { %2673 = vmatpush.bf16.msrb.mxu0 %v9374_v42 }
 0x9f4   :  { %v3994_v49 = vpop.permute.xlu1 %3993  ;;  %v2079_v47 = vpop.f32.mrf.mxu1 }
 0x9f5   :  { %v3996_v40 = vmul.f32 %v3994_v49, %v9377_v1 }
 0x9f7   :  { %v3997_v60 = vadd.f32 %v3996_v40, %v3985_v52  ;;  %v7343_v40 = vld [vmem:[#allocation8] sm:$0xff] }
 0x9f9   :  { %4005 = vrot.lane.b32.xlu0 %v3997_v60, %s5596_s22 }
 0x9fc   :  { %v4198_v33 = vpop.permute.xlu1 %4197  ;;  %v2196_v17 = vpop.f32.mrf.mxu1 }
 0x9fd   :  { %v4200_v5 = vmul.f32 %v4198_v33, %v7213_v55  ;;  %v2197_v42 = vadd.f32 %v2196_v17, %v2184_v53  ;;  %v9379_v33 = vld [vmem:[#allocation80_spill] sm:$0xff]  ;;  %v7350_v17 = vld [vmem:[#allocation8 + $0x18] sm:$0xff] }
 0x9fe   :  { %v2210_v55 = vadd.f32 %v7262_v31, %v9379_v33  ;;  %v9380_v33 = vld [vmem:[#allocation75_spill] sm:$0xff] }
 0x9ff   :  { %v4201_v47 = vadd.f32 %v4200_v5, %v7193_v12  ;;  %v4835_v63 = vmul.f32 -1.442695, %v2197_v42 }
 0xa01   :  { %4420 = vst.msk [vmem:[#allocation2] sm:$0xff] %vm140_vm0, %v4201_v47  ;;  %5167 = vpow2.f32 %v4835_v63  ;;  %4215 = vrot.lane.b32.xlu0 %v4201_v47, %s5588_s23  ;;  %v4224_v49 = vmul.f32 %v4222_v39, %v4201_v47  ;;  %v2223_v63 = vadd.f32 %v7156_v56, %v2210_v55 }
 0xa03   :  { %4226 = vrot.lane.b32.xlu1 %v4224_v49, %s5588_s23 }
 0xa04   :  { %v2198_v52 = vpop.f32.mrf.mxu1 }
 0xa07   :  { %v5168_v1 = vpop.eup %5167 }
 0xa08   :  { %v2248_v38 = vadd.f32 1.0, %v5168_v1 }
 0xa0a   :  { %5169 = vrcp.f32 %v2248_v38  ;;  %v2260_v47 = vand.u32 2147483648, %v2248_v38  ;;  %v2258_v31 = vand.u32 2147483647, %v2248_v38  ;;  %vm2254_vm6 = vweird.f32 %v2248_v38 }
 0xa0b   :  { %177 = vrot.lane.b32.xlu1 %v7343_v40, %s5596_s22 }
 0xa0c   :  { %v2261_v56 = vor.u32 1.1754944e-38, %v2260_v47  ;;  %vm2259_vm8 = vcmp.eq.f32.partialorder %v2258_v31, 8.507059e+37  ;;  %v7386_v31 = vld [vmem:[#allocation14 + $0x30] sm:$0xff] }
 0xa10   :  { %v5170_v42 = vpop.eup %5169 }
 0xa11   :  { %v2250_v60 = vmul.f32 %v5170_v42, %v2248_v38  ;;  %vm2255_vm5 = vweird.f32 %v5170_v42 }
 0xa12   :  { %vm2256_vm7 = vmor %vm2254_vm6, %vm2255_vm5 }
 0xa13   :  { %v2251_v53 = vsub.f32 1.0, %v2250_v60  ;;  %1394 = vrot.lane.b32.xlu1 %v7350_v17, %s5596_s22  ;;  %v2275_v5 = vpop.f32.mrf.mxu0 }
 0xa14   :  { %v2279_v39 = vadd.f32 %v2275_v5, %v2223_v63 }
 0xa15   :  { %v2252_v49 = vmul.f32 %v5170_v42, %v2251_v53 }
 0xa16   :  { %5171 = vtanh.f32 %v2279_v39  ;;  %v9383_v39 = vld [vmem:[#allocation88_spill] sm:$0xff] }
 0xa17   :  { %v2253_v52 = vadd.f32 %v5170_v42, %v2252_v49 }
 0xa19   :  { %v2257_v1 = vsel %vm2256_vm7, %v5170_v42, %v2253_v52  ;;  %v5318_v52 = vld [vmem:[#allocation8 + $0x60] sm:$0xff] }
 0xa1a   :  { %v2262_v55 = vsel %vm2259_vm8, %v2261_v56, %v2257_v1  ;;  %v7391_v56 = vld [vmem:[#allocation14 + $0x28] sm:$0xff] }
 0xa1b   :  { %v2281_v60 = vsub.f32 1.0, %v2262_v55  ;;  %2093 = vrot.lane.b32.xlu1 %v9380_v33, %s5596_s22  ;;  %v2277_v18 = vpop.f32.mrf.mxu0 }
 0xa1c   :  { %v5172_v15 = vpop.eup %5171 }
 0xa1d   :  { %v2282_v63 = vmul.f32 %v2281_v60, %v7141_v0  ;;  %v2283_v53 = vmul.f32 %v5172_v15, %v2262_v55  ;;  %v7375_v0 = vld [vmem:[#allocation8 + $0x48] sm:$0xff]  ;;  %v7397_v55 = vld [vmem:[#allocation14 + $0x20] sm:$0xff]  ;;  %v7403_v60 = vld [vmem:[#allocation14 + $0x18] sm:$0xff] }
 0xa1e   :  { %9384 = vst [vmem:[#allocation75_spill] sm:$0xff] %v7375_v0 }
 0xa1f   :  { %v2284_v38 = vadd.f32 %v2283_v53, %v2282_v63  ;;  %v7407_v53 = vld [vmem:[#allocation14 + $0x10] sm:$0xff] }
 0xa20   :  { %9385 = vst [vmem:[#allocation88_spill] sm:$0xff] %v7407_v53 }
 0xa21   :  { %v7367_v42 = vsel %vm7360_vm9, %v2284_v38, %v7137_v23  ;;  %v2285_v47 = vpack.c.bf16 %v2284_v38, %v2284_v38  ;;  %v7382_v23 = vld [vmem:[#allocation14 + $0x38] sm:$0xff]  ;;  %v7411_v38 = vld [vmem:[#allocation14 + $0x8] sm:$0xff] }
 0xa22   :  { %v7371_v49 = vmul.f32 %v9383_v39, %v7367_v42  ;;  %9386 = vst [vmem:[#allocation101_spill] sm:$0xff] %v7411_v38  ;;  %v9388_v39 = vld [vmem:[#allocation31_spill] sm:$0xff] }
 0xa23   :  { %2294 = vmatmul.bf16.vlgmr.msrb.gmra.mxu1 %v2285_v47  ;;  %v7373_v18 = vpop.f32.mrf.mxu0  ;;  %2792 = vrot.lane.b32.xlu1 %v7375_v0, %s5596_s22  ;;  %v9387_v47 = vld [vmem:[#allocation83_spill] sm:$0xff]  ;;  %v9392_v0 = vld [vmem:[#allocation34_spill] sm:$0xff] }
 0xa24   :  { %v2379_v15 = vpack.c.bf16 %v7371_v49, %v7371_v49  ;;  %2499 = vmatpush.bf16.msrb.mxu1 %v7145_v19 }
 0xa26   :  { %2389 = vmatmul.bf16.vlgmr.msrb.gmra.mxu3 %v2379_v15 }
 0xa27   :  { %2534 = vmatpush.bf16.msrb.mxu3 %v7382_v23 }
 0xa28   :  { %2500 = vmatpush.bf16.msrb.mxu1 %v7149_v28 }
 0xa2b   :  { %v2405_v22 = vpop.f32.mrf.mxu0  ;;  %2535 = vmatpush.bf16.msrb.mxu3 %v7386_v31  ;;  %3491 = vrot.lane.b32.xlu1 %v5318_v52, %s5596_s22  ;;  %v9390_v52 = vld [vmem:[#allocation32_spill] sm:$0xff] }
 0xa2c   :  { %2501 = vmatpush.bf16.msrb.mxu1 %v7153_v58  ;;  %v9389_v22 = vld [vmem:[#allocation35_spill] sm:$0xff] }
 0xa2f   :  { %2536 = vmatpush.bf16.msrb.mxu3 %v7391_v56 }
 0xa30   :  { %2502 = vmatpush.bf16.msrb.mxu1 %v7159_v13 }
 0xa33   :  { %2415 = vmatmul.bf16.vlgmr.msra.gmra.mxu1 %v2379_v15  ;;  %v7395_v1 = vpop.f32.mrf.mxu0  ;;  %2537 = vmatpush.bf16.msrb.mxu3 %v7397_v55 }
 0xa34   :  { %2503 = vmatpush.bf16.msrb.mxu1 %v7163_v16  ;;  %4190 = vrot.lane.b32.xlu1 %v7193_v12, %s5596_s22 }
 0xa36   :  { %2441 = vmatmul.bf16.vlgmr.msra.gmra.mxu3 %v2379_v15  ;;  %v7416_v15 = vld [vmem:[#allocation14] sm:$0xff] }
 0xa37   :  { %2538 = vmatpush.bf16.msrb.mxu3 %v7403_v60 }
 0xa38   :  { %2504 = vmatpush.bf16.msrb.mxu1 %v7167_v37 }
 0xa3b   :  { %v2457_v63 = vpop.f32.mrf.mxu0  ;;  %2539 = vmatpush.bf16.msrb.mxu3 %v7407_v53  ;;  %v9394_v53 = vld [vmem:[#allocation38_spill] sm:$0xff] }
 0xa3c   :  { %2505 = vmatpush.bf16.msrb.mxu1 %v7171_v8  ;;  %v9391_v63 = vld [vmem:[#allocation39_spill] sm:$0xff] }
 0xa3d   :  { %v9393_v8 = vld [vmem:[#allocation43_spill] sm:$0xff] }
 0xa3f   :  { %2540 = vmatpush.bf16.msrb.mxu3 %v7411_v38  ;;  %v9395_v38 = vld [vmem:[#allocation47_spill] sm:$0xff] }
 0xa40   :  { %2506 = vmatpush.bf16.msrb.mxu1 %v9387_v47 }
 0xa43   :  { %2541 = vmatpush.bf16.msrb.mxu3 %v7416_v15 }
 0xa44   :  { %2627 = vmatpush.bf16.msra.mxu1 %v9388_v39 }
 0xa47   :  { %2653 = vmatpush.bf16.msra.mxu3 %v9389_v22 }
 0xa48   :  { %2628 = vmatpush.bf16.msra.mxu1 %v9390_v52 }
 0xa4b   :  { %2654 = vmatpush.bf16.msra.mxu3 %v9391_v63 }
 0xa4c   :  { %2629 = vmatpush.bf16.msra.mxu1 %v9392_v0 }
 0xa4f   :  { %2655 = vmatpush.bf16.msra.mxu3 %v9393_v8 }
 0xa50   :  { %2630 = vmatpush.bf16.msra.mxu1 %v9394_v53 }
 0xa53   :  { %2656 = vmatpush.bf16.msra.mxu3 %v9395_v38 }
 0xa54   :  { %2631 = vmatpush.bf16.msra.mxu1 %v9344_v32 }
 0xa57   :  { %2657 = vmatpush.bf16.msra.mxu3 %v9345_v20  ;;  %v9397_v20 = vsub.f32 1.0, %v7193_v12 }
 0xa58   :  { %2632 = vmatpush.bf16.msra.mxu1 %v9346_v43 }
 0xa5b   :  { %2658 = vmatpush.bf16.msra.mxu3 %v9347_v11  ;;  %v7440_v11 = vld [vmem:[#allocation8 + $0x10] sm:$0xff] }
 0xa5c   :  { %2633 = vmatpush.bf16.msra.mxu1 %v9348_v4  ;;  %v9400_v4 = vld [vmem:[#allocation89_spill] sm:$0xff] }
 0xa5f   :  { %2659 = vmatpush.bf16.msra.mxu3 %v9349_v6 }
 0xa60   :  { %2634 = vmatpush.bf16.msra.mxu1 %v9350_v57  ;;  %v7444_v57 = vld [vmem:[#allocation8 + $0x28] sm:$0xff] }
 0xa63   :  { %2660 = vmatpush.bf16.msra.mxu3 %v9351_v51 }
 0xa6b   :  { %v7434_v8 = vpop.permute.xlu0 %4005 }
 0xa6c   :  { %9396 = vst [vmem:[#allocation83_spill] sm:$0xff] %v7434_v8  ;;  %v7448_v8 = vld [vmem:[#allocation8 + $0x40] sm:$0xff] }
 0xa6d   :  { %9398 = vst [vmem:[#allocation31_spill] sm:$0xff] %v7448_v8 }
 0xa73   :  { %v4216_v53 = vpop.permute.xlu0 %4215 }
 0xa74   :  { %v4218_v32 = vmul.f32 %v4216_v53, %v7193_v12  ;;  %v5328_v12 = vld [vmem:[#allocation8 + $0x58] sm:$0xff] }
 0xa75   :  { %v4227_v38 = vpop.permute.xlu1 %4226 }
 0xa76   :  { %v4229_v0 = vmul.f32 %v4227_v38, %v9397_v20 }
 0xa78   :  { %v4230_v43 = vadd.f32 %v4229_v0, %v4218_v32  ;;  %v7456_v32 = vld [vmem:[%s8686_s8] ss:$0 sm:$0xff] }
 0xa79   :  { %9399 = vst [vmem:[#allocation102_spill] sm:$0xff] %v7456_v32 }
 0xa7a   :  { %4238 = vrot.lane.b32.xlu0 %v4230_v43, %s5596_s22 }
 0xa82   :  { %1161 = vrot.lane.b32.xlu0 %v7440_v11, %s5596_s22 }
 0xa8a   :  { %1860 = vrot.lane.b32.xlu0 %v7444_v57, %s5596_s22 }
 0xa92   :  { %2559 = vrot.lane.b32.xlu0 %v7448_v8, %s5596_s22 }
 0xa9a   :  { %3258 = vrot.lane.b32.xlu0 %v5328_v12, %s5596_s22 }
 0xaa0   :  { %v2295_v20 = vpop.f32.mrf.mxu1 }
 0xaa1   :  { %v2296_v43 = vadd.f32 %v7456_v32, %v2295_v20  ;;  %v9401_v20 = vld [vmem:[#allocation26_spill] sm:$0xff] }
 0xaa2   :  { %3957 = vrot.lane.b32.xlu0 %v7101_v36, %s5596_s22 }
 0xaa3   :  { %v2299_v0 = vmax.f32 %v2296_v43, 0.0  ;;  %v9402_v43 = vld [vmem:[#allocation27_spill] sm:$0xff] }
 0xaa5   :  { %v2300_v53 = vpack.c.bf16 %v2299_v0, %v2299_v0 }
 0xaa7   :  { %2309 = vmatmul.bf16.vlgmr.msrb.gmra.mxu2 %v2300_v53 }
 0xaa8   :  { %v2297_v38 = vpop.f32.mrf.mxu1  ;;  %2519 = vmatpush.bf16.msrb.mxu2 %v7237_v50 }
 0xaa9   :  { %v2390_v51 = vpop.f32.mrf.mxu3  ;;  %v9403_v38 = vld [vmem:[#allocation81_spill] sm:$0xff] }
 0xaaa   :  { %v2391_v12 = vadd.f32 %v2390_v51, %v5967_v41 }
 0xaac   :  { %v2404_v6 = vadd.f32 %v7373_v18, %v2391_v12  ;;  %2520 = vmatpush.bf16.msrb.mxu2 %v9400_v4 }
 0xaae   :  { %v4846_v63 = vmul.f32 -1.442695, %v2404_v6  ;;  %v9404_v6 = vld [vmem:[#allocation24_spill] sm:$0xff] }
 0xab0   :  { %5173 = vpow2.f32 %v4846_v63  ;;  %v7465_v52 = vpop.f32.mrf.mxu1  ;;  %2521 = vmatpush.bf16.msrb.mxu2 %v9401_v20  ;;  %v9405_v20 = vld [vmem:[#allocation25_spill] sm:$0xff] }
 0xab1   :  { %v2392_v36 = vpop.f32.mrf.mxu3 }
 0xab4   :  { %2522 = vmatpush.bf16.msrb.mxu2 %v9402_v43 }
 0xab6   :  { %v5174_v0 = vpop.eup %5173 }
 0xab7   :  { %v2462_v53 = vadd.f32 1.0, %v5174_v0  ;;  %4842 = vmatmul.msk.bf16.vlgmr.msra.gmra.mxu2 %vm5900_vm2, %v7292_v24 }
 0xab8   :  { %v2418_v51 = vpop.f32.mrf.mxu1  ;;  %2523 = vmatpush.bf16.msrb.mxu2 %v9403_v38 }
 0xab9   :  { %5175 = vrcp.f32 %v2462_v53  ;;  %v7473_v18 = vpop.f32.mrf.mxu3  ;;  %v2474_v4 = vand.u32 2147483648, %v2462_v53  ;;  %v2472_v50 = vand.u32 2147483647, %v2462_v53  ;;  %vm2468_vm11 = vweird.f32 %v2462_v53 }
 0xabb   :  { %v2475_v51 = vor.u32 1.1754944e-38, %v2474_v4  ;;  %vm2473_vm13 = vcmp.eq.f32.partialorder %v2472_v50, 8.507059e+37  ;;  %v9406_v4 = vld [vmem:[#allocation99_spill] sm:$0xff] }
 0xabc   :  { %2524 = vmatpush.bf16.msrb.mxu2 %v9404_v6  ;;  %v2610_v50 = vsel %vm140_vm0, %v9406_v4, %v7448_v8  ;;  %v9412_v8 = vld [vmem:[#allocation93_spill] sm:$0xff] }
 0xabf   :  { %v5176_v63 = vpop.eup %5175 }
 0xac0   :  { %v2464_v12 = vmul.f32 %v5176_v63, %v2462_v53  ;;  %2525 = vmatpush.bf16.msrb.mxu2 %v9405_v20  ;;  %vm2469_vm10 = vweird.f32 %v5176_v63  ;;  %v7500_v53 = vpop.permute.xlu2 %4233 }
 0xac1   :  { %v2444_v36 = vpop.f32.mrf.mxu3  ;;  %vm2470_vm12 = vmor %vm2468_vm11, %vm2469_vm10  ;;  %9407 = vst [vmem:[#allocation25_spill] sm:$0xff] %v7500_v53  ;;  %v172_v53 = vld [vmem:[%s8689_s11] sm:$0xff] }
 0xac2   :  { %v2465_v43 = vsub.f32 1.0, %v2464_v12 }
 0xac4   :  { %v2466_v0 = vmul.f32 %v5176_v63, %v2465_v43  ;;  %2526 = vmatpush.bf16.msrb.mxu2 %v7275_v21  ;;  %v7492_v43 = vpack.c.bf16 %v2610_v50, %v2610_v50 }
 0xac6   :  { %v2467_v24 = vadd.f32 %v5176_v63, %v2466_v0 }
 0xac8   :  { %2640 = vmatpush.bf16.msra.mxu2 %v5739_v44  ;;  %v2471_v38 = vsel %vm2470_vm12, %v5176_v63, %v2467_v24  ;;  %v178_v63 = vpop.permute.xlu1 %177  ;;  %v929_v24 = vpop.permute.xlu2 %928 }
 0xac9   :  { %v2476_v6 = vsel %vm2473_vm13, %v2475_v51, %v2471_v38  ;;  %v5330_v38 = vld [vmem:[%s8681_s3] ss:$0 sm:$0xff] }
 0xaca   :  { %v2497_v36 = vmul.f32 %v2476_v6, %v7371_v49  ;;  %v174_v6 = vsub.f32 %v7343_v40, %v5330_v38  ;;  %v9411_v40 = vld [vmem:[#allocation72_spill] sm:$0xff] }
 0xacb   :  { %v1158_v38 = vsub.f32 %v7440_v11, %v9411_v40 }
 0xacc   :  { %2641 = vmatpush.bf16.msra.mxu2 %v5748_v54  ;;  %v2498_v12 = vpack.c.bf16 %v2497_v36, %v2497_v36  ;;  %v175_v0 = vand.u32 2147483647, %v174_v6  ;;  %v9409_v36 = vld [vmem:[#allocation76_spill] sm:$0xff] }
 0xace   :  { %2507 = vmatmul.bf16.vlgmr.msrb.gmra.mxu1 %v2498_v12  ;;  %v9410_v12 = vld [vmem:[#allocation84_spill] sm:$0xff]  ;;  %v180_v50 = vmul.f32 %v178_v63, %v175_v0  ;;  %v9413_v0 = vld [vmem:[#allocation86_spill] sm:$0xff] }
 0xacf   :  { %2679 = vmatpush.bf16.msrb.mxu1 %v5844_v9  ;;  %v925_v4 = vsub.f32 %v9410_v12, %v9409_v36  ;;  %v9414_v12 = vld [vmem:[#allocation97_spill] sm:$0xff] }
 0xad0   :  { %2642 = vmatpush.bf16.msra.mxu2 %v5760_v10  ;;  %v1395_v36 = vpop.permute.xlu1 %1394  ;;  %v1628_v11 = vpop.permute.xlu2 %1627 }
 0xad1   :  { %v926_v6 = vand.u32 2147483647, %v925_v4 }
 0xad3   :  { %2680 = vmatpush.bf16.msrb.mxu1 %v5855_v30  ;;  %v931_v63 = vmul.f32 %v929_v24, %v926_v6  ;;  %v9416_v24 = vld [vmem:[#allocation82_spill] sm:$0xff] }
 0xad4   :  { %2643 = vmatpush.bf16.msra.mxu2 %v9067_v35 }
 0xad7   :  { %2681 = vmatpush.bf16.msrb.mxu1 %v5863_v46 }
 0xad8   :  { %2644 = vmatpush.bf16.msra.mxu2 %v9069_v29 }
 0xadb   :  { %2682 = vmatpush.bf16.msrb.mxu1 %v5882_v45 }
 0xadc   :  { %2645 = vmatpush.bf16.msra.mxu2 %v9071_v26 }
 0xade   :  { %4851 = vmatmul.msk.bf16.vlgmr.msra.gmra.mxu1 %vm5900_vm2, %v7492_v43 }
 0xadf   :  { %2683 = vmatpush.bf16.msrb.mxu1 %v5886_v59 }
 0xae0   :  { %2646 = vmatpush.bf16.msra.mxu2 %v9072_v3 }
 0xae3   :  { %2684 = vmatpush.bf16.msrb.mxu1 %v5889_v7 }
 0xae4   :  { %2647 = vmatpush.bf16.msra.mxu2 %v9073_v14  ;;  %v1391_v14 = vsub.f32 %v7350_v17, %v9412_v8  ;;  %v9415_v8 = vld [vmem:[#allocation33_spill] sm:$0xff] }
 0xae7   :  { %2685 = vmatpush.bf16.msrb.mxu1 %v5892_v25  ;;  %v1392_v25 = vand.u32 2147483647, %v1391_v14 }
 0xaeb   :  { %2686 = vmatpush.bf16.msrb.mxu1 %v5895_v27  ;;  %v1159_v27 = vand.u32 2147483647, %v1158_v38 }
 0xaec   :  { %v7509_v51 = vpop.permute.xlu0 %4238 }
 0xaed   :  { %9408 = vst [vmem:[#allocation99_spill] sm:$0xff] %v7509_v51  ;;  %v181_v51 = vadd.f32 %v180_v50, %v172_v53  ;;  %v1857_v53 = vsub.f32 %v7444_v57, %v9375_v2  ;;  %v2090_v50 = vsub.f32 %v9380_v33, %v9416_v24  ;;  %v9419_v57 = vld [vmem:[#allocation44_spill] sm:$0xff]  ;;  %v9423_v33 = vld [vmem:[#allocation57_spill] sm:$0xff] }
 0xaee   :  { %4857 = vmatmul.msk.bf16.vlgmr.msrb.gmra.mxu1 %vm5900_vm2, %v7492_v43  ;;  %v9420_v2 = vld [vmem:[#allocation48_spill] sm:$0xff] }
 0xaef   :  { %2847 = vmatpush.bf16.msra.mxu1 %v5732_v34  ;;  %v1624_v34 = vsub.f32 %v9414_v12, %v9413_v0  ;;  %v932_v26 = vadd.f32 %v931_v63, %v181_v51  ;;  %v1858_v0 = vand.u32 2147483647, %v1857_v53  ;;  %v2094_v12 = vpop.permute.xlu1 %2093  ;;  %v9417_v51 = vld [vmem:[#allocation36_spill] sm:$0xff]  ;;  %v9424_v63 = vld [vmem:[#allocation59_spill] sm:$0xff] }
 0xaf0   :  { %v9428_v53 = vld [vmem:[#allocation63_spill] sm:$0xff] }
 0xaf1   :  { %v1625_v40 = vand.u32 2147483647, %v1624_v34 }
 0xaf3   :  { %2848 = vmatpush.bf16.msra.mxu1 %v9151_v48  ;;  %v1397_v48 = vmul.f32 %v1395_v36, %v1392_v25  ;;  %v1630_v17 = vmul.f32 %v1628_v11, %v1625_v40  ;;  %v9418_v25 = vld [vmem:[#allocation40_spill] sm:$0xff]  ;;  %v9421_v36 = vld [vmem:[#allocation49_spill] sm:$0xff] }
 0xaf4   :  { %v1162_v3 = vpop.permute.xlu0 %1161  ;;  %v9425_v11 = vld [vmem:[#allocation60_spill] sm:$0xff]  ;;  %v9426_v40 = vld [vmem:[#allocation61_spill] sm:$0xff] }
 0xaf5   :  { %v1164_v7 = vmul.f32 %v1162_v3, %v1159_v27  ;;  %v2091_v3 = vand.u32 2147483647, %v2090_v50  ;;  %v9429_v50 = vld [vmem:[#allocation85_spill] sm:$0xff] }
 0xaf7   :  { %2849 = vmatpush.bf16.msra.mxu1 %v9309_v62  ;;  %v1165_v4 = vadd.f32 %v1164_v7, %v932_v26  ;;  %v2096_v34 = vmul.f32 %v2094_v12, %v2091_v3 }
 0xaf9   :  { %v1398_v38 = vadd.f32 %v1397_v48, %v1165_v4  ;;  %v9422_v48 = vld [vmem:[#allocation53_spill] sm:$0xff]  ;;  %v9427_v4 = vld [vmem:[#allocation62_spill] sm:$0xff] }
 0xafb   :  { %2850 = vmatpush.bf16.msra.mxu1 %v9415_v8  ;;  %v1631_v6 = vadd.f32 %v1630_v17, %v1398_v38 }
 0xafc   :  { %v1861_v14 = vpop.permute.xlu0 %1860 }
 0xafd   :  { %v1863_v27 = vmul.f32 %v1861_v14, %v1858_v0  ;;  %v9430_v0 = vld [vmem:[#allocation37_spill] sm:$0xff]  ;;  %v2327_v14 = vpop.permute.xlu2 %2326 }
 0xaff   :  { %2851 = vmatpush.bf16.msra.mxu1 %v9417_v51  ;;  %v1864_v7 = vadd.f32 %v1863_v27, %v1631_v6 }
 0xb01   :  { %v2097_v26 = vadd.f32 %v2096_v34, %v1864_v7 }
 0xb03   :  { %2852 = vmatpush.bf16.msra.mxu1 %v9418_v25 }
 0xb07   :  { %2853 = vmatpush.bf16.msra.mxu1 %v9419_v57 }
 0xb0b   :  { %2854 = vmatpush.bf16.msra.mxu1 %v9420_v2 }
 0xb0f   :  { %2899 = vmatpush.bf16.msrb.mxu1 %v9421_v36 }
 0xb13   :  { %2900 = vmatpush.bf16.msrb.mxu1 %v9422_v48 }
 0xb17   :  { %2901 = vmatpush.bf16.msrb.mxu1 %v9423_v33 }
 0xb1b   :  { %2902 = vmatpush.bf16.msrb.mxu1 %v9424_v63 }
 0xb1f   :  { %2903 = vmatpush.bf16.msrb.mxu1 %v9425_v11 }
 0xb23   :  { %2904 = vmatpush.bf16.msrb.mxu1 %v9426_v40 }
 0xb27   :  { %2905 = vmatpush.bf16.msrb.mxu1 %v9427_v4  ;;  %v9431_v4 = vld [vmem:[#allocation79_spill] sm:$0xff] }
 0xb2a   :  { %v2310_v17 = vpop.f32.mrf.mxu2 }
 0xb2b   :  { %2906 = vmatpush.bf16.msrb.mxu1 %v9428_v53  ;;  %v2311_v38 = vadd.f32 %v9429_v50, %v2310_v17  ;;  %v2417_v53 = vadd.f32 %v7465_v52, %v9431_v4 }
 0xb2d   :  { %v7549_v6 = vsel %vm7360_vm9, %v2311_v38, %v9416_v24  ;;  %v9432_v38 = vld [vmem:[#allocation80_spill] sm:$0xff] }
 0xb2e   :  { %v2323_v12 = vsub.f32 %v9430_v0, %v7549_v6  ;;  %v2443_v63 = vadd.f32 %v7473_v18, %v9432_v38 }
 0xb30   :  { %v2324_v3 = vand.u32 2147483647, %v2323_v12  ;;  %v2456_v12 = vadd.f32 %v7395_v1, %v2443_v63 }
 0xb32   :  { %v2329_v27 = vmul.f32 %v2327_v14, %v2324_v3  ;;  %v2312_v34 = vpop.f32.mrf.mxu2 }
 0xb34   :  { %v7553_v7 = vadd.f32 %v2329_v27, %v2097_v26 }
 0xb3a   :  { %v2429_v40 = vpop.f32.mrf.mxu2 }
 0xb3b   :  { %v2430_v11 = vadd.f32 %v2429_v40, %v2417_v53 }
 0xb3d   :  { %v4847_v17 = vmul.f32 -1.442695, %v2430_v11 }
 0xb3f   :  { %5177 = vpow2.f32 %v4847_v17 }
 0xb42   :  { %v2431_v50 = vpop.f32.mrf.mxu2 }
 0xb45   :  { %v5178_v5 = vpop.eup %5177 }
 0xb46   :  { %v2481_v24 = vadd.f32 1.0, %v5178_v5 }
 0xb48   :  { %5179 = vrcp.f32 %v2481_v24  ;;  %v2493_v52 = vand.u32 2147483648, %v2481_v24  ;;  %v2491_v40 = vand.u32 2147483647, %v2481_v24  ;;  %vm2487_vm15 = vweird.f32 %v2481_v24 }
 0xb4a   :  { %v2494_v18 = vor.u32 1.1754944e-38, %v2493_v52  ;;  %vm2492_vm3 = vcmp.eq.f32.partialorder %v2491_v40, 8.507059e+37  ;;  %v9435_v52 = vld [vmem:[#allocation94_spill] sm:$0xff] }
 0xb4b   :  { %v2508_v0 = vpop.f32.mrf.mxu1 }
 0xb4c   :  { %v2512_v26 = vadd.f32 %v2508_v0, %v2456_v12  ;;  %v2550_v0 = vstv %s2549_s4  ;;  %s3947_s4 = scalar_select %p4920_p13, 1, 0 }
 0xb4d   :  { %vm7564_vm4 = vcmp.eq.s32.totalorder %v2550_v0, 1  ;;  %v9450_v0 = vld [vmem:[#allocation58_spill] sm:$0xff] }
 0xb4e   :  { %v5180_v14 = vpop.eup %5179  ;;  %5181 = vtanh.f32 %v2512_v26 }
 0xb4f   :  { %v2483_v3 = vmul.f32 %v5180_v14, %v2481_v24  ;;  %vm2488_vm14 = vweird.f32 %v5180_v14 }
 0xb50   :  { %vm2489_vm1 = vmor %vm2487_vm15, %vm2488_vm14 }
 0xb51   :  { %v2484_v27 = vsub.f32 1.0, %v2483_v3 }
 0xb53   :  { %v2485_v11 = vmul.f32 %v5180_v14, %v2484_v27  ;;  %v2510_v53 = vpop.f32.mrf.mxu1 }
 0xb54   :  { %v5182_v63 = vpop.eup %5181  ;;  %v9438_v53 = vld [vmem:[#allocation101_spill] sm:$0xff] }
 0xb55   :  { %v2486_v34 = vadd.f32 %v5180_v14, %v2485_v11 }
 0xb57   :  { %v2490_v1 = vsel %vm2489_vm1, %v5180_v14, %v2486_v34  ;;  %v9441_v34 = vld [vmem:[#allocation34_spill] sm:$0xff] }
 0xb58   :  { %v2495_v17 = vsel %vm2492_vm3, %v2494_v18, %v2490_v1  ;;  %v9443_v18 = vld [vmem:[#allocation38_spill] sm:$0xff]  ;;  %v9444_v1 = vld [vmem:[#allocation47_spill] sm:$0xff] }
 0xb59   :  { %v2514_v50 = vsub.f32 1.0, %v2495_v17  ;;  %v2516_v5 = vmul.f32 %v5182_v63, %v2495_v17  ;;  %v9445_v63 = vld [vmem:[#allocation42_spill] sm:$0xff] }
 0xb5a   :  { %v9447_v17 = vld [vmem:[#allocation46_spill] sm:$0xff] }
 0xb5b   :  { %v2515_v12 = vmul.f32 %v2514_v50, %v7371_v49  ;;  %v2636_v3 = vpop.f32.mrf.mxu1  ;;  %v9448_v50 = vld [vmem:[#allocation55_spill] sm:$0xff] }
 0xb5d   :  { %v2517_v27 = vadd.f32 %v2516_v5, %v2515_v12  ;;  %v9449_v5 = vld [vmem:[#allocation51_spill] sm:$0xff]  ;;  %v9451_v12 = vld [vmem:[#allocation56_spill] sm:$0xff] }
 0xb5f   :  { %v7571_v24 = vsel %vm7564_vm4, %v2517_v27, %v7367_v42  ;;  %v2518_v14 = vpack.c.bf16 %v2517_v27, %v2517_v27  ;;  %v9452_v27 = vld [vmem:[#allocation64_spill] sm:$0xff] }
 0xb60   :  { %v7575_v11 = vmul.f32 %v9435_v52, %v7571_v24 }
 0xb61   :  { %2527 = vmatmul.bf16.vlgmr.msrb.gmra.mxu2 %v2518_v14 }
 0xb62   :  { %v2612_v49 = vpack.c.bf16 %v7575_v11, %v7575_v11  ;;  %2732 = vmatpush.bf16.msrb.mxu2 %v7145_v19 }
 0xb63   :  { %v2638_v40 = vpop.f32.mrf.mxu1 }
 0xb64   :  { %2622 = vmatmul.bf16.vlgmr.msra.gmra.mxu0 %v2612_v49 }
 0xb65   :  { %2767 = vmatpush.bf16.msra.mxu0 %v7382_v23 }
 0xb66   :  { %2733 = vmatpush.bf16.msrb.mxu2 %v7149_v28  ;;  %v9436_v28 = vld [vmem:[#allocation88_spill] sm:$0xff] }
 0xb69   :  { %2768 = vmatpush.bf16.msra.mxu0 %v7386_v31 }
 0xb6a   :  { %2734 = vmatpush.bf16.msrb.mxu2 %v7153_v58  ;;  %v9437_v58 = vld [vmem:[#allocation95_spill] sm:$0xff] }
 0xb6b   :  { %v7584_v42 = vpop.f32.mrf.mxu1 }
 0xb6d   :  { %2769 = vmatpush.bf16.msra.mxu0 %v7391_v56 }
 0xb6e   :  { %2735 = vmatpush.bf16.msrb.mxu2 %v7159_v13  ;;  %v9439_v13 = vld [vmem:[#allocation32_spill] sm:$0xff] }
 0xb71   :  { %2648 = vmatmul.bf16.vlgmr.msra.gmra.mxu2 %v2612_v49  ;;  %2770 = vmatpush.bf16.msra.mxu0 %v7397_v55 }
 0xb72   :  { %2736 = vmatpush.bf16.msrb.mxu2 %v7163_v16  ;;  %v9440_v16 = vld [vmem:[#allocation39_spill] sm:$0xff] }
 0xb73   :  { %v2690_v19 = vpop.f32.mrf.mxu1 }
 0xb74   :  { %2674 = vmatmul.bf16.vlgmr.msrb.gmra.mxu0 %v2612_v49 }
 0xb75   :  { %2771 = vmatpush.bf16.msra.mxu0 %v7403_v60 }
 0xb76   :  { %2737 = vmatpush.bf16.msrb.mxu2 %v7167_v37  ;;  %v9442_v37 = vld [vmem:[#allocation43_spill] sm:$0xff] }
 0xb79   :  { %2772 = vmatpush.bf16.msra.mxu0 %v9436_v28 }
 0xb7a   :  { %2738 = vmatpush.bf16.msrb.mxu2 %v9437_v58 }
 0xb7d   :  { %2773 = vmatpush.bf16.msra.mxu0 %v9438_v53 }
 0xb7e   :  { %2739 = vmatpush.bf16.msrb.mxu2 %v9387_v47  ;;  %v9446_v47 = vld [vmem:[#allocation52_spill] sm:$0xff] }
 0xb81   :  { %2774 = vmatpush.bf16.msra.mxu0 %v7416_v15 }
 0xb82   :  { %2860 = vmatpush.bf16.msra.mxu2 %v9388_v39 }
 0xb85   :  { %2886 = vmatpush.bf16.msrb.mxu0 %v9389_v22 }
 0xb86   :  { %2861 = vmatpush.bf16.msra.mxu2 %v9439_v13 }
 0xb89   :  { %2887 = vmatpush.bf16.msrb.mxu0 %v9440_v16 }
 0xb8a   :  { %2862 = vmatpush.bf16.msra.mxu2 %v9441_v34 }
 0xb8d   :  { %2888 = vmatpush.bf16.msrb.mxu0 %v9442_v37 }
 0xb8e   :  { %2863 = vmatpush.bf16.msra.mxu2 %v9443_v18 }
 0xb91   :  { %2889 = vmatpush.bf16.msrb.mxu0 %v9444_v1  ;;  %v9454_v1 = vld [vmem:[#allocation89_spill] sm:$0xff] }
 0xb92   :  { %2864 = vmatpush.bf16.msra.mxu2 %v9445_v63  ;;  %v9453_v63 = vld [vmem:[#allocation98_spill] sm:$0xff] }
 0xb95   :  { %2890 = vmatpush.bf16.msrb.mxu0 %v9446_v47 }
 0xb96   :  { %2865 = vmatpush.bf16.msra.mxu2 %v9447_v17 }
 0xb99   :  { %2891 = vmatpush.bf16.msrb.mxu0 %v9448_v50 }
 0xb9a   :  { %2866 = vmatpush.bf16.msra.mxu2 %v9449_v5 }
 0xb9d   :  { %2892 = vmatpush.bf16.msrb.mxu0 %v9450_v0 }
 0xb9e   :  { %2867 = vmatpush.bf16.msra.mxu2 %v9451_v12 }
 0xba1   :  { %2893 = vmatpush.bf16.msrb.mxu0 %v9452_v27 }
 0xbe1   :  { %v2623_v14 = vpop.f32.mrf.mxu0 }
 0xbe2   :  { %v2624_v52 = vadd.f32 %v2623_v14, %v5967_v41  ;;  %v9455_v14 = vld [vmem:[#allocation26_spill] sm:$0xff] }
 0xbe4   :  { %v2637_v49 = vadd.f32 %v2636_v3, %v2624_v52  ;;  %v2528_v40 = vpop.f32.mrf.mxu2 }
 0xbe5   :  { %v2529_v19 = vadd.f32 %v7456_v32, %v2528_v40  ;;  %v9456_v40 = vld [vmem:[#allocation27_spill] sm:$0xff] }
 0xbe6   :  { %v4858_v58 = vmul.f32 -1.442695, %v2637_v49 }
 0xbe7   :  { %v2532_v47 = vmax.f32 %v2529_v19, 0.0 }
 0xbe8   :  { %5183 = vpow2.f32 %v4858_v58 }
 0xbe9   :  { %v2533_v17 = vpack.c.bf16 %v2532_v47, %v2532_v47  ;;  %v2625_v50 = vpop.f32.mrf.mxu0 }
 0xbeb   :  { %2542 = vmatmul.bf16.vlgmr.msrb.gmra.mxu3 %v2533_v17 }
 0xbec   :  { %v2530_v5 = vpop.f32.mrf.mxu2  ;;  %2752 = vmatpush.bf16.msrb.mxu3 %v9453_v63 }
 0xbee   :  { %v5184_v0 = vpop.eup %5183 }
 0xbef   :  { %v2695_v12 = vadd.f32 1.0, %v5184_v0  ;;  %v9457_v0 = vld [vmem:[#allocation81_spill] sm:$0xff] }
 0xbf0   :  { %2753 = vmatpush.bf16.msrb.mxu3 %v9454_v1 }
 0xbf1   :  { %5185 = vrcp.f32 %v2695_v12  ;;  %v7617_v27 = vpop.f32.mrf.mxu0  ;;  %v2707_v50 = vand.u32 2147483648, %v2695_v12  ;;  %v2705_v5 = vand.u32 2147483647, %v2695_v12  ;;  %vm2701_vm6 = vweird.f32 %v2695_v12 }
 0xbf3   :  { %v2708_v58 = vor.u32 1.1754944e-38, %v2707_v50  ;;  %vm2706_vm8 = vcmp.eq.f32.partialorder %v2705_v5, 8.507059e+37  ;;  %v9464_v50 = vld [vmem:[#allocation50_spill] sm:$0xff] }
 0xbf4   :  { %v7619_v3 = vpop.f32.mrf.mxu2  ;;  %2754 = vmatpush.bf16.msrb.mxu3 %v9455_v14  ;;  %v9467_v5 = vld [vmem:[#allocation54_spill] sm:$0xff] }
 0xbf7   :  { %v5186_v52 = vpop.eup %5185 }
 0xbf8   :  { %v2697_v49 = vmul.f32 %v5186_v52, %v2695_v12  ;;  %2755 = vmatpush.bf16.msrb.mxu3 %v9456_v40  ;;  %vm2702_vm5 = vweird.f32 %v5186_v52  ;;  %v9458_v40 = vld [vmem:[#allocation24_spill] sm:$0xff]  ;;  %v9460_v12 = vld [vmem:[#allocation73_spill] sm:$0xff] }
 0xbf9   :  { %v2677_v47 = vpop.f32.mrf.mxu0  ;;  %vm2703_vm7 = vmor %vm2701_vm6, %vm2702_vm5 }
 0xbfa   :  { %v2698_v17 = vsub.f32 1.0, %v2697_v49 }
 0xbfb   :  { %4854 = vmatmul.msk.bf16.vlgmr.msra.gmra.mxu3 %vm5900_vm2, %v7492_v43  ;;  %v9459_v43 = vld [vmem:[#allocation75_spill] sm:$0xff] }
 0xbfc   :  { %v2699_v63 = vmul.f32 %v5186_v52, %v2698_v17  ;;  %v2651_v1 = vpop.f32.mrf.mxu2  ;;  %2756 = vmatpush.bf16.msrb.mxu3 %v9457_v0  ;;  %v9463_v17 = vld [vmem:[#allocation68_spill] sm:$0xff]  ;;  %v9468_v0 = vld [vmem:[#allocation29_spill] sm:$0xff] }
 0xbfd   :  { %v9466_v1 = vld [vmem:[#allocation28_spill] sm:$0xff] }
 0xbfe   :  { %v2700_v19 = vadd.f32 %v5186_v52, %v2699_v63  ;;  %v9465_v63 = vld [vmem:[#allocation69_spill] sm:$0xff] }
 0xc00   :  { %v2704_v14 = vsel %vm2703_vm7, %v5186_v52, %v2700_v19  ;;  %2757 = vmatpush.bf16.msrb.mxu3 %v9458_v40  ;;  %v2843_v52 = vsel %vm140_vm0, %v9460_v12, %v9459_v43  ;;  %v9469_v19 = vld [vmem:[#allocation59_spill] sm:$0xff]  ;;  %v9472_v40 = vld [vmem:[#allocation62_spill] sm:$0xff]  ;;  %v7677_v43 = vld [vmem:[%s8688_s10] ss:$0 sm:$0xff] }
 0xc01   :  { %v2709_v49 = vsel %vm2706_vm8, %v2708_v58, %v2704_v14  ;;  %v9470_v58 = vld [vmem:[#allocation60_spill] sm:$0xff]  ;;  %v9471_v14 = vld [vmem:[#allocation61_spill] sm:$0xff]  ;;  %9474 = vst [vmem:[#allocation76_spill] sm:$0xff] %v7677_v43 }
 0xc02   :  { %v2730_v47 = vmul.f32 %v2709_v49, %v7575_v11  ;;  %v9473_v49 = vld [vmem:[#allocation63_spill] sm:$0xff] }
 0xc04   :  { %v2731_v32 = vpack.c.bf16 %v2730_v47, %v2730_v47  ;;  %2758 = vmatpush.bf16.msrb.mxu3 %v9405_v20  ;;  %v9462_v20 = vld [vmem:[#allocation45_spill] sm:$0xff] }
 0xc06   :  { %2740 = vmatmul.bf16.vlgmr.msrb.gmra.mxu2 %v2731_v32  ;;  %v7641_v32 = vpack.c.bf16 %v2843_v52, %v2843_v52 }
 0xc07   :  { %2912 = vmatpush.bf16.msrb.mxu2 %v5844_v9 }
 0xc08   :  { %2759 = vmatpush.bf16.msrb.mxu3 %v7275_v21  ;;  %v9461_v21 = vld [vmem:[#allocation67_spill] sm:$0xff] }
 0xc0b   :  { %2913 = vmatpush.bf16.msrb.mxu2 %v5855_v30 }
 0xc0c   :  { %2873 = vmatpush.bf16.msra.mxu3 %v5739_v44 }
 0xc0f   :  { %2914 = vmatpush.bf16.msrb.mxu2 %v5863_v46 }
 0xc10   :  { %2874 = vmatpush.bf16.msra.mxu3 %v5748_v54 }
 0xc13   :  { %2915 = vmatpush.bf16.msrb.mxu2 %v5882_v45 }
 0xc14   :  { %2875 = vmatpush.bf16.msra.mxu3 %v5760_v10 }
 0xc16   :  { %4863 = vmatmul.msk.bf16.vlgmr.msra.gmra.mxu2 %vm5900_vm2, %v7641_v32 }
 0xc17   :  { %2916 = vmatpush.bf16.msrb.mxu2 %v5886_v59 }
 0xc18   :  { %2876 = vmatpush.bf16.msra.mxu3 %v9067_v35 }
 0xc1b   :  { %2917 = vmatpush.bf16.msrb.mxu2 %v9461_v21 }
 0xc1c   :  { %2877 = vmatpush.bf16.msra.mxu3 %v9069_v29 }
 0xc1f   :  { %2918 = vmatpush.bf16.msrb.mxu2 %v9463_v17 }
 0xc20   :  { %2878 = vmatpush.bf16.msra.mxu3 %v9462_v20 }
 0xc23   :  { %2919 = vmatpush.bf16.msrb.mxu2 %v9465_v63 }
 0xc24   :  { %2879 = vmatpush.bf16.msra.mxu3 %v9464_v50 }
 0xc26   :  { %4869 = vmatmul.msk.bf16.vlgmr.msrb.gmra.mxu2 %vm5900_vm2, %v7641_v32 }
 0xc27   :  { %3080 = vmatpush.bf16.msra.mxu2 %v9466_v1 }
 0xc28   :  { %2880 = vmatpush.bf16.msra.mxu3 %v9467_v5 }
 0xc2b   :  { %3081 = vmatpush.bf16.msra.mxu2 %v9468_v0 }
 0xc2f   :  { %3082 = vmatpush.bf16.msra.mxu2 %v9309_v62 }
 0xc33   :  { %3083 = vmatpush.bf16.msra.mxu2 %v9415_v8 }
 0xc37   :  { %3084 = vmatpush.bf16.msra.mxu2 %v9417_v51 }
 0xc3b   :  { %3085 = vmatpush.bf16.msra.mxu2 %v9418_v25 }
 0xc3f   :  { %3086 = vmatpush.bf16.msra.mxu2 %v9419_v57 }
 0xc43   :  { %3087 = vmatpush.bf16.msra.mxu2 %v9420_v2 }
 0xc47   :  { %3132 = vmatpush.bf16.msrb.mxu2 %v9421_v36  ;;  %v2650_v36 = vadd.f32 %v7619_v3, %v9431_v4 }
 0xc4b   :  { %3133 = vmatpush.bf16.msrb.mxu2 %v9422_v48 }
 0xc4f   :  { %3134 = vmatpush.bf16.msrb.mxu2 %v9423_v33 }
 0xc53   :  { %3135 = vmatpush.bf16.msrb.mxu2 %v9469_v19  ;;  %v2560_v19 = vpop.permute.xlu0 %2559 }
 0xc57   :  { %3136 = vmatpush.bf16.msrb.mxu2 %v9470_v58  ;;  %v9475_v58 = vld [vmem:[#allocation31_spill] sm:$0xff] }
 0xc5b   :  { %3137 = vmatpush.bf16.msrb.mxu2 %v9471_v14 }
 0xc5f   :  { %3138 = vmatpush.bf16.msrb.mxu2 %v9472_v40 }
 0xc63   :  { %3139 = vmatpush.bf16.msrb.mxu2 %v9473_v49 }
 0xc6e   :  { %v2543_v47 = vpop.f32.mrf.mxu3 }
 0xc6f   :  { %v2544_v12 = vadd.f32 %v7677_v43, %v2543_v47 }
 0xc71   :  { %v7683_v52 = vsel %vm7564_vm4, %v2544_v12, %v7549_v6 }
 0xc72   :  { %v2556_v14 = vsub.f32 %v9475_v58, %v7683_v52  ;;  %v2676_v58 = vadd.f32 %v7617_v27, %v9432_v38 }
 0xc74   :  { %v2557_v40 = vand.u32 2147483647, %v2556_v14 }
 0xc76   :  { %v2562_v33 = vmul.f32 %v2560_v19, %v2557_v40  ;;  %v2545_v49 = vpop.f32.mrf.mxu3  ;;  %v2689_v19 = vadd.f32 %v7584_v42, %v2676_v58 }
 0xc78   :  { %v7688_v48 = vadd.f32 %v2562_v33, %v7553_v7 }
 0xc7e   :  { %v2662_v2 = vpop.f32.mrf.mxu3 }
 0xc7f   :  { %v2663_v47 = vadd.f32 %v2662_v2, %v2650_v36 }
 0xc81   :  { %v4859_v43 = vmul.f32 -1.442695, %v2663_v47 }
 0xc83   :  { %5187 = vpow2.f32 %v4859_v43 }
 0xc86   :  { %v2664_v26 = vpop.f32.mrf.mxu3 }
 0xc89   :  { %v5188_v6 = vpop.eup %5187  ;;  %v2741_v12 = vpop.f32.mrf.mxu2 }
 0xc8a   :  { %v2714_v57 = vadd.f32 1.0, %v5188_v6  ;;  %v2745_v7 = vadd.f32 %v2741_v12, %v2689_v19  ;;  %v2783_v19 = vstv %s2782_s7 }
 0xc8b   :  { %vm7701_vm13 = vcmp.eq.s32.totalorder %v2783_v19, 1  ;;  %v9486_v19 = vld [vmem:[#allocation56_spill] sm:$0xff] }
 0xc8c   :  { %5189 = vrcp.f32 %v2714_v57  ;;  %v2726_v2 = vand.u32 2147483648, %v2714_v57  ;;  %v2724_v3 = vand.u32 2147483647, %v2714_v57  ;;  %vm2720_vm10 = vweird.f32 %v2714_v57 }
 0xc8d   :  { %5191 = vtanh.f32 %v2745_v7 }
 0xc8e   :  { %v2727_v42 = vor.u32 1.1754944e-38, %v2726_v2  ;;  %vm2725_vm12 = vcmp.eq.f32.partialorder %v2724_v3, 8.507059e+37  ;;  %v9478_v2 = vld [vmem:[#allocation87_spill] sm:$0xff]  ;;  %v7716_v3 = vld [vmem:[#allocation11 + $0x38] sm:$0xff] }
 0xc91   :  { %v2743_v14 = vpop.f32.mrf.mxu2 }
 0xc92   :  { %v5190_v33 = vpop.eup %5189 }
 0xc93   :  { %v2716_v40 = vmul.f32 %v5190_v33, %v2714_v57  ;;  %vm2721_vm9 = vweird.f32 %v5190_v33  ;;  %v5192_v26 = vpop.eup %5191 }
 0xc94   :  { %vm2722_vm11 = vmor %vm2720_vm10, %vm2721_vm9 }
 0xc95   :  { %v2717_v49 = vsub.f32 1.0, %v2716_v40 }
 0xc97   :  { %v2718_v36 = vmul.f32 %v5190_v33, %v2717_v49 }
 0xc99   :  { %v2719_v43 = vadd.f32 %v5190_v33, %v2718_v36  ;;  %v7698_v27 = vpop.f32.mrf.mxu2 }
 0xc9b   :  { %v2723_v47 = vsel %vm2722_vm11, %v5190_v33, %v2719_v43 }
 0xc9c   :  { %v2728_v6 = vsel %vm2725_vm12, %v2727_v42, %v2723_v47  ;;  %v7726_v42 = vld [vmem:[#allocation11 + $0x28] sm:$0xff] }
 0xc9d   :  { %v2747_v12 = vsub.f32 1.0, %v2728_v6  ;;  %v2749_v58 = vmul.f32 %v5192_v26, %v2728_v6  ;;  %v7730_v26 = vld [vmem:[#allocation11 + $0x20] sm:$0xff] }
 0xc9e   :  { %v9482_v6 = vld [vmem:[#allocation46_spill] sm:$0xff] }
 0xc9f   :  { %v2748_v14 = vmul.f32 %v2747_v12, %v7575_v11  ;;  %v9484_v12 = vld [vmem:[#allocation51_spill] sm:$0xff] }
 0xca1   :  { %v2750_v40 = vadd.f32 %v2749_v58, %v2748_v14  ;;  %v2871_v57 = vpop.f32.mrf.mxu2  ;;  %v9485_v58 = vld [vmem:[#allocation58_spill] sm:$0xff]  ;;  %v9487_v14 = vld [vmem:[#allocation64_spill] sm:$0xff] }
 0xca3   :  { %v7708_v49 = vsel %vm7701_vm13, %v2750_v40, %v7571_v24  ;;  %v2751_v33 = vpack.c.bf16 %v2750_v40, %v2750_v40  ;;  %v7722_v24 = vld [vmem:[#allocation11 + $0x30] sm:$0xff] }
 0xca4   :  { %v7712_v36 = vmul.f32 %v9478_v2, %v7708_v49 }
 0xca5   :  { %2760 = vmatmul.bf16.vlgmr.msrb.gmra.mxu3 %v2751_v33 }
 0xca6   :  { %v2845_v11 = vpack.c.bf16 %v7712_v36, %v7712_v36  ;;  %2965 = vmatpush.bf16.msrb.mxu3 %v7716_v3 }
 0xca8   :  { %2855 = vmatmul.bf16.vlgmr.msra.gmra.mxu1 %v2845_v11 }
 0xca9   :  { %v7719_v43 = vpop.f32.mrf.mxu2  ;;  %3000 = vmatpush.bf16.msra.mxu1 %v7382_v23  ;;  %v7734_v23 = vld [vmem:[#allocation11 + $0x18] sm:$0xff] }
 0xcaa   :  { %2966 = vmatpush.bf16.msrb.mxu3 %v7722_v24 }
 0xcad   :  { %3001 = vmatpush.bf16.msra.mxu1 %v7386_v31  ;;  %v7738_v31 = vld [vmem:[#allocation11 + $0x10] sm:$0xff] }
 0xcae   :  { %2967 = vmatpush.bf16.msrb.mxu3 %v7726_v42 }
 0xcb1   :  { %v2923_v47 = vpop.f32.mrf.mxu2  ;;  %3002 = vmatpush.bf16.msra.mxu1 %v7391_v56  ;;  %v7742_v56 = vld [vmem:[#allocation11 + $0x8] sm:$0xff] }
 0xcb2   :  { %2968 = vmatpush.bf16.msrb.mxu3 %v7730_v26 }
 0xcb5   :  { %2881 = vmatmul.bf16.vlgmr.msra.gmra.mxu3 %v2845_v11  ;;  %3003 = vmatpush.bf16.msra.mxu1 %v7397_v55  ;;  %v7746_v55 = vld [vmem:[#allocation11] sm:$0xff] }
 0xcb6   :  { %2969 = vmatpush.bf16.msrb.mxu3 %v7734_v23 }
 0xcb8   :  { %2907 = vmatmul.bf16.vlgmr.msrb.gmra.mxu1 %v2845_v11  ;;  %v9488_v11 = vld [vmem:[#allocation102_spill] sm:$0xff] }
 0xcb9   :  { %3004 = vmatpush.bf16.msra.mxu1 %v7403_v60  ;;  %v9479_v60 = vld [vmem:[#allocation47_spill] sm:$0xff] }
 0xcba   :  { %2970 = vmatpush.bf16.msrb.mxu3 %v7738_v31 }
 0xcbd   :  { %3005 = vmatpush.bf16.msra.mxu1 %v9436_v28  ;;  %v9480_v28 = vld [vmem:[#allocation42_spill] sm:$0xff] }
 0xcbe   :  { %2971 = vmatpush.bf16.msrb.mxu3 %v7742_v56 }
 0xcc1   :  { %3006 = vmatpush.bf16.msra.mxu1 %v9438_v53  ;;  %v9481_v53 = vld [vmem:[#allocation52_spill] sm:$0xff] }
 0xcc2   :  { %2972 = vmatpush.bf16.msrb.mxu3 %v7746_v55 }
 0xcc5   :  { %3007 = vmatpush.bf16.msra.mxu1 %v7416_v15  ;;  %v9483_v15 = vld [vmem:[#allocation55_spill] sm:$0xff] }
 0xcc6   :  { %3093 = vmatpush.bf16.msra.mxu3 %v9388_v39 }
 0xcc9   :  { %3119 = vmatpush.bf16.msrb.mxu1 %v9389_v22 }
 0xcca   :  { %3094 = vmatpush.bf16.msra.mxu3 %v9439_v13 }
 0xccd   :  { %3120 = vmatpush.bf16.msrb.mxu1 %v9440_v16 }
 0xcce   :  { %3095 = vmatpush.bf16.msra.mxu3 %v9441_v34 }
 0xcd1   :  { %3121 = vmatpush.bf16.msrb.mxu1 %v9442_v37 }
 0xcd2   :  { %3096 = vmatpush.bf16.msra.mxu3 %v9443_v18 }
 0xcd5   :  { %3122 = vmatpush.bf16.msrb.mxu1 %v9479_v60  ;;  %v7772_v60 = vld [vmem:[#allocation12 + $0x30] sm:$0xff] }
 0xcd6   :  { %3097 = vmatpush.bf16.msra.mxu3 %v9480_v28  ;;  %9489 = vst [vmem:[#allocation84_spill] sm:$0xff] %v7772_v60 }
 0xcd9   :  { %3123 = vmatpush.bf16.msrb.mxu1 %v9481_v53 }
 0xcda   :  { %3098 = vmatpush.bf16.msra.mxu3 %v9482_v6 }
 0xcdd   :  { %3124 = vmatpush.bf16.msrb.mxu1 %v9483_v15 }
 0xcde   :  { %3099 = vmatpush.bf16.msra.mxu3 %v9484_v12 }
 0xce1   :  { %3125 = vmatpush.bf16.msrb.mxu1 %v9485_v58  ;;  %v7769_v58 = vld [vmem:[#allocation12 + $0x38] sm:$0xff] }
 0xce2   :  { %3100 = vmatpush.bf16.msra.mxu3 %v9486_v19 }
 0xce5   :  { %3126 = vmatpush.bf16.msrb.mxu1 %v9487_v14 }
 0xd25   :  { %v2856_v40 = vpop.f32.mrf.mxu1 }
 0xd26   :  { %v2857_v57 = vadd.f32 %v2856_v40, %v5967_v41 }
 0xd28   :  { %v2870_v33 = vadd.f32 %v7698_v27, %v2857_v57  ;;  %v2761_v2 = vpop.f32.mrf.mxu3 }
 0xd29   :  { %v2762_v47 = vadd.f32 %v9488_v11, %v2761_v2 }
 0xd2a   :  { %v4870_v53 = vmul.f32 -1.442695, %v2870_v33 }
 0xd2b   :  { %v2765_v6 = vmax.f32 %v2762_v47, 0.0  ;;  %v7788_v47 = vld [vmem:[#allocation12 + $0x18] sm:$0xff] }
 0xd2c   :  { %5193 = vpow2.f32 %v4870_v53  ;;  %v7779_v53 = vld [vmem:[#allocation12 + $0x28] sm:$0xff]  ;;  %9492 = vst [vmem:[#allocation86_spill] sm:$0xff] %v7788_v47 }
 0xd2d   :  { %v2766_v15 = vpack.c.bf16 %v2765_v6, %v2765_v6  ;;  %v2858_v28 = vpop.f32.mrf.mxu1  ;;  %9490 = vst [vmem:[#allocation72_spill] sm:$0xff] %v7779_v53 }
 0xd2f   :  { %2775 = vmatmul.bf16.vlgmr.msra.gmra.mxu0 %v2766_v15  ;;  %v7782_v15 = vld [vmem:[#allocation12 + $0x20] sm:$0xff] }
 0xd30   :  { %v2763_v12 = vpop.f32.mrf.mxu3  ;;  %2985 = vmatpush.bf16.msra.mxu0 %v7769_v58  ;;  %9491 = vst [vmem:[#allocation93_spill] sm:$0xff] %v7782_v15 }
 0xd32   :  { %v5194_v14 = vpop.eup %5193 }
 0xd33   :  { %v2928_v19 = vadd.f32 1.0, %v5194_v14 }
 0xd34   :  { %2986 = vmatpush.bf16.msra.mxu0 %v7772_v60 }
 0xd35   :  { %5195 = vrcp.f32 %v2928_v19  ;;  %v7775_v27 = vpop.f32.mrf.mxu1  ;;  %v2940_v57 = vand.u32 2147483648, %v2928_v19  ;;  %v2938_v11 = vand.u32 2147483647, %v2928_v19  ;;  %vm2934_vm15 = vweird.f32 %v2928_v19 }
 0xd37   :  { %v2941_v60 = vor.u32 1.1754944e-38, %v2940_v57  ;;  %vm2939_vm3 = vcmp.eq.f32.partialorder %v2938_v11, 8.507059e+37  ;;  %v9496_v57 = vld [vmem:[#allocation44_spill] sm:$0xff]  ;;  %v9498_v11 = vld [vmem:[#allocation49_spill] sm:$0xff] }
 0xd38   :  { %v7777_v40 = vpop.f32.mrf.mxu3  ;;  %2987 = vmatpush.bf16.msra.mxu0 %v7779_v53 }
 0xd3b   :  { %v5196_v28 = vpop.eup %5195 }
 0xd3c   :  { %v2930_v6 = vmul.f32 %v5196_v28, %v2928_v19  ;;  %2988 = vmatpush.bf16.msra.mxu0 %v7782_v15  ;;  %vm2935_vm14 = vweird.f32 %v5196_v28  ;;  %v7799_v19 = vld [vmem:[#allocation12] sm:$0xff] }
 0xd3d   :  { %v2910_v12 = vpop.f32.mrf.mxu1  ;;  %vm2936_vm1 = vmor %vm2934_vm15, %vm2935_vm14 }
 0xd3e   :  { %v2931_v14 = vsub.f32 1.0, %v2930_v6  ;;  %v7791_v6 = vld [vmem:[#allocation12 + $0x10] sm:$0xff] }
 0xd3f   :  { %4866 = vmatmul.msk.bf16.vlgmr.msrb.gmra.mxu0 %vm5900_vm2, %v7641_v32  ;;  %9493 = vst [vmem:[#allocation97_spill] sm:$0xff] %v7791_v6 }
 0xd40   :  { %v2932_v33 = vmul.f32 %v5196_v28, %v2931_v14  ;;  %v2884_v2 = vpop.f32.mrf.mxu3  ;;  %2989 = vmatpush.bf16.msra.mxu0 %v7788_v47 }
 0xd41   :  { %v7795_v2 = vld [vmem:[#allocation12 + $0x8] sm:$0xff] }
 0xd42   :  { %v2933_v53 = vadd.f32 %v5196_v28, %v2932_v33  ;;  %v9497_v33 = vld [vmem:[#allocation48_spill] sm:$0xff] }
 0xd44   :  { %v2937_v15 = vsel %vm2936_vm1, %v5196_v28, %v2933_v53  ;;  %2990 = vmatpush.bf16.msra.mxu0 %v7791_v6  ;;  %v9495_v53 = vld [vmem:[#allocation91_spill] sm:$0xff] }
 0xd45   :  { %v2942_v12 = vsel %vm2939_vm3, %v2941_v60, %v2937_v15  ;;  %v7806_v60 = vld [vmem:[#allocation8 + $0x50] sm:$0xff] }
 0xd46   :  { %v2963_v32 = vmul.f32 %v2942_v12, %v7712_v36  ;;  %9494 = vst [vmem:[#allocation82_spill] sm:$0xff] %v7806_v60  ;;  %v3076_v28 = vsel %vm140_vm0, %v9495_v53, %v7806_v60  ;;  %v9499_v12 = vld [vmem:[#allocation53_spill] sm:$0xff]  ;;  %v9502_v53 = vld [vmem:[#allocation60_spill] sm:$0xff]  ;;  %v9504_v60 = vld [vmem:[#allocation62_spill] sm:$0xff] }
 0xd47   :  { %v7813_v15 = vpack.c.bf16 %v3076_v28, %v3076_v28  ;;  %v9503_v28 = vld [vmem:[#allocation61_spill] sm:$0xff] }
 0xd48   :  { %v2964_v14 = vpack.c.bf16 %v2963_v32, %v2963_v32  ;;  %2991 = vmatpush.bf16.msra.mxu0 %v7795_v2  ;;  %v9500_v32 = vld [vmem:[#allocation57_spill] sm:$0xff] }
 0xd4a   :  { %2973 = vmatmul.bf16.vlgmr.msrb.gmra.mxu3 %v2964_v14  ;;  %v9501_v14 = vld [vmem:[#allocation59_spill] sm:$0xff] }
 0xd4b   :  { %3145 = vmatpush.bf16.msrb.mxu3 %v5844_v9 }
 0xd4c   :  { %2992 = vmatpush.bf16.msra.mxu0 %v7799_v19 }
 0xd4f   :  { %3146 = vmatpush.bf16.msrb.mxu3 %v5855_v30 }
 0xd50   :  { %3106 = vmatpush.bf16.msrb.mxu0 %v5739_v44 }
 0xd53   :  { %3147 = vmatpush.bf16.msrb.mxu3 %v5863_v46 }
 0xd54   :  { %3107 = vmatpush.bf16.msrb.mxu0 %v5748_v54 }
 0xd57   :  { %3148 = vmatpush.bf16.msrb.mxu3 %v5882_v45 }
 0xd58   :  { %3108 = vmatpush.bf16.msrb.mxu0 %v5760_v10 }
 0xd5a   :  { %4875 = vmatmul.msk.bf16.vlgmr.msra.gmra.mxu3 %vm5900_vm2, %v7813_v15 }
 0xd5b   :  { %3149 = vmatpush.bf16.msrb.mxu3 %v5886_v59 }
 0xd5c   :  { %3109 = vmatpush.bf16.msrb.mxu0 %v9067_v35 }
 0xd5f   :  { %3150 = vmatpush.bf16.msrb.mxu3 %v9461_v21 }
 0xd60   :  { %3110 = vmatpush.bf16.msrb.mxu0 %v9069_v29 }
 0xd63   :  { %3151 = vmatpush.bf16.msrb.mxu3 %v9463_v17 }
 0xd64   :  { %3111 = vmatpush.bf16.msrb.mxu0 %v9462_v20 }
 0xd67   :  { %3152 = vmatpush.bf16.msrb.mxu3 %v9465_v63 }
 0xd68   :  { %3112 = vmatpush.bf16.msrb.mxu0 %v9464_v50 }
 0xd6a   :  { %4881 = vmatmul.msk.bf16.vlgmr.msrb.gmra.mxu3 %vm5900_vm2, %v7813_v15 }
 0xd6b   :  { %3313 = vmatpush.bf16.msra.mxu3 %v9466_v1 }
 0xd6c   :  { %3113 = vmatpush.bf16.msrb.mxu0 %v9467_v5 }
 0xd6f   :  { %3314 = vmatpush.bf16.msra.mxu3 %v9468_v0 }
 0xd73   :  { %3315 = vmatpush.bf16.msra.mxu3 %v9309_v62 }
 0xd77   :  { %3316 = vmatpush.bf16.msra.mxu3 %v9415_v8 }
 0xd7b   :  { %3317 = vmatpush.bf16.msra.mxu3 %v9417_v51  ;;  %v9505_v51 = vld [vmem:[#allocation63_spill] sm:$0xff] }
 0xd7f   :  { %3318 = vmatpush.bf16.msra.mxu3 %v9418_v25 }
 0xd83   :  { %3319 = vmatpush.bf16.msra.mxu3 %v9496_v57  ;;  %v9506_v57 = vld [vmem:[#allocation76_spill] sm:$0xff] }
 0xd87   :  { %3320 = vmatpush.bf16.msra.mxu3 %v9497_v33 }
 0xd8b   :  { %3365 = vmatpush.bf16.msrb.mxu3 %v9498_v11 }
 0xd8f   :  { %3366 = vmatpush.bf16.msrb.mxu3 %v9499_v12  ;;  %v5349_v12 = vld [vmem:[#allocation8 + $0x48] sm:$0xff] }
 0xd93   :  { %3367 = vmatpush.bf16.msrb.mxu3 %v9500_v32 }
 0xd97   :  { %3368 = vmatpush.bf16.msrb.mxu3 %v9501_v14  ;;  %v2793_v14 = vpop.permute.xlu1 %2792 }
 0xd9b   :  { %3369 = vmatpush.bf16.msrb.mxu3 %v9502_v53 }
 0xd9f   :  { %3370 = vmatpush.bf16.msrb.mxu3 %v9503_v28 }
 0xda3   :  { %3371 = vmatpush.bf16.msrb.mxu3 %v9504_v60 }
 0xda7   :  { %3372 = vmatpush.bf16.msrb.mxu3 %v9505_v51  ;;  %v2883_v51 = vadd.f32 %v7777_v40, %v9431_v4 }
 0xdac   :  { %v2776_v25 = vpop.f32.mrf.mxu0 }
 0xdad   :  { %v2777_v8 = vadd.f32 %v9506_v57, %v2776_v25 }
 0xdaf   :  { %v7850_v11 = vsel %vm7701_vm13, %v2777_v8, %v7683_v52 }
 0xdb0   :  { %v2789_v32 = vsub.f32 %v5349_v12, %v7850_v11  ;;  %v2909_v12 = vadd.f32 %v7775_v27, %v9432_v38 }
 0xdb2   :  { %v2790_v33 = vand.u32 2147483647, %v2789_v32 }
 0xdb4   :  { %v2795_v53 = vmul.f32 %v2793_v14, %v2790_v33  ;;  %v2778_v62 = vpop.f32.mrf.mxu0 }
 0xdb5   :  { %v2922_v62 = vadd.f32 %v7719_v43, %v2909_v12 }
 0xdb6   :  { %v7854_v28 = vadd.f32 %v2795_v53, %v7688_v48 }
 0xdbc   :  { %v2895_v60 = vpop.f32.mrf.mxu0 }
 0xdbd   :  { %v2896_v25 = vadd.f32 %v2895_v60, %v2883_v51 }
 0xdbf   :  { %v4871_v57 = vmul.f32 -1.442695, %v2896_v25 }
 0xdc1   :  { %5197 = vpow2.f32 %v4871_v57 }
 0xdc4   :  { %v2897_v7 = vpop.f32.mrf.mxu0 }
 0xdc7   :  { %v5198_v8 = vpop.eup %5197 }
 0xdc8   :  { %v2947_v52 = vadd.f32 1.0, %v5198_v8 }
 0xdca   :  { %5199 = vrcp.f32 %v2947_v52  ;;  %v2959_v51 = vand.u32 2147483648, %v2947_v52  ;;  %v2957_v60 = vand.u32 2147483647, %v2947_v52  ;;  %vm2953_vm5 = vweird.f32 %v2947_v52 }
 0xdcc   :  { %v2960_v27 = vor.u32 1.1754944e-38, %v2959_v51  ;;  %vm2958_vm7 = vcmp.eq.f32.partialorder %v2957_v60, 8.507059e+37  ;;  %v9509_v51 = vld [vmem:[#allocation90_spill] sm:$0xff] }
 0xdcd   :  { %v2974_v32 = vpop.f32.mrf.mxu3 }
 0xdce   :  { %v2978_v48 = vadd.f32 %v2974_v32, %v2922_v62  ;;  %v3016_v62 = vstv %s3015_s29  ;;  %s4413_s29 = scalar_select %p4944_p1, 1, 0 }
 0xdcf   :  { %vm7867_vm8 = vcmp.eq.s32.totalorder %v3016_v62, 1  ;;  %v7914_v62 = vld [vmem:[#allocation14] sm:$0xff] }
 0xdd0   :  { %v5200_v33 = vpop.eup %5199  ;;  %5201 = vtanh.f32 %v2978_v48 }
 0xdd1   :  { %v2949_v14 = vmul.f32 %v5200_v33, %v2947_v52  ;;  %vm2954_vm4 = vweird.f32 %v5200_v33 }
 0xdd2   :  { %vm2955_vm6 = vmor %vm2953_vm5, %vm2954_vm4 }
 0xdd3   :  { %v2950_v53 = vsub.f32 1.0, %v2949_v14 }
 0xdd5   :  { %v2951_v40 = vmul.f32 %v5200_v33, %v2950_v53  ;;  %v2976_v57 = vpop.f32.mrf.mxu3 }
 0xdd6   :  { %v5202_v7 = vpop.eup %5201  ;;  %v7883_v57 = vld [vmem:[#allocation14 + $0x38] sm:$0xff] }
 0xdd7   :  { %v2952_v25 = vadd.f32 %v5200_v33, %v2951_v40 }
 0xdd9   :  { %v2956_v43 = vsel %vm2955_vm6, %v5200_v33, %v2952_v25 }
 0xdda   :  { %v2961_v8 = vsel %vm2958_vm7, %v2960_v27, %v2956_v43  ;;  %v7893_v27 = vld [vmem:[#allocation14 + $0x28] sm:$0xff]  ;;  %v7897_v43 = vld [vmem:[#allocation14 + $0x20] sm:$0xff] }
 0xddb   :  { %v2980_v12 = vsub.f32 1.0, %v2961_v8  ;;  %v2982_v32 = vmul.f32 %v5202_v7, %v2961_v8  ;;  %v7901_v8 = vld [vmem:[#allocation14 + $0x18] sm:$0xff] }
 0xddd   :  { %v2981_v14 = vmul.f32 %v2980_v12, %v7712_v36  ;;  %v7865_v38 = vpop.f32.mrf.mxu3  ;;  %v7905_v12 = vld [vmem:[#allocation14 + $0x10] sm:$0xff] }
 0xddf   :  { %v2983_v53 = vadd.f32 %v2982_v32, %v2981_v14  ;;  %v7909_v32 = vld [vmem:[#allocation14 + $0x8] sm:$0xff] }
 0xde0   :  { %v9510_v14 = vld [vmem:[#allocation47_spill] sm:$0xff] }
 0xde1   :  { %v7874_v52 = vsel %vm7867_vm8, %v2983_v53, %v7708_v49  ;;  %v2984_v33 = vpack.c.bf16 %v2983_v53, %v2983_v53  ;;  %v7887_v49 = vld [vmem:[#allocation14 + $0x30] sm:$0xff]  ;;  %v9511_v53 = vld [vmem:[#allocation42_spill] sm:$0xff] }
 0xde2   :  { %v7878_v40 = vmul.f32 %v9509_v51, %v7874_v52  ;;  %v9513_v51 = vld [vmem:[#allocation46_spill] sm:$0xff] }
 0xde3   :  { %2993 = vmatmul.bf16.vlgmr.msra.gmra.mxu0 %v2984_v33  ;;  %v9512_v33 = vld [vmem:[#allocation52_spill] sm:$0xff] }
 0xde4   :  { %v3078_v36 = vpack.c.bf16 %v7878_v40, %v7878_v40  ;;  %3198 = vmatpush.bf16.msra.mxu0 %v7716_v3 }
 0xde5   :  { %v3104_v60 = vpop.f32.mrf.mxu3 }
 0xde6   :  { %3088 = vmatmul.bf16.vlgmr.msra.gmra.mxu2 %v3078_v36  ;;  %v9515_v60 = vld [vmem:[#allocation51_spill] sm:$0xff] }
 0xde7   :  { %3233 = vmatpush.bf16.msra.mxu2 %v7883_v57 }
 0xde8   :  { %3199 = vmatpush.bf16.msra.mxu0 %v7722_v24 }
 0xdeb   :  { %3234 = vmatpush.bf16.msra.mxu2 %v7887_v49 }
 0xdec   :  { %3200 = vmatpush.bf16.msra.mxu0 %v7726_v42 }
 0xded   :  { %v7891_v25 = vpop.f32.mrf.mxu3 }
 0xdef   :  { %3235 = vmatpush.bf16.msra.mxu2 %v7893_v27 }
 0xdf0   :  { %3201 = vmatpush.bf16.msra.mxu0 %v7730_v26 }
 0xdf3   :  { %3114 = vmatmul.bf16.vlgmr.msrb.gmra.mxu0 %v3078_v36  ;;  %3236 = vmatpush.bf16.msra.mxu2 %v7897_v43 }
 0xdf4   :  { %3202 = vmatpush.bf16.msra.mxu0 %v7734_v23 }
 0xdf5   :  { %v3156_v7 = vpop.f32.mrf.mxu3 }
 0xdf6   :  { %3140 = vmatmul.bf16.vlgmr.msrb.gmra.mxu2 %v3078_v36  ;;  %v9514_v36 = vld [vmem:[#allocation55_spill] sm:$0xff]  ;;  %v9516_v7 = vld [vmem:[#allocation58_spill] sm:$0xff] }
 0xdf7   :  { %3237 = vmatpush.bf16.msra.mxu2 %v7901_v8 }
 0xdf8   :  { %3203 = vmatpush.bf16.msra.mxu0 %v7738_v31 }
 0xdfb   :  { %3238 = vmatpush.bf16.msra.mxu2 %v7905_v12 }
 0xdfc   :  { %3204 = vmatpush.bf16.msra.mxu0 %v7742_v56 }
 0xdff   :  { %3239 = vmatpush.bf16.msra.mxu2 %v7909_v32 }
 0xe00   :  { %3205 = vmatpush.bf16.msra.mxu0 %v7746_v55 }
 0xe03   :  { %3240 = vmatpush.bf16.msra.mxu2 %v7914_v62 }
 0xe04   :  { %3326 = vmatpush.bf16.msrb.mxu0 %v9388_v39 }
 0xe07   :  { %3352 = vmatpush.bf16.msrb.mxu2 %v9389_v22  ;;  %v9520_v22 = vld [vmem:[#allocation72_spill] sm:$0xff] }
 0xe08   :  { %3327 = vmatpush.bf16.msrb.mxu0 %v9439_v13 }
 0xe0b   :  { %3353 = vmatpush.bf16.msrb.mxu2 %v9440_v16  ;;  %v9517_v16 = vld [vmem:[#allocation56_spill] sm:$0xff] }
 0xe0c   :  { %3328 = vmatpush.bf16.msrb.mxu0 %v9441_v34  ;;  %v9518_v34 = vld [vmem:[#allocation64_spill] sm:$0xff] }
 0xe0f   :  { %3354 = vmatpush.bf16.msrb.mxu2 %v9442_v37 }
 0xe10   :  { %3329 = vmatpush.bf16.msrb.mxu0 %v9443_v18 }
 0xe13   :  { %3355 = vmatpush.bf16.msrb.mxu2 %v9510_v14  ;;  %v7935_v14 = vld [vmem:[%s8686_s8] ss:$0 sm:$0xff] }
 0xe14   :  { %3330 = vmatpush.bf16.msrb.mxu0 %v9511_v53 }
 0xe17   :  { %3356 = vmatpush.bf16.msrb.mxu2 %v9512_v33 }
 0xe18   :  { %3331 = vmatpush.bf16.msrb.mxu0 %v9513_v51 }
 0xe1b   :  { %3357 = vmatpush.bf16.msrb.mxu2 %v9514_v36 }
 0xe1c   :  { %3332 = vmatpush.bf16.msrb.mxu0 %v9515_v60 }
 0xe1f   :  { %3358 = vmatpush.bf16.msrb.mxu2 %v9516_v7 }
 0xe20   :  { %3333 = vmatpush.bf16.msrb.mxu0 %v9517_v16 }
 0xe23   :  { %3359 = vmatpush.bf16.msrb.mxu2 %v9518_v34  ;;  %v9519_v34 = vld [vmem:[#allocation84_spill] sm:$0xff] }
 0xe60   :  { %v2994_v37 = vpop.f32.mrf.mxu0 }
 0xe61   :  { %v2995_v33 = vadd.f32 %v7935_v14, %v2994_v37 }
 0xe63   :  { %v2998_v53 = vmax.f32 %v2995_v33, 0.0  ;;  %v9521_v33 = vld [vmem:[#allocation93_spill] sm:$0xff] }
 0xe65   :  { %v2999_v51 = vpack.c.bf16 %v2998_v53, %v2998_v53 }
 0xe67   :  { %3008 = vmatmul.bf16.vlgmr.msra.gmra.mxu1 %v2999_v51 }
 0xe68   :  { %v2996_v36 = vpop.f32.mrf.mxu0  ;;  %3218 = vmatpush.bf16.msra.mxu1 %v7769_v58 }
 0xe69   :  { %v3089_v60 = vpop.f32.mrf.mxu2 }
 0xe6a   :  { %v3090_v7 = vadd.f32 %v3089_v60, %v5967_v41 }
 0xe6c   :  { %v3103_v16 = vadd.f32 %v7865_v38, %v3090_v7  ;;  %3219 = vmatpush.bf16.msra.mxu1 %v9519_v34 }
 0xe6e   :  { %v4882_v18 = vmul.f32 -1.442695, %v3103_v16 }
 0xe70   :  { %5203 = vpow2.f32 %v4882_v18  ;;  %v7942_v13 = vpop.f32.mrf.mxu0  ;;  %3220 = vmatpush.bf16.msra.mxu1 %v9520_v22 }
 0xe71   :  { %v3091_v37 = vpop.f32.mrf.mxu2 }
 0xe74   :  { %3221 = vmatpush.bf16.msra.mxu1 %v9521_v33 }
 0xe76   :  { %v5204_v53 = vpop.eup %5203 }
 0xe77   :  { %v3161_v51 = vadd.f32 1.0, %v5204_v53  ;;  %4878 = vmatmul.msk.bf16.vlgmr.msrb.gmra.mxu1 %vm5900_vm2, %v7813_v15 }
 0xe78   :  { %v3117_v36 = vpop.f32.mrf.mxu0  ;;  %3222 = vmatpush.bf16.msra.mxu1 %v7788_v47 }
 0xe79   :  { %5205 = vrcp.f32 %v3161_v51  ;;  %v7950_v38 = vpop.f32.mrf.mxu2  ;;  %v3173_v37 = vand.u32 2147483648, %v3161_v51  ;;  %v3171_v33 = vand.u32 2147483647, %v3161_v51  ;;  %vm3167_vm10 = vweird.f32 %v3161_v51 }
 0xe7b   :  { %v3174_v36 = vor.u32 1.1754944e-38, %v3173_v37  ;;  %vm3172_vm12 = vcmp.eq.f32.partialorder %v3171_v33, 8.507059e+37  ;;  %v7964_v33 = vld [vmem:[#allocation8 + $0x58] sm:$0xff]  ;;  %v9526_v37 = vld [vmem:[#allocation36_spill] sm:$0xff] }
 0xe7c   :  { %3223 = vmatpush.bf16.msra.mxu1 %v7791_v6  ;;  %9522 = vst [vmem:[#allocation85_spill] sm:$0xff] %v7964_v33 }
 0xe7f   :  { %v5206_v16 = vpop.eup %5205 }
 0xe80   :  { %v3163_v18 = vmul.f32 %v5206_v16, %v3161_v51  ;;  %3224 = vmatpush.bf16.msra.mxu1 %v7795_v2  ;;  %vm3168_vm9 = vweird.f32 %v5206_v16 }
 0xe81   :  { %v3143_v60 = vpop.f32.mrf.mxu2  ;;  %vm3169_vm11 = vmor %vm3167_vm10, %vm3168_vm9 }
 0xe82   :  { %v3164_v7 = vsub.f32 1.0, %v3163_v18 }
 0xe84   :  { %v3165_v53 = vmul.f32 %v5206_v16, %v3164_v7  ;;  %3225 = vmatpush.bf16.msra.mxu1 %v7799_v19  ;;  %v9525_v7 = vld [vmem:[#allocation33_spill] sm:$0xff] }
 0xe86   :  { %v3166_v15 = vadd.f32 %v5206_v16, %v3165_v53  ;;  %v9527_v53 = vld [vmem:[#allocation40_spill] sm:$0xff] }
 0xe88   :  { %3339 = vmatpush.bf16.msrb.mxu1 %v5739_v44  ;;  %v3170_v47 = vsel %vm3169_vm11, %v5206_v16, %v3166_v15  ;;  %v9524_v16 = vld [vmem:[#allocation30_spill] sm:$0xff]  ;;  %v9528_v15 = vld [vmem:[#allocation44_spill] sm:$0xff] }
 0xe89   :  { %v3175_v6 = vsel %vm3172_vm12, %v3174_v36, %v3170_v47  ;;  %v9523_v47 = vld [vmem:[#allocation71_spill] sm:$0xff]  ;;  %v9529_v36 = vld [vmem:[#allocation48_spill] sm:$0xff] }
 0xe8a   :  { %v3196_v60 = vmul.f32 %v3175_v6, %v7878_v40  ;;  %v3309_v6 = vsel %vm140_vm0, %v9523_v47, %v7964_v33  ;;  %v9532_v47 = vld [vmem:[#allocation57_spill] sm:$0xff]  ;;  %v9534_v33 = vld [vmem:[#allocation60_spill] sm:$0xff] }
 0xe8b   :  { %v7971_v51 = vpack.c.bf16 %v3309_v6, %v3309_v6  ;;  %v9533_v6 = vld [vmem:[#allocation59_spill] sm:$0xff] }
 0xe8c   :  { %3340 = vmatpush.bf16.msrb.mxu1 %v5748_v54  ;;  %v3197_v18 = vpack.c.bf16 %v3196_v60, %v3196_v60  ;;  %v9530_v60 = vld [vmem:[#allocation49_spill] sm:$0xff] }
 0xe8e   :  { %3206 = vmatmul.bf16.vlgmr.msra.gmra.mxu0 %v3197_v18  ;;  %v9531_v18 = vld [vmem:[#allocation53_spill] sm:$0xff] }
 0xe8f   :  { %3378 = vmatpush.bf16.msra.mxu0 %v5844_v9 }
 0xe90   :  { %3341 = vmatpush.bf16.msrb.mxu1 %v5760_v10 }
 0xe93   :  { %3379 = vmatpush.bf16.msra.mxu0 %v5855_v30 }
 0xe94   :  { %3342 = vmatpush.bf16.msrb.mxu1 %v9067_v35 }
 0xe97   :  { %3380 = vmatpush.bf16.msra.mxu0 %v5863_v46 }
 0xe98   :  { %3343 = vmatpush.bf16.msrb.mxu1 %v9069_v29 }
 0xe9b   :  { %3381 = vmatpush.bf16.msra.mxu0 %v5882_v45 }
 0xe9c   :  { %3344 = vmatpush.bf16.msrb.mxu1 %v9462_v20 }
 0xe9e   :  { %4887 = vmatmul.msk.bf16.vlgmr.msrb.gmra.mxu0 %vm5900_vm2, %v7971_v51 }
 0xe9f   :  { %3382 = vmatpush.bf16.msra.mxu0 %v5886_v59 }
 0xea0   :  { %3345 = vmatpush.bf16.msrb.mxu1 %v9464_v50 }
 0xea3   :  { %3383 = vmatpush.bf16.msra.mxu0 %v9461_v21 }
 0xea4   :  { %3346 = vmatpush.bf16.msrb.mxu1 %v9467_v5 }
 0xea7   :  { %3384 = vmatpush.bf16.msra.mxu0 %v9463_v17 }
 0xeab   :  { %3385 = vmatpush.bf16.msra.mxu0 %v9465_v63  ;;  %v9540_v63 = vld [vmem:[#allocation80_spill] sm:$0xff] }
 0xeae   :  { %4893 = vmatmul.msk.bf16.vlgmr.msra.gmra.mxu0 %vm5900_vm2, %v7971_v51 }
 0xeaf   :  { %3546 = vmatpush.bf16.msrb.mxu0 %v9466_v1 }
 0xeb3   :  { %3547 = vmatpush.bf16.msrb.mxu0 %v9468_v0 }
 0xeb7   :  { %3548 = vmatpush.bf16.msrb.mxu0 %v9524_v16  ;;  %v9535_v16 = vld [vmem:[#allocation61_spill] sm:$0xff] }
 0xebb   :  { %3549 = vmatpush.bf16.msrb.mxu0 %v9525_v7  ;;  %v9536_v7 = vld [vmem:[#allocation62_spill] sm:$0xff] }
 0xebf   :  { %3550 = vmatpush.bf16.msrb.mxu0 %v9526_v37 }
 0xec3   :  { %3551 = vmatpush.bf16.msrb.mxu0 %v9527_v53  ;;  %v9537_v53 = vld [vmem:[#allocation76_spill] sm:$0xff] }
 0xec7   :  { %3552 = vmatpush.bf16.msrb.mxu0 %v9528_v15  ;;  %v9538_v15 = vld [vmem:[#allocation63_spill] sm:$0xff] }
 0xecb   :  { %3553 = vmatpush.bf16.msrb.mxu0 %v9529_v36 }
 0xecf   :  { %3598 = vmatpush.bf16.msra.mxu0 %v9530_v60 }
 0xed3   :  { %3599 = vmatpush.bf16.msra.mxu0 %v9531_v18 }
 0xed7   :  { %3600 = vmatpush.bf16.msra.mxu0 %v9532_v47  ;;  %v9539_v47 = vld [vmem:[#allocation82_spill] sm:$0xff] }
 0xedb   :  { %3601 = vmatpush.bf16.msra.mxu0 %v9533_v6  ;;  %v3026_v6 = vpop.permute.xlu2 %3025 }
 0xedf   :  { %3602 = vmatpush.bf16.msra.mxu0 %v9534_v33 }
 0xee3   :  { %3603 = vmatpush.bf16.msra.mxu0 %v9535_v16 }
 0xee4   :  { %v3009_v37 = vpop.f32.mrf.mxu1 }
 0xee5   :  { %v3010_v0 = vadd.f32 %v9537_v53, %v3009_v37  ;;  %v3116_v37 = vadd.f32 %v7942_v13, %v9431_v4 }
 0xee7   :  { %3604 = vmatpush.bf16.msra.mxu0 %v9536_v7  ;;  %v8005_v60 = vsel %vm7867_vm8, %v3010_v0, %v7850_v11 }
 0xee8   :  { %v3022_v18 = vsub.f32 %v9539_v47, %v8005_v60  ;;  %v3142_v47 = vadd.f32 %v7950_v38, %v9540_v63 }
 0xeea   :  { %v3023_v36 = vand.u32 2147483647, %v3022_v18 }
 0xeeb   :  { %3605 = vmatpush.bf16.msra.mxu0 %v9538_v15 }
 0xeec   :  { %v3028_v33 = vmul.f32 %v3026_v6, %v3023_v36  ;;  %v3011_v1 = vpop.f32.mrf.mxu1 }
 0xeed   :  { %v3155_v1 = vadd.f32 %v7891_v25, %v3142_v47 }
 0xeee   :  { %v8010_v16 = vadd.f32 %v3028_v33, %v7854_v28 }
 0xef4   :  { %v3128_v53 = vpop.f32.mrf.mxu1 }
 0xef5   :  { %v3129_v15 = vadd.f32 %v3128_v53, %v3116_v37 }
 0xef7   :  { %v4883_v7 = vmul.f32 -1.442695, %v3129_v15 }
 0xef9   :  { %5207 = vpow2.f32 %v4883_v7 }
 0xefc   :  { %v3130_v48 = vpop.f32.mrf.mxu1 }
 0xeff   :  { %v5208_v0 = vpop.eup %5207 }
 0xf00   :  { %v3180_v11 = vadd.f32 1.0, %v5208_v0  ;;  %v3249_v0 = vstv %s3248_s16  ;;  %s5599_s16 = smov [#allocation16]  }
 0xf01   :  { %vm8021_vm3 = vcmp.eq.s32.totalorder %v3249_v0, 1  ;;  %s4440_s23 = sshll.u32 %s5599_s16, 4  ;;  %s4441_s23 = int_to_ptr.vmem [resolvable:$true] %s4440_s23 }
 0xf02   :  { %5209 = vrcp.f32 %v3180_v11  ;;  %v3192_v13 = vand.u32 2147483648, %v3180_v11  ;;  %v3190_v6 = vand.u32 2147483647, %v3180_v11  ;;  %vm3186_vm14 = vweird.f32 %v3180_v11 }
 0xf04   :  { %v3193_v38 = vor.u32 1.1754944e-38, %v3192_v13  ;;  %vm3191_vm1 = vcmp.eq.f32.partialorder %v3190_v6, 8.507059e+37  ;;  %v9553_v6 = vld [vmem:[#allocation46_spill] sm:$0xff] }
 0xf08   :  { %v5210_v18 = vpop.eup %5209 }
 0xf09   :  { %v3182_v36 = vmul.f32 %v5210_v18, %v3180_v11  ;;  %vm3187_vm13 = vweird.f32 %v5210_v18 }
 0xf0a   :  { %vm3188_vm15 = vmor %vm3186_vm14, %vm3187_vm13 }
 0xf0b   :  { %v3183_v28 = vsub.f32 1.0, %v3182_v36  ;;  %v3207_v33 = vpop.f32.mrf.mxu0 }
 0xf0c   :  { %v3211_v15 = vadd.f32 %v3207_v33, %v3155_v1  ;;  %v9543_v33 = vld [vmem:[#allocation92_spill] sm:$0xff] }
 0xf0d   :  { %v3184_v7 = vmul.f32 %v5210_v18, %v3183_v28 }
 0xf0e   :  { %5211 = vtanh.f32 %v3211_v15 }
 0xf0f   :  { %v3185_v37 = vadd.f32 %v5210_v18, %v3184_v7  ;;  %v9551_v7 = vld [vmem:[#allocation42_spill] sm:$0xff] }
 0xf11   :  { %v3189_v53 = vsel %vm3188_vm15, %v5210_v18, %v3185_v37  ;;  %v9554_v37 = vld [vmem:[#allocation55_spill] sm:$0xff] }
 0xf12   :  { %v3194_v25 = vsel %vm3191_vm1, %v3193_v38, %v3189_v53  ;;  %v9555_v38 = vld [vmem:[#allocation51_spill] sm:$0xff]  ;;  %v9556_v53 = vld [vmem:[#allocation58_spill] sm:$0xff] }
 0xf13   :  { %v3213_v48 = vsub.f32 1.0, %v3194_v25  ;;  %v3209_v47 = vpop.f32.mrf.mxu0 }
 0xf14   :  { %v5212_v36 = vpop.eup %5211 }
 0xf15   :  { %v3214_v63 = vmul.f32 %v3213_v48, %v7878_v40  ;;  %v3215_v4 = vmul.f32 %v5212_v36, %v3194_v25  ;;  %v9557_v25 = vld [vmem:[#allocation56_spill] sm:$0xff] }
 0xf16   :  { %v9558_v48 = vld [vmem:[#allocation64_spill] sm:$0xff] }
 0xf17   :  { %v3216_v28 = vadd.f32 %v3215_v4, %v3214_v63 }
 0xf19   :  { %v8028_v11 = vsel %vm8021_vm3, %v3216_v28, %v7874_v52  ;;  %v3217_v18 = vpack.c.bf16 %v3216_v28, %v3216_v28  ;;  %v9549_v52 = vld [vmem:[#allocation38_spill] sm:$0xff] }
 0xf1a   :  { %v8032_v13 = vmul.f32 %v9543_v33, %v8028_v11 }
 0xf1b   :  { %3226 = vmatmul.bf16.vlgmr.msra.gmra.mxu1 %v3217_v18  ;;  %v3335_v15 = vpop.f32.mrf.mxu0 }
 0xf1c   :  { %v3311_v40 = vpack.c.bf16 %v8032_v13, %v8032_v13  ;;  %3431 = vmatpush.bf16.msra.mxu1 %v7716_v3 }
 0xf1e   :  { %3321 = vmatmul.bf16.vlgmr.msra.gmra.mxu3 %v3311_v40 }
 0xf1f   :  { %3466 = vmatpush.bf16.msra.mxu3 %v7883_v57 }
 0xf20   :  { %3432 = vmatpush.bf16.msra.mxu1 %v7722_v24  ;;  %v9544_v24 = vld [vmem:[#allocation35_spill] sm:$0xff] }
 0xf23   :  { %v3337_v4 = vpop.f32.mrf.mxu0  ;;  %3467 = vmatpush.bf16.msra.mxu3 %v7887_v49 }
 0xf24   :  { %3433 = vmatpush.bf16.msra.mxu1 %v7726_v42  ;;  %v9545_v42 = vld [vmem:[#allocation32_spill] sm:$0xff] }
 0xf27   :  { %3468 = vmatpush.bf16.msra.mxu3 %v7893_v27 }
 0xf28   :  { %3434 = vmatpush.bf16.msra.mxu1 %v7730_v26  ;;  %v9546_v26 = vld [vmem:[#allocation39_spill] sm:$0xff] }
 0xf2b   :  { %3347 = vmatmul.bf16.vlgmr.msrb.gmra.mxu1 %v3311_v40  ;;  %v8043_v63 = vpop.f32.mrf.mxu0  ;;  %3469 = vmatpush.bf16.msra.mxu3 %v7897_v43 }
 0xf2c   :  { %3435 = vmatpush.bf16.msra.mxu1 %v7734_v23  ;;  %v9547_v23 = vld [vmem:[#allocation34_spill] sm:$0xff] }
 0xf2e   :  { %3373 = vmatmul.bf16.vlgmr.msrb.gmra.mxu3 %v3311_v40 }
 0xf2f   :  { %3470 = vmatpush.bf16.msra.mxu3 %v7901_v8 }
 0xf30   :  { %3436 = vmatpush.bf16.msra.mxu1 %v7738_v31  ;;  %v9548_v31 = vld [vmem:[#allocation43_spill] sm:$0xff] }
 0xf33   :  { %v3389_v3 = vpop.f32.mrf.mxu0  ;;  %3471 = vmatpush.bf16.msra.mxu3 %v7905_v12 }
 0xf34   :  { %3437 = vmatpush.bf16.msra.mxu1 %v7742_v56  ;;  %v9550_v56 = vld [vmem:[#allocation47_spill] sm:$0xff] }
 0xf37   :  { %3472 = vmatpush.bf16.msra.mxu3 %v7909_v32 }
 0xf38   :  { %3438 = vmatpush.bf16.msra.mxu1 %v7746_v55  ;;  %v9552_v55 = vld [vmem:[#allocation52_spill] sm:$0xff] }
 0xf3b   :  { %3473 = vmatpush.bf16.msra.mxu3 %v7914_v62 }
 0xf3c   :  { %3559 = vmatpush.bf16.msrb.mxu1 %v9388_v39 }
 0xf3f   :  { %3585 = vmatpush.bf16.msrb.mxu3 %v9544_v24 }
 0xf40   :  { %3560 = vmatpush.bf16.msrb.mxu1 %v9545_v42 }
 0xf43   :  { %3586 = vmatpush.bf16.msrb.mxu3 %v9546_v26 }
 0xf44   :  { %3561 = vmatpush.bf16.msrb.mxu1 %v9547_v23 }
 0xf47   :  { %3587 = vmatpush.bf16.msrb.mxu3 %v9548_v31 }
 0xf48   :  { %3562 = vmatpush.bf16.msrb.mxu1 %v9549_v52 }
 0xf4b   :  { %3588 = vmatpush.bf16.msrb.mxu3 %v9550_v56 }
 0xf4c   :  { %3563 = vmatpush.bf16.msrb.mxu1 %v9551_v7 }
 0xf4f   :  { %3589 = vmatpush.bf16.msrb.mxu3 %v9552_v55 }
 0xf50   :  { %3564 = vmatpush.bf16.msrb.mxu1 %v9553_v6 }
 0xf53   :  { %3590 = vmatpush.bf16.msrb.mxu3 %v9554_v37 }
 0xf54   :  { %3565 = vmatpush.bf16.msrb.mxu1 %v9555_v38 }
 0xf57   :  { %3591 = vmatpush.bf16.msrb.mxu3 %v9556_v53 }
 0xf58   :  { %3566 = vmatpush.bf16.msrb.mxu1 %v9557_v25 }
 0xf5b   :  { %3592 = vmatpush.bf16.msrb.mxu3 %v9558_v48 }
 0xf98   :  { %v3227_v0 = vpop.f32.mrf.mxu1 }
 0xf99   :  { %v3228_v47 = vadd.f32 %v7935_v14, %v3227_v0  ;;  %v9559_v0 = vld [vmem:[#allocation93_spill] sm:$0xff] }
 0xf9b   :  { %v3231_v36 = vmax.f32 %v3228_v47, 0.0 }
 0xf9d   :  { %v3232_v28 = vpack.c.bf16 %v3231_v36, %v3231_v36 }
 0xf9f   :  { %3241 = vmatmul.bf16.vlgmr.msra.gmra.mxu2 %v3232_v28  ;;  %v9560_v28 = vld [vmem:[#allocation86_spill] sm:$0xff] }
 0xfa0   :  { %v3229_v18 = vpop.f32.mrf.mxu1  ;;  %3451 = vmatpush.bf16.msra.mxu2 %v7769_v58 }
 0xfa1   :  { %v3322_v33 = vpop.f32.mrf.mxu3 }
 0xfa2   :  { %v3323_v40 = vadd.f32 %v3322_v33, %v5967_v41 }
 0xfa4   :  { %v3336_v4 = vadd.f32 %v3335_v15, %v3323_v40  ;;  %3452 = vmatpush.bf16.msra.mxu2 %v9519_v34  ;;  %v9561_v15 = vld [vmem:[#allocation97_spill] sm:$0xff] }
 0xfa6   :  { %v4894_v3 = vmul.f32 -1.442695, %v3336_v4 }
 0xfa8   :  { %5213 = vpow2.f32 %v4894_v3  ;;  %v8074_v25 = vpop.f32.mrf.mxu1  ;;  %3453 = vmatpush.bf16.msra.mxu2 %v9520_v22 }
 0xfa9   :  { %v3324_v48 = vpop.f32.mrf.mxu3 }
 0xfac   :  { %3454 = vmatpush.bf16.msra.mxu2 %v9559_v0 }
 0xfae   :  { %v5214_v47 = vpop.eup %5213 }
 0xfaf   :  { %v3394_v36 = vadd.f32 1.0, %v5214_v47  ;;  %4890 = vmatmul.msk.bf16.vlgmr.msrb.gmra.mxu2 %vm5900_vm2, %v7971_v51 }
 0xfb0   :  { %v3350_v58 = vpop.f32.mrf.mxu1  ;;  %3455 = vmatpush.bf16.msra.mxu2 %v9560_v28 }
 0xfb1   :  { %5215 = vrcp.f32 %v3394_v36  ;;  %v8082_v34 = vpop.f32.mrf.mxu3  ;;  %v3406_v40 = vand.u32 2147483648, %v3394_v36  ;;  %v3404_v3 = vand.u32 2147483647, %v3394_v36  ;;  %vm3400_vm5 = vweird.f32 %v3394_v36 }
 0xfb3   :  { %v3407_v0 = vor.u32 1.1754944e-38, %v3406_v40  ;;  %vm3405_vm7 = vcmp.eq.f32.partialorder %v3404_v3, 8.507059e+37  ;;  %v9567_v40 = vld [vmem:[#allocation30_spill] sm:$0xff]  ;;  %v9569_v3 = vld [vmem:[#allocation36_spill] sm:$0xff] }
 0xfb4   :  { %3456 = vmatpush.bf16.msra.mxu2 %v9561_v15 }
 0xfb7   :  { %v5216_v18 = vpop.eup %5215 }
 0xfb8   :  { %v3396_v33 = vmul.f32 %v5216_v18, %v3394_v36  ;;  %3457 = vmatpush.bf16.msra.mxu2 %v7795_v2  ;;  %vm3401_vm4 = vweird.f32 %v5216_v18  ;;  %v9563_v36 = vld [vmem:[#allocation96_spill] sm:$0xff] }
 0xfb9   :  { %v3376_v22 = vpop.f32.mrf.mxu3  ;;  %vm3402_vm6 = vmor %vm3400_vm5, %vm3401_vm4 }
 0xfba   :  { %v3397_v48 = vsub.f32 1.0, %v3396_v33  ;;  %v9564_v33 = vld [vmem:[#allocation69_spill] sm:$0xff]  ;;  %v9565_v22 = vld [vmem:[#allocation28_spill] sm:$0xff] }
 0xfbc   :  { %v3398_v4 = vmul.f32 %v5216_v18, %v3397_v48  ;;  %3458 = vmatpush.bf16.msra.mxu2 %v7799_v19  ;;  %v8096_v19 = vld [vmem:[#allocation8 + $0x60] sm:$0xff]  ;;  %v9566_v48 = vld [vmem:[#allocation29_spill] sm:$0xff] }
 0xfbd   :  { %9562 = vst [vmem:[#allocation37_spill] sm:$0xff] %v8096_v19  ;;  %v3542_v15 = vsel %vm140_vm0, %v9563_v36, %v8096_v19  ;;  %v9576_v36 = vld [vmem:[#allocation59_spill] sm:$0xff]  ;;  %v9578_v19 = vld [vmem:[#allocation61_spill] sm:$0xff] }
 0xfbe   :  { %v3399_v51 = vadd.f32 %v5216_v18, %v3398_v4  ;;  %v9568_v4 = vld [vmem:[#allocation33_spill] sm:$0xff] }
 0xfc0   :  { %3572 = vmatpush.bf16.msrb.mxu2 %v5739_v44  ;;  %v3403_v47 = vsel %vm3402_vm6, %v5216_v18, %v3399_v51  ;;  %v8103_v18 = vpack.c.bf16 %v3542_v15, %v3542_v15  ;;  %v9570_v51 = vld [vmem:[#allocation40_spill] sm:$0xff] }
 0xfc1   :  { %v3408_v58 = vsel %vm3405_vm7, %v3407_v0, %v3403_v47  ;;  %v9571_v0 = vld [vmem:[#allocation44_spill] sm:$0xff] }
 0xfc2   :  { %v3429_v2 = vmul.f32 %v3408_v58, %v8032_v13  ;;  %v9572_v47 = vld [vmem:[#allocation48_spill] sm:$0xff]  ;;  %v9573_v58 = vld [vmem:[#allocation49_spill] sm:$0xff] }
 0xfc3   :  { %v9577_v15 = vld [vmem:[#allocation60_spill] sm:$0xff] }
 0xfc4   :  { %3573 = vmatpush.bf16.msrb.mxu2 %v5748_v54  ;;  %v3430_v28 = vpack.c.bf16 %v3429_v2, %v3429_v2  ;;  %v9574_v2 = vld [vmem:[#allocation53_spill] sm:$0xff] }
 0xfc6   :  { %3439 = vmatmul.bf16.vlgmr.msra.gmra.mxu1 %v3430_v28  ;;  %v9575_v28 = vld [vmem:[#allocation57_spill] sm:$0xff] }
 0xfc7   :  { %3611 = vmatpush.bf16.msra.mxu1 %v5844_v9 }
 0xfc8   :  { %3574 = vmatpush.bf16.msrb.mxu2 %v5760_v10 }
 0xfcb   :  { %3612 = vmatpush.bf16.msra.mxu1 %v5855_v30 }
 0xfcc   :  { %3575 = vmatpush.bf16.msrb.mxu2 %v9067_v35 }
 0xfcf   :  { %3613 = vmatpush.bf16.msra.mxu1 %v5863_v46 }
 0xfd0   :  { %3576 = vmatpush.bf16.msrb.mxu2 %v9069_v29 }
 0xfd3   :  { %3614 = vmatpush.bf16.msra.mxu1 %v5882_v45 }
 0xfd4   :  { %3577 = vmatpush.bf16.msrb.mxu2 %v9462_v20 }
 0xfd6   :  { %4899 = vmatmul.msk.bf16.vlgmr.msrb.gmra.mxu1 %vm5900_vm2, %v8103_v18 }
 0xfd7   :  { %3615 = vmatpush.bf16.msra.mxu1 %v5886_v59 }
 0xfd8   :  { %3578 = vmatpush.bf16.msrb.mxu2 %v9464_v50 }
 0xfdb   :  { %3616 = vmatpush.bf16.msra.mxu1 %v9461_v21 }
 0xfdc   :  { %3579 = vmatpush.bf16.msrb.mxu2 %v9467_v5 }
 0xfdf   :  { %3617 = vmatpush.bf16.msra.mxu1 %v9463_v17 }
 0xfe3   :  { %3618 = vmatpush.bf16.msra.mxu1 %v9564_v33 }
 0xfe6   :  { %4905 = vmatmul.msk.bf16.vlgmr.msra.gmra.mxu1 %vm5900_vm2, %v8103_v18 }
 0xfe7   :  { %3779 = vmatpush.bf16.msrb.mxu1 %v9565_v22  ;;  %v9584_v22 = vld [vmem:[#allocation80_spill] sm:$0xff] }
 0xfeb   :  { %3780 = vmatpush.bf16.msrb.mxu1 %v9566_v48 }
 0xfef   :  { %3781 = vmatpush.bf16.msrb.mxu1 %v9567_v40  ;;  %v9583_v40 = vld [vmem:[#allocation79_spill] sm:$0xff] }
 0xff0   :  { %v3349_v48 = vadd.f32 %v8074_v25, %v9583_v40 }
 0xff3   :  { %3782 = vmatpush.bf16.msrb.mxu1 %v9568_v4  ;;  %v9579_v4 = vld [vmem:[#allocation62_spill] sm:$0xff] }
 0xff7   :  { %3783 = vmatpush.bf16.msrb.mxu1 %v9569_v3  ;;  %v9580_v3 = vld [vmem:[#allocation63_spill] sm:$0xff] }
 0xffb   :  { %3784 = vmatpush.bf16.msrb.mxu1 %v9570_v51 }
 0xfff   :  { %3785 = vmatpush.bf16.msrb.mxu1 %v9571_v0 }
0x1003   :  { %3786 = vmatpush.bf16.msrb.mxu1 %v9572_v47  ;;  %v8136_v47 = vld [vmem:[%s8688_s10] ss:$0 sm:$0xff] }
0x1004   :  { %9581 = vst [vmem:[#allocation94_spill] sm:$0xff] %v8136_v47 }
0x1007   :  { %3831 = vmatpush.bf16.msra.mxu1 %v9573_v58 }
0x100b   :  { %3832 = vmatpush.bf16.msra.mxu1 %v9574_v2 }
0x100f   :  { %3833 = vmatpush.bf16.msra.mxu1 %v9575_v28  ;;  %v3259_v28 = vpop.permute.xlu0 %3258 }
0x1013   :  { %3834 = vmatpush.bf16.msra.mxu1 %v9576_v36 }
0x1017   :  { %3835 = vmatpush.bf16.msra.mxu1 %v9577_v15  ;;  %v9582_v15 = vld [vmem:[#allocation85_spill] sm:$0xff] }
0x101b   :  { %3836 = vmatpush.bf16.msra.mxu1 %v9578_v19 }
0x101f   :  { %3837 = vmatpush.bf16.msra.mxu1 %v9579_v4 }
0x1022   :  { %v3242_v51 = vpop.f32.mrf.mxu2 }
0x1023   :  { %3838 = vmatpush.bf16.msra.mxu1 %v9580_v3  ;;  %v3243_v2 = vadd.f32 %v8136_v47, %v3242_v51 }
0x1025   :  { %v8142_v36 = vsel %vm8021_vm3, %v3243_v2, %v8005_v60 }
0x1026   :  { %v3255_v19 = vsub.f32 %v9582_v15, %v8142_v36  ;;  %v3375_v15 = vadd.f32 %v8082_v34, %v9584_v22 }
0x1028   :  { %v3256_v4 = vand.u32 2147483647, %v3255_v19 }
0x102a   :  { %v3261_v58 = vmul.f32 %v3259_v28, %v3256_v4  ;;  %v3244_v3 = vpop.f32.mrf.mxu2  ;;  %v3388_v4 = vadd.f32 %v8043_v63, %v3375_v15 }
0x102c   :  { %v8147_v0 = vadd.f32 %v3261_v58, %v8010_v16 }
0x1032   :  { %v3361_v5 = vpop.f32.mrf.mxu2 }
0x1033   :  { %v3362_v51 = vadd.f32 %v3361_v5, %v3349_v48 }
0x1035   :  { %v4895_v47 = vmul.f32 -1.442695, %v3362_v51 }
0x1037   :  { %5217 = vpow2.f32 %v4895_v47 }
0x103a   :  { %v3363_v1 = vpop.f32.mrf.mxu2 }
0x103d   :  { %v5218_v60 = vpop.eup %5217 }
0x103e   :  { %v3413_v2 = vadd.f32 1.0, %v5218_v60 }
0x1040   :  { %5219 = vrcp.f32 %v3413_v2  ;;  %v3425_v5 = vand.u32 2147483648, %v3413_v2  ;;  %v3423_v48 = vand.u32 2147483647, %v3413_v2  ;;  %vm3419_vm9 = vweird.f32 %v3413_v2 }
0x1042   :  { %v3426_v34 = vor.u32 1.1754944e-38, %v3425_v5  ;;  %vm3424_vm11 = vcmp.eq.f32.partialorder %v3423_v48, 8.507059e+37  ;;  %v9587_v5 = vld [vmem:[#allocation78_spill] sm:$0xff]  ;;  %v8173_v48 = vld [vmem:[#allocation11 + $0x38] sm:$0xff] }
0x1043   :  { %v3440_v19 = vpop.f32.mrf.mxu1 }
0x1044   :  { %v3444_v16 = vadd.f32 %v3440_v19, %v3388_v4  ;;  %v3482_v4 = vstv %s3481_s2 }
0x1045   :  { %vm8158_vm12 = vcmp.eq.s32.totalorder %v3482_v4, 1 }
0x1046   :  { %v5220_v3 = vpop.eup %5219  ;;  %5221 = vtanh.f32 %v3444_v16 }
0x1047   :  { %v3415_v58 = vmul.f32 %v5220_v3, %v3413_v2  ;;  %vm3420_vm8 = vweird.f32 %v5220_v3 }
0x1048   :  { %vm3421_vm10 = vmor %vm3419_vm9, %vm3420_vm8 }
0x1049   :  { %v3416_v28 = vsub.f32 1.0, %v3415_v58 }
0x104b   :  { %v3417_v25 = vmul.f32 %v5220_v3, %v3416_v28  ;;  %v3442_v47 = vpop.f32.mrf.mxu1 }
0x104c   :  { %v5222_v1 = vpop.eup %5221 }
0x104d   :  { %v3418_v51 = vadd.f32 %v5220_v3, %v3417_v25 }
0x104f   :  { %v3422_v63 = vsel %vm3421_vm10, %v5220_v3, %v3418_v51  ;;  %v8177_v51 = vld [vmem:[#allocation11 + $0x30] sm:$0xff] }
0x1050   :  { %v3427_v60 = vsel %vm3424_vm11, %v3426_v34, %v3422_v63  ;;  %v8187_v63 = vld [vmem:[#allocation11 + $0x20] sm:$0xff] }
0x1051   :  { %v3446_v15 = vsub.f32 1.0, %v3427_v60  ;;  %v3448_v19 = vmul.f32 %v5222_v1, %v3427_v60  ;;  %v8195_v1 = vld [vmem:[#allocation11 + $0x10] sm:$0xff] }
0x1053   :  { %v3447_v58 = vmul.f32 %v3446_v15, %v8032_v13  ;;  %v3568_v22 = vpop.f32.mrf.mxu1 }
0x1055   :  { %v3449_v28 = vadd.f32 %v3448_v19, %v3447_v58 }
0x1057   :  { %v8165_v2 = vsel %vm8158_vm12, %v3449_v28, %v8028_v11  ;;  %v3450_v3 = vpack.c.bf16 %v3449_v28, %v3449_v28  ;;  %v8181_v11 = vld [vmem:[#allocation11 + $0x28] sm:$0xff] }
0x1058   :  { %v8169_v25 = vmul.f32 %v9587_v5, %v8165_v2 }
0x1059   :  { %3459 = vmatmul.bf16.vlgmr.msra.gmra.mxu2 %v3450_v3 }
0x105a   :  { %v3544_v13 = vpack.c.bf16 %v8169_v25, %v8169_v25  ;;  %3664 = vmatpush.bf16.msra.mxu2 %v8173_v48 }
0x105b   :  { %v3570_v47 = vpop.f32.mrf.mxu1 }
0x105c   :  { %3554 = vmatmul.bf16.vlgmr.msrb.gmra.mxu0 %v3544_v13 }
0x105d   :  { %3699 = vmatpush.bf16.msrb.mxu0 %v7883_v57  ;;  %v8191_v57 = vld [vmem:[#allocation11 + $0x18] sm:$0xff] }
0x105e   :  { %3665 = vmatpush.bf16.msra.mxu2 %v8177_v51 }
0x1061   :  { %3700 = vmatpush.bf16.msrb.mxu0 %v7887_v49 }
0x1062   :  { %3666 = vmatpush.bf16.msra.mxu2 %v8181_v11 }
0x1063   :  { %v8184_v34 = vpop.f32.mrf.mxu1 }
0x1065   :  { %3701 = vmatpush.bf16.msrb.mxu0 %v7893_v27  ;;  %v8199_v27 = vld [vmem:[#allocation11 + $0x8] sm:$0xff] }
0x1066   :  { %3667 = vmatpush.bf16.msra.mxu2 %v8187_v63 }
0x1069   :  { %3580 = vmatmul.bf16.vlgmr.msrb.gmra.mxu2 %v3544_v13  ;;  %3702 = vmatpush.bf16.msrb.mxu0 %v7897_v43  ;;  %v8203_v43 = vld [vmem:[#allocation11] sm:$0xff] }
0x106a   :  { %3668 = vmatpush.bf16.msra.mxu2 %v8191_v57 }
0x106b   :  { %v3622_v49 = vpop.f32.mrf.mxu1 }
0x106c   :  { %3606 = vmatmul.bf16.vlgmr.msra.gmra.mxu0 %v3544_v13  ;;  %v8225_v13 = vld [vmem:[#allocation12 + $0x38] sm:$0xff] }
0x106d   :  { %3703 = vmatpush.bf16.msrb.mxu0 %v7901_v8  ;;  %v9588_v8 = vld [vmem:[#allocation56_spill] sm:$0xff]  ;;  %9590 = vst [vmem:[#allocation88_spill] sm:$0xff] %v8225_v13 }
0x106e   :  { %3669 = vmatpush.bf16.msra.mxu2 %v8195_v1 }
0x1071   :  { %3704 = vmatpush.bf16.msrb.mxu0 %v7905_v12  ;;  %v9589_v12 = vld [vmem:[#allocation64_spill] sm:$0xff] }
0x1072   :  { %3670 = vmatpush.bf16.msra.mxu2 %v8199_v27 }
0x1075   :  { %3705 = vmatpush.bf16.msrb.mxu0 %v7909_v32 }
0x1076   :  { %3671 = vmatpush.bf16.msra.mxu2 %v8203_v43 }
0x1079   :  { %3706 = vmatpush.bf16.msrb.mxu0 %v7914_v62 }
0x107a   :  { %3792 = vmatpush.bf16.msrb.mxu2 %v9388_v39 }
0x107d   :  { %3818 = vmatpush.bf16.msra.mxu0 %v9544_v24 }
0x107e   :  { %3793 = vmatpush.bf16.msrb.mxu2 %v9545_v42 }
0x1081   :  { %3819 = vmatpush.bf16.msra.mxu0 %v9546_v26 }
0x1082   :  { %3794 = vmatpush.bf16.msrb.mxu2 %v9547_v23 }
0x1085   :  { %3820 = vmatpush.bf16.msra.mxu0 %v9548_v31 }
0x1086   :  { %3795 = vmatpush.bf16.msrb.mxu2 %v9549_v52 }
0x1089   :  { %3821 = vmatpush.bf16.msra.mxu0 %v9550_v56 }
0x108a   :  { %3796 = vmatpush.bf16.msrb.mxu2 %v9551_v7 }
0x108d   :  { %3822 = vmatpush.bf16.msra.mxu0 %v9552_v55 }
0x108e   :  { %3797 = vmatpush.bf16.msrb.mxu2 %v9553_v6 }
0x1091   :  { %3823 = vmatpush.bf16.msra.mxu0 %v9554_v37 }
0x1092   :  { %3798 = vmatpush.bf16.msrb.mxu2 %v9555_v38 }
0x1095   :  { %3824 = vmatpush.bf16.msra.mxu0 %v9556_v53 }
0x1096   :  { %3799 = vmatpush.bf16.msrb.mxu2 %v9588_v8 }
0x1099   :  { %3825 = vmatpush.bf16.msra.mxu0 %v9589_v12  ;;  %v8228_v12 = vld [vmem:[#allocation12 + $0x30] sm:$0xff] }
0x109a   :  { %9591 = vst [vmem:[#allocation95_spill] sm:$0xff] %v8228_v12 }
0x10d9   :  { %v3555_v32 = vpop.f32.mrf.mxu0 }
0x10da   :  { %v3556_v62 = vadd.f32 %v3555_v32, %v5967_v41  ;;  %v8235_v32 = vld [vmem:[#allocation12 + $0x28] sm:$0xff] }
0x10db   :  { %9592 = vst [vmem:[#allocation101_spill] sm:$0xff] %v8235_v32 }
0x10dc   :  { %v3569_v60 = vadd.f32 %v3568_v22, %v3556_v62  ;;  %v3460_v15 = vpop.f32.mrf.mxu2 }
0x10dd   :  { %v3461_v19 = vadd.f32 %v7935_v14, %v3460_v15  ;;  %v8238_v15 = vld [vmem:[#allocation12 + $0x20] sm:$0xff] }
0x10de   :  { %v4906_v4 = vmul.f32 -1.442695, %v3569_v60  ;;  %9593 = vst [vmem:[#allocation98_spill] sm:$0xff] %v8238_v15 }
0x10df   :  { %v3464_v58 = vmax.f32 %v3461_v19, 0.0 }
0x10e0   :  { %5223 = vpow2.f32 %v4906_v4 }
0x10e1   :  { %v3465_v28 = vpack.c.bf16 %v3464_v58, %v3464_v58  ;;  %v3557_v3 = vpop.f32.mrf.mxu0 }
0x10e3   :  { %3474 = vmatmul.bf16.vlgmr.msra.gmra.mxu3 %v3465_v28 }
0x10e4   :  { %v3462_v5 = vpop.f32.mrf.mxu2  ;;  %3684 = vmatpush.bf16.msra.mxu3 %v8225_v13 }
0x10e6   :  { %v5224_v47 = vpop.eup %5223 }
0x10e7   :  { %v3627_v49 = vadd.f32 1.0, %v5224_v47  ;;  %v8244_v47 = vld [vmem:[#allocation12 + $0x18] sm:$0xff] }
0x10e8   :  { %3685 = vmatpush.bf16.msra.mxu3 %v8228_v12 }
0x10e9   :  { %5225 = vrcp.f32 %v3627_v49  ;;  %v8231_v22 = vpop.f32.mrf.mxu0  ;;  %v3639_v58 = vand.u32 2147483648, %v3627_v49  ;;  %v3637_v5 = vand.u32 2147483647, %v3627_v49  ;;  %vm3633_vm14 = vweird.f32 %v3627_v49 }
0x10eb   :  { %v3640_v12 = vor.u32 1.1754944e-38, %v3639_v58  ;;  %vm3638_vm1 = vcmp.eq.f32.partialorder %v3637_v5, 8.507059e+37  ;;  %v9596_v58 = vld [vmem:[#allocation28_spill] sm:$0xff]  ;;  %v9598_v5 = vld [vmem:[#allocation29_spill] sm:$0xff] }
0x10ec   :  { %v8233_v14 = vpop.f32.mrf.mxu2  ;;  %3686 = vmatpush.bf16.msra.mxu3 %v8235_v32 }
0x10ef   :  { %v5226_v62 = vpop.eup %5225 }
0x10f0   :  { %v3629_v60 = vmul.f32 %v5226_v62, %v3627_v49  ;;  %3687 = vmatpush.bf16.msra.mxu3 %v8238_v15  ;;  %vm3634_vm13 = vweird.f32 %v5226_v62  ;;  %v8255_v49 = vld [vmem:[#allocation12] sm:$0xff] }
0x10f1   :  { %v3609_v19 = vpop.f32.mrf.mxu0  ;;  %vm3635_vm15 = vmor %vm3633_vm14, %vm3634_vm13 }
0x10f2   :  { %v3630_v4 = vsub.f32 1.0, %v3629_v60  ;;  %v8247_v60 = vld [vmem:[#allocation12 + $0x10] sm:$0xff] }
0x10f3   :  { %4902 = vmatmul.msk.bf16.vlgmr.msrb.gmra.mxu3 %vm5900_vm2, %v8103_v18 }
0x10f4   :  { %v3631_v28 = vmul.f32 %v5226_v62, %v3630_v4  ;;  %v3583_v3 = vpop.f32.mrf.mxu2  ;;  %3688 = vmatpush.bf16.msra.mxu3 %v8244_v47 }
0x10f5   :  { %v8251_v3 = vld [vmem:[#allocation12 + $0x8] sm:$0xff] }
0x10f6   :  { %v3632_v32 = vadd.f32 %v5226_v62, %v3631_v28  ;;  %v9597_v28 = vld [vmem:[#allocation54_spill] sm:$0xff] }
0x10f8   :  { %v3636_v15 = vsel %vm3635_vm15, %v5226_v62, %v3632_v32  ;;  %3689 = vmatpush.bf16.msra.mxu3 %v8247_v60  ;;  %v9595_v32 = vld [vmem:[#allocation74_spill] sm:$0xff] }
0x10f9   :  { %v3641_v19 = vsel %vm3638_vm1, %v3640_v12, %v3636_v15  ;;  %v8262_v12 = vld [vmem:[#allocation8 + $0x68] sm:$0xff] }
0x10fa   :  { %v3662_v18 = vmul.f32 %v3641_v19, %v8169_v25  ;;  %9594 = vst [vmem:[#allocation89_spill] sm:$0xff] %v8262_v12  ;;  %v3775_v62 = vsel %vm140_vm0, %v9595_v32, %v8262_v12  ;;  %v9599_v19 = vld [vmem:[#allocation30_spill] sm:$0xff]  ;;  %v9602_v32 = vld [vmem:[#allocation40_spill] sm:$0xff] }
0x10fb   :  { %v8269_v15 = vpack.c.bf16 %v3775_v62, %v3775_v62  ;;  %v9603_v62 = vld [vmem:[#allocation44_spill] sm:$0xff] }
0x10fc   :  { %v3663_v4 = vpack.c.bf16 %v3662_v18, %v3662_v18  ;;  %3690 = vmatpush.bf16.msra.mxu3 %v8251_v3  ;;  %v9600_v18 = vld [vmem:[#allocation33_spill] sm:$0xff]  ;;  %v9604_v12 = vld [vmem:[#allocation48_spill] sm:$0xff] }
0x10fe   :  { %3672 = vmatmul.bf16.vlgmr.msra.gmra.mxu2 %v3663_v4  ;;  %v9601_v4 = vld [vmem:[#allocation36_spill] sm:$0xff] }
0x10ff   :  { %3844 = vmatpush.bf16.msra.mxu2 %v5844_v9 }
0x1100   :  { %3691 = vmatpush.bf16.msra.mxu3 %v8255_v49 }
0x1103   :  { %3845 = vmatpush.bf16.msra.mxu2 %v5855_v30 }
0x1104   :  { %3805 = vmatpush.bf16.msrb.mxu3 %v5739_v44 }
0x1107   :  { %3846 = vmatpush.bf16.msra.mxu2 %v5863_v46 }
0x1108   :  { %3806 = vmatpush.bf16.msrb.mxu3 %v5748_v54 }
0x110b   :  { %3847 = vmatpush.bf16.msra.mxu2 %v5882_v45 }
0x110c   :  { %3807 = vmatpush.bf16.msrb.mxu3 %v5760_v10 }
0x110e   :  { %4911 = vmatmul.msk.bf16.vlgmr.msrb.gmra.mxu2 %vm5900_vm2, %v8269_v15 }
0x110f   :  { %3848 = vmatpush.bf16.msra.mxu2 %v5886_v59 }
0x1110   :  { %3808 = vmatpush.bf16.msrb.mxu3 %v9067_v35 }
0x1113   :  { %3849 = vmatpush.bf16.msra.mxu2 %v9461_v21 }
0x1114   :  { %3809 = vmatpush.bf16.msrb.mxu3 %v9069_v29  ;;  %v9615_v29 = vld [vmem:[#allocation80_spill] sm:$0xff] }
0x1117   :  { %3850 = vmatpush.bf16.msra.mxu2 %v9463_v17 }
0x1118   :  { %3810 = vmatpush.bf16.msrb.mxu3 %v9462_v20 }
0x111b   :  { %3851 = vmatpush.bf16.msra.mxu2 %v9564_v33  ;;  %v9607_v33 = vld [vmem:[#allocation57_spill] sm:$0xff] }
0x111c   :  { %3811 = vmatpush.bf16.msrb.mxu3 %v9464_v50  ;;  %v9608_v50 = vld [vmem:[#allocation59_spill] sm:$0xff] }
0x111e   :  { %4917 = vmatmul.msk.bf16.vlgmr.msra.gmra.mxu2 %vm5900_vm2, %v8269_v15 }
0x111f   :  { %4012 = vmatpush.bf16.msrb.mxu2 %v9596_v58  ;;  %v9605_v58 = vld [vmem:[#allocation49_spill] sm:$0xff] }
0x1120   :  { %3812 = vmatpush.bf16.msrb.mxu3 %v9597_v28  ;;  %v9606_v28 = vld [vmem:[#allocation53_spill] sm:$0xff] }
0x1123   :  { %4013 = vmatpush.bf16.msrb.mxu2 %v9598_v5  ;;  %v9609_v5 = vld [vmem:[#allocation60_spill] sm:$0xff] }
0x1127   :  { %4014 = vmatpush.bf16.msrb.mxu2 %v9599_v19  ;;  %v9610_v19 = vld [vmem:[#allocation61_spill] sm:$0xff] }
0x112b   :  { %4015 = vmatpush.bf16.msrb.mxu2 %v9600_v18  ;;  %v9611_v18 = vld [vmem:[#allocation62_spill] sm:$0xff] }
0x112f   :  { %4016 = vmatpush.bf16.msrb.mxu2 %v9601_v4  ;;  %v9612_v4 = vld [vmem:[#allocation63_spill] sm:$0xff] }
0x1133   :  { %4017 = vmatpush.bf16.msrb.mxu2 %v9602_v32 }
0x1137   :  { %4018 = vmatpush.bf16.msrb.mxu2 %v9603_v62  ;;  %v9613_v62 = vld [vmem:[#allocation94_spill] sm:$0xff] }
0x113b   :  { %4019 = vmatpush.bf16.msrb.mxu2 %v9604_v12 }
0x113f   :  { %4064 = vmatpush.bf16.msra.mxu2 %v9605_v58 }
0x1143   :  { %4065 = vmatpush.bf16.msra.mxu2 %v9606_v28 }
0x1147   :  { %4066 = vmatpush.bf16.msra.mxu2 %v9607_v33  ;;  %v9614_v33 = vld [vmem:[#allocation37_spill] sm:$0xff] }
0x114b   :  { %4067 = vmatpush.bf16.msra.mxu2 %v9608_v50  ;;  %v3492_v50 = vpop.permute.xlu1 %3491 }
0x114f   :  { %4068 = vmatpush.bf16.msra.mxu2 %v9609_v5 }
0x1153   :  { %4069 = vmatpush.bf16.msra.mxu2 %v9610_v19 }
0x1157   :  { %4070 = vmatpush.bf16.msra.mxu2 %v9611_v18 }
0x115b   :  { %4071 = vmatpush.bf16.msra.mxu2 %v9612_v4  ;;  %v3582_v4 = vadd.f32 %v8233_v14, %v9583_v40 }
0x1166   :  { %v3475_v32 = vpop.f32.mrf.mxu3 }
0x1167   :  { %v3476_v17 = vadd.f32 %v9613_v62, %v3475_v32 }
0x1169   :  { %v8306_v58 = vsel %vm8158_vm12, %v3476_v17, %v8142_v36 }
0x116a   :  { %v3488_v28 = vsub.f32 %v9614_v33, %v8306_v58  ;;  %v3608_v33 = vadd.f32 %v8231_v22, %v9615_v29 }
0x116c   :  { %v3489_v12 = vand.u32 2147483647, %v3488_v28 }
0x116e   :  { %v3494_v5 = vmul.f32 %v3492_v50, %v3489_v12  ;;  %v3477_v20 = vpop.f32.mrf.mxu3 }
0x116f   :  { %v3621_v20 = vadd.f32 %v8184_v34, %v3608_v33 }
0x1170   :  { %v8311_v19 = vadd.f32 %v3494_v5, %v8147_v0 }
0x1176   :  { %v3594_v18 = vpop.f32.mrf.mxu3 }
0x1177   :  { %v3595_v32 = vadd.f32 %v3594_v18, %v3582_v4 }
0x1179   :  { %v4907_v62 = vmul.f32 -1.442695, %v3595_v32 }
0x117b   :  { %5227 = vpow2.f32 %v4907_v62 }
0x117e   :  { %v3596_v16 = vpop.f32.mrf.mxu3 }
0x1181   :  { %v5228_v17 = vpop.eup %5227  ;;  %v3673_v36 = vpop.f32.mrf.mxu2 }
0x1182   :  { %v3646_v21 = vadd.f32 1.0, %v5228_v17  ;;  %v3677_v12 = vadd.f32 %v3673_v36, %v3621_v20  ;;  %v3715_v20 = vstv %s3714_s21 }
0x1183   :  { %vm8324_vm7 = vcmp.eq.s32.totalorder %v3715_v20, 1  ;;  %v8371_v20 = vld [vmem:[#allocation14] sm:$0xff] }
0x1184   :  { %5229 = vrcp.f32 %v3646_v21  ;;  %v3658_v14 = vand.u32 2147483648, %v3646_v21  ;;  %v3656_v4 = vand.u32 2147483647, %v3646_v21  ;;  %vm3652_vm4 = vweird.f32 %v3646_v21 }
0x1185   :  { %5231 = vtanh.f32 %v3677_v12 }
0x1186   :  { %v3659_v34 = vor.u32 1.1754944e-38, %v3658_v14  ;;  %vm3657_vm6 = vcmp.eq.f32.partialorder %v3656_v4, 8.507059e+37  ;;  %v9618_v14 = vld [vmem:[#allocation70_spill] sm:$0xff] }
0x1189   :  { %v3675_v50 = vpop.f32.mrf.mxu2 }
0x118a   :  { %v5230_v0 = vpop.eup %5229 }
0x118b   :  { %v3648_v28 = vmul.f32 %v5230_v0, %v3646_v21  ;;  %vm3653_vm3 = vweird.f32 %v5230_v0  ;;  %v5232_v16 = vpop.eup %5231 }
0x118c   :  { %vm3654_vm5 = vmor %vm3652_vm4, %vm3653_vm3 }
0x118d   :  { %v3649_v5 = vsub.f32 1.0, %v3648_v28 }
0x118f   :  { %v3650_v18 = vmul.f32 %v5230_v0, %v3649_v5 }
0x1191   :  { %v3651_v62 = vadd.f32 %v5230_v0, %v3650_v18  ;;  %v8321_v22 = vpop.f32.mrf.mxu2 }
0x1193   :  { %v3655_v32 = vsel %vm3654_vm5, %v5230_v0, %v3651_v62  ;;  %v8342_v62 = vld [vmem:[#allocation14 + $0x38] sm:$0xff] }
0x1194   :  { %v3660_v17 = vsel %vm3657_vm6, %v3659_v34, %v3655_v32  ;;  %v8350_v32 = vld [vmem:[#allocation14 + $0x28] sm:$0xff] }
0x1195   :  { %v3679_v36 = vsub.f32 1.0, %v3660_v17  ;;  %v3681_v33 = vmul.f32 %v5232_v16, %v3660_v17  ;;  %v8354_v16 = vld [vmem:[#allocation14 + $0x20] sm:$0xff]  ;;  %v8358_v17 = vld [vmem:[#allocation14 + $0x18] sm:$0xff] }
0x1197   :  { %v3680_v50 = vmul.f32 %v3679_v36, %v8169_v25  ;;  %v8362_v36 = vld [vmem:[#allocation14 + $0x10] sm:$0xff] }
0x1199   :  { %v3682_v28 = vadd.f32 %v3681_v33, %v3680_v50  ;;  %v3803_v21 = vpop.f32.mrf.mxu2  ;;  %v8366_v33 = vld [vmem:[#allocation14 + $0x8] sm:$0xff]  ;;  %v9619_v50 = vld [vmem:[#allocation64_spill] sm:$0xff] }
0x119b   :  { %v8331_v5 = vsel %vm8324_vm7, %v3682_v28, %v8165_v2  ;;  %v3683_v0 = vpack.c.bf16 %v3682_v28, %v3682_v28  ;;  %v8346_v2 = vld [vmem:[#allocation14 + $0x30] sm:$0xff] }
0x119c   :  { %v8335_v18 = vmul.f32 %v9618_v14, %v8331_v5 }
0x119d   :  { %3692 = vmatmul.bf16.vlgmr.msra.gmra.mxu3 %v3683_v0 }
0x119e   :  { %v3777_v25 = vpack.c.bf16 %v8335_v18, %v8335_v18  ;;  %3897 = vmatpush.bf16.msra.mxu3 %v8173_v48 }
0x11a0   :  { %3787 = vmatmul.bf16.vlgmr.msrb.gmra.mxu1 %v3777_v25 }
0x11a1   :  { %v8340_v4 = vpop.f32.mrf.mxu2  ;;  %3932 = vmatpush.bf16.msrb.mxu1 %v8342_v62 }
0x11a2   :  { %3898 = vmatpush.bf16.msra.mxu3 %v8177_v51 }
0x11a5   :  { %3933 = vmatpush.bf16.msrb.mxu1 %v8346_v2 }
0x11a6   :  { %3899 = vmatpush.bf16.msra.mxu3 %v8181_v11 }
0x11a9   :  { %v3855_v34 = vpop.f32.mrf.mxu2  ;;  %3934 = vmatpush.bf16.msrb.mxu1 %v8350_v32 }
0x11aa   :  { %3900 = vmatpush.bf16.msra.mxu3 %v8187_v63 }
0x11ad   :  { %3813 = vmatmul.bf16.vlgmr.msrb.gmra.mxu3 %v3777_v25  ;;  %3935 = vmatpush.bf16.msrb.mxu1 %v8354_v16 }
0x11ae   :  { %3901 = vmatpush.bf16.msra.mxu3 %v8191_v57 }
0x11b0   :  { %3839 = vmatmul.bf16.vlgmr.msra.gmra.mxu1 %v3777_v25  ;;  %v8394_v25 = vld [vmem:[%s8686_s8] ss:$0 sm:$0xff] }
0x11b1   :  { %3936 = vmatpush.bf16.msrb.mxu1 %v8358_v17 }
0x11b2   :  { %3902 = vmatpush.bf16.msra.mxu3 %v8195_v1 }
0x11b5   :  { %3937 = vmatpush.bf16.msrb.mxu1 %v8362_v36 }
0x11b6   :  { %3903 = vmatpush.bf16.msra.mxu3 %v8199_v27 }
0x11b9   :  { %3938 = vmatpush.bf16.msrb.mxu1 %v8366_v33 }
0x11ba   :  { %3904 = vmatpush.bf16.msra.mxu3 %v8203_v43 }
0x11bd   :  { %3939 = vmatpush.bf16.msrb.mxu1 %v8371_v20 }
0x11be   :  { %4025 = vmatpush.bf16.msrb.mxu3 %v9388_v39 }
0x11c1   :  { %4051 = vmatpush.bf16.msra.mxu1 %v9544_v24 }
0x11c2   :  { %4026 = vmatpush.bf16.msrb.mxu3 %v9545_v42 }
0x11c5   :  { %4052 = vmatpush.bf16.msra.mxu1 %v9546_v26 }
0x11c6   :  { %4027 = vmatpush.bf16.msrb.mxu3 %v9547_v23 }
0x11c9   :  { %4053 = vmatpush.bf16.msra.mxu1 %v9548_v31 }
0x11ca   :  { %4028 = vmatpush.bf16.msrb.mxu3 %v9549_v52 }
0x11cd   :  { %4054 = vmatpush.bf16.msra.mxu1 %v9550_v56 }
0x11ce   :  { %4029 = vmatpush.bf16.msrb.mxu3 %v9551_v7 }
0x11d1   :  { %4055 = vmatpush.bf16.msra.mxu1 %v9552_v55  ;;  %v9621_v55 = vld [vmem:[#allocation101_spill] sm:$0xff] }
0x11d2   :  { %4030 = vmatpush.bf16.msrb.mxu3 %v9553_v6 }
0x11d5   :  { %4056 = vmatpush.bf16.msra.mxu1 %v9554_v37 }
0x11d6   :  { %4031 = vmatpush.bf16.msrb.mxu3 %v9555_v38 }
0x11d9   :  { %4057 = vmatpush.bf16.msra.mxu1 %v9556_v53 }
0x11da   :  { %4032 = vmatpush.bf16.msrb.mxu3 %v9588_v8 }
0x11dd   :  { %4058 = vmatpush.bf16.msra.mxu1 %v9619_v50 }
0x121d   :  { %v3788_v28 = vpop.f32.mrf.mxu1 }
0x121e   :  { %v3789_v21 = vadd.f32 %v3788_v28, %v5967_v41 }
0x1220   :  { %v3802_v0 = vadd.f32 %v8321_v22, %v3789_v21  ;;  %v3693_v14 = vpop.f32.mrf.mxu3  ;;  %v9620_v22 = vld [vmem:[#allocation95_spill] sm:$0xff] }
0x1221   :  { %v3694_v34 = vadd.f32 %v8394_v25, %v3693_v14 }
0x1222   :  { %v4918_v38 = vmul.f32 -1.442695, %v3802_v0 }
0x1223   :  { %v3697_v37 = vmax.f32 %v3694_v34, 0.0 }
0x1224   :  { %5233 = vpow2.f32 %v4918_v38  ;;  %v9622_v38 = vld [vmem:[#allocation98_spill] sm:$0xff] }
0x1225   :  { %v3698_v53 = vpack.c.bf16 %v3697_v37, %v3697_v37  ;;  %v3790_v8 = vpop.f32.mrf.mxu1 }
0x1227   :  { %3707 = vmatmul.bf16.vlgmr.msrb.gmra.mxu0 %v3698_v53 }
0x1228   :  { %v3695_v50 = vpop.f32.mrf.mxu3  ;;  %3917 = vmatpush.bf16.msrb.mxu0 %v8225_v13 }
0x122a   :  { %v5234_v28 = vpop.eup %5233 }
0x122b   :  { %v3860_v41 = vadd.f32 1.0, %v5234_v28 }
0x122c   :  { %3918 = vmatpush.bf16.msrb.mxu0 %v9620_v22 }
0x122d   :  { %5235 = vrcp.f32 %v3860_v41  ;;  %v8399_v21 = vpop.f32.mrf.mxu1  ;;  %v3872_v8 = vand.u32 2147483648, %v3860_v41  ;;  %v3870_v28 = vand.u32 2147483647, %v3860_v41  ;;  %vm3866_vm9 = vweird.f32 %v3860_v41 }
0x122f   :  { %vm3871_vm11 = vcmp.eq.f32.partialorder %v3870_v28, 8.507059e+37  ;;  %v9632_v28 = vld [vmem:[#allocation54_spill] sm:$0xff] }
0x1230   :  { %v8401_v6 = vpop.f32.mrf.mxu3  ;;  %3919 = vmatpush.bf16.msrb.mxu0 %v9621_v55  ;;  %v3873_v55 = vor.u32 1.1754944e-38, %v3872_v8  ;;  %v9629_v8 = vld [vmem:[#allocation50_spill] sm:$0xff] }
0x1233   :  { %v5236_v0 = vpop.eup %5235 }
0x1234   :  { %v3862_v14 = vmul.f32 %v5236_v0, %v3860_v41  ;;  %3920 = vmatpush.bf16.msrb.mxu0 %v9622_v38  ;;  %vm3867_vm8 = vweird.f32 %v5236_v0  ;;  %v8418_v41 = vld [vmem:[#allocation8 + $0x70] sm:$0xff] }
0x1235   :  { %v3842_v37 = vpop.f32.mrf.mxu1  ;;  %vm3868_vm10 = vmor %vm3866_vm9, %vm3867_vm8  ;;  %9623 = vst [vmem:[#allocation26_spill] sm:$0xff] %v8418_v41 }
0x1236   :  { %v3863_v53 = vsub.f32 1.0, %v3862_v14 }
0x1237   :  { %4914 = vmatmul.msk.bf16.vlgmr.msra.gmra.mxu0 %vm5900_vm2, %v8269_v15 }
0x1238   :  { %v3864_v50 = vmul.f32 %v5236_v0, %v3863_v53  ;;  %v3816_v34 = vpop.f32.mrf.mxu3  ;;  %3921 = vmatpush.bf16.msrb.mxu0 %v8244_v47  ;;  %v9628_v53 = vld [vmem:[#allocation68_spill] sm:$0xff] }
0x1239   :  { %v9631_v34 = vld [vmem:[#allocation28_spill] sm:$0xff] }
0x123a   :  { %v3865_v22 = vadd.f32 %v5236_v0, %v3864_v50  ;;  %v9630_v50 = vld [vmem:[#allocation69_spill] sm:$0xff] }
0x123c   :  { %v3869_v13 = vsel %vm3868_vm10, %v5236_v0, %v3865_v22  ;;  %3922 = vmatpush.bf16.msrb.mxu0 %v8247_v60  ;;  %v9625_v22 = vld [vmem:[#allocation41_spill] sm:$0xff]  ;;  %v9626_v0 = vld [vmem:[#allocation67_spill] sm:$0xff] }
0x123d   :  { %v3874_v14 = vsel %vm3871_vm11, %v3873_v55, %v3869_v13  ;;  %v9624_v55 = vld [vmem:[#allocation83_spill] sm:$0xff] }
0x123e   :  { %v3895_v37 = vmul.f32 %v3874_v14, %v8335_v18  ;;  %v4008_v13 = vsel %vm140_vm0, %v9624_v55, %v8418_v41  ;;  %v9633_v14 = vld [vmem:[#allocation29_spill] sm:$0xff]  ;;  %v9637_v41 = vld [vmem:[#allocation40_spill] sm:$0xff] }
0x123f   :  { %v8425_v15 = vpack.c.bf16 %v4008_v13, %v4008_v13  ;;  %v9635_v55 = vld [vmem:[#allocation33_spill] sm:$0xff]  ;;  %v9636_v13 = vld [vmem:[#allocation36_spill] sm:$0xff] }
0x1240   :  { %v3896_v38 = vpack.c.bf16 %v3895_v37, %v3895_v37  ;;  %3923 = vmatpush.bf16.msrb.mxu0 %v8251_v3  ;;  %v9634_v37 = vld [vmem:[#allocation30_spill] sm:$0xff] }
0x1242   :  { %3905 = vmatmul.bf16.vlgmr.msra.gmra.mxu3 %v3896_v38  ;;  %v9627_v38 = vld [vmem:[#allocation45_spill] sm:$0xff] }
0x1243   :  { %4077 = vmatpush.bf16.msra.mxu3 %v5844_v9 }
0x1244   :  { %3924 = vmatpush.bf16.msrb.mxu0 %v8255_v49 }
0x1247   :  { %4078 = vmatpush.bf16.msra.mxu3 %v5855_v30 }
0x1248   :  { %4038 = vmatpush.bf16.msra.mxu0 %v5739_v44 }
0x124b   :  { %4079 = vmatpush.bf16.msra.mxu3 %v5863_v46 }
0x124c   :  { %4039 = vmatpush.bf16.msra.mxu0 %v5748_v54 }
0x124f   :  { %4080 = vmatpush.bf16.msra.mxu3 %v5882_v45 }
0x1250   :  { %4040 = vmatpush.bf16.msra.mxu0 %v5760_v10 }
0x1252   :  { %4923 = vmatmul.msk.bf16.vlgmr.msrb.gmra.mxu3 %vm5900_vm2, %v8425_v15 }
0x1253   :  { %4081 = vmatpush.bf16.msra.mxu3 %v5886_v59  ;;  %v9643_v59 = vld [vmem:[#allocation59_spill] sm:$0xff] }
0x1254   :  { %4041 = vmatpush.bf16.msra.mxu0 %v9067_v35 }
0x1257   :  { %4082 = vmatpush.bf16.msra.mxu3 %v9626_v0  ;;  %v9641_v0 = vld [vmem:[#allocation53_spill] sm:$0xff] }
0x1258   :  { %4042 = vmatpush.bf16.msra.mxu0 %v9625_v22 }
0x125b   :  { %4083 = vmatpush.bf16.msra.mxu3 %v9628_v53  ;;  %v9638_v53 = vld [vmem:[#allocation44_spill] sm:$0xff] }
0x125c   :  { %4043 = vmatpush.bf16.msra.mxu0 %v9627_v38 }
0x125f   :  { %4084 = vmatpush.bf16.msra.mxu3 %v9630_v50  ;;  %v9639_v50 = vld [vmem:[#allocation48_spill] sm:$0xff] }
0x1260   :  { %4044 = vmatpush.bf16.msra.mxu0 %v9629_v8 }
0x1262   :  { %4929 = vmatmul.msk.bf16.vlgmr.msra.gmra.mxu3 %vm5900_vm2, %v8425_v15 }
0x1263   :  { %4245 = vmatpush.bf16.msrb.mxu3 %v9631_v34  ;;  %v9640_v34 = vld [vmem:[#allocation49_spill] sm:$0xff] }
0x1264   :  { %4045 = vmatpush.bf16.msra.mxu0 %v9632_v28  ;;  %v9642_v28 = vld [vmem:[#allocation57_spill] sm:$0xff] }
0x1267   :  { %4246 = vmatpush.bf16.msrb.mxu3 %v9633_v14  ;;  %v9644_v14 = vld [vmem:[#allocation60_spill] sm:$0xff] }
0x126b   :  { %4247 = vmatpush.bf16.msrb.mxu3 %v9634_v37  ;;  %v9645_v37 = vld [vmem:[#allocation61_spill] sm:$0xff] }
0x126f   :  { %4248 = vmatpush.bf16.msrb.mxu3 %v9635_v55  ;;  %v9646_v55 = vld [vmem:[#allocation62_spill] sm:$0xff] }
0x1273   :  { %4249 = vmatpush.bf16.msrb.mxu3 %v9636_v13  ;;  %v9647_v13 = vld [vmem:[#allocation63_spill] sm:$0xff] }
0x1277   :  { %4250 = vmatpush.bf16.msrb.mxu3 %v9637_v41 }
0x127b   :  { %4251 = vmatpush.bf16.msrb.mxu3 %v9638_v53  ;;  %v9648_v53 = vld [vmem:[#allocation94_spill] sm:$0xff] }
0x127f   :  { %4252 = vmatpush.bf16.msrb.mxu3 %v9639_v50 }
0x1283   :  { %4297 = vmatpush.bf16.msra.mxu3 %v9640_v34 }
0x1287   :  { %4298 = vmatpush.bf16.msra.mxu3 %v9641_v0  ;;  %v9649_v0 = vld [vmem:[#allocation89_spill] sm:$0xff] }
0x128b   :  { %4299 = vmatpush.bf16.msra.mxu3 %v9642_v28 }
0x128f   :  { %4300 = vmatpush.bf16.msra.mxu3 %v9643_v59  ;;  %v3725_v59 = vpop.permute.xlu2 %3724 }
0x1293   :  { %4301 = vmatpush.bf16.msra.mxu3 %v9644_v14 }
0x1297   :  { %4302 = vmatpush.bf16.msra.mxu3 %v9645_v37 }
0x129b   :  { %4303 = vmatpush.bf16.msra.mxu3 %v9646_v55  ;;  %v3815_v55 = vadd.f32 %v8401_v6, %v9583_v40 }
0x129f   :  { %4304 = vmatpush.bf16.msra.mxu3 %v9647_v13 }
0x12a4   :  { %v3708_v41 = vpop.f32.mrf.mxu0 }
0x12a5   :  { %v3709_v8 = vadd.f32 %v9648_v53, %v3708_v41 }
0x12a7   :  { %v8462_v50 = vsel %vm8324_vm7, %v3709_v8, %v8306_v58 }
0x12a8   :  { %v3721_v28 = vsub.f32 %v9649_v0, %v8462_v50  ;;  %v3841_v0 = vadd.f32 %v8399_v21, %v9615_v29 }
0x12aa   :  { %v3722_v34 = vand.u32 2147483647, %v3721_v28 }
0x12ac   :  { %v3727_v14 = vmul.f32 %v3725_v59, %v3722_v34  ;;  %v3710_v45 = vpop.f32.mrf.mxu0 }
0x12ad   :  { %v3854_v45 = vadd.f32 %v8340_v4, %v3841_v0 }
0x12ae   :  { %v8467_v37 = vadd.f32 %v3727_v14, %v8311_v19 }
0x12b4   :  { %v3827_v13 = vpop.f32.mrf.mxu0 }
0x12b5   :  { %v3828_v41 = vadd.f32 %v3827_v13, %v3815_v55 }
0x12b7   :  { %v4919_v53 = vmul.f32 -1.442695, %v3828_v41 }
0x12b9   :  { %5237 = vpow2.f32 %v4919_v53 }
0x12bc   :  { %v3829_v12 = vpop.f32.mrf.mxu0 }
0x12bf   :  { %v5238_v58 = vpop.eup %5237 }
0x12c0   :  { %v3879_v8 = vadd.f32 1.0, %v5238_v58 }
0x12c2   :  { %5239 = vrcp.f32 %v3879_v8  ;;  %v3891_v6 = vand.u32 2147483648, %v3879_v8  ;;  %v3889_v55 = vand.u32 2147483647, %v3879_v8  ;;  %vm3885_vm13 = vweird.f32 %v3879_v8 }
0x12c4   :  { %v3892_v21 = vor.u32 1.1754944e-38, %v3891_v6  ;;  %vm3890_vm15 = vcmp.eq.f32.partialorder %v3889_v55, 8.507059e+37  ;;  %v9652_v6 = vld [vmem:[#allocation100_spill] sm:$0xff] }
0x12c5   :  { %v3906_v28 = vpop.f32.mrf.mxu3 }
0x12c6   :  { %v3910_v19 = vadd.f32 %v3906_v28, %v3854_v45  ;;  %v3948_v45 = vstv %s3947_s4 }
0x12c7   :  { %vm8478_vm1 = vcmp.eq.s32.totalorder %v3948_v45, 1 }
0x12c8   :  { %v5240_v59 = vpop.eup %5239  ;;  %5241 = vtanh.f32 %v3910_v19 }
0x12c9   :  { %v3881_v34 = vmul.f32 %v5240_v59, %v3879_v8  ;;  %vm3886_vm12 = vweird.f32 %v5240_v59 }
0x12ca   :  { %vm3887_vm14 = vmor %vm3885_vm13, %vm3886_vm12 }
0x12cb   :  { %v3882_v14 = vsub.f32 1.0, %v3881_v34 }
0x12cd   :  { %v3883_v53 = vmul.f32 %v5240_v59, %v3882_v14  ;;  %v3908_v13 = vpop.f32.mrf.mxu3 }
0x12ce   :  { %v5242_v12 = vpop.eup %5241 }
0x12cf   :  { %v3884_v41 = vadd.f32 %v5240_v59, %v3883_v53 }
0x12d1   :  { %v3888_v4 = vsel %vm3887_vm14, %v5240_v59, %v3884_v41  ;;  %v9653_v41 = vld [vmem:[#allocation52_spill] sm:$0xff] }
0x12d2   :  { %v3893_v58 = vsel %vm3890_vm15, %v3892_v21, %v3888_v4  ;;  %v9655_v21 = vld [vmem:[#allocation55_spill] sm:$0xff] }
0x12d3   :  { %v3912_v0 = vsub.f32 1.0, %v3893_v58  ;;  %v3914_v28 = vmul.f32 %v5242_v12, %v3893_v58  ;;  %v9660_v12 = vld [vmem:[#allocation88_spill] sm:$0xff] }
0x12d5   :  { %v3913_v34 = vmul.f32 %v3912_v0, %v8335_v18  ;;  %v4034_v29 = vpop.f32.mrf.mxu3  ;;  %v9661_v0 = vld [vmem:[#allocation77_spill] sm:$0xff] }
0x12d7   :  { %v3915_v14 = vadd.f32 %v3914_v28, %v3913_v34  ;;  %v9662_v34 = vld [vmem:[#allocation95_spill] sm:$0xff] }
0x12d9   :  { %v8485_v8 = vsel %vm8478_vm1, %v3915_v14, %v8331_v5  ;;  %v3916_v59 = vpack.c.bf16 %v3915_v14, %v3915_v14 }
0x12da   :  { %v8489_v53 = vmul.f32 %v9652_v6, %v8485_v8  ;;  %v9663_v6 = vld [vmem:[#allocation101_spill] sm:$0xff] }
0x12db   :  { %3925 = vmatmul.bf16.vlgmr.msrb.gmra.mxu0 %v3916_v59 }
0x12dc   :  { %v4010_v18 = vpack.c.bf16 %v8489_v53, %v8489_v53  ;;  %4130 = vmatpush.bf16.msrb.mxu0 %v8173_v48 }
0x12dd   :  { %v4036_v55 = vpop.f32.mrf.mxu3 }
0x12de   :  { %4020 = vmatmul.bf16.vlgmr.msrb.gmra.mxu2 %v4010_v18  ;;  %v9664_v55 = vld [vmem:[#allocation98_spill] sm:$0xff] }
0x12df   :  { %4165 = vmatpush.bf16.msrb.mxu2 %v8342_v62 }
0x12e0   :  { %4131 = vmatpush.bf16.msrb.mxu0 %v8177_v51 }
0x12e3   :  { %4166 = vmatpush.bf16.msrb.mxu2 %v8346_v2 }
0x12e4   :  { %4132 = vmatpush.bf16.msrb.mxu0 %v8181_v11 }
0x12e5   :  { %v8498_v5 = vpop.f32.mrf.mxu3 }
0x12e7   :  { %4167 = vmatpush.bf16.msrb.mxu2 %v8350_v32 }
0x12e8   :  { %4133 = vmatpush.bf16.msrb.mxu0 %v8187_v63 }
0x12eb   :  { %4046 = vmatmul.bf16.vlgmr.msra.gmra.mxu0 %v4010_v18  ;;  %4168 = vmatpush.bf16.msrb.mxu2 %v8354_v16 }
0x12ec   :  { %4134 = vmatpush.bf16.msrb.mxu0 %v8191_v57 }
0x12ed   :  { %v4088_v13 = vpop.f32.mrf.mxu3 }
0x12ee   :  { %4072 = vmatmul.bf16.vlgmr.msra.gmra.mxu2 %v4010_v18 }
0x12ef   :  { %4169 = vmatpush.bf16.msrb.mxu2 %v8358_v17 }
0x12f0   :  { %4135 = vmatpush.bf16.msrb.mxu0 %v8195_v1 }
0x12f3   :  { %4170 = vmatpush.bf16.msrb.mxu2 %v8362_v36 }
0x12f4   :  { %4136 = vmatpush.bf16.msrb.mxu0 %v8199_v27 }
0x12f7   :  { %4171 = vmatpush.bf16.msrb.mxu2 %v8366_v33 }
0x12f8   :  { %4137 = vmatpush.bf16.msrb.mxu0 %v8203_v43 }
0x12fb   :  { %4172 = vmatpush.bf16.msrb.mxu2 %v8371_v20 }
0x12fc   :  { %4258 = vmatpush.bf16.msra.mxu0 %v9388_v39  ;;  %v9654_v39 = vld [vmem:[#allocation46_spill] sm:$0xff] }
0x12ff   :  { %4284 = vmatpush.bf16.msra.mxu2 %v9544_v24  ;;  %v9656_v24 = vld [vmem:[#allocation51_spill] sm:$0xff] }
0x1300   :  { %4259 = vmatpush.bf16.msra.mxu0 %v9545_v42  ;;  %v9657_v42 = vld [vmem:[#allocation58_spill] sm:$0xff] }
0x1303   :  { %4285 = vmatpush.bf16.msra.mxu2 %v9546_v26  ;;  %v9658_v26 = vld [vmem:[#allocation56_spill] sm:$0xff] }
0x1304   :  { %4260 = vmatpush.bf16.msra.mxu0 %v9547_v23  ;;  %v9659_v23 = vld [vmem:[#allocation64_spill] sm:$0xff] }
0x1307   :  { %4286 = vmatpush.bf16.msra.mxu2 %v9548_v31 }
0x1308   :  { %4261 = vmatpush.bf16.msra.mxu0 %v9549_v52 }
0x130b   :  { %4287 = vmatpush.bf16.msra.mxu2 %v9550_v56 }
0x130c   :  { %4262 = vmatpush.bf16.msra.mxu0 %v9551_v7 }
0x130f   :  { %4288 = vmatpush.bf16.msra.mxu2 %v9653_v41 }
0x1310   :  { %4263 = vmatpush.bf16.msra.mxu0 %v9654_v39 }
0x1313   :  { %4289 = vmatpush.bf16.msra.mxu2 %v9655_v21 }
0x1314   :  { %4264 = vmatpush.bf16.msra.mxu0 %v9656_v24 }
0x1317   :  { %4290 = vmatpush.bf16.msra.mxu2 %v9657_v42 }
0x1318   :  { %4265 = vmatpush.bf16.msra.mxu0 %v9658_v26 }
0x131b   :  { %4291 = vmatpush.bf16.msra.mxu2 %v9659_v23 }
0x1358   :  { %v3926_v31 = vpop.f32.mrf.mxu0 }
0x1359   :  { %v3927_v52 = vadd.f32 %v8394_v25, %v3926_v31 }
0x135b   :  { %v3930_v56 = vmax.f32 %v3927_v52, 0.0 }
0x135d   :  { %v3931_v4 = vpack.c.bf16 %v3930_v56, %v3930_v56 }
0x135f   :  { %3940 = vmatmul.bf16.vlgmr.msrb.gmra.mxu1 %v3931_v4 }
0x1360   :  { %v3928_v7 = vpop.f32.mrf.mxu0  ;;  %4150 = vmatpush.bf16.msrb.mxu1 %v9660_v12 }
0x1361   :  { %v4021_v58 = vpop.f32.mrf.mxu2 }
0x1362   :  { %v4022_v28 = vadd.f32 %v4021_v58, %v9661_v0 }
0x1364   :  { %v4035_v45 = vadd.f32 %v4034_v29, %v4022_v28  ;;  %4151 = vmatpush.bf16.msrb.mxu1 %v9662_v34 }
0x1366   :  { %v4930_v14 = vmul.f32 -1.442695, %v4035_v45 }
0x1368   :  { %5243 = vpow2.f32 %v4930_v14  ;;  %v4047_v59 = vpop.f32.mrf.mxu0  ;;  %4152 = vmatpush.bf16.msrb.mxu1 %v9663_v6 }
0x1369   :  { %v4023_v18 = vpop.f32.mrf.mxu2 }
0x136a   :  { %v9672_v18 = vld [vmem:[#allocation69_spill] sm:$0xff] }
0x136c   :  { %4153 = vmatpush.bf16.msrb.mxu1 %v9664_v55 }
0x136e   :  { %v5244_v13 = vpop.eup %5243 }
0x136f   :  { %v4093_v41 = vadd.f32 1.0, %v5244_v13  ;;  %4926 = vmatmul.msk.bf16.vlgmr.msra.gmra.mxu1 %vm5900_vm2, %v8425_v15  ;;  %v9673_v13 = vld [vmem:[#allocation94_spill] sm:$0xff] }
0x1370   :  { %v4049_v39 = vpop.f32.mrf.mxu0  ;;  %4154 = vmatpush.bf16.msrb.mxu1 %v8244_v47 }
0x1371   :  { %5245 = vrcp.f32 %v4093_v41  ;;  %v4073_v29 = vpop.f32.mrf.mxu2  ;;  %v4105_v23 = vand.u32 2147483648, %v4093_v41  ;;  %v4103_v52 = vand.u32 2147483647, %v4093_v41  ;;  %vm4099_vm4 = vweird.f32 %v4093_v41 }
0x1373   :  { %v4106_v56 = vor.u32 1.1754944e-38, %v4105_v23  ;;  %vm4104_vm6 = vcmp.eq.f32.partialorder %v4103_v52, 8.507059e+37 }
0x1374   :  { %4155 = vmatpush.bf16.msrb.mxu1 %v8247_v60 }
0x1377   :  { %v5246_v21 = vpop.eup %5245 }
0x1378   :  { %v4095_v24 = vmul.f32 %v5246_v21, %v4093_v41  ;;  %4156 = vmatpush.bf16.msrb.mxu1 %v8251_v3  ;;  %vm4100_vm3 = vweird.f32 %v5246_v21 }
0x1379   :  { %v4075_v42 = vpop.f32.mrf.mxu2  ;;  %vm4101_vm5 = vmor %vm4099_vm4, %vm4100_vm3 }
0x137a   :  { %v4096_v26 = vsub.f32 1.0, %v4095_v24  ;;  %v3958_v42 = vpop.permute.xlu0 %3957 }
0x137c   :  { %v4097_v31 = vmul.f32 %v5246_v21, %v4096_v26  ;;  %4157 = vmatpush.bf16.msrb.mxu1 %v8255_v49 }
0x137e   :  { %v4098_v15 = vadd.f32 %v5246_v21, %v4097_v31 }
0x1380   :  { %4271 = vmatpush.bf16.msra.mxu1 %v5739_v44  ;;  %v4102_v4 = vsel %vm4101_vm5, %v5246_v21, %v4098_v15  ;;  %v8549_v44 = vld [vmem:[#allocation8 + $0x78] sm:$0xff]  ;;  %v9674_v21 = vld [vmem:[#allocation26_spill] sm:$0xff]  ;;  %v4048_v15 = vadd.f32 %v4047_v59, %v9583_v40 }
0x1381   :  { %v4107_v7 = vsel %vm4104_vm6, %v4106_v56, %v4102_v4 }
0x1382   :  { %v4128_v58 = vmul.f32 %v4107_v7, %v8489_v53 }
0x1384   :  { %4272 = vmatpush.bf16.msra.mxu1 %v5748_v54  ;;  %v4129_v28 = vpack.c.bf16 %v4128_v58, %v4128_v58  ;;  %v9665_v54 = vld [vmem:[#allocation99_spill] sm:$0xff] }
0x1385   :  { %v4241_v45 = vsel %vm140_vm0, %v9665_v54, %v8549_v44 }
0x1386   :  { %4138 = vmatmul.bf16.vlgmr.msrb.gmra.mxu0 %v4129_v28  ;;  %v8556_v14 = vpack.c.bf16 %v4241_v45, %v4241_v45  ;;  %v9675_v28 = vld [vmem:[#allocation80_spill] sm:$0xff] }
0x1387   :  { %4310 = vmatpush.bf16.msrb.mxu0 %v5844_v9  ;;  %v9667_v9 = vld [vmem:[#allocation50_spill] sm:$0xff]  ;;  %v4074_v54 = vadd.f32 %v4073_v29, %v9675_v28 }
0x1388   :  { %4273 = vmatpush.bf16.msra.mxu1 %v5760_v10  ;;  %v9666_v10 = vld [vmem:[#allocation65_spill] sm:$0xff] }
0x138b   :  { %4311 = vmatpush.bf16.msrb.mxu0 %v5855_v30  ;;  %v9668_v30 = vld [vmem:[#allocation66_spill] sm:$0xff] }
0x138c   :  { %4274 = vmatpush.bf16.msra.mxu1 %v9067_v35  ;;  %v9670_v35 = vld [vmem:[#allocation67_spill] sm:$0xff] }
0x138f   :  { %4312 = vmatpush.bf16.msrb.mxu0 %v5863_v46  ;;  %v9669_v46 = vld [vmem:[#allocation54_spill] sm:$0xff] }
0x1390   :  { %4275 = vmatpush.bf16.msra.mxu1 %v9625_v22  ;;  %v9671_v22 = vld [vmem:[#allocation68_spill] sm:$0xff] }
0x1393   :  { %4313 = vmatpush.bf16.msrb.mxu0 %v9666_v10 }
0x1394   :  { %4276 = vmatpush.bf16.msra.mxu1 %v9627_v38 }
0x1396   :  { %4935 = vmatmul.msk.bf16.vlgmr.msra.gmra.mxu0 %vm5900_vm2, %v8556_v14 }
0x1397   :  { %4314 = vmatpush.bf16.msrb.mxu0 %v9668_v30 }
0x1398   :  { %4277 = vmatpush.bf16.msra.mxu1 %v9667_v9  ;;  %v4087_v9 = vadd.f32 %v8498_v5, %v4074_v54 }
0x139b   :  { %4315 = vmatpush.bf16.msrb.mxu0 %v9670_v35 }
0x139c   :  { %4278 = vmatpush.bf16.msra.mxu1 %v9669_v46 }
0x139f   :  { %4316 = vmatpush.bf16.msrb.mxu0 %v9671_v22 }
0x13a3   :  { %4317 = vmatpush.bf16.msrb.mxu0 %v9672_v18 }
0x13a6   :  { %4941 = vmatmul.msk.bf16.vlgmr.msrb.gmra.mxu0 %vm5900_vm2, %v8556_v14 }
0x13dc   :  { %v3941_v38 = vpop.f32.mrf.mxu1 }
0x13dd   :  { %v3942_v41 = vadd.f32 %v9673_v13, %v3941_v38 }
0x13df   :  { %v8574_v39 = vsel %vm8478_vm1, %v3942_v41, %v8462_v50  ;;  %v4181_v41 = vstv %s4180_s26 }
0x13e0   :  { %v3954_v24 = vsub.f32 %v9674_v21, %v8574_v39  ;;  %vm8588_vm11 = vcmp.eq.s32.totalorder %v4181_v41, 1 }
0x13e2   :  { %v3955_v26 = vand.u32 2147483647, %v3954_v24 }
0x13e4   :  { %v3960_v23 = vmul.f32 %v3958_v42, %v3955_v26  ;;  %v3943_v31 = vpop.f32.mrf.mxu1 }
0x13e6   :  { %v8579_v52 = vadd.f32 %v3960_v23, %v8467_v37 }
0x13ec   :  { %v4060_v56 = vpop.f32.mrf.mxu1 }
0x13ed   :  { %v4061_v4 = vadd.f32 %v4060_v56, %v4048_v15 }
0x13ef   :  { %v4931_v7 = vmul.f32 -1.442695, %v4061_v4  ;;  %v9678_v4 = vld [vmem:[#allocation25_spill] sm:$0xff] }
0x13f1   :  { %5247 = vpow2.f32 %v4931_v7 }
0x13f4   :  { %v4062_v58 = vpop.f32.mrf.mxu1 }
0x13f7   :  { %v5248_v19 = vpop.eup %5247 }
0x13f8   :  { %v4112_v50 = vadd.f32 1.0, %v5248_v19 }
0x13fa   :  { %5249 = vrcp.f32 %v4112_v50  ;;  %v4124_v37 = vand.u32 2147483648, %v4112_v50  ;;  %v4122_v22 = vand.u32 2147483647, %v4112_v50  ;;  %vm4118_vm8 = vweird.f32 %v4112_v50 }
0x13fc   :  { %v4125_v29 = vor.u32 1.1754944e-38, %v4124_v37  ;;  %vm4123_vm10 = vcmp.eq.f32.partialorder %v4122_v22, 8.507059e+37  ;;  %v4191_v37 = vpop.permute.xlu1 %4190 }
0x1400   :  { %v5250_v45 = vpop.eup %5249 }
0x1401   :  { %v4114_v10 = vmul.f32 %v5250_v45, %v4112_v50  ;;  %vm4119_vm7 = vweird.f32 %v5250_v45 }
0x1402   :  { %vm4120_vm9 = vmor %vm4118_vm8, %vm4119_vm7 }
0x1403   :  { %v4115_v30 = vsub.f32 1.0, %v4114_v10  ;;  %v4139_v46 = vpop.f32.mrf.mxu0 }
0x1404   :  { %v4143_v59 = vadd.f32 %v4139_v46, %v4087_v9  ;;  %v8638_v9 = vld [vmem:[%s8688_s10] ss:$0 sm:$0xff] }
0x1405   :  { %v4116_v35 = vmul.f32 %v5250_v45, %v4115_v30 }
0x1406   :  { %5251 = vtanh.f32 %v4143_v59 }
0x1407   :  { %v4117_v18 = vadd.f32 %v5250_v45, %v4116_v35 }
0x1409   :  { %v4121_v38 = vsel %vm4120_vm9, %v5250_v45, %v4117_v18 }
0x140a   :  { %v4126_v5 = vsel %vm4123_vm10, %v4125_v29, %v4121_v38 }
0x140b   :  { %v4145_v13 = vsub.f32 1.0, %v4126_v5  ;;  %v4141_v21 = vpop.f32.mrf.mxu0 }
0x140c   :  { %v5252_v24 = vpop.eup %5251 }
0x140d   :  { %v4146_v42 = vmul.f32 %v4145_v13, %v8489_v53  ;;  %v4147_v26 = vmul.f32 %v5252_v24, %v4126_v5 }
0x140f   :  { %v4148_v31 = vadd.f32 %v4147_v26, %v4146_v42 }
0x1411   :  { %v8595_v15 = vsel %vm8588_vm11, %v4148_v31, %v8485_v8  ;;  %v4149_v56 = vpack.c.bf16 %v4148_v31, %v4148_v31 }
0x1412   :  { %v8599_v7 = vmul.f32 %v9678_v4, %v8595_v15 }
0x1413   :  { %4158 = vmatmul.bf16.vlgmr.msrb.gmra.mxu1 %v4149_v56  ;;  %v4267_v58 = vpop.f32.mrf.mxu0 }
0x1414   :  { %v4243_v53 = vpack.c.bf16 %v8599_v7, %v8599_v7  ;;  %4363 = vmatpush.bf16.msrb.mxu1 %v8173_v48 }
0x1416   :  { %4253 = vmatmul.bf16.vlgmr.msrb.gmra.mxu3 %v4243_v53 }
0x1417   :  { %4398 = vmatpush.bf16.msrb.mxu3 %v8342_v62 }
0x1418   :  { %4364 = vmatpush.bf16.msrb.mxu1 %v8177_v51 }
0x141b   :  { %v4269_v19 = vpop.f32.mrf.mxu0  ;;  %4399 = vmatpush.bf16.msrb.mxu3 %v8346_v2 }
0x141c   :  { %4365 = vmatpush.bf16.msrb.mxu1 %v8181_v11 }
0x141f   :  { %4400 = vmatpush.bf16.msrb.mxu3 %v8350_v32 }
0x1420   :  { %4366 = vmatpush.bf16.msrb.mxu1 %v8187_v63 }
0x1423   :  { %4279 = vmatmul.bf16.vlgmr.msra.gmra.mxu1 %v4243_v53  ;;  %v8610_v8 = vpop.f32.mrf.mxu0  ;;  %4401 = vmatpush.bf16.msrb.mxu3 %v8354_v16 }
0x1424   :  { %4367 = vmatpush.bf16.msrb.mxu1 %v8191_v57 }
0x1426   :  { %4305 = vmatmul.bf16.vlgmr.msra.gmra.mxu3 %v4243_v53 }
0x1427   :  { %4402 = vmatpush.bf16.msrb.mxu3 %v8358_v17 }
0x1428   :  { %4368 = vmatpush.bf16.msrb.mxu1 %v8195_v1 }
0x142b   :  { %v4321_v48 = vpop.f32.mrf.mxu0  ;;  %4403 = vmatpush.bf16.msrb.mxu3 %v8362_v36 }
0x142c   :  { %4369 = vmatpush.bf16.msrb.mxu1 %v8199_v27 }
0x142f   :  { %4404 = vmatpush.bf16.msrb.mxu3 %v8366_v33 }
0x1430   :  { %4370 = vmatpush.bf16.msrb.mxu1 %v8203_v43 }
0x1433   :  { %4405 = vmatpush.bf16.msrb.mxu3 %v8371_v20 }
0x1490   :  { %v4159_v51 = vpop.f32.mrf.mxu1 }
0x1491   :  { %v4160_v11 = vadd.f32 %v8394_v25, %v4159_v51 }
0x1493   :  { %v4163_v63 = vmax.f32 %v4160_v11, 0.0 }
0x1495   :  { %v4164_v57 = vpack.c.bf16 %v4163_v63, %v4163_v63  ;;  %v4414_v63 = vstv %s4413_s29 }
0x1496   :  { %vm8660_vm4 = vcmp.eq.s32.totalorder %v4414_v63, 1 }
0x1497   :  { %4173 = vmatmul.bf16.vlgmr.msrb.gmra.mxu2 %v4164_v57 }
0x1498   :  { %v4161_v62 = vpop.f32.mrf.mxu1  ;;  %4383 = vmatpush.bf16.msrb.mxu2 %v9660_v12 }
0x1499   :  { %v4254_v1 = vpop.f32.mrf.mxu3 }
0x149a   :  { %v4255_v2 = vadd.f32 %v4254_v1, %v9661_v0 }
0x149c   :  { %v4268_v32 = vadd.f32 %v4267_v58, %v4255_v2  ;;  %4384 = vmatpush.bf16.msrb.mxu2 %v9662_v34 }
0x149e   :  { %v4942_v27 = vmul.f32 -1.442695, %v4268_v32 }
0x14a0   :  { %5253 = vpow2.f32 %v4942_v27  ;;  %v4280_v43 = vpop.f32.mrf.mxu1  ;;  %4385 = vmatpush.bf16.msrb.mxu2 %v9663_v6 }
0x14a1   :  { %v4256_v16 = vpop.f32.mrf.mxu3  ;;  %v4281_v29 = vadd.f32 %v4280_v43, %v9583_v40 }
0x14a4   :  { %4386 = vmatpush.bf16.msrb.mxu2 %v9664_v55 }
0x14a6   :  { %v5254_v17 = vpop.eup %5253 }
0x14a7   :  { %v4326_v36 = vadd.f32 1.0, %v5254_v17  ;;  %4938 = vmatmul.msk.bf16.vlgmr.msra.gmra.mxu2 %vm5900_vm2, %v8556_v14 }
0x14a8   :  { %v4282_v33 = vpop.f32.mrf.mxu1  ;;  %4387 = vmatpush.bf16.msrb.mxu2 %v8244_v47 }
0x14a9   :  { %5255 = vrcp.f32 %v4326_v36  ;;  %v4306_v20 = vpop.f32.mrf.mxu3  ;;  %v4338_v55 = vand.u32 2147483648, %v4326_v36  ;;  %v4336_v54 = vand.u32 2147483647, %v4326_v36  ;;  %vm4332_vm2 = vweird.f32 %v4326_v36 }
0x14aa   :  { %v4307_v21 = vadd.f32 %v4306_v20, %v9675_v28 }
0x14ab   :  { %v4339_v47 = vor.u32 1.1754944e-38, %v4338_v55  ;;  %vm4337_vm14 = vcmp.eq.f32.partialorder %v4336_v54, 8.507059e+37 }
0x14ac   :  { %4388 = vmatpush.bf16.msrb.mxu2 %v8247_v60 }
0x14af   :  { %v5256_v12 = vpop.eup %5255 }
0x14b0   :  { %v4328_v0 = vmul.f32 %v5256_v12, %v4326_v36  ;;  %4389 = vmatpush.bf16.msrb.mxu2 %v8251_v3  ;;  %vm4333_vm12 = vweird.f32 %v5256_v12 }
0x14b1   :  { %v4308_v34 = vpop.f32.mrf.mxu3  ;;  %vm4334_vm13 = vmor %vm4332_vm2, %vm4333_vm12 }
0x14b2   :  { %v4329_v6 = vsub.f32 1.0, %v4328_v0 }
0x14b4   :  { %v4330_v50 = vmul.f32 %v5256_v12, %v4329_v6  ;;  %4390 = vmatpush.bf16.msrb.mxu2 %v8255_v49 }
0x14b6   :  { %v4331_v61 = vadd.f32 %v5256_v12, %v4330_v50 }
0x14b8   :  { %v4335_v14 = vsel %vm4334_vm13, %v5256_v12, %v4331_v61 }
0x14b9   :  { %v4340_v45 = vsel %vm4337_vm14, %v4339_v47, %v4335_v14 }
0x14ba   :  { %v4361_v60 = vmul.f32 %v4340_v45, %v8599_v7 }
0x14bc   :  { %v4362_v10 = vpack.c.bf16 %v4361_v60, %v4361_v60 }
0x14be   :  { %4371 = vmatmul.bf16.vlgmr.msrb.gmra.mxu1 %v4362_v10 }
0x151a   :  { %v4174_v3 = vpop.f32.mrf.mxu2 }
0x151b   :  { %v4175_v30 = vadd.f32 %v8638_v9, %v4174_v3 }
0x151d   :  { %v8644_v49 = vsel %vm8588_vm11, %v4175_v30, %v8574_v39 }
0x151e   :  { %v4187_v46 = vsub.f32 %v8549_v44, %v8644_v49 }
0x1520   :  { %v4188_v59 = vand.u32 2147483647, %v4187_v46 }
0x1522   :  { %v4193_v35 = vmul.f32 %v4191_v37, %v4188_v59  ;;  %v4176_v22 = vpop.f32.mrf.mxu2 }
0x1524   :  { %v4194_v18 = vadd.f32 %v4193_v35, %v8579_v52  ;;  %v4320_v52 = vadd.f32 %v8610_v8, %v4307_v21 }
0x1526   :  { %4421 = vst.msk [vmem:[%s8689_s11] sm:$0xff] %vm140_vm0, %v4194_v18 }
0x152a   :  { %v4293_v38 = vpop.f32.mrf.mxu2 }
0x152b   :  { %v4294_v5 = vadd.f32 %v4293_v38, %v4281_v29 }
0x152d   :  { %v4943_v39 = vmul.f32 -1.442695, %v4294_v5 }
0x152f   :  { %5257 = vpow2.f32 %v4943_v39 }
0x1532   :  { %v4295_v13 = vpop.f32.mrf.mxu2 }
0x1535   :  { %v5258_v41 = vpop.eup %5257 }
0x1536   :  { %v4345_v44 = vadd.f32 1.0, %v5258_v41 }
0x1538   :  { %5259 = vrcp.f32 %v4345_v44  ;;  %v4357_v40 = vand.u32 2147483648, %v4345_v44  ;;  %v4355_v4 = vand.u32 2147483647, %v4345_v44  ;;  %vm4351_vm15 = vweird.f32 %v4345_v44 }
0x153a   :  { %v4358_v28 = vor.u32 1.1754944e-38, %v4357_v40  ;;  %vm4356_vm3 = vcmp.eq.f32.partialorder %v4355_v4, 8.507059e+37 }
0x153b   :  { %v4372_v24 = vpop.f32.mrf.mxu1 }
0x153c   :  { %v4376_v26 = vadd.f32 %v4372_v24, %v4320_v52 }
0x153e   :  { %v5260_v42 = vpop.eup %5259  ;;  %5261 = vtanh.f32 %v4376_v26 }
0x153f   :  { %v4347_v23 = vmul.f32 %v5260_v42, %v4345_v44  ;;  %vm4352_vm0 = vweird.f32 %v5260_v42 }
0x1540   :  { %vm4353_vm1 = vmor %vm4351_vm15, %vm4352_vm0 }
0x1541   :  { %v4348_v31 = vsub.f32 1.0, %v4347_v23 }
0x1543   :  { %v4349_v56 = vmul.f32 %v5260_v42, %v4348_v31  ;;  %v4374_v58 = vpop.f32.mrf.mxu1 }
0x1544   :  { %v5262_v8 = vpop.eup %5261 }
0x1545   :  { %v4350_v53 = vadd.f32 %v5260_v42, %v4349_v56 }
0x1547   :  { %v4354_v19 = vsel %vm4353_vm1, %v5260_v42, %v4350_v53 }
0x1548   :  { %v4359_v48 = vsel %vm4356_vm3, %v4358_v28, %v4354_v19 }
0x1549   :  { %v4378_v51 = vsub.f32 1.0, %v4359_v48  ;;  %v4380_v11 = vmul.f32 %v5262_v8, %v4359_v48 }
0x154b   :  { %v4379_v57 = vmul.f32 %v4378_v51, %v8599_v7 }
0x154d   :  { %v4381_v1 = vadd.f32 %v4380_v11, %v4379_v57 }
0x154f   :  { %v4382_v2 = vpack.c.bf16 %v4381_v1, %v4381_v1  ;;  %v4416_v32 = vsel %vm8660_vm4, %v4381_v1, %v8595_v15 }
0x1550   :  { %4418 = vst [vmem:[#allocation15] sm:$0xff] %v4416_v32 }
0x1551   :  { %4391 = vmatmul.bf16.vlgmr.msrb.gmra.mxu2 %v4382_v2  ;;  %4434 = dma.vmem_to_hbm [thread:$0]  %s4430_s30, 128, %s4432_s15, [#allocation6]  }
0x15d4   :  { %v4392_v27 = vpop.f32.mrf.mxu2 }
0x15d5   :  { %v4393_v43 = vadd.f32 %v8394_v25, %v4392_v27 }
0x15d7   :  { %v4396_v16 = vmax.f32 %v4393_v43, 0.0 }
0x15d9   :  { %v4397_v17 = vpack.c.bf16 %v4396_v16, %v4396_v16 }
0x15db   :  { %4406 = vmatmul.bf16.vlgmr.msrb.gmra.mxu3 %v4397_v17 }
0x15dc   :  { %v4394_v36 = vpop.f32.mrf.mxu2 }
0x165e   :  { %v4407_v25 = vpop.f32.mrf.mxu3 }
0x165f   :  { %v4408_v15 = vadd.f32 %v8638_v9, %v4407_v25 }
0x1661   :  { %v4417_v7 = vsel %vm8660_vm4, %v4408_v15, %v8644_v49 }
0x1662   :  { %4419 = vst [vmem:[#allocation16] sm:$0xff] %v4417_v7 }
0x1663   :  { %4445 = dma.vmem_to_hbm [thread:$0]  %s4441_s23, 128, %s4443_s19, [#allocation17]  }
0x1666   :  { %v4409_v33 = vpop.f32.mrf.mxu3 }
0x1667   :  { %5579 = dma.done.wait [#allocation6], 128  }
0x1668   :  { %5580 = vsyncadd [#allocation6], 4294967168 }
0x1669   :  { %5581 = dma.done.wait [#allocation17], 128  }
0x166a   :  { %5582 = vsyncadd [#allocation17], 4294967168 }
0x166b   :  { %4456 = vsyncpa [#allocation5], 1 }
0x166c   :  { %4457 = vsyncpa [#allocation10], 1 }
0x166d   :  { %4458 = vsyncpa [#allocation13], 1 }
0x166e   :  { %4459 = vsyncpa [#allocation6], 1 }
0x166f   :  { %4460 = vsyncpa [#allocation17], 1 }
0x1670   :  { %4461 = vsyncpa [#allocation7], 1 }

</bundles_post_ra>
